<compile_context>
chip_gen: v7x
topology: tpu7x:2x2x1
jax: 0.10.0
libtpu: 0.0.40
codegen_flags: <defaults>
</compile_context>

<pallas_src>
import functools

import jax
import jax.numpy as jnp
from jax import lax
from jax.experimental import pallas as pl
from jax.experimental.pallas import tpu as pltpu


_HALO = 16                         # look-ahead rows per time tile (>= max tap groups - 1)
_VMEM_LIMIT_BYTES = 48 * 1024 * 1024   # safe on v5e/v6e (128 MiB) and v7x (64 MiB)


# ---------------------------------------------------------------------------
# Pallas kernel: one (batch, C_out-tile, T-tile) output block of a grouped,
# strided Conv1d (+ bias + optional LeakyReLU).  Tap groups reduced in-register.
# Inputs / weights are bf16, accumulation + bias + activation are f32.
# ---------------------------------------------------------------------------
def _conv_tile_kernel(x_ref, xh_ref, w_ref, b_ref, o_ref, *,
                      slope, apply_act, ct_is_one):
    # x_ref : (1, TT, D)    bf16  current time tile of the folded input
    # xh_ref: (1, HALO, D)  bf16  next rows of the same input (tap look-ahead)
    # w_ref : (1, Ka, D, CT) bf16 per-tap weight blocks ((1, Ka, 1, D) if CT==1)
    # b_ref : (1, 1, CT)    f32   bias
    # o_ref : (1, TT, CT)   f32   output tile
    tt = o_ref.shape[1]
    ct = o_ref.shape[2]
    ka = w_ref.shape[1]

    # Current tile plus halo: rows t .. t + Ka - 1 are all available.
    xw = jnp.concatenate([x_ref[0], xh_ref[0]], axis=0)          # (TT+H, D) bf16
    if ct_is_one:
        xf = xw.astype(jnp.float32)

    acc = jnp.zeros((tt, ct), jnp.float32)
    for a in range(ka):                                          # unrolled taps
        if ct_is_one:
            # last layer (C_out == 1): lane-dense multiply + reduce (no N=1 matmul)
            w_row = w_ref[0, a].astype(jnp.float32)              # (1, D)
            ya = jnp.sum(xf * w_row, axis=-1, keepdims=True)     # (TT+H, 1)
        else:
            ya = jnp.dot(xw, w_ref[0, a],
                         preferred_element_type=jnp.float32)     # (TT+H, CT) f32
        acc = acc + ya[a:a + tt, :]                              # shift-accumulate

    y = acc + b_ref[0]
    if apply_act:
        y = jnp.where(y >= 0.0, y, slope * y)                    # LeakyReLU
    o_ref[0] = y


# ---------------------------------------------------------------------------
# ScaleDiscriminator definition (matches the PyTorch module's __init__).
# ---------------------------------------------------------------------------
LAYER_CFG = [
    # (c_in, c_out, k, stride, padding, groups, apply_leaky_relu)
    (1,    16,   15, 1, 7,  1,   True),
    (16,   64,   41, 4, 20, 4,   True),
    (64,   256,  41, 4, 20, 16,  True),
    (256,  1024, 41, 4, 20, 64,  True),
    (1024, 1024, 41, 4, 20, 256, True),
    (1024, 1024, 5,  1, 2,  1,   True),
    (1024, 1,    3,  1, 1,  1,   False),
]


def _layer_plan(cfg):
    """Static per-layer tiling plan (pure Python ints)."""
    c_in, c_out, k, s, p, g, act = cfg
    ka = -(-k // s)                                # tap groups = ceil(K / S)
    if g > 1:
        ct = min(c_out, 128)                       # grouped: keep densification bounded
        cout_g = c_out // g
        assert ct % cout_g == 0
        ci = (ct // cout_g) * (c_in // g)
    else:
        ct = min(c_out, 256)                       # dense: fill the 256-wide MXU
        ci = c_in
    nc = c_out // ct
    assert nc * ct == c_out
    return dict(Ka=ka, CT=ct, NC=nc, D_tile=ci * s)


def _time_plan(t_out, d_tile, ct):
    """Pick a time-tile size TT (multiple of the halo) and the tile count NT."""
    row_bytes = 2 * max(d_tile, 1) + 4 * max(ct, 1)   # bf16 x row + f32 out row
    target = max(512, (4 << 20) // row_bytes)
    tt = min(8192, target)
    tt = max(_HALO, (tt // _HALO) * _HALO)
    tt = min(tt, -(-t_out // _HALO) * _HALO)
    nt = -(-t_out // tt)
    return tt, nt


# ---------------------------------------------------------------------------
# Weight re-layout: (C_out, C_in/g, K) -> per-C_out-tile blocks
# (NC, Ka, CI*S, CT), block-diagonal only inside one tile, ci-major columns.
# ---------------------------------------------------------------------------
def _prepare_weight(w, *, groups, stride, ka, nc, ct):
    c_out, cin_g, k = w.shape
    s = stride
    wp = jnp.pad(w.astype(jnp.float32), ((0, 0), (0, 0), (0, ka * s - k)))
    wp = wp.reshape(c_out, cin_g, ka, s)                     # (co, ci_g, a, r)
    if groups == 1:
        wd = jnp.transpose(wp, (2, 1, 3, 0))                 # (a, ci, r, co)
        wd = wd.reshape(ka, cin_g * s, nc, ct)
        wd = jnp.transpose(wd, (2, 0, 1, 3))                 # (NC, Ka, D, CT)
    else:
        cout_g = c_out // groups
        gt = ct // cout_g                                    # groups per tile
        wp = wp.reshape(nc, gt, cout_g, cin_g, ka, s)        # (j, g, c, i, a, r)
        eye = jnp.eye(gt, dtype=jnp.float32)
        # Wd[j,a,h,i,r,g,c] = w[j,g,c,i,a,r] * delta(g == h)
        wd = jnp.einsum('jgciar,gh->jahirgc', wp, eye)
        wd = wd.reshape(nc, ka, gt * cin_g * s, gt * cout_g)
    return wd                                                # (NC, Ka, CI*S, CT)


def _prepare_layer(w, b, cfg):
    """Densified bf16 weights + f32 bias for one generic conv layer."""
    c_in, c_out, k, s, p, g, act = cfg
    plan = _layer_plan(cfg)
    wd = _prepare_weight(w, groups=g, stride=s, ka=plan["Ka"],
                         nc=plan["NC"], ct=plan["CT"])
    if plan["CT"] == 1:
        wd = jnp.swapaxes(wd, 2, 3)                          # (NC, Ka, 1, D)
    wd = wd.astype(jnp.bfloat16)
    b3 = b.astype(jnp.float32).reshape(plan["NC"], 1, plan["CT"])
    return wd, b3


def _prepare_layer1(w, b):
    """Layer 1 (C_in=1, K=15, stride 1, 'same') as a (22 -> 8*16) matmul.

    Output column u*16 + c holds channel c at time-phase u (t = 8q + u).
    """
    wt = w[:, 0, :].astype(jnp.float32)                      # (16, 15)
    cols = [jnp.pad(wt.T, ((u, 7 - u), (0, 0))) for u in range(8)]   # each (22, 16)
    m = jnp.stack(cols, axis=1).reshape(22, 128)             # (22, 8*16)
    wd = m[None, None].astype(jnp.bfloat16)                  # (1, 1, 22, 128)
    b3 = jnp.tile(b.astype(jnp.float32), 8).reshape(1, 1, 128)
    return wd, b3


def prepare_params(params):
    """One-time weight preparation (hoisted out of the per-call forward)."""
    prepared = [_prepare_layer1(*params[0])]
    for (w, b), cfg in zip(params[1:], LAYER_CFG[1:]):
        prepared.append(_prepare_layer(w, b, cfg))
    return prepared


# ---------------------------------------------------------------------------
# Shared pallas_call wrapper (grid = (B, C_out tiles, T tiles)).
# ---------------------------------------------------------------------------
def _conv_pallas(xq, wd, b3, *, t_out, tt, nt, d_tile, ct, nc, ka,
                 slope, apply_act):
    B, nq, d_full = xq.shape
    assert nq >= nt * tt + _HALO
    assert ka - 1 <= _HALO
    ct_is_one = (ct == 1)
    cb = 1 if d_tile < d_full else 0               # channel-block index multiplier
    halo_step = tt // _HALO
    w_block = (1, ka, 1, d_tile) if ct_is_one else (1, ka, d_tile, ct)

    kernel = functools.partial(_conv_tile_kernel, slope=slope,
                               apply_act=apply_act, ct_is_one=ct_is_one)

    out = pl.pallas_call(
        kernel,
        out_shape=jax.ShapeDtypeStruct((B, nt * tt, nc * ct), jnp.float32),
        grid=(B, nc, nt),                          # T innermost -> weights stay resident
        in_specs=[
            pl.BlockSpec((1, tt, d_tile), lambda b, j, i: (b, i, j * cb)),
            pl.BlockSpec((1, _HALO, d_tile),
                         lambda b, j, i: (b, (i + 1) * halo_step, j * cb)),
            pl.BlockSpec(w_block, lambda b, j, i: (j, 0, 0, 0)),
            pl.BlockSpec((1, 1, ct), lambda b, j, i: (j, 0, 0)),
        ],
        out_specs=pl.BlockSpec((1, tt, ct), lambda b, j, i: (b, i, j)),
        compiler_params=pltpu.CompilerParams(
            dimension_semantics=("parallel", "parallel", "parallel"),
            vmem_limit_bytes=_VMEM_LIMIT_BYTES),
    )(xq, xq, wd, b3)                              # xq passed twice: main + halo view

    if nt * tt != t_out:
        out = out[:, :t_out, :]
    return out


# ---------------------------------------------------------------------------
# Layer 1: lane-dense matmul formulation (see _prepare_layer1).
# ---------------------------------------------------------------------------
def conv_layer1(x_wav, prep, slope):
    wd, b3 = prep
    B, T = x_wav.shape
    nq_valid = -(-T // 8)                          # output rows of 8 time steps
    tt, nt = _time_plan(nq_valid, 22, 128)
    nq = nt * tt + _HALO

    # xp[j] = x[j - 7] (zero outside);  row q of the im2col = xp[8q : 8q + 22].
    L = 8 * nq + 16
    xp = jnp.pad(x_wav.astype(jnp.bfloat16), ((0, 0), (7, L - 7 - T)))
    a0 = xp[:, 0:8 * nq].reshape(B, nq, 8)
    a1 = xp[:, 8:8 * nq + 8].reshape(B, nq, 8)
    a2 = xp[:, 16:8 * nq + 16].reshape(B, nq, 8)[:, :, :6]
    xq = jnp.concatenate([a0, a1, a2], axis=-1)    # (B, NQ, 22)

    out = _conv_pallas(xq, wd, b3, t_out=nq_valid, tt=tt, nt=nt,
                       d_tile=22, ct=128, nc=1, ka=1,
                       slope=slope, apply_act=True)
    # (B, NQv, 128) columns are (u, c) -> (B, T, 16) channels-last
    out = out.reshape(B, nq_valid, 8, 16).reshape(B, nq_valid * 8, 16)
    return out[:, :T, :]


# ---------------------------------------------------------------------------
# Generic Conv1d(+LeakyReLU) layer.  channels-last in, channels-last out.
# ---------------------------------------------------------------------------
def conv1d_layer(x_cl, wd, b3, cfg, slope):
    c_in, c_out, K, S, P, G, act = cfg
    plan = _layer_plan(cfg)
    ct, nc, d_tile, ka = plan["CT"], plan["NC"], plan["D_tile"], plan["Ka"]

    B, T, _ = x_cl.shape
    t_out = (T + 2 * P - K) // S + 1
    tt, nt = _time_plan(t_out, d_tile, ct)
    nq = nt * tt + _HALO

    # glue: pad time, fold (channel, stride-phase) into the last dim, bf16.
    t_total = nq * S
    tail = t_total - T - P
    assert tail >= 0
    xp = jnp.pad(x_cl.astype(jnp.bfloat16), ((0, 0), (P, tail), (0, 0)))
    if S > 1:
        xq = xp.reshape(B, nq, S, c_in).transpose(0, 1, 3, 2)   # ci-major columns
        xq = xq.reshape(B, nq, c_in * S)
    else:
        xq = xp.reshape(B, nq, c_in * S)

    return _conv_pallas(xq, wd, b3, t_out=t_out, tt=tt, nt=nt,
                        d_tile=d_tile, ct=ct, nc=nc, ka=ka,
                        slope=slope, apply_act=act)


# ---------------------------------------------------------------------------
# Forward pass.
# ---------------------------------------------------------------------------
def scale_discriminator_forward(x, prepared, relu_constant):
    """x: (B, 1, T).  Returns (prediction (B, T_last), features [(B,C,T'),...])."""
    B = x.shape[0]
    x_wav = x.astype(jnp.float32).reshape(B, -1)

    out = conv_layer1(x_wav, prepared[0], relu_constant)     # (B, T, 16) channels-last
    features = [jnp.transpose(out, (0, 2, 1))]               # NCT feature
    for (wd, b3), cfg in zip(prepared[1:], LAYER_CFG[1:]):
        out = conv1d_layer(out, wd, b3, cfg, relu_constant)
        features.append(jnp.transpose(out, (0, 2, 1)))
    prediction = out.reshape(B, -1)                           # C_out == 1 -> (B, T')
    return prediction, features


def init_params(key):
    """Deterministic synthetic parameters (PyTorch-like uniform init)."""
    params = []
    for (c_in, c_out, k, s, p, g, act) in LAYER_CFG:
        key, kw, kb = jax.random.split(key, 3)
        cin_g = c_in // g
        bound = 1.0 / (cin_g * k) ** 0.5
        w = jax.random.uniform(kw, (c_out, cin_g, k), jnp.float32, -bound, bound)
        b = jax.random.uniform(kb, (c_out,), jnp.float32, -bound, bound)
        params.append((w, b))
    return params


# ---------------------------------------------------------------------------
# Pure-XLA reference with matched numerics (bf16 operands, f32 accumulate).
# ---------------------------------------------------------------------------
def reference_forward(x, params, relu_constant):
    out = x.astype(jnp.float32)
    feats = []
    for (w, b), (c_in, c_out, k, s, p, g, act) in zip(params, LAYER_CFG):
        out = lax.conv_general_dilated(
            out.astype(jnp.bfloat16), w.astype(jnp.bfloat16), (s,), [(p, p)],
            dimension_numbers=('NCH', 'OIH', 'NCH'),
            feature_group_count=g,
            preferred_element_type=jnp.float32)
        out = out + b.astype(jnp.float32)[None, :, None]
        if act:
            out = jnp.where(out >= 0, out, relu_constant * out)
        feats.append(out)
    return out.reshape(out.shape[0], -1), feats


if __name__ == "__main__":
    relu_constant = 0.1
    key = jax.random.PRNGKey(0)
    k_x, k_p = jax.random.split(key)

    B, T = 2, 256
    x = jax.random.normal(k_x, (B, 1, T), jnp.float32)        # wav (B, 1, T)
    params = init_params(k_p)
    prepared = prepare_params(params)                          # one-time weight prep

    fwd = jax.jit(functools.partial(scale_discriminator_forward,
                                    relu_constant=relu_constant))
    pred, feats = fwd(x, prepared)
    pred = jax.block_until_ready(pred)
    feats = [jax.block_until_ready(f) for f in feats]

    # Verify against a matched-precision (bf16 operand / f32 accumulate) reference.
    pred_ref, feats_ref = reference_forward(x, params, relu_constant)
    assert pred.shape == (B, 1), pred.shape
    assert len(feats) == len(LAYER_CFG)
    for f, fr in zip(feats, feats_ref):
        assert f.shape == fr.shape, (f.shape, fr.shape)
        assert jnp.allclose(f, fr, rtol=5e-3, atol=5e-3), \
            float(jnp.abs(f - fr).max())
    assert jnp.allclose(pred, pred_ref, rtol=5e-3, atol=5e-3)

    print("KERNEL_OK")
</pallas_src>

<mosaic_0001>
module attributes {stable_mosaic.version = 11 : i64} {
  func.func @_conv_tile_kernel(%arg0: i32, %arg1: i32, %arg2: i32, %arg3: memref<1x32x22xbf16, #tpu.memory_space<vmem>>, %arg4: memref<1x16x22xbf16, #tpu.memory_space<vmem>>, %arg5: memref<1x1x22x128xbf16, #tpu.memory_space<vmem>>, %arg6: memref<1x1x128xf32, #tpu.memory_space<vmem>>, %arg7: memref<1x32x128xf32, #tpu.memory_space<vmem>>) attributes {dimension_semantics = [#tpu.dimension_semantics<parallel>, #tpu.dimension_semantics<parallel>, #tpu.dimension_semantics<parallel>], iteration_bounds = array<i64: 2, 1, 1>, scalar_prefetch = 0 : i64, scratch_operands = 0 : i64, tpu.core_type = #tpu.core_type<tc>, window_params = [{transform_indices = @transform_0, window_bounds = array<i64: 1, 32, 22>}, {transform_indices = @transform_1, window_bounds = array<i64: 1, 16, 22>}, {transform_indices = @transform_2, window_bounds = array<i64: 1, 1, 22, 128>}, {transform_indices = @transform_3, window_bounds = array<i64: 1, 1, 128>}, {transform_indices = @transform_4, window_bounds = array<i64: 1, 32, 128>}]} {
    %c0 = arith.constant 0 : index
    %c0_0 = arith.constant 0 : index
    %c0_1 = arith.constant 0 : index
    %0 = vector.load %arg3[%c0, %c0_0, %c0_1] : memref<1x32x22xbf16, #tpu.memory_space<vmem>>, vector<1x32x22xbf16>
    %1 = vector.shape_cast %0 : vector<1x32x22xbf16> to vector<32x22xbf16>
    %c0_2 = arith.constant 0 : index
    %c0_3 = arith.constant 0 : index
    %c0_4 = arith.constant 0 : index
    %2 = vector.load %arg4[%c0_2, %c0_3, %c0_4] : memref<1x16x22xbf16, #tpu.memory_space<vmem>>, vector<1x16x22xbf16>
    %3 = vector.shape_cast %2 : vector<1x16x22xbf16> to vector<16x22xbf16>
    %4 = tpu.concatenate %1, %3 in 0 : vector<32x22xbf16>, vector<16x22xbf16> -> vector<48x22xbf16>
    %cst = arith.constant 0.000000e+00 : f32
    %5 = vector.broadcast %cst : f32 to vector<32x128xf32>
    %c0_5 = arith.constant 0 : index
    %c0_6 = arith.constant 0 : index
    %c0_7 = arith.constant 0 : index
    %c0_8 = arith.constant 0 : index
    %6 = vector.load %arg5[%c0_5, %c0_6, %c0_7, %c0_8] : memref<1x1x22x128xbf16, #tpu.memory_space<vmem>>, vector<1x1x22x128xbf16>
    %7 = vector.shape_cast %6 : vector<1x1x22x128xbf16> to vector<22x128xbf16>
    %cst_9 = arith.constant dense<0.000000e+00> : vector<48x128xf32>
    %8 = tpu.matmul %4, %7, %cst_9 {dimension_numbers = #tpu.dot_dimension_numbers<[1], [0], [0], [1], [0, 0, 1, 1], [], []>} : vector<48x22xbf16>, vector<22x128xbf16>, vector<48x128xf32> -> vector<48x128xf32>
    %9 = vector.extract_strided_slice %8 {offsets = [0, 0], sizes = [32, 128], strides = [1, 1]} : vector<48x128xf32> to vector<32x128xf32>
    %10 = arith.addf %5, %9 : vector<32x128xf32>
    %c0_10 = arith.constant 0 : index
    %c0_11 = arith.constant 0 : index
    %c0_12 = arith.constant 0 : index
    %11 = vector.load %arg6[%c0_10, %c0_11, %c0_12] : memref<1x1x128xf32, #tpu.memory_space<vmem>>, vector<1x1x128xf32>
    %12 = vector.shape_cast %11 : vector<1x1x128xf32> to vector<1x128xf32>
    %13 = vector.broadcast %12 : vector<1x128xf32> to vector<32x128xf32>
    %14 = arith.addf %10, %13 : vector<32x128xf32>
    %cst_13 = arith.constant 0.000000e+00 : f32
    %15 = vector.broadcast %cst_13 : f32 to vector<32x128xf32>
    %16 = arith.cmpf oge, %14, %15 : vector<32x128xf32>
    %cst_14 = arith.constant 1.000000e-01 : f32
    %17 = vector.broadcast %cst_14 : f32 to vector<32x128xf32>
    %18 = arith.mulf %17, %14 : vector<32x128xf32>
    %19 = arith.select %16, %14, %18 : vector<32x128xi1>, vector<32x128xf32>
    %c0_15 = arith.constant 0 : index
    %c0_16 = arith.constant 0 : index
    %c0_17 = arith.constant 0 : index
    %20 = vector.load %arg7[%c0_15, %c0_16, %c0_17] : memref<1x32x128xf32, #tpu.memory_space<vmem>>, vector<1x32x128xf32>
    %21 = vector.shape_cast %20 : vector<1x32x128xf32> to vector<32x128xf32>
    %22 = vector.shape_cast %19 : vector<32x128xf32> to vector<1x32x128xf32>
    tpu.vector_store %arg7[%c0_15, %c0_16, %c0_17], %22 {strides = array<i32>} : memref<1x32x128xf32, #tpu.memory_space<vmem>>, vector<1x32x128xf32>,
    return
  }
  func.func @transform_0(%arg0: i32, %arg1: i32, %arg2: i32) -> (i32, i32, i32) {
    %c0_i32 = arith.constant 0 : i32
    %0 = arith.muli %arg1, %c0_i32 : i32
    %c0_i32_0 = arith.constant 0 : i32
    return %arg0, %arg2, %0 : i32, i32, i32
  }
  func.func @transform_1(%arg0: i32, %arg1: i32, %arg2: i32) -> (i32, i32, i32) {
    %c1_i32 = arith.constant 1 : i32
    %0 = arith.addi %arg2, %c1_i32 : i32
    %c2_i32 = arith.constant 2 : i32
    %1 = arith.muli %0, %c2_i32 : i32
    %c0_i32 = arith.constant 0 : i32
    %2 = arith.muli %arg1, %c0_i32 : i32
    %c0_i32_0 = arith.constant 0 : i32
    return %arg0, %1, %2 : i32, i32, i32
  }
  func.func @transform_2(%arg0: i32, %arg1: i32, %arg2: i32) -> (i32, i32, i32, i32) {
    %c0_i32 = arith.constant 0 : i32
    %c0_i32_0 = arith.constant 0 : i32
    %c0_i32_1 = arith.constant 0 : i32
    %c0_i32_2 = arith.constant 0 : i32
    return %arg1, %c0_i32, %c0_i32_0, %c0_i32_1 : i32, i32, i32, i32
  }
  func.func @transform_3(%arg0: i32, %arg1: i32, %arg2: i32) -> (i32, i32, i32) {
    %c0_i32 = arith.constant 0 : i32
    %c0_i32_0 = arith.constant 0 : i32
    %c0_i32_1 = arith.constant 0 : i32
    return %arg1, %c0_i32, %c0_i32_0 : i32, i32, i32
  }
  func.func @transform_4(%arg0: i32, %arg1: i32, %arg2: i32) -> (i32, i32, i32) {
    %c0_i32 = arith.constant 0 : i32
    return %arg0, %arg2, %arg1 : i32, i32, i32
  }
}

module attributes {stable_mosaic.version = 11 : i64} {
  func.func @_conv_tile_kernel(%arg0: i32, %arg1: i32, %arg2: i32, %arg3: memref<1x64x64xbf16, #tpu.memory_space<vmem>>, %arg4: memref<1x16x64xbf16, #tpu.memory_space<vmem>>, %arg5: memref<1x11x64x64xbf16, #tpu.memory_space<vmem>>, %arg6: memref<1x1x64xf32, #tpu.memory_space<vmem>>, %arg7: memref<1x64x64xf32, #tpu.memory_space<vmem>>) attributes {dimension_semantics = [#tpu.dimension_semantics<parallel>, #tpu.dimension_semantics<parallel>, #tpu.dimension_semantics<parallel>], iteration_bounds = array<i64: 2, 1, 1>, scalar_prefetch = 0 : i64, scratch_operands = 0 : i64, tpu.core_type = #tpu.core_type<tc>, window_params = [{transform_indices = @transform_0, window_bounds = array<i64: 1, 64, 64>}, {transform_indices = @transform_1, window_bounds = array<i64: 1, 16, 64>}, {transform_indices = @transform_2, window_bounds = array<i64: 1, 11, 64, 64>}, {transform_indices = @transform_3, window_bounds = array<i64: 1, 1, 64>}, {transform_indices = @transform_4, window_bounds = array<i64: 1, 64, 64>}]} {
    %c0 = arith.constant 0 : index
    %c0_0 = arith.constant 0 : index
    %c0_1 = arith.constant 0 : index
    %0 = vector.load %arg3[%c0, %c0_0, %c0_1] : memref<1x64x64xbf16, #tpu.memory_space<vmem>>, vector<1x64x64xbf16>
    %1 = vector.shape_cast %0 : vector<1x64x64xbf16> to vector<64x64xbf16>
    %c0_2 = arith.constant 0 : index
    %c0_3 = arith.constant 0 : index
    %c0_4 = arith.constant 0 : index
    %2 = vector.load %arg4[%c0_2, %c0_3, %c0_4] : memref<1x16x64xbf16, #tpu.memory_space<vmem>>, vector<1x16x64xbf16>
    %3 = vector.shape_cast %2 : vector<1x16x64xbf16> to vector<16x64xbf16>
    %4 = tpu.concatenate %1, %3 in 0 : vector<64x64xbf16>, vector<16x64xbf16> -> vector<80x64xbf16>
    %cst = arith.constant 0.000000e+00 : f32
    %5 = vector.broadcast %cst : f32 to vector<64x64xf32>
    %c0_5 = arith.constant 0 : index
    %c0_6 = arith.constant 0 : index
    %c0_7 = arith.constant 0 : index
    %c0_8 = arith.constant 0 : index
    %6 = vector.load %arg5[%c0_5, %c0_6, %c0_7, %c0_8] : memref<1x11x64x64xbf16, #tpu.memory_space<vmem>>, vector<1x1x64x64xbf16>
    %7 = vector.shape_cast %6 : vector<1x1x64x64xbf16> to vector<64x64xbf16>
    %cst_9 = arith.constant dense<0.000000e+00> : vector<80x64xf32>
    %8 = tpu.matmul %4, %7, %cst_9 {dimension_numbers = #tpu.dot_dimension_numbers<[1], [0], [0], [1], [0, 0, 1, 1], [], []>} : vector<80x64xbf16>, vector<64x64xbf16>, vector<80x64xf32> -> vector<80x64xf32>
    %9 = vector.extract_strided_slice %8 {offsets = [0, 0], sizes = [64, 64], strides = [1, 1]} : vector<80x64xf32> to vector<64x64xf32>
    %10 = arith.addf %5, %9 : vector<64x64xf32>
    %c0_10 = arith.constant 0 : index
    %c1 = arith.constant 1 : index
    %c0_11 = arith.constant 0 : index
    %c0_12 = arith.constant 0 : index
    %11 = vector.load %arg5[%c0_10, %c1, %c0_11, %c0_12] : memref<1x11x64x64xbf16, #tpu.memory_space<vmem>>, vector<1x1x64x64xbf16>
    %12 = vector.shape_cast %11 : vector<1x1x64x64xbf16> to vector<64x64xbf16>
    %cst_13 = arith.constant dense<0.000000e+00> : vector<80x64xf32>
    %13 = tpu.matmul %4, %12, %cst_13 {dimension_numbers = #tpu.dot_dimension_numbers<[1], [0], [0], [1], [0, 0, 1, 1], [], []>} : vector<80x64xbf16>, vector<64x64xbf16>, vector<80x64xf32> -> vector<80x64xf32>
    %14 = vector.extract_strided_slice %13 {offsets = [1, 0], sizes = [64, 64], strides = [1, 1]} : vector<80x64xf32> to vector<64x64xf32>
    %15 = arith.addf %10, %14 : vector<64x64xf32>
    %c0_14 = arith.constant 0 : index
    %c2 = arith.constant 2 : index
    %c0_15 = arith.constant 0 : index
    %c0_16 = arith.constant 0 : index
    %16 = vector.load %arg5[%c0_14, %c2, %c0_15, %c0_16] : memref<1x11x64x64xbf16, #tpu.memory_space<vmem>>, vector<1x1x64x64xbf16>
    %17 = vector.shape_cast %16 : vector<1x1x64x64xbf16> to vector<64x64xbf16>
    %cst_17 = arith.constant dense<0.000000e+00> : vector<80x64xf32>
    %18 = tpu.matmul %4, %17, %cst_17 {dimension_numbers = #tpu.dot_dimension_numbers<[1], [0], [0], [1], [0, 0, 1, 1], [], []>} : vector<80x64xbf16>, vector<64x64xbf16>, vector<80x64xf32> -> vector<80x64xf32>
    %19 = vector.extract_strided_slice %18 {offsets = [2, 0], sizes = [64, 64], strides = [1, 1]} : vector<80x64xf32> to vector<64x64xf32>
    %20 = arith.addf %15, %19 : vector<64x64xf32>
    %c0_18 = arith.constant 0 : index
    %c3 = arith.constant 3 : index
    %c0_19 = arith.constant 0 : index
    %c0_20 = arith.constant 0 : index
    %21 = vector.load %arg5[%c0_18, %c3, %c0_19, %c0_20] : memref<1x11x64x64xbf16, #tpu.memory_space<vmem>>, vector<1x1x64x64xbf16>
    %22 = vector.shape_cast %21 : vector<1x1x64x64xbf16> to vector<64x64xbf16>
    %cst_21 = arith.constant dense<0.000000e+00> : vector<80x64xf32>
    %23 = tpu.matmul %4, %22, %cst_21 {dimension_numbers = #tpu.dot_dimension_numbers<[1], [0], [0], [1], [0, 0, 1, 1], [], []>} : vector<80x64xbf16>, vector<64x64xbf16>, vector<80x64xf32> -> vector<80x64xf32>
    %24 = vector.extract_strided_slice %23 {offsets = [3, 0], sizes = [64, 64], strides = [1, 1]} : vector<80x64xf32> to vector<64x64xf32>
    %25 = arith.addf %20, %24 : vector<64x64xf32>
    %c0_22 = arith.constant 0 : index
    %c4 = arith.constant 4 : index
    %c0_23 = arith.constant 0 : index
    %c0_24 = arith.constant 0 : index
    %26 = vector.load %arg5[%c0_22, %c4, %c0_23, %c0_24] : memref<1x11x64x64xbf16, #tpu.memory_space<vmem>>, vector<1x1x64x64xbf16>
    %27 = vector.shape_cast %26 : vector<1x1x64x64xbf16> to vector<64x64xbf16>
    %cst_25 = arith.constant dense<0.000000e+00> : vector<80x64xf32>
    %28 = tpu.matmul %4, %27, %cst_25 {dimension_numbers = #tpu.dot_dimension_numbers<[1], [0], [0], [1], [0, 0, 1, 1], [], []>} : vector<80x64xbf16>, vector<64x64xbf16>, vector<80x64xf32> -> vector<80x64xf32>
    %29 = vector.extract_strided_slice %28 {offsets = [4, 0], sizes = [64, 64], strides = [1, 1]} : vector<80x64xf32> to vector<64x64xf32>
    %30 = arith.addf %25, %29 : vector<64x64xf32>
    %c0_26 = arith.constant 0 : index
    %c5 = arith.constant 5 : index
    %c0_27 = arith.constant 0 : index
    %c0_28 = arith.constant 0 : index
    %31 = vector.load %arg5[%c0_26, %c5, %c0_27, %c0_28] : memref<1x11x64x64xbf16, #tpu.memory_space<vmem>>, vector<1x1x64x64xbf16>
    %32 = vector.shape_cast %31 : vector<1x1x64x64xbf16> to vector<64x64xbf16>
    %cst_29 = arith.constant dense<0.000000e+00> : vector<80x64xf32>
    %33 = tpu.matmul %4, %32, %cst_29 {dimension_numbers = #tpu.dot_dimension_numbers<[1], [0], [0], [1], [0, 0, 1, 1], [], []>} : vector<80x64xbf16>, vector<64x64xbf16>, vector<80x64xf32> -> vector<80x64xf32>
    %34 = vector.extract_strided_slice %33 {offsets = [5, 0], sizes = [64, 64], strides = [1, 1]} : vector<80x64xf32> to vector<64x64xf32>
    %35 = arith.addf %30, %34 : vector<64x64xf32>
    %c0_30 = arith.constant 0 : index
    %c6 = arith.constant 6 : index
    %c0_31 = arith.constant 0 : index
    %c0_32 = arith.constant 0 : index
    %36 = vector.load %arg5[%c0_30, %c6, %c0_31, %c0_32] : memref<1x11x64x64xbf16, #tpu.memory_space<vmem>>, vector<1x1x64x64xbf16>
    %37 = vector.shape_cast %36 : vector<1x1x64x64xbf16> to vector<64x64xbf16>
    %cst_33 = arith.constant dense<0.000000e+00> : vector<80x64xf32>
    %38 = tpu.matmul %4, %37, %cst_33 {dimension_numbers = #tpu.dot_dimension_numbers<[1], [0], [0], [1], [0, 0, 1, 1], [], []>} : vector<80x64xbf16>, vector<64x64xbf16>, vector<80x64xf32> -> vector<80x64xf32>
    %39 = vector.extract_strided_slice %38 {offsets = [6, 0], sizes = [64, 64], strides = [1, 1]} : vector<80x64xf32> to vector<64x64xf32>
    %40 = arith.addf %35, %39 : vector<64x64xf32>
    %c0_34 = arith.constant 0 : index
    %c7 = arith.constant 7 : index
    %c0_35 = arith.constant 0 : index
    %c0_36 = arith.constant 0 : index
    %41 = vector.load %arg5[%c0_34, %c7, %c0_35, %c0_36] : memref<1x11x64x64xbf16, #tpu.memory_space<vmem>>, vector<1x1x64x64xbf16>
    %42 = vector.shape_cast %41 : vector<1x1x64x64xbf16> to vector<64x64xbf16>
    %cst_37 = arith.constant dense<0.000000e+00> : vector<80x64xf32>
    %43 = tpu.matmul %4, %42, %cst_37 {dimension_numbers = #tpu.dot_dimension_numbers<[1], [0], [0], [1], [0, 0, 1, 1], [], []>} : vector<80x64xbf16>, vector<64x64xbf16>, vector<80x64xf32> -> vector<80x64xf32>
    %44 = vector.extract_strided_slice %43 {offsets = [7, 0], sizes = [64, 64], strides = [1, 1]} : vector<80x64xf32> to vector<64x64xf32>
    %45 = arith.addf %40, %44 : vector<64x64xf32>
    %c0_38 = arith.constant 0 : index
    %c8 = arith.constant 8 : index
    %c0_39 = arith.constant 0 : index
    %c0_40 = arith.constant 0 : index
    %46 = vector.load %arg5[%c0_38, %c8, %c0_39, %c0_40] : memref<1x11x64x64xbf16, #tpu.memory_space<vmem>>, vector<1x1x64x64xbf16>
    %47 = vector.shape_cast %46 : vector<1x1x64x64xbf16> to vector<64x64xbf16>
    %cst_41 = arith.constant dense<0.000000e+00> : vector<80x64xf32>
    %48 = tpu.matmul %4, %47, %cst_41 {dimension_numbers = #tpu.dot_dimension_numbers<[1], [0], [0], [1], [0, 0, 1, 1], [], []>} : vector<80x64xbf16>, vector<64x64xbf16>, vector<80x64xf32> -> vector<80x64xf32>
    %49 = vector.extract_strided_slice %48 {offsets = [8, 0], sizes = [64, 64], strides = [1, 1]} : vector<80x64xf32> to vector<64x64xf32>
    %50 = arith.addf %45, %49 : vector<64x64xf32>
    %c0_42 = arith.constant 0 : index
    %c9 = arith.constant 9 : index
    %c0_43 = arith.constant 0 : index
    %c0_44 = arith.constant 0 : index
    %51 = vector.load %arg5[%c0_42, %c9, %c0_43, %c0_44] : memref<1x11x64x64xbf16, #tpu.memory_space<vmem>>, vector<1x1x64x64xbf16>
    %52 = vector.shape_cast %51 : vector<1x1x64x64xbf16> to vector<64x64xbf16>
    %cst_45 = arith.constant dense<0.000000e+00> : vector<80x64xf32>
    %53 = tpu.matmul %4, %52, %cst_45 {dimension_numbers = #tpu.dot_dimension_numbers<[1], [0], [0], [1], [0, 0, 1, 1], [], []>} : vector<80x64xbf16>, vector<64x64xbf16>, vector<80x64xf32> -> vector<80x64xf32>
    %54 = vector.extract_strided_slice %53 {offsets = [9, 0], sizes = [64, 64], strides = [1, 1]} : vector<80x64xf32> to vector<64x64xf32>
    %55 = arith.addf %50, %54 : vector<64x64xf32>
    %c0_46 = arith.constant 0 : index
    %c10 = arith.constant 10 : index
    %c0_47 = arith.constant 0 : index
    %c0_48 = arith.constant 0 : index
    %56 = vector.load %arg5[%c0_46, %c10, %c0_47, %c0_48] : memref<1x11x64x64xbf16, #tpu.memory_space<vmem>>, vector<1x1x64x64xbf16>
    %57 = vector.shape_cast %56 : vector<1x1x64x64xbf16> to vector<64x64xbf16>
    %cst_49 = arith.constant dense<0.000000e+00> : vector<80x64xf32>
    %58 = tpu.matmul %4, %57, %cst_49 {dimension_numbers = #tpu.dot_dimension_numbers<[1], [0], [0], [1], [0, 0, 1, 1], [], []>} : vector<80x64xbf16>, vector<64x64xbf16>, vector<80x64xf32> -> vector<80x64xf32>
    %59 = vector.extract_strided_slice %58 {offsets = [10, 0], sizes = [64, 64], strides = [1, 1]} : vector<80x64xf32> to vector<64x64xf32>
    %60 = arith.addf %55, %59 : vector<64x64xf32>
    %c0_50 = arith.constant 0 : index
    %c0_51 = arith.constant 0 : index
    %c0_52 = arith.constant 0 : index
    %61 = vector.load %arg6[%c0_50, %c0_51, %c0_52] : memref<1x1x64xf32, #tpu.memory_space<vmem>>, vector<1x1x64xf32>
    %62 = vector.shape_cast %61 : vector<1x1x64xf32> to vector<1x64xf32>
    %63 = vector.broadcast %62 : vector<1x64xf32> to vector<64x64xf32>
    %64 = arith.addf %60, %63 : vector<64x64xf32>
    %cst_53 = arith.constant 0.000000e+00 : f32
    %65 = vector.broadcast %cst_53 : f32 to vector<64x64xf32>
    %66 = arith.cmpf oge, %64, %65 : vector<64x64xf32>
    %cst_54 = arith.constant 1.000000e-01 : f32
    %67 = vector.broadcast %cst_54 : f32 to vector<64x64xf32>
    %68 = arith.mulf %67, %64 : vector<64x64xf32>
    %69 = arith.select %66, %64, %68 : vector<64x64xi1>, vector<64x64xf32>
    %c0_55 = arith.constant 0 : index
    %c0_56 = arith.constant 0 : index
    %c0_57 = arith.constant 0 : index
    %70 = vector.load %arg7[%c0_55, %c0_56, %c0_57] : memref<1x64x64xf32, #tpu.memory_space<vmem>>, vector<1x64x64xf32>
    %71 = vector.shape_cast %70 : vector<1x64x64xf32> to vector<64x64xf32>
    %72 = vector.shape_cast %69 : vector<64x64xf32> to vector<1x64x64xf32>
    tpu.vector_store %arg7[%c0_55, %c0_56, %c0_57], %72 {strides = array<i32>} : memref<1x64x64xf32, #tpu.memory_space<vmem>>, vector<1x64x64xf32>,
    return
  }
  func.func @transform_0(%arg0: i32, %arg1: i32, %arg2: i32) -> (i32, i32, i32) {
    %c0_i32 = arith.constant 0 : i32
    %0 = arith.muli %arg1, %c0_i32 : i32
    %c0_i32_0 = arith.constant 0 : i32
    return %arg0, %arg2, %0 : i32, i32, i32
  }
  func.func @transform_1(%arg0: i32, %arg1: i32, %arg2: i32) -> (i32, i32, i32) {
    %c1_i32 = arith.constant 1 : i32
    %0 = arith.addi %arg2, %c1_i32 : i32
    %c4_i32 = arith.constant 4 : i32
    %1 = arith.muli %0, %c4_i32 : i32
    %c0_i32 = arith.constant 0 : i32
    %2 = arith.muli %arg1, %c0_i32 : i32
    %c0_i32_0 = arith.constant 0 : i32
    return %arg0, %1, %2 : i32, i32, i32
  }
  func.func @transform_2(%arg0: i32, %arg1: i32, %arg2: i32) -> (i32, i32, i32, i32) {
    %c0_i32 = arith.constant 0 : i32
    %c0_i32_0 = arith.constant 0 : i32
    %c0_i32_1 = arith.constant 0 : i32
    %c0_i32_2 = arith.constant 0 : i32
    return %arg1, %c0_i32, %c0_i32_0, %c0_i32_1 : i32, i32, i32, i32
  }
  func.func @transform_3(%arg0: i32, %arg1: i32, %arg2: i32) -> (i32, i32, i32) {
    %c0_i32 = arith.constant 0 : i32
    %c0_i32_0 = arith.constant 0 : i32
    %c0_i32_1 = arith.constant 0 : i32
    return %arg1, %c0_i32, %c0_i32_0 : i32, i32, i32
  }
  func.func @transform_4(%arg0: i32, %arg1: i32, %arg2: i32) -> (i32, i32, i32) {
    %c0_i32 = arith.constant 0 : i32
    return %arg0, %arg2, %arg1 : i32, i32, i32
  }
}

module attributes {stable_mosaic.version = 11 : i64} {
  func.func @_conv_tile_kernel(%arg0: i32, %arg1: i32, %arg2: i32, %arg3: memref<1x16x128xbf16, #tpu.memory_space<vmem>>, %arg4: memref<1x16x128xbf16, #tpu.memory_space<vmem>>, %arg5: memref<1x11x128x128xbf16, #tpu.memory_space<vmem>>, %arg6: memref<1x1x128xf32, #tpu.memory_space<vmem>>, %arg7: memref<1x16x128xf32, #tpu.memory_space<vmem>>) attributes {dimension_semantics = [#tpu.dimension_semantics<parallel>, #tpu.dimension_semantics<parallel>, #tpu.dimension_semantics<parallel>], iteration_bounds = array<i64: 2, 2, 1>, scalar_prefetch = 0 : i64, scratch_operands = 0 : i64, tpu.core_type = #tpu.core_type<tc>, window_params = [{transform_indices = @transform_0, window_bounds = array<i64: 1, 16, 128>}, {transform_indices = @transform_1, window_bounds = array<i64: 1, 16, 128>}, {transform_indices = @transform_2, window_bounds = array<i64: 1, 11, 128, 128>}, {transform_indices = @transform_3, window_bounds = array<i64: 1, 1, 128>}, {transform_indices = @transform_4, window_bounds = array<i64: 1, 16, 128>}]} {
    %c0 = arith.constant 0 : index
    %c0_0 = arith.constant 0 : index
    %c0_1 = arith.constant 0 : index
    %0 = vector.load %arg3[%c0, %c0_0, %c0_1] : memref<1x16x128xbf16, #tpu.memory_space<vmem>>, vector<1x16x128xbf16>
    %1 = vector.shape_cast %0 : vector<1x16x128xbf16> to vector<16x128xbf16>
    %c0_2 = arith.constant 0 : index
    %c0_3 = arith.constant 0 : index
    %c0_4 = arith.constant 0 : index
    %2 = vector.load %arg4[%c0_2, %c0_3, %c0_4] : memref<1x16x128xbf16, #tpu.memory_space<vmem>>, vector<1x16x128xbf16>
    %3 = vector.shape_cast %2 : vector<1x16x128xbf16> to vector<16x128xbf16>
    %4 = tpu.concatenate %1, %3 in 0 : vector<16x128xbf16>, vector<16x128xbf16> -> vector<32x128xbf16>
    %cst = arith.constant 0.000000e+00 : f32
    %5 = vector.broadcast %cst : f32 to vector<16x128xf32>
    %c0_5 = arith.constant 0 : index
    %c0_6 = arith.constant 0 : index
    %c0_7 = arith.constant 0 : index
    %c0_8 = arith.constant 0 : index
    %6 = vector.load %arg5[%c0_5, %c0_6, %c0_7, %c0_8] : memref<1x11x128x128xbf16, #tpu.memory_space<vmem>>, vector<1x1x128x128xbf16>
    %7 = vector.shape_cast %6 : vector<1x1x128x128xbf16> to vector<128x128xbf16>
    %cst_9 = arith.constant dense<0.000000e+00> : vector<32x128xf32>
    %8 = tpu.matmul %4, %7, %cst_9 {dimension_numbers = #tpu.dot_dimension_numbers<[1], [0], [0], [1], [0, 0, 1, 1], [], []>} : vector<32x128xbf16>, vector<128x128xbf16>, vector<32x128xf32> -> vector<32x128xf32>
    %9 = vector.extract_strided_slice %8 {offsets = [0, 0], sizes = [16, 128], strides = [1, 1]} : vector<32x128xf32> to vector<16x128xf32>
    %10 = arith.addf %5, %9 : vector<16x128xf32>
    %c0_10 = arith.constant 0 : index
    %c1 = arith.constant 1 : index
    %c0_11 = arith.constant 0 : index
    %c0_12 = arith.constant 0 : index
    %11 = vector.load %arg5[%c0_10, %c1, %c0_11, %c0_12] : memref<1x11x128x128xbf16, #tpu.memory_space<vmem>>, vector<1x1x128x128xbf16>
    %12 = vector.shape_cast %11 : vector<1x1x128x128xbf16> to vector<128x128xbf16>
    %cst_13 = arith.constant dense<0.000000e+00> : vector<32x128xf32>
    %13 = tpu.matmul %4, %12, %cst_13 {dimension_numbers = #tpu.dot_dimension_numbers<[1], [0], [0], [1], [0, 0, 1, 1], [], []>} : vector<32x128xbf16>, vector<128x128xbf16>, vector<32x128xf32> -> vector<32x128xf32>
    %14 = vector.extract_strided_slice %13 {offsets = [1, 0], sizes = [16, 128], strides = [1, 1]} : vector<32x128xf32> to vector<16x128xf32>
    %15 = arith.addf %10, %14 : vector<16x128xf32>
    %c0_14 = arith.constant 0 : index
    %c2 = arith.constant 2 : index
    %c0_15 = arith.constant 0 : index
    %c0_16 = arith.constant 0 : index
    %16 = vector.load %arg5[%c0_14, %c2, %c0_15, %c0_16] : memref<1x11x128x128xbf16, #tpu.memory_space<vmem>>, vector<1x1x128x128xbf16>
    %17 = vector.shape_cast %16 : vector<1x1x128x128xbf16> to vector<128x128xbf16>
    %cst_17 = arith.constant dense<0.000000e+00> : vector<32x128xf32>
    %18 = tpu.matmul %4, %17, %cst_17 {dimension_numbers = #tpu.dot_dimension_numbers<[1], [0], [0], [1], [0, 0, 1, 1], [], []>} : vector<32x128xbf16>, vector<128x128xbf16>, vector<32x128xf32> -> vector<32x128xf32>
    %19 = vector.extract_strided_slice %18 {offsets = [2, 0], sizes = [16, 128], strides = [1, 1]} : vector<32x128xf32> to vector<16x128xf32>
    %20 = arith.addf %15, %19 : vector<16x128xf32>
    %c0_18 = arith.constant 0 : index
    %c3 = arith.constant 3 : index
    %c0_19 = arith.constant 0 : index
    %c0_20 = arith.constant 0 : index
    %21 = vector.load %arg5[%c0_18, %c3, %c0_19, %c0_20] : memref<1x11x128x128xbf16, #tpu.memory_space<vmem>>, vector<1x1x128x128xbf16>
    %22 = vector.shape_cast %21 : vector<1x1x128x128xbf16> to vector<128x128xbf16>
    %cst_21 = arith.constant dense<0.000000e+00> : vector<32x128xf32>
    %23 = tpu.matmul %4, %22, %cst_21 {dimension_numbers = #tpu.dot_dimension_numbers<[1], [0], [0], [1], [0, 0, 1, 1], [], []>} : vector<32x128xbf16>, vector<128x128xbf16>, vector<32x128xf32> -> vector<32x128xf32>
    %24 = vector.extract_strided_slice %23 {offsets = [3, 0], sizes = [16, 128], strides = [1, 1]} : vector<32x128xf32> to vector<16x128xf32>
    %25 = arith.addf %20, %24 : vector<16x128xf32>
    %c0_22 = arith.constant 0 : index
    %c4 = arith.constant 4 : index
    %c0_23 = arith.constant 0 : index
    %c0_24 = arith.constant 0 : index
    %26 = vector.load %arg5[%c0_22, %c4, %c0_23, %c0_24] : memref<1x11x128x128xbf16, #tpu.memory_space<vmem>>, vector<1x1x128x128xbf16>
    %27 = vector.shape_cast %26 : vector<1x1x128x128xbf16> to vector<128x128xbf16>
    %cst_25 = arith.constant dense<0.000000e+00> : vector<32x128xf32>
    %28 = tpu.matmul %4, %27, %cst_25 {dimension_numbers = #tpu.dot_dimension_numbers<[1], [0], [0], [1], [0, 0, 1, 1], [], []>} : vector<32x128xbf16>, vector<128x128xbf16>, vector<32x128xf32> -> vector<32x128xf32>
    %29 = vector.extract_strided_slice %28 {offsets = [4, 0], sizes = [16, 128], strides = [1, 1]} : vector<32x128xf32> to vector<16x128xf32>
    %30 = arith.addf %25, %29 : vector<16x128xf32>
    %c0_26 = arith.constant 0 : index
    %c5 = arith.constant 5 : index
    %c0_27 = arith.constant 0 : index
    %c0_28 = arith.constant 0 : index
    %31 = vector.load %arg5[%c0_26, %c5, %c0_27, %c0_28] : memref<1x11x128x128xbf16, #tpu.memory_space<vmem>>, vector<1x1x128x128xbf16>
    %32 = vector.shape_cast %31 : vector<1x1x128x128xbf16> to vector<128x128xbf16>
    %cst_29 = arith.constant dense<0.000000e+00> : vector<32x128xf32>
    %33 = tpu.matmul %4, %32, %cst_29 {dimension_numbers = #tpu.dot_dimension_numbers<[1], [0], [0], [1], [0, 0, 1, 1], [], []>} : vector<32x128xbf16>, vector<128x128xbf16>, vector<32x128xf32> -> vector<32x128xf32>
    %34 = vector.extract_strided_slice %33 {offsets = [5, 0], sizes = [16, 128], strides = [1, 1]} : vector<32x128xf32> to vector<16x128xf32>
    %35 = arith.addf %30, %34 : vector<16x128xf32>
    %c0_30 = arith.constant 0 : index
    %c6 = arith.constant 6 : index
    %c0_31 = arith.constant 0 : index
    %c0_32 = arith.constant 0 : index
    %36 = vector.load %arg5[%c0_30, %c6, %c0_31, %c0_32] : memref<1x11x128x128xbf16, #tpu.memory_space<vmem>>, vector<1x1x128x128xbf16>
    %37 = vector.shape_cast %36 : vector<1x1x128x128xbf16> to vector<128x128xbf16>
    %cst_33 = arith.constant dense<0.000000e+00> : vector<32x128xf32>
    %38 = tpu.matmul %4, %37, %cst_33 {dimension_numbers = #tpu.dot_dimension_numbers<[1], [0], [0], [1], [0, 0, 1, 1], [], []>} : vector<32x128xbf16>, vector<128x128xbf16>, vector<32x128xf32> -> vector<32x128xf32>
    %39 = vector.extract_strided_slice %38 {offsets = [6, 0], sizes = [16, 128], strides = [1, 1]} : vector<32x128xf32> to vector<16x128xf32>
    %40 = arith.addf %35, %39 : vector<16x128xf32>
    %c0_34 = arith.constant 0 : index
    %c7 = arith.constant 7 : index
    %c0_35 = arith.constant 0 : index
    %c0_36 = arith.constant 0 : index
    %41 = vector.load %arg5[%c0_34, %c7, %c0_35, %c0_36] : memref<1x11x128x128xbf16, #tpu.memory_space<vmem>>, vector<1x1x128x128xbf16>
    %42 = vector.shape_cast %41 : vector<1x1x128x128xbf16> to vector<128x128xbf16>
    %cst_37 = arith.constant dense<0.000000e+00> : vector<32x128xf32>
    %43 = tpu.matmul %4, %42, %cst_37 {dimension_numbers = #tpu.dot_dimension_numbers<[1], [0], [0], [1], [0, 0, 1, 1], [], []>} : vector<32x128xbf16>, vector<128x128xbf16>, vector<32x128xf32> -> vector<32x128xf32>
    %44 = vector.extract_strided_slice %43 {offsets = [7, 0], sizes = [16, 128], strides = [1, 1]} : vector<32x128xf32> to vector<16x128xf32>
    %45 = arith.addf %40, %44 : vector<16x128xf32>
    %c0_38 = arith.constant 0 : index
    %c8 = arith.constant 8 : index
    %c0_39 = arith.constant 0 : index
    %c0_40 = arith.constant 0 : index
    %46 = vector.load %arg5[%c0_38, %c8, %c0_39, %c0_40] : memref<1x11x128x128xbf16, #tpu.memory_space<vmem>>, vector<1x1x128x128xbf16>
    %47 = vector.shape_cast %46 : vector<1x1x128x128xbf16> to vector<128x128xbf16>
    %cst_41 = arith.constant dense<0.000000e+00> : vector<32x128xf32>
    %48 = tpu.matmul %4, %47, %cst_41 {dimension_numbers = #tpu.dot_dimension_numbers<[1], [0], [0], [1], [0, 0, 1, 1], [], []>} : vector<32x128xbf16>, vector<128x128xbf16>, vector<32x128xf32> -> vector<32x128xf32>
    %49 = vector.extract_strided_slice %48 {offsets = [8, 0], sizes = [16, 128], strides = [1, 1]} : vector<32x128xf32> to vector<16x128xf32>
    %50 = arith.addf %45, %49 : vector<16x128xf32>
    %c0_42 = arith.constant 0 : index
    %c9 = arith.constant 9 : index
    %c0_43 = arith.constant 0 : index
    %c0_44 = arith.constant 0 : index
    %51 = vector.load %arg5[%c0_42, %c9, %c0_43, %c0_44] : memref<1x11x128x128xbf16, #tpu.memory_space<vmem>>, vector<1x1x128x128xbf16>
    %52 = vector.shape_cast %51 : vector<1x1x128x128xbf16> to vector<128x128xbf16>
    %cst_45 = arith.constant dense<0.000000e+00> : vector<32x128xf32>
    %53 = tpu.matmul %4, %52, %cst_45 {dimension_numbers = #tpu.dot_dimension_numbers<[1], [0], [0], [1], [0, 0, 1, 1], [], []>} : vector<32x128xbf16>, vector<128x128xbf16>, vector<32x128xf32> -> vector<32x128xf32>
    %54 = vector.extract_strided_slice %53 {offsets = [9, 0], sizes = [16, 128], strides = [1, 1]} : vector<32x128xf32> to vector<16x128xf32>
    %55 = arith.addf %50, %54 : vector<16x128xf32>
    %c0_46 = arith.constant 0 : index
    %c10 = arith.constant 10 : index
    %c0_47 = arith.constant 0 : index
    %c0_48 = arith.constant 0 : index
    %56 = vector.load %arg5[%c0_46, %c10, %c0_47, %c0_48] : memref<1x11x128x128xbf16, #tpu.memory_space<vmem>>, vector<1x1x128x128xbf16>
    %57 = vector.shape_cast %56 : vector<1x1x128x128xbf16> to vector<128x128xbf16>
    %cst_49 = arith.constant dense<0.000000e+00> : vector<32x128xf32>
    %58 = tpu.matmul %4, %57, %cst_49 {dimension_numbers = #tpu.dot_dimension_numbers<[1], [0], [0], [1], [0, 0, 1, 1], [], []>} : vector<32x128xbf16>, vector<128x128xbf16>, vector<32x128xf32> -> vector<32x128xf32>
    %59 = vector.extract_strided_slice %58 {offsets = [10, 0], sizes = [16, 128], strides = [1, 1]} : vector<32x128xf32> to vector<16x128xf32>
    %60 = arith.addf %55, %59 : vector<16x128xf32>
    %c0_50 = arith.constant 0 : index
    %c0_51 = arith.constant 0 : index
    %c0_52 = arith.constant 0 : index
    %61 = vector.load %arg6[%c0_50, %c0_51, %c0_52] : memref<1x1x128xf32, #tpu.memory_space<vmem>>, vector<1x1x128xf32>
    %62 = vector.shape_cast %61 : vector<1x1x128xf32> to vector<1x128xf32>
    %63 = vector.broadcast %62 : vector<1x128xf32> to vector<16x128xf32>
    %64 = arith.addf %60, %63 : vector<16x128xf32>
    %cst_53 = arith.constant 0.000000e+00 : f32
    %65 = vector.broadcast %cst_53 : f32 to vector<16x128xf32>
    %66 = arith.cmpf oge, %64, %65 : vector<16x128xf32>
    %cst_54 = arith.constant 1.000000e-01 : f32
    %67 = vector.broadcast %cst_54 : f32 to vector<16x128xf32>
    %68 = arith.mulf %67, %64 : vector<16x128xf32>
    %69 = arith.select %66, %64, %68 : vector<16x128xi1>, vector<16x128xf32>
    %c0_55 = arith.constant 0 : index
    %c0_56 = arith.constant 0 : index
    %c0_57 = arith.constant 0 : index
    %70 = vector.load %arg7[%c0_55, %c0_56, %c0_57] : memref<1x16x128xf32, #tpu.memory_space<vmem>>, vector<1x16x128xf32>
    %71 = vector.shape_cast %70 : vector<1x16x128xf32> to vector<16x128xf32>
    %72 = vector.shape_cast %69 : vector<16x128xf32> to vector<1x16x128xf32>
    tpu.vector_store %arg7[%c0_55, %c0_56, %c0_57], %72 {strides = array<i32>} : memref<1x16x128xf32, #tpu.memory_space<vmem>>, vector<1x16x128xf32>,
    return
  }
  func.func @transform_0(%arg0: i32, %arg1: i32, %arg2: i32) -> (i32, i32, i32) {
    %c1_i32 = arith.constant 1 : i32
    %0 = arith.muli %arg1, %c1_i32 : i32
    %c0_i32 = arith.constant 0 : i32
    return %arg0, %arg2, %0 : i32, i32, i32
  }
  func.func @transform_1(%arg0: i32, %arg1: i32, %arg2: i32) -> (i32, i32, i32) {
    %c1_i32 = arith.constant 1 : i32
    %0 = arith.addi %arg2, %c1_i32 : i32
    %c1_i32_0 = arith.constant 1 : i32
    %1 = arith.muli %0, %c1_i32_0 : i32
    %c1_i32_1 = arith.constant 1 : i32
    %2 = arith.muli %arg1, %c1_i32_1 : i32
    %c0_i32 = arith.constant 0 : i32
    return %arg0, %1, %2 : i32, i32, i32
  }
  func.func @transform_2(%arg0: i32, %arg1: i32, %arg2: i32) -> (i32, i32, i32, i32) {
    %c0_i32 = arith.constant 0 : i32
    %c0_i32_0 = arith.constant 0 : i32
    %c0_i32_1 = arith.constant 0 : i32
    %c0_i32_2 = arith.constant 0 : i32
    return %arg1, %c0_i32, %c0_i32_0, %c0_i32_1 : i32, i32, i32, i32
  }
  func.func @transform_3(%arg0: i32, %arg1: i32, %arg2: i32) -> (i32, i32, i32) {
    %c0_i32 = arith.constant 0 : i32
    %c0_i32_0 = arith.constant 0 : i32
    %c0_i32_1 = arith.constant 0 : i32
    return %arg1, %c0_i32, %c0_i32_0 : i32, i32, i32
  }
  func.func @transform_4(%arg0: i32, %arg1: i32, %arg2: i32) -> (i32, i32, i32) {
    %c0_i32 = arith.constant 0 : i32
    return %arg0, %arg2, %arg1 : i32, i32, i32
  }
}

module attributes {stable_mosaic.version = 11 : i64} {
  func.func @_conv_tile_kernel(%arg0: i32, %arg1: i32, %arg2: i32, %arg3: memref<1x16x128xbf16, #tpu.memory_space<vmem>>, %arg4: memref<1x16x128xbf16, #tpu.memory_space<vmem>>, %arg5: memref<1x11x128x128xbf16, #tpu.memory_space<vmem>>, %arg6: memref<1x1x128xf32, #tpu.memory_space<vmem>>, %arg7: memref<1x16x128xf32, #tpu.memory_space<vmem>>) attributes {dimension_semantics = [#tpu.dimension_semantics<parallel>, #tpu.dimension_semantics<parallel>, #tpu.dimension_semantics<parallel>], iteration_bounds = array<i64: 2, 8, 1>, scalar_prefetch = 0 : i64, scratch_operands = 0 : i64, tpu.core_type = #tpu.core_type<tc>, window_params = [{transform_indices = @transform_0, window_bounds = array<i64: 1, 16, 128>}, {transform_indices = @transform_1, window_bounds = array<i64: 1, 16, 128>}, {transform_indices = @transform_2, window_bounds = array<i64: 1, 11, 128, 128>}, {transform_indices = @transform_3, window_bounds = array<i64: 1, 1, 128>}, {transform_indices = @transform_4, window_bounds = array<i64: 1, 16, 128>}]} {
    %c0 = arith.constant 0 : index
    %c0_0 = arith.constant 0 : index
    %c0_1 = arith.constant 0 : index
    %0 = vector.load %arg3[%c0, %c0_0, %c0_1] : memref<1x16x128xbf16, #tpu.memory_space<vmem>>, vector<1x16x128xbf16>
    %1 = vector.shape_cast %0 : vector<1x16x128xbf16> to vector<16x128xbf16>
    %c0_2 = arith.constant 0 : index
    %c0_3 = arith.constant 0 : index
    %c0_4 = arith.constant 0 : index
    %2 = vector.load %arg4[%c0_2, %c0_3, %c0_4] : memref<1x16x128xbf16, #tpu.memory_space<vmem>>, vector<1x16x128xbf16>
    %3 = vector.shape_cast %2 : vector<1x16x128xbf16> to vector<16x128xbf16>
    %4 = tpu.concatenate %1, %3 in 0 : vector<16x128xbf16>, vector<16x128xbf16> -> vector<32x128xbf16>
    %cst = arith.constant 0.000000e+00 : f32
    %5 = vector.broadcast %cst : f32 to vector<16x128xf32>
    %c0_5 = arith.constant 0 : index
    %c0_6 = arith.constant 0 : index
    %c0_7 = arith.constant 0 : index
    %c0_8 = arith.constant 0 : index
    %6 = vector.load %arg5[%c0_5, %c0_6, %c0_7, %c0_8] : memref<1x11x128x128xbf16, #tpu.memory_space<vmem>>, vector<1x1x128x128xbf16>
    %7 = vector.shape_cast %6 : vector<1x1x128x128xbf16> to vector<128x128xbf16>
    %cst_9 = arith.constant dense<0.000000e+00> : vector<32x128xf32>
    %8 = tpu.matmul %4, %7, %cst_9 {dimension_numbers = #tpu.dot_dimension_numbers<[1], [0], [0], [1], [0, 0, 1, 1], [], []>} : vector<32x128xbf16>, vector<128x128xbf16>, vector<32x128xf32> -> vector<32x128xf32>
    %9 = vector.extract_strided_slice %8 {offsets = [0, 0], sizes = [16, 128], strides = [1, 1]} : vector<32x128xf32> to vector<16x128xf32>
    %10 = arith.addf %5, %9 : vector<16x128xf32>
    %c0_10 = arith.constant 0 : index
    %c1 = arith.constant 1 : index
    %c0_11 = arith.constant 0 : index
    %c0_12 = arith.constant 0 : index
    %11 = vector.load %arg5[%c0_10, %c1, %c0_11, %c0_12] : memref<1x11x128x128xbf16, #tpu.memory_space<vmem>>, vector<1x1x128x128xbf16>
    %12 = vector.shape_cast %11 : vector<1x1x128x128xbf16> to vector<128x128xbf16>
    %cst_13 = arith.constant dense<0.000000e+00> : vector<32x128xf32>
    %13 = tpu.matmul %4, %12, %cst_13 {dimension_numbers = #tpu.dot_dimension_numbers<[1], [0], [0], [1], [0, 0, 1, 1], [], []>} : vector<32x128xbf16>, vector<128x128xbf16>, vector<32x128xf32> -> vector<32x128xf32>
    %14 = vector.extract_strided_slice %13 {offsets = [1, 0], sizes = [16, 128], strides = [1, 1]} : vector<32x128xf32> to vector<16x128xf32>
    %15 = arith.addf %10, %14 : vector<16x128xf32>
    %c0_14 = arith.constant 0 : index
    %c2 = arith.constant 2 : index
    %c0_15 = arith.constant 0 : index
    %c0_16 = arith.constant 0 : index
    %16 = vector.load %arg5[%c0_14, %c2, %c0_15, %c0_16] : memref<1x11x128x128xbf16, #tpu.memory_space<vmem>>, vector<1x1x128x128xbf16>
    %17 = vector.shape_cast %16 : vector<1x1x128x128xbf16> to vector<128x128xbf16>
    %cst_17 = arith.constant dense<0.000000e+00> : vector<32x128xf32>
    %18 = tpu.matmul %4, %17, %cst_17 {dimension_numbers = #tpu.dot_dimension_numbers<[1], [0], [0], [1], [0, 0, 1, 1], [], []>} : vector<32x128xbf16>, vector<128x128xbf16>, vector<32x128xf32> -> vector<32x128xf32>
    %19 = vector.extract_strided_slice %18 {offsets = [2, 0], sizes = [16, 128], strides = [1, 1]} : vector<32x128xf32> to vector<16x128xf32>
    %20 = arith.addf %15, %19 : vector<16x128xf32>
    %c0_18 = arith.constant 0 : index
    %c3 = arith.constant 3 : index
    %c0_19 = arith.constant 0 : index
    %c0_20 = arith.constant 0 : index
    %21 = vector.load %arg5[%c0_18, %c3, %c0_19, %c0_20] : memref<1x11x128x128xbf16, #tpu.memory_space<vmem>>, vector<1x1x128x128xbf16>
    %22 = vector.shape_cast %21 : vector<1x1x128x128xbf16> to vector<128x128xbf16>
    %cst_21 = arith.constant dense<0.000000e+00> : vector<32x128xf32>
    %23 = tpu.matmul %4, %22, %cst_21 {dimension_numbers = #tpu.dot_dimension_numbers<[1], [0], [0], [1], [0, 0, 1, 1], [], []>} : vector<32x128xbf16>, vector<128x128xbf16>, vector<32x128xf32> -> vector<32x128xf32>
    %24 = vector.extract_strided_slice %23 {offsets = [3, 0], sizes = [16, 128], strides = [1, 1]} : vector<32x128xf32> to vector<16x128xf32>
    %25 = arith.addf %20, %24 : vector<16x128xf32>
    %c0_22 = arith.constant 0 : index
    %c4 = arith.constant 4 : index
    %c0_23 = arith.constant 0 : index
    %c0_24 = arith.constant 0 : index
    %26 = vector.load %arg5[%c0_22, %c4, %c0_23, %c0_24] : memref<1x11x128x128xbf16, #tpu.memory_space<vmem>>, vector<1x1x128x128xbf16>
    %27 = vector.shape_cast %26 : vector<1x1x128x128xbf16> to vector<128x128xbf16>
    %cst_25 = arith.constant dense<0.000000e+00> : vector<32x128xf32>
    %28 = tpu.matmul %4, %27, %cst_25 {dimension_numbers = #tpu.dot_dimension_numbers<[1], [0], [0], [1], [0, 0, 1, 1], [], []>} : vector<32x128xbf16>, vector<128x128xbf16>, vector<32x128xf32> -> vector<32x128xf32>
    %29 = vector.extract_strided_slice %28 {offsets = [4, 0], sizes = [16, 128], strides = [1, 1]} : vector<32x128xf32> to vector<16x128xf32>
    %30 = arith.addf %25, %29 : vector<16x128xf32>
    %c0_26 = arith.constant 0 : index
    %c5 = arith.constant 5 : index
    %c0_27 = arith.constant 0 : index
    %c0_28 = arith.constant 0 : index
    %31 = vector.load %arg5[%c0_26, %c5, %c0_27, %c0_28] : memref<1x11x128x128xbf16, #tpu.memory_space<vmem>>, vector<1x1x128x128xbf16>
    %32 = vector.shape_cast %31 : vector<1x1x128x128xbf16> to vector<128x128xbf16>
    %cst_29 = arith.constant dense<0.000000e+00> : vector<32x128xf32>
    %33 = tpu.matmul %4, %32, %cst_29 {dimension_numbers = #tpu.dot_dimension_numbers<[1], [0], [0], [1], [0, 0, 1, 1], [], []>} : vector<32x128xbf16>, vector<128x128xbf16>, vector<32x128xf32> -> vector<32x128xf32>
    %34 = vector.extract_strided_slice %33 {offsets = [5, 0], sizes = [16, 128], strides = [1, 1]} : vector<32x128xf32> to vector<16x128xf32>
    %35 = arith.addf %30, %34 : vector<16x128xf32>
    %c0_30 = arith.constant 0 : index
    %c6 = arith.constant 6 : index
    %c0_31 = arith.constant 0 : index
    %c0_32 = arith.constant 0 : index
    %36 = vector.load %arg5[%c0_30, %c6, %c0_31, %c0_32] : memref<1x11x128x128xbf16, #tpu.memory_space<vmem>>, vector<1x1x128x128xbf16>
    %37 = vector.shape_cast %36 : vector<1x1x128x128xbf16> to vector<128x128xbf16>
    %cst_33 = arith.constant dense<0.000000e+00> : vector<32x128xf32>
    %38 = tpu.matmul %4, %37, %cst_33 {dimension_numbers = #tpu.dot_dimension_numbers<[1], [0], [0], [1], [0, 0, 1, 1], [], []>} : vector<32x128xbf16>, vector<128x128xbf16>, vector<32x128xf32> -> vector<32x128xf32>
    %39 = vector.extract_strided_slice %38 {offsets = [6, 0], sizes = [16, 128], strides = [1, 1]} : vector<32x128xf32> to vector<16x128xf32>
    %40 = arith.addf %35, %39 : vector<16x128xf32>
    %c0_34 = arith.constant 0 : index
    %c7 = arith.constant 7 : index
    %c0_35 = arith.constant 0 : index
    %c0_36 = arith.constant 0 : index
    %41 = vector.load %arg5[%c0_34, %c7, %c0_35, %c0_36] : memref<1x11x128x128xbf16, #tpu.memory_space<vmem>>, vector<1x1x128x128xbf16>
    %42 = vector.shape_cast %41 : vector<1x1x128x128xbf16> to vector<128x128xbf16>
    %cst_37 = arith.constant dense<0.000000e+00> : vector<32x128xf32>
    %43 = tpu.matmul %4, %42, %cst_37 {dimension_numbers = #tpu.dot_dimension_numbers<[1], [0], [0], [1], [0, 0, 1, 1], [], []>} : vector<32x128xbf16>, vector<128x128xbf16>, vector<32x128xf32> -> vector<32x128xf32>
    %44 = vector.extract_strided_slice %43 {offsets = [7, 0], sizes = [16, 128], strides = [1, 1]} : vector<32x128xf32> to vector<16x128xf32>
    %45 = arith.addf %40, %44 : vector<16x128xf32>
    %c0_38 = arith.constant 0 : index
    %c8 = arith.constant 8 : index
    %c0_39 = arith.constant 0 : index
    %c0_40 = arith.constant 0 : index
    %46 = vector.load %arg5[%c0_38, %c8, %c0_39, %c0_40] : memref<1x11x128x128xbf16, #tpu.memory_space<vmem>>, vector<1x1x128x128xbf16>
    %47 = vector.shape_cast %46 : vector<1x1x128x128xbf16> to vector<128x128xbf16>
    %cst_41 = arith.constant dense<0.000000e+00> : vector<32x128xf32>
    %48 = tpu.matmul %4, %47, %cst_41 {dimension_numbers = #tpu.dot_dimension_numbers<[1], [0], [0], [1], [0, 0, 1, 1], [], []>} : vector<32x128xbf16>, vector<128x128xbf16>, vector<32x128xf32> -> vector<32x128xf32>
    %49 = vector.extract_strided_slice %48 {offsets = [8, 0], sizes = [16, 128], strides = [1, 1]} : vector<32x128xf32> to vector<16x128xf32>
    %50 = arith.addf %45, %49 : vector<16x128xf32>
    %c0_42 = arith.constant 0 : index
    %c9 = arith.constant 9 : index
    %c0_43 = arith.constant 0 : index
    %c0_44 = arith.constant 0 : index
    %51 = vector.load %arg5[%c0_42, %c9, %c0_43, %c0_44] : memref<1x11x128x128xbf16, #tpu.memory_space<vmem>>, vector<1x1x128x128xbf16>
    %52 = vector.shape_cast %51 : vector<1x1x128x128xbf16> to vector<128x128xbf16>
    %cst_45 = arith.constant dense<0.000000e+00> : vector<32x128xf32>
    %53 = tpu.matmul %4, %52, %cst_45 {dimension_numbers = #tpu.dot_dimension_numbers<[1], [0], [0], [1], [0, 0, 1, 1], [], []>} : vector<32x128xbf16>, vector<128x128xbf16>, vector<32x128xf32> -> vector<32x128xf32>
    %54 = vector.extract_strided_slice %53 {offsets = [9, 0], sizes = [16, 128], strides = [1, 1]} : vector<32x128xf32> to vector<16x128xf32>
    %55 = arith.addf %50, %54 : vector<16x128xf32>
    %c0_46 = arith.constant 0 : index
    %c10 = arith.constant 10 : index
    %c0_47 = arith.constant 0 : index
    %c0_48 = arith.constant 0 : index
    %56 = vector.load %arg5[%c0_46, %c10, %c0_47, %c0_48] : memref<1x11x128x128xbf16, #tpu.memory_space<vmem>>, vector<1x1x128x128xbf16>
    %57 = vector.shape_cast %56 : vector<1x1x128x128xbf16> to vector<128x128xbf16>
    %cst_49 = arith.constant dense<0.000000e+00> : vector<32x128xf32>
    %58 = tpu.matmul %4, %57, %cst_49 {dimension_numbers = #tpu.dot_dimension_numbers<[1], [0], [0], [1], [0, 0, 1, 1], [], []>} : vector<32x128xbf16>, vector<128x128xbf16>, vector<32x128xf32> -> vector<32x128xf32>
    %59 = vector.extract_strided_slice %58 {offsets = [10, 0], sizes = [16, 128], strides = [1, 1]} : vector<32x128xf32> to vector<16x128xf32>
    %60 = arith.addf %55, %59 : vector<16x128xf32>
    %c0_50 = arith.constant 0 : index
    %c0_51 = arith.constant 0 : index
    %c0_52 = arith.constant 0 : index
    %61 = vector.load %arg6[%c0_50, %c0_51, %c0_52] : memref<1x1x128xf32, #tpu.memory_space<vmem>>, vector<1x1x128xf32>
    %62 = vector.shape_cast %61 : vector<1x1x128xf32> to vector<1x128xf32>
    %63 = vector.broadcast %62 : vector<1x128xf32> to vector<16x128xf32>
    %64 = arith.addf %60, %63 : vector<16x128xf32>
    %cst_53 = arith.constant 0.000000e+00 : f32
    %65 = vector.broadcast %cst_53 : f32 to vector<16x128xf32>
    %66 = arith.cmpf oge, %64, %65 : vector<16x128xf32>
    %cst_54 = arith.constant 1.000000e-01 : f32
    %67 = vector.broadcast %cst_54 : f32 to vector<16x128xf32>
    %68 = arith.mulf %67, %64 : vector<16x128xf32>
    %69 = arith.select %66, %64, %68 : vector<16x128xi1>, vector<16x128xf32>
    %c0_55 = arith.constant 0 : index
    %c0_56 = arith.constant 0 : index
    %c0_57 = arith.constant 0 : index
    %70 = vector.load %arg7[%c0_55, %c0_56, %c0_57] : memref<1x16x128xf32, #tpu.memory_space<vmem>>, vector<1x16x128xf32>
    %71 = vector.shape_cast %70 : vector<1x16x128xf32> to vector<16x128xf32>
    %72 = vector.shape_cast %69 : vector<16x128xf32> to vector<1x16x128xf32>
    tpu.vector_store %arg7[%c0_55, %c0_56, %c0_57], %72 {strides = array<i32>} : memref<1x16x128xf32, #tpu.memory_space<vmem>>, vector<1x16x128xf32>,
    return
  }
  func.func @transform_0(%arg0: i32, %arg1: i32, %arg2: i32) -> (i32, i32, i32) {
    %c1_i32 = arith.constant 1 : i32
    %0 = arith.muli %arg1, %c1_i32 : i32
    %c0_i32 = arith.constant 0 : i32
    return %arg0, %arg2, %0 : i32, i32, i32
  }
  func.func @transform_1(%arg0: i32, %arg1: i32, %arg2: i32) -> (i32, i32, i32) {
    %c1_i32 = arith.constant 1 : i32
    %0 = arith.addi %arg2, %c1_i32 : i32
    %c1_i32_0 = arith.constant 1 : i32
    %1 = arith.muli %0, %c1_i32_0 : i32
    %c1_i32_1 = arith.constant 1 : i32
    %2 = arith.muli %arg1, %c1_i32_1 : i32
    %c0_i32 = arith.constant 0 : i32
    return %arg0, %1, %2 : i32, i32, i32
  }
  func.func @transform_2(%arg0: i32, %arg1: i32, %arg2: i32) -> (i32, i32, i32, i32) {
    %c0_i32 = arith.constant 0 : i32
    %c0_i32_0 = arith.constant 0 : i32
    %c0_i32_1 = arith.constant 0 : i32
    %c0_i32_2 = arith.constant 0 : i32
    return %arg1, %c0_i32, %c0_i32_0, %c0_i32_1 : i32, i32, i32, i32
  }
  func.func @transform_3(%arg0: i32, %arg1: i32, %arg2: i32) -> (i32, i32, i32) {
    %c0_i32 = arith.constant 0 : i32
    %c0_i32_0 = arith.constant 0 : i32
    %c0_i32_1 = arith.constant 0 : i32
    return %arg1, %c0_i32, %c0_i32_0 : i32, i32, i32
  }
  func.func @transform_4(%arg0: i32, %arg1: i32, %arg2: i32) -> (i32, i32, i32) {
    %c0_i32 = arith.constant 0 : i32
    return %arg0, %arg2, %arg1 : i32, i32, i32
  }
}

module attributes {stable_mosaic.version = 11 : i64} {
  func.func @_conv_tile_kernel(%arg0: i32, %arg1: i32, %arg2: i32, %arg3: memref<1x16x512xbf16, #tpu.memory_space<vmem>>, %arg4: memref<1x16x512xbf16, #tpu.memory_space<vmem>>, %arg5: memref<1x11x512x128xbf16, #tpu.memory_space<vmem>>, %arg6: memref<1x1x128xf32, #tpu.memory_space<vmem>>, %arg7: memref<1x16x128xf32, #tpu.memory_space<vmem>>) attributes {dimension_semantics = [#tpu.dimension_semantics<parallel>, #tpu.dimension_semantics<parallel>, #tpu.dimension_semantics<parallel>], iteration_bounds = array<i64: 2, 8, 1>, scalar_prefetch = 0 : i64, scratch_operands = 0 : i64, tpu.core_type = #tpu.core_type<tc>, window_params = [{transform_indices = @transform_0, window_bounds = array<i64: 1, 16, 512>}, {transform_indices = @transform_1, window_bounds = array<i64: 1, 16, 512>}, {transform_indices = @transform_2, window_bounds = array<i64: 1, 11, 512, 128>}, {transform_indices = @transform_3, window_bounds = array<i64: 1, 1, 128>}, {transform_indices = @transform_4, window_bounds = array<i64: 1, 16, 128>}]} {
    %c0 = arith.constant 0 : index
    %c0_0 = arith.constant 0 : index
    %c0_1 = arith.constant 0 : index
    %0 = vector.load %arg3[%c0, %c0_0, %c0_1] : memref<1x16x512xbf16, #tpu.memory_space<vmem>>, vector<1x16x512xbf16>
    %1 = vector.shape_cast %0 : vector<1x16x512xbf16> to vector<16x512xbf16>
    %c0_2 = arith.constant 0 : index
    %c0_3 = arith.constant 0 : index
    %c0_4 = arith.constant 0 : index
    %2 = vector.load %arg4[%c0_2, %c0_3, %c0_4] : memref<1x16x512xbf16, #tpu.memory_space<vmem>>, vector<1x16x512xbf16>
    %3 = vector.shape_cast %2 : vector<1x16x512xbf16> to vector<16x512xbf16>
    %4 = tpu.concatenate %1, %3 in 0 : vector<16x512xbf16>, vector<16x512xbf16> -> vector<32x512xbf16>
    %cst = arith.constant 0.000000e+00 : f32
    %5 = vector.broadcast %cst : f32 to vector<16x128xf32>
    %c0_5 = arith.constant 0 : index
    %c0_6 = arith.constant 0 : index
    %c0_7 = arith.constant 0 : index
    %c0_8 = arith.constant 0 : index
    %6 = vector.load %arg5[%c0_5, %c0_6, %c0_7, %c0_8] : memref<1x11x512x128xbf16, #tpu.memory_space<vmem>>, vector<1x1x512x128xbf16>
    %7 = vector.shape_cast %6 : vector<1x1x512x128xbf16> to vector<512x128xbf16>
    %cst_9 = arith.constant dense<0.000000e+00> : vector<32x128xf32>
    %8 = tpu.matmul %4, %7, %cst_9 {dimension_numbers = #tpu.dot_dimension_numbers<[1], [0], [0], [1], [0, 0, 1, 1], [], []>} : vector<32x512xbf16>, vector<512x128xbf16>, vector<32x128xf32> -> vector<32x128xf32>
    %9 = vector.extract_strided_slice %8 {offsets = [0, 0], sizes = [16, 128], strides = [1, 1]} : vector<32x128xf32> to vector<16x128xf32>
    %10 = arith.addf %5, %9 : vector<16x128xf32>
    %c0_10 = arith.constant 0 : index
    %c1 = arith.constant 1 : index
    %c0_11 = arith.constant 0 : index
    %c0_12 = arith.constant 0 : index
    %11 = vector.load %arg5[%c0_10, %c1, %c0_11, %c0_12] : memref<1x11x512x128xbf16, #tpu.memory_space<vmem>>, vector<1x1x512x128xbf16>
    %12 = vector.shape_cast %11 : vector<1x1x512x128xbf16> to vector<512x128xbf16>
    %cst_13 = arith.constant dense<0.000000e+00> : vector<32x128xf32>
    %13 = tpu.matmul %4, %12, %cst_13 {dimension_numbers = #tpu.dot_dimension_numbers<[1], [0], [0], [1], [0, 0, 1, 1], [], []>} : vector<32x512xbf16>, vector<512x128xbf16>, vector<32x128xf32> -> vector<32x128xf32>
    %14 = vector.extract_strided_slice %13 {offsets = [1, 0], sizes = [16, 128], strides = [1, 1]} : vector<32x128xf32> to vector<16x128xf32>
    %15 = arith.addf %10, %14 : vector<16x128xf32>
    %c0_14 = arith.constant 0 : index
    %c2 = arith.constant 2 : index
    %c0_15 = arith.constant 0 : index
    %c0_16 = arith.constant 0 : index
    %16 = vector.load %arg5[%c0_14, %c2, %c0_15, %c0_16] : memref<1x11x512x128xbf16, #tpu.memory_space<vmem>>, vector<1x1x512x128xbf16>
    %17 = vector.shape_cast %16 : vector<1x1x512x128xbf16> to vector<512x128xbf16>
    %cst_17 = arith.constant dense<0.000000e+00> : vector<32x128xf32>
    %18 = tpu.matmul %4, %17, %cst_17 {dimension_numbers = #tpu.dot_dimension_numbers<[1], [0], [0], [1], [0, 0, 1, 1], [], []>} : vector<32x512xbf16>, vector<512x128xbf16>, vector<32x128xf32> -> vector<32x128xf32>
    %19 = vector.extract_strided_slice %18 {offsets = [2, 0], sizes = [16, 128], strides = [1, 1]} : vector<32x128xf32> to vector<16x128xf32>
    %20 = arith.addf %15, %19 : vector<16x128xf32>
    %c0_18 = arith.constant 0 : index
    %c3 = arith.constant 3 : index
    %c0_19 = arith.constant 0 : index
    %c0_20 = arith.constant 0 : index
    %21 = vector.load %arg5[%c0_18, %c3, %c0_19, %c0_20] : memref<1x11x512x128xbf16, #tpu.memory_space<vmem>>, vector<1x1x512x128xbf16>
    %22 = vector.shape_cast %21 : vector<1x1x512x128xbf16> to vector<512x128xbf16>
    %cst_21 = arith.constant dense<0.000000e+00> : vector<32x128xf32>
    %23 = tpu.matmul %4, %22, %cst_21 {dimension_numbers = #tpu.dot_dimension_numbers<[1], [0], [0], [1], [0, 0, 1, 1], [], []>} : vector<32x512xbf16>, vector<512x128xbf16>, vector<32x128xf32> -> vector<32x128xf32>
    %24 = vector.extract_strided_slice %23 {offsets = [3, 0], sizes = [16, 128], strides = [1, 1]} : vector<32x128xf32> to vector<16x128xf32>
    %25 = arith.addf %20, %24 : vector<16x128xf32>
    %c0_22 = arith.constant 0 : index
    %c4 = arith.constant 4 : index
    %c0_23 = arith.constant 0 : index
    %c0_24 = arith.constant 0 : index
    %26 = vector.load %arg5[%c0_22, %c4, %c0_23, %c0_24] : memref<1x11x512x128xbf16, #tpu.memory_space<vmem>>, vector<1x1x512x128xbf16>
    %27 = vector.shape_cast %26 : vector<1x1x512x128xbf16> to vector<512x128xbf16>
    %cst_25 = arith.constant dense<0.000000e+00> : vector<32x128xf32>
    %28 = tpu.matmul %4, %27, %cst_25 {dimension_numbers = #tpu.dot_dimension_numbers<[1], [0], [0], [1], [0, 0, 1, 1], [], []>} : vector<32x512xbf16>, vector<512x128xbf16>, vector<32x128xf32> -> vector<32x128xf32>
    %29 = vector.extract_strided_slice %28 {offsets = [4, 0], sizes = [16, 128], strides = [1, 1]} : vector<32x128xf32> to vector<16x128xf32>
    %30 = arith.addf %25, %29 : vector<16x128xf32>
    %c0_26 = arith.constant 0 : index
    %c5 = arith.constant 5 : index
    %c0_27 = arith.constant 0 : index
    %c0_28 = arith.constant 0 : index
    %31 = vector.load %arg5[%c0_26, %c5, %c0_27, %c0_28] : memref<1x11x512x128xbf16, #tpu.memory_space<vmem>>, vector<1x1x512x128xbf16>
    %32 = vector.shape_cast %31 : vector<1x1x512x128xbf16> to vector<512x128xbf16>
    %cst_29 = arith.constant dense<0.000000e+00> : vector<32x128xf32>
    %33 = tpu.matmul %4, %32, %cst_29 {dimension_numbers = #tpu.dot_dimension_numbers<[1], [0], [0], [1], [0, 0, 1, 1], [], []>} : vector<32x512xbf16>, vector<512x128xbf16>, vector<32x128xf32> -> vector<32x128xf32>
    %34 = vector.extract_strided_slice %33 {offsets = [5, 0], sizes = [16, 128], strides = [1, 1]} : vector<32x128xf32> to vector<16x128xf32>
    %35 = arith.addf %30, %34 : vector<16x128xf32>
    %c0_30 = arith.constant 0 : index
    %c6 = arith.constant 6 : index
    %c0_31 = arith.constant 0 : index
    %c0_32 = arith.constant 0 : index
    %36 = vector.load %arg5[%c0_30, %c6, %c0_31, %c0_32] : memref<1x11x512x128xbf16, #tpu.memory_space<vmem>>, vector<1x1x512x128xbf16>
    %37 = vector.shape_cast %36 : vector<1x1x512x128xbf16> to vector<512x128xbf16>
    %cst_33 = arith.constant dense<0.000000e+00> : vector<32x128xf32>
    %38 = tpu.matmul %4, %37, %cst_33 {dimension_numbers = #tpu.dot_dimension_numbers<[1], [0], [0], [1], [0, 0, 1, 1], [], []>} : vector<32x512xbf16>, vector<512x128xbf16>, vector<32x128xf32> -> vector<32x128xf32>
    %39 = vector.extract_strided_slice %38 {offsets = [6, 0], sizes = [16, 128], strides = [1, 1]} : vector<32x128xf32> to vector<16x128xf32>
    %40 = arith.addf %35, %39 : vector<16x128xf32>
    %c0_34 = arith.constant 0 : index
    %c7 = arith.constant 7 : index
    %c0_35 = arith.constant 0 : index
    %c0_36 = arith.constant 0 : index
    %41 = vector.load %arg5[%c0_34, %c7, %c0_35, %c0_36] : memref<1x11x512x128xbf16, #tpu.memory_space<vmem>>, vector<1x1x512x128xbf16>
    %42 = vector.shape_cast %41 : vector<1x1x512x128xbf16> to vector<512x128xbf16>
    %cst_37 = arith.constant dense<0.000000e+00> : vector<32x128xf32>
    %43 = tpu.matmul %4, %42, %cst_37 {dimension_numbers = #tpu.dot_dimension_numbers<[1], [0], [0], [1], [0, 0, 1, 1], [], []>} : vector<32x512xbf16>, vector<512x128xbf16>, vector<32x128xf32> -> vector<32x128xf32>
    %44 = vector.extract_strided_slice %43 {offsets = [7, 0], sizes = [16, 128], strides = [1, 1]} : vector<32x128xf32> to vector<16x128xf32>
    %45 = arith.addf %40, %44 : vector<16x128xf32>
    %c0_38 = arith.constant 0 : index
    %c8 = arith.constant 8 : index
    %c0_39 = arith.constant 0 : index
    %c0_40 = arith.constant 0 : index
    %46 = vector.load %arg5[%c0_38, %c8, %c0_39, %c0_40] : memref<1x11x512x128xbf16, #tpu.memory_space<vmem>>, vector<1x1x512x128xbf16>
    %47 = vector.shape_cast %46 : vector<1x1x512x128xbf16> to vector<512x128xbf16>
    %cst_41 = arith.constant dense<0.000000e+00> : vector<32x128xf32>
    %48 = tpu.matmul %4, %47, %cst_41 {dimension_numbers = #tpu.dot_dimension_numbers<[1], [0], [0], [1], [0, 0, 1, 1], [], []>} : vector<32x512xbf16>, vector<512x128xbf16>, vector<32x128xf32> -> vector<32x128xf32>
    %49 = vector.extract_strided_slice %48 {offsets = [8, 0], sizes = [16, 128], strides = [1, 1]} : vector<32x128xf32> to vector<16x128xf32>
    %50 = arith.addf %45, %49 : vector<16x128xf32>
    %c0_42 = arith.constant 0 : index
    %c9 = arith.constant 9 : index
    %c0_43 = arith.constant 0 : index
    %c0_44 = arith.constant 0 : index
    %51 = vector.load %arg5[%c0_42, %c9, %c0_43, %c0_44] : memref<1x11x512x128xbf16, #tpu.memory_space<vmem>>, vector<1x1x512x128xbf16>
    %52 = vector.shape_cast %51 : vector<1x1x512x128xbf16> to vector<512x128xbf16>
    %cst_45 = arith.constant dense<0.000000e+00> : vector<32x128xf32>
    %53 = tpu.matmul %4, %52, %cst_45 {dimension_numbers = #tpu.dot_dimension_numbers<[1], [0], [0], [1], [0, 0, 1, 1], [], []>} : vector<32x512xbf16>, vector<512x128xbf16>, vector<32x128xf32> -> vector<32x128xf32>
    %54 = vector.extract_strided_slice %53 {offsets = [9, 0], sizes = [16, 128], strides = [1, 1]} : vector<32x128xf32> to vector<16x128xf32>
    %55 = arith.addf %50, %54 : vector<16x128xf32>
    %c0_46 = arith.constant 0 : index
    %c10 = arith.constant 10 : index
    %c0_47 = arith.constant 0 : index
    %c0_48 = arith.constant 0 : index
    %56 = vector.load %arg5[%c0_46, %c10, %c0_47, %c0_48] : memref<1x11x512x128xbf16, #tpu.memory_space<vmem>>, vector<1x1x512x128xbf16>
    %57 = vector.shape_cast %56 : vector<1x1x512x128xbf16> to vector<512x128xbf16>
    %cst_49 = arith.constant dense<0.000000e+00> : vector<32x128xf32>
    %58 = tpu.matmul %4, %57, %cst_49 {dimension_numbers = #tpu.dot_dimension_numbers<[1], [0], [0], [1], [0, 0, 1, 1], [], []>} : vector<32x512xbf16>, vector<512x128xbf16>, vector<32x128xf32> -> vector<32x128xf32>
    %59 = vector.extract_strided_slice %58 {offsets = [10, 0], sizes = [16, 128], strides = [1, 1]} : vector<32x128xf32> to vector<16x128xf32>
    %60 = arith.addf %55, %59 : vector<16x128xf32>
    %c0_50 = arith.constant 0 : index
    %c0_51 = arith.constant 0 : index
    %c0_52 = arith.constant 0 : index
    %61 = vector.load %arg6[%c0_50, %c0_51, %c0_52] : memref<1x1x128xf32, #tpu.memory_space<vmem>>, vector<1x1x128xf32>
    %62 = vector.shape_cast %61 : vector<1x1x128xf32> to vector<1x128xf32>
    %63 = vector.broadcast %62 : vector<1x128xf32> to vector<16x128xf32>
    %64 = arith.addf %60, %63 : vector<16x128xf32>
    %cst_53 = arith.constant 0.000000e+00 : f32
    %65 = vector.broadcast %cst_53 : f32 to vector<16x128xf32>
    %66 = arith.cmpf oge, %64, %65 : vector<16x128xf32>
    %cst_54 = arith.constant 1.000000e-01 : f32
    %67 = vector.broadcast %cst_54 : f32 to vector<16x128xf32>
    %68 = arith.mulf %67, %64 : vector<16x128xf32>
    %69 = arith.select %66, %64, %68 : vector<16x128xi1>, vector<16x128xf32>
    %c0_55 = arith.constant 0 : index
    %c0_56 = arith.constant 0 : index
    %c0_57 = arith.constant 0 : index
    %70 = vector.load %arg7[%c0_55, %c0_56, %c0_57] : memref<1x16x128xf32, #tpu.memory_space<vmem>>, vector<1x16x128xf32>
    %71 = vector.shape_cast %70 : vector<1x16x128xf32> to vector<16x128xf32>
    %72 = vector.shape_cast %69 : vector<16x128xf32> to vector<1x16x128xf32>
    tpu.vector_store %arg7[%c0_55, %c0_56, %c0_57], %72 {strides = array<i32>} : memref<1x16x128xf32, #tpu.memory_space<vmem>>, vector<1x16x128xf32>,
    return
  }
  func.func @transform_0(%arg0: i32, %arg1: i32, %arg2: i32) -> (i32, i32, i32) {
    %c1_i32 = arith.constant 1 : i32
    %0 = arith.muli %arg1, %c1_i32 : i32
    %c0_i32 = arith.constant 0 : i32
    return %arg0, %arg2, %0 : i32, i32, i32
  }
  func.func @transform_1(%arg0: i32, %arg1: i32, %arg2: i32) -> (i32, i32, i32) {
    %c1_i32 = arith.constant 1 : i32
    %0 = arith.addi %arg2, %c1_i32 : i32
    %c1_i32_0 = arith.constant 1 : i32
    %1 = arith.muli %0, %c1_i32_0 : i32
    %c1_i32_1 = arith.constant 1 : i32
    %2 = arith.muli %arg1, %c1_i32_1 : i32
    %c0_i32 = arith.constant 0 : i32
    return %arg0, %1, %2 : i32, i32, i32
  }
  func.func @transform_2(%arg0: i32, %arg1: i32, %arg2: i32) -> (i32, i32, i32, i32) {
    %c0_i32 = arith.constant 0 : i32
    %c0_i32_0 = arith.constant 0 : i32
    %c0_i32_1 = arith.constant 0 : i32
    %c0_i32_2 = arith.constant 0 : i32
    return %arg1, %c0_i32, %c0_i32_0, %c0_i32_1 : i32, i32, i32, i32
  }
  func.func @transform_3(%arg0: i32, %arg1: i32, %arg2: i32) -> (i32, i32, i32) {
    %c0_i32 = arith.constant 0 : i32
    %c0_i32_0 = arith.constant 0 : i32
    %c0_i32_1 = arith.constant 0 : i32
    return %arg1, %c0_i32, %c0_i32_0 : i32, i32, i32
  }
  func.func @transform_4(%arg0: i32, %arg1: i32, %arg2: i32) -> (i32, i32, i32) {
    %c0_i32 = arith.constant 0 : i32
    return %arg0, %arg2, %arg1 : i32, i32, i32
  }
}

module attributes {stable_mosaic.version = 11 : i64} {
  func.func @_conv_tile_kernel(%arg0: i32, %arg1: i32, %arg2: i32, %arg3: memref<1x16x1024xbf16, #tpu.memory_space<vmem>>, %arg4: memref<1x16x1024xbf16, #tpu.memory_space<vmem>>, %arg5: memref<1x5x1024x256xbf16, #tpu.memory_space<vmem>>, %arg6: memref<1x1x256xf32, #tpu.memory_space<vmem>>, %arg7: memref<1x16x256xf32, #tpu.memory_space<vmem>>) attributes {dimension_semantics = [#tpu.dimension_semantics<parallel>, #tpu.dimension_semantics<parallel>, #tpu.dimension_semantics<parallel>], iteration_bounds = array<i64: 2, 4, 1>, scalar_prefetch = 0 : i64, scratch_operands = 0 : i64, tpu.core_type = #tpu.core_type<tc>, window_params = [{transform_indices = @transform_0, window_bounds = array<i64: 1, 16, 1024>}, {transform_indices = @transform_1, window_bounds = array<i64: 1, 16, 1024>}, {transform_indices = @transform_2, window_bounds = array<i64: 1, 5, 1024, 256>}, {transform_indices = @transform_3, window_bounds = array<i64: 1, 1, 256>}, {transform_indices = @transform_4, window_bounds = array<i64: 1, 16, 256>}]} {
    %c0 = arith.constant 0 : index
    %c0_0 = arith.constant 0 : index
    %c0_1 = arith.constant 0 : index
    %0 = vector.load %arg3[%c0, %c0_0, %c0_1] : memref<1x16x1024xbf16, #tpu.memory_space<vmem>>, vector<1x16x1024xbf16>
    %1 = vector.shape_cast %0 : vector<1x16x1024xbf16> to vector<16x1024xbf16>
    %c0_2 = arith.constant 0 : index
    %c0_3 = arith.constant 0 : index
    %c0_4 = arith.constant 0 : index
    %2 = vector.load %arg4[%c0_2, %c0_3, %c0_4] : memref<1x16x1024xbf16, #tpu.memory_space<vmem>>, vector<1x16x1024xbf16>
    %3 = vector.shape_cast %2 : vector<1x16x1024xbf16> to vector<16x1024xbf16>
    %4 = tpu.concatenate %1, %3 in 0 : vector<16x1024xbf16>, vector<16x1024xbf16> -> vector<32x1024xbf16>
    %cst = arith.constant 0.000000e+00 : f32
    %5 = vector.broadcast %cst : f32 to vector<16x256xf32>
    %c0_5 = arith.constant 0 : index
    %c0_6 = arith.constant 0 : index
    %c0_7 = arith.constant 0 : index
    %c0_8 = arith.constant 0 : index
    %6 = vector.load %arg5[%c0_5, %c0_6, %c0_7, %c0_8] : memref<1x5x1024x256xbf16, #tpu.memory_space<vmem>>, vector<1x1x1024x256xbf16>
    %7 = vector.shape_cast %6 : vector<1x1x1024x256xbf16> to vector<1024x256xbf16>
    %cst_9 = arith.constant dense<0.000000e+00> : vector<32x256xf32>
    %8 = tpu.matmul %4, %7, %cst_9 {dimension_numbers = #tpu.dot_dimension_numbers<[1], [0], [0], [1], [0, 0, 1, 1], [], []>} : vector<32x1024xbf16>, vector<1024x256xbf16>, vector<32x256xf32> -> vector<32x256xf32>
    %9 = vector.extract_strided_slice %8 {offsets = [0, 0], sizes = [16, 256], strides = [1, 1]} : vector<32x256xf32> to vector<16x256xf32>
    %10 = arith.addf %5, %9 : vector<16x256xf32>
    %c0_10 = arith.constant 0 : index
    %c1 = arith.constant 1 : index
    %c0_11 = arith.constant 0 : index
    %c0_12 = arith.constant 0 : index
    %11 = vector.load %arg5[%c0_10, %c1, %c0_11, %c0_12] : memref<1x5x1024x256xbf16, #tpu.memory_space<vmem>>, vector<1x1x1024x256xbf16>
    %12 = vector.shape_cast %11 : vector<1x1x1024x256xbf16> to vector<1024x256xbf16>
    %cst_13 = arith.constant dense<0.000000e+00> : vector<32x256xf32>
    %13 = tpu.matmul %4, %12, %cst_13 {dimension_numbers = #tpu.dot_dimension_numbers<[1], [0], [0], [1], [0, 0, 1, 1], [], []>} : vector<32x1024xbf16>, vector<1024x256xbf16>, vector<32x256xf32> -> vector<32x256xf32>
    %14 = vector.extract_strided_slice %13 {offsets = [1, 0], sizes = [16, 256], strides = [1, 1]} : vector<32x256xf32> to vector<16x256xf32>
    %15 = arith.addf %10, %14 : vector<16x256xf32>
    %c0_14 = arith.constant 0 : index
    %c2 = arith.constant 2 : index
    %c0_15 = arith.constant 0 : index
    %c0_16 = arith.constant 0 : index
    %16 = vector.load %arg5[%c0_14, %c2, %c0_15, %c0_16] : memref<1x5x1024x256xbf16, #tpu.memory_space<vmem>>, vector<1x1x1024x256xbf16>
    %17 = vector.shape_cast %16 : vector<1x1x1024x256xbf16> to vector<1024x256xbf16>
    %cst_17 = arith.constant dense<0.000000e+00> : vector<32x256xf32>
    %18 = tpu.matmul %4, %17, %cst_17 {dimension_numbers = #tpu.dot_dimension_numbers<[1], [0], [0], [1], [0, 0, 1, 1], [], []>} : vector<32x1024xbf16>, vector<1024x256xbf16>, vector<32x256xf32> -> vector<32x256xf32>
    %19 = vector.extract_strided_slice %18 {offsets = [2, 0], sizes = [16, 256], strides = [1, 1]} : vector<32x256xf32> to vector<16x256xf32>
    %20 = arith.addf %15, %19 : vector<16x256xf32>
    %c0_18 = arith.constant 0 : index
    %c3 = arith.constant 3 : index
    %c0_19 = arith.constant 0 : index
    %c0_20 = arith.constant 0 : index
    %21 = vector.load %arg5[%c0_18, %c3, %c0_19, %c0_20] : memref<1x5x1024x256xbf16, #tpu.memory_space<vmem>>, vector<1x1x1024x256xbf16>
    %22 = vector.shape_cast %21 : vector<1x1x1024x256xbf16> to vector<1024x256xbf16>
    %cst_21 = arith.constant dense<0.000000e+00> : vector<32x256xf32>
    %23 = tpu.matmul %4, %22, %cst_21 {dimension_numbers = #tpu.dot_dimension_numbers<[1], [0], [0], [1], [0, 0, 1, 1], [], []>} : vector<32x1024xbf16>, vector<1024x256xbf16>, vector<32x256xf32> -> vector<32x256xf32>
    %24 = vector.extract_strided_slice %23 {offsets = [3, 0], sizes = [16, 256], strides = [1, 1]} : vector<32x256xf32> to vector<16x256xf32>
    %25 = arith.addf %20, %24 : vector<16x256xf32>
    %c0_22 = arith.constant 0 : index
    %c4 = arith.constant 4 : index
    %c0_23 = arith.constant 0 : index
    %c0_24 = arith.constant 0 : index
    %26 = vector.load %arg5[%c0_22, %c4, %c0_23, %c0_24] : memref<1x5x1024x256xbf16, #tpu.memory_space<vmem>>, vector<1x1x1024x256xbf16>
    %27 = vector.shape_cast %26 : vector<1x1x1024x256xbf16> to vector<1024x256xbf16>
    %cst_25 = arith.constant dense<0.000000e+00> : vector<32x256xf32>
    %28 = tpu.matmul %4, %27, %cst_25 {dimension_numbers = #tpu.dot_dimension_numbers<[1], [0], [0], [1], [0, 0, 1, 1], [], []>} : vector<32x1024xbf16>, vector<1024x256xbf16>, vector<32x256xf32> -> vector<32x256xf32>
    %29 = vector.extract_strided_slice %28 {offsets = [4, 0], sizes = [16, 256], strides = [1, 1]} : vector<32x256xf32> to vector<16x256xf32>
    %30 = arith.addf %25, %29 : vector<16x256xf32>
    %c0_26 = arith.constant 0 : index
    %c0_27 = arith.constant 0 : index
    %c0_28 = arith.constant 0 : index
    %31 = vector.load %arg6[%c0_26, %c0_27, %c0_28] : memref<1x1x256xf32, #tpu.memory_space<vmem>>, vector<1x1x256xf32>
    %32 = vector.shape_cast %31 : vector<1x1x256xf32> to vector<1x256xf32>
    %33 = vector.broadcast %32 : vector<1x256xf32> to vector<16x256xf32>
    %34 = arith.addf %30, %33 : vector<16x256xf32>
    %cst_29 = arith.constant 0.000000e+00 : f32
    %35 = vector.broadcast %cst_29 : f32 to vector<16x256xf32>
    %36 = arith.cmpf oge, %34, %35 : vector<16x256xf32>
    %cst_30 = arith.constant 1.000000e-01 : f32
    %37 = vector.broadcast %cst_30 : f32 to vector<16x256xf32>
    %38 = arith.mulf %37, %34 : vector<16x256xf32>
    %39 = arith.select %36, %34, %38 : vector<16x256xi1>, vector<16x256xf32>
    %c0_31 = arith.constant 0 : index
    %c0_32 = arith.constant 0 : index
    %c0_33 = arith.constant 0 : index
    %40 = vector.load %arg7[%c0_31, %c0_32, %c0_33] : memref<1x16x256xf32, #tpu.memory_space<vmem>>, vector<1x16x256xf32>
    %41 = vector.shape_cast %40 : vector<1x16x256xf32> to vector<16x256xf32>
    %42 = vector.shape_cast %39 : vector<16x256xf32> to vector<1x16x256xf32>
    tpu.vector_store %arg7[%c0_31, %c0_32, %c0_33], %42 {strides = array<i32>} : memref<1x16x256xf32, #tpu.memory_space<vmem>>, vector<1x16x256xf32>,
    return
  }
  func.func @transform_0(%arg0: i32, %arg1: i32, %arg2: i32) -> (i32, i32, i32) {
    %c0_i32 = arith.constant 0 : i32
    %0 = arith.muli %arg1, %c0_i32 : i32
    %c0_i32_0 = arith.constant 0 : i32
    return %arg0, %arg2, %0 : i32, i32, i32
  }
  func.func @transform_1(%arg0: i32, %arg1: i32, %arg2: i32) -> (i32, i32, i32) {
    %c1_i32 = arith.constant 1 : i32
    %0 = arith.addi %arg2, %c1_i32 : i32
    %c1_i32_0 = arith.constant 1 : i32
    %1 = arith.muli %0, %c1_i32_0 : i32
    %c0_i32 = arith.constant 0 : i32
    %2 = arith.muli %arg1, %c0_i32 : i32
    %c0_i32_1 = arith.constant 0 : i32
    return %arg0, %1, %2 : i32, i32, i32
  }
  func.func @transform_2(%arg0: i32, %arg1: i32, %arg2: i32) -> (i32, i32, i32, i32) {
    %c0_i32 = arith.constant 0 : i32
    %c0_i32_0 = arith.constant 0 : i32
    %c0_i32_1 = arith.constant 0 : i32
    %c0_i32_2 = arith.constant 0 : i32
    return %arg1, %c0_i32, %c0_i32_0, %c0_i32_1 : i32, i32, i32, i32
  }
  func.func @transform_3(%arg0: i32, %arg1: i32, %arg2: i32) -> (i32, i32, i32) {
    %c0_i32 = arith.constant 0 : i32
    %c0_i32_0 = arith.constant 0 : i32
    %c0_i32_1 = arith.constant 0 : i32
    return %arg1, %c0_i32, %c0_i32_0 : i32, i32, i32
  }
  func.func @transform_4(%arg0: i32, %arg1: i32, %arg2: i32) -> (i32, i32, i32) {
    %c0_i32 = arith.constant 0 : i32
    return %arg0, %arg2, %arg1 : i32, i32, i32
  }
}

module attributes {stable_mosaic.version = 11 : i64} {
  func.func @_conv_tile_kernel(%arg0: i32, %arg1: i32, %arg2: i32, %arg3: memref<1x16x1024xbf16, #tpu.memory_space<vmem>>, %arg4: memref<1x16x1024xbf16, #tpu.memory_space<vmem>>, %arg5: memref<1x3x1x1024xbf16, #tpu.memory_space<vmem>>, %arg6: memref<1x1x1xf32, #tpu.memory_space<vmem>>, %arg7: memref<1x16x1xf32, #tpu.memory_space<vmem>>) attributes {dimension_semantics = [#tpu.dimension_semantics<parallel>, #tpu.dimension_semantics<parallel>, #tpu.dimension_semantics<parallel>], iteration_bounds = array<i64: 2, 1, 1>, scalar_prefetch = 0 : i64, scratch_operands = 0 : i64, tpu.core_type = #tpu.core_type<tc>, window_params = [{transform_indices = @transform_0, window_bounds = array<i64: 1, 16, 1024>}, {transform_indices = @transform_1, window_bounds = array<i64: 1, 16, 1024>}, {transform_indices = @transform_2, window_bounds = array<i64: 1, 3, 1, 1024>}, {transform_indices = @transform_3, window_bounds = array<i64: 1, 1, 1>}, {transform_indices = @transform_4, window_bounds = array<i64: 1, 16, 1>}]} {
    %c0 = arith.constant 0 : index
    %c0_0 = arith.constant 0 : index
    %c0_1 = arith.constant 0 : index
    %0 = vector.load %arg3[%c0, %c0_0, %c0_1] : memref<1x16x1024xbf16, #tpu.memory_space<vmem>>, vector<1x16x1024xbf16>
    %1 = vector.shape_cast %0 : vector<1x16x1024xbf16> to vector<16x1024xbf16>
    %c0_2 = arith.constant 0 : index
    %c0_3 = arith.constant 0 : index
    %c0_4 = arith.constant 0 : index
    %2 = vector.load %arg4[%c0_2, %c0_3, %c0_4] : memref<1x16x1024xbf16, #tpu.memory_space<vmem>>, vector<1x16x1024xbf16>
    %3 = vector.shape_cast %2 : vector<1x16x1024xbf16> to vector<16x1024xbf16>
    %4 = tpu.concatenate %1, %3 in 0 : vector<16x1024xbf16>, vector<16x1024xbf16> -> vector<32x1024xbf16>
    %5 = arith.extf %4 : vector<32x1024xbf16> to vector<32x1024xf32>
    %cst = arith.constant 0.000000e+00 : f32
    %6 = vector.broadcast %cst : f32 to vector<16x1xf32>
    %c0_5 = arith.constant 0 : index
    %c0_6 = arith.constant 0 : index
    %c0_7 = arith.constant 0 : index
    %c0_8 = arith.constant 0 : index
    %7 = vector.load %arg5[%c0_5, %c0_6, %c0_7, %c0_8] : memref<1x3x1x1024xbf16, #tpu.memory_space<vmem>>, vector<1x1x1x1024xbf16>
    %8 = vector.shape_cast %7 : vector<1x1x1x1024xbf16> to vector<1x1024xbf16>
    %9 = arith.extf %8 : vector<1x1024xbf16> to vector<1x1024xf32>
    %10 = vector.broadcast %9 : vector<1x1024xf32> to vector<32x1024xf32>
    %11 = arith.mulf %5, %10 : vector<32x1024xf32>
    %cst_9 = arith.constant dense<0.000000e+00> : vector<32xf32>
    %12 = vector.multi_reduction <add>, %11, %cst_9 [1] : vector<32x1024xf32> to vector<32xf32>
    %13 = vector.shape_cast %12 : vector<32xf32> to vector<32x1xf32>
    %14 = vector.extract_strided_slice %13 {offsets = [0, 0], sizes = [16, 1], strides = [1, 1]} : vector<32x1xf32> to vector<16x1xf32>
    %15 = arith.addf %6, %14 : vector<16x1xf32>
    %c0_10 = arith.constant 0 : index
    %c1 = arith.constant 1 : index
    %c0_11 = arith.constant 0 : index
    %c0_12 = arith.constant 0 : index
    %16 = vector.load %arg5[%c0_10, %c1, %c0_11, %c0_12] : memref<1x3x1x1024xbf16, #tpu.memory_space<vmem>>, vector<1x1x1x1024xbf16>
    %17 = vector.shape_cast %16 : vector<1x1x1x1024xbf16> to vector<1x1024xbf16>
    %18 = arith.extf %17 : vector<1x1024xbf16> to vector<1x1024xf32>
    %19 = vector.broadcast %18 : vector<1x1024xf32> to vector<32x1024xf32>
    %20 = arith.mulf %5, %19 : vector<32x1024xf32>
    %cst_13 = arith.constant dense<0.000000e+00> : vector<32xf32>
    %21 = vector.multi_reduction <add>, %20, %cst_13 [1] : vector<32x1024xf32> to vector<32xf32>
    %22 = vector.shape_cast %21 : vector<32xf32> to vector<32x1xf32>
    %23 = vector.extract_strided_slice %22 {offsets = [1, 0], sizes = [16, 1], strides = [1, 1]} : vector<32x1xf32> to vector<16x1xf32>
    %24 = arith.addf %15, %23 : vector<16x1xf32>
    %c0_14 = arith.constant 0 : index
    %c2 = arith.constant 2 : index
    %c0_15 = arith.constant 0 : index
    %c0_16 = arith.constant 0 : index
    %25 = vector.load %arg5[%c0_14, %c2, %c0_15, %c0_16] : memref<1x3x1x1024xbf16, #tpu.memory_space<vmem>>, vector<1x1x1x1024xbf16>
    %26 = vector.shape_cast %25 : vector<1x1x1x1024xbf16> to vector<1x1024xbf16>
    %27 = arith.extf %26 : vector<1x1024xbf16> to vector<1x1024xf32>
    %28 = vector.broadcast %27 : vector<1x1024xf32> to vector<32x1024xf32>
    %29 = arith.mulf %5, %28 : vector<32x1024xf32>
    %cst_17 = arith.constant dense<0.000000e+00> : vector<32xf32>
    %30 = vector.multi_reduction <add>, %29, %cst_17 [1] : vector<32x1024xf32> to vector<32xf32>
    %31 = vector.shape_cast %30 : vector<32xf32> to vector<32x1xf32>
    %32 = vector.extract_strided_slice %31 {offsets = [2, 0], sizes = [16, 1], strides = [1, 1]} : vector<32x1xf32> to vector<16x1xf32>
    %33 = arith.addf %24, %32 : vector<16x1xf32>
    %c0_18 = arith.constant 0 : index
    %c0_19 = arith.constant 0 : index
    %c0_20 = arith.constant 0 : index
    %34 = vector.load %arg6[%c0_18, %c0_19, %c0_20] : memref<1x1x1xf32, #tpu.memory_space<vmem>>, vector<1x1x1xf32>
    %35 = vector.shape_cast %34 : vector<1x1x1xf32> to vector<1x1xf32>
    %36 = vector.broadcast %35 : vector<1x1xf32> to vector<16x1xf32>
    %37 = arith.addf %33, %36 : vector<16x1xf32>
    %c0_21 = arith.constant 0 : index
    %c0_22 = arith.constant 0 : index
    %c0_23 = arith.constant 0 : index
    %38 = vector.load %arg7[%c0_21, %c0_22, %c0_23] : memref<1x16x1xf32, #tpu.memory_space<vmem>>, vector<1x16x1xf32>
    %39 = vector.shape_cast %38 : vector<1x16x1xf32> to vector<16x1xf32>
    %40 = vector.shape_cast %37 : vector<16x1xf32> to vector<1x16x1xf32>
    tpu.vector_store %arg7[%c0_21, %c0_22, %c0_23], %40 {strides = array<i32>} : memref<1x16x1xf32, #tpu.memory_space<vmem>>, vector<1x16x1xf32>,
    return
  }
  func.func @transform_0(%arg0: i32, %arg1: i32, %arg2: i32) -> (i32, i32, i32) {
    %c0_i32 = arith.constant 0 : i32
    %0 = arith.muli %arg1, %c0_i32 : i32
    %c0_i32_0 = arith.constant 0 : i32
    return %arg0, %arg2, %0 : i32, i32, i32
  }
  func.func @transform_1(%arg0: i32, %arg1: i32, %arg2: i32) -> (i32, i32, i32) {
    %c1_i32 = arith.constant 1 : i32
    %0 = arith.addi %arg2, %c1_i32 : i32
    %c1_i32_0 = arith.constant 1 : i32
    %1 = arith.muli %0, %c1_i32_0 : i32
    %c0_i32 = arith.constant 0 : i32
    %2 = arith.muli %arg1, %c0_i32 : i32
    %c0_i32_1 = arith.constant 0 : i32
    return %arg0, %1, %2 : i32, i32, i32
  }
  func.func @transform_2(%arg0: i32, %arg1: i32, %arg2: i32) -> (i32, i32, i32, i32) {
    %c0_i32 = arith.constant 0 : i32
    %c0_i32_0 = arith.constant 0 : i32
    %c0_i32_1 = arith.constant 0 : i32
    %c0_i32_2 = arith.constant 0 : i32
    return %arg1, %c0_i32, %c0_i32_0, %c0_i32_1 : i32, i32, i32, i32
  }
  func.func @transform_3(%arg0: i32, %arg1: i32, %arg2: i32) -> (i32, i32, i32) {
    %c0_i32 = arith.constant 0 : i32
    %c0_i32_0 = arith.constant 0 : i32
    %c0_i32_1 = arith.constant 0 : i32
    return %arg1, %c0_i32, %c0_i32_0 : i32, i32, i32
  }
  func.func @transform_4(%arg0: i32, %arg1: i32, %arg2: i32) -> (i32, i32, i32) {
    %c0_i32 = arith.constant 0 : i32
    return %arg0, %arg2, %arg1 : i32, i32, i32
  }
}

</mosaic_0001>

<bundles_post_ra>
// kernel: scale_discriminator_forward.7
= control target key start
LH: loop header
LB: loop body
LE: loop exit
PB: predicated region body
PF: predicated region fallthrough
CT: control target
= control target key end

     0   :  { %9 = vsyncpa [#allocation3], 0  ;;  %s995_s0 = inlined_call_operand.vmem [shape: bf16[2,48,22], index: 0, kind: input, shape index: {}, may-alias: {0,1}]   ;;  %s996_s1 = inlined_call_operand.vmem [shape: bf16[2,48,22], index: 1, kind: input, shape index: {}, may-alias: {0,1}]   ;;  %s997_s2 = inlined_call_operand.hbm [shape: bf16[1,1,22,128], index: 2, kind: input, shape index: {}]   ;;  %s998_s3 = inlined_call_operand.hbm [shape: f32[1,1,128], index: 3, kind: input, shape index: {}]   ;;  %s999_s4 = inlined_call_operand.vmem [shape: f32[2,32,128], index: 4, kind: output, shape index: {}]  }
   0x1   :  { %10 = vsyncpa [#allocation5], 0  ;;  %s871_s15 = smov 0   ;;  %s873_s16 = smov 0  }
   0x2   :  { %s875_s17 = smov 0  }
   0x3 LB: > { %s643_s18 = sadd.s32 4294967295, %s838_s17   ;;  %s35_s19 = sadd.s32 1, %s834_s16  ;;  %s838_s17 = sphi %s875_s17, %s16_s17   ;;  %s834_s16 = sphi %s873_s16, %s1009_s16   ;;  %s830_s15 = sphi %s871_s15, %s1008_s15  }
   0x4   : > { %p37_p0 = scmp.ge.s32.totalorder %s35_s19, 2  ;;  %p645_p1 = scmp.ge.s32.totalorder %s838_s17, 1 }
   0x5   : > { %p182_p2 = scmp.lt.s32.totalorder %s838_s17, 3  ;;  %p896_p4 = scmp.eq.s32.totalorder %s643_s18, 0 }
   0x6   : > { %s1011_s19 = smov (%p37_p0, %s35_s19), 0  ;;  %s840_s22 = smov [#allocation2]  }
   0x7   : > { %p892_p3 = pnand %p645_p1, %p182_p2  ;;  %s197_s23 = sshll.u32 %s840_s22, 4  ;;  %s198_s23 = int_to_ptr.vmem [resolvable:$true] %s197_s23 }
   0x8   : > { %s1004_s21 = scalar_select %p896_p4, 1, 0 }
   0x9   : > { %s1003_s20 = scalar_select %p892_p3, 1, 0 }
   0xa   : > { %p705_p5 = pneg %p892_p3  ;;  %s841_s25 = smov [#allocation4]  }
   0xb   : > { %s213_s26 = sshll.u32 %s841_s25, 4  ;;  %s752_s29 = scalar_lea.hbm %s997_s2, 192  ;;  %s908_s26 = int_to_ptr.vmem [resolvable:$true] %s213_s26 }
   0xc   : > { %p904_p6 = pnand %p896_p4, %p705_p5  ;;  %p753_p7 = scmp.ne.s32.totalorder %s997_s2, %s752_s29 }
   0xd   : > { %p759_p11 = scmp.lt.u32.totalorder %s752_s29, %s997_s2 }
   0xe   : > { %p754_p8 = pneg %p904_p6 }
  0x10   : > { %p755_p9 = pnand %p754_p8, %p753_p7 }
  0x12   : > { %p756_p10 = pneg %p755_p9 }
  0x14   : > { %p761_p12 = pnand %p759_p11, %p756_p10 }
  0x16   : > { %764 = shalt.err (!%p761_p12)
}
  0x17   : > { %s765_s8 = scalar_lea.vmem %s198_s23, 192  ;;  %p773_p2 = scmp.lt.s32.totalorder %s198_s23, %s198_s23 }
  0x18   : > { %p766_p13 = scmp.ne.s32.totalorder %s198_s23, %s765_s8  ;;  %p774_p5 = scmp.lt.s32.totalorder %s765_s8, %s765_s8 }
  0x1a   : > { %p768_p0 = pnand %p766_p13, %p754_p8  ;;  %p775_p4 = por %p774_p5, %p773_p2 }
  0x1c   : > { %p769_p1 = pneg %p768_p0 }
  0x1e   : > { %p776_p3 = pnand %p775_p4, %p769_p1 }
  0x20   : > { %779 = shalt.err (!%p776_p3)
}
  0x21   : > { %s842_s9 = smov 64   ;;  %s843_s10 = smov 4  }
  0x22   : > { %708 = dma.hbm_to_vmem [thread:$0]  (!%p904_p6), %s997_s2, 192, %s198_s23, [#allocation3], %s842_s9, %s842_s9, %s843_s10  }
  0x23   : > { %s780_s18 = scalar_lea.hbm %s998_s3, 16 }
  0x24   : > { %p781_p7 = scmp.ne.s32.totalorder %s998_s3, %s780_s18  ;;  %p787_p9 = scmp.lt.u32.totalorder %s780_s18, %s998_s3 }
  0x26   : > { %p783_p3 = pnand %p781_p7, %p754_p8 }
  0x28   : > { %p784_p4 = pneg %p783_p3 }
  0x2a   : > { %p789_p10 = pnand %p787_p9, %p784_p4 }
  0x2c   : > { %792 = shalt.err (!%p789_p10)
}
  0x2d   : > { %s793_s23 = scalar_lea.vmem %s908_s26, 16  ;;  %s800_s29 = scalar_lea.vmem %s908_s26, 32 }
  0x2e   : > { %p794_p11 = scmp.ne.s32.totalorder %s908_s26, %s793_s23  ;;  %p801_p0 = scmp.lt.s32.totalorder %s908_s26, %s908_s26 }
  0x2f   : > { %p802_p1 = scmp.lt.s32.totalorder %s800_s29, %s793_s23 }
  0x30   : > { %p796_p12 = pnand %p794_p11, %p754_p8 }
  0x31   : > { %p803_p2 = por %p802_p1, %p801_p0 }
  0x32   : > { %p797_p13 = pneg %p796_p12 }
  0x34   : > { %p804_p5 = pnand %p803_p2, %p797_p13 }
  0x36   : > { %807 = shalt.err (!%p804_p5)
}
  0x37   : > { %711 = dma.hbm_to_vmem [thread:$0]  (!%p904_p6), %s998_s3, 16, %s908_s26, [#allocation5]  }
  0x38   : > { %p1006_p7 = scmp.ne.s32.totalorder %s1003_s20, 0 }
  0x39   : > { %p1007_p8 = scmp.ne.s32.totalorder (!%p1006_p7), %s1004_s21, 0 }
  0x3a   : > { %264 = sbr.rel (%p1006_p7) target bundleno = 301 (0x12d), region = 36 }
  0x41   : > { %821 = dma.done.wait (%p1007_p8), [#allocation3], 192  }
  0x42   : > { %823 = vsyncadd (%p1007_p8), [#allocation3], 4294967104 }
  0x43   : > { %825 = dma.done.wait (%p1007_p8), [#allocation5], 16  }
  0x44   : > { %827 = vsyncadd (%p1007_p8), [#allocation5], 4294967280  ;;  %p325_p3 = scmp.lt.s32.totalorder %s830_s15, 1  ;;  %v844_v0 = vmov 0.0   ;;  %vm845_vm0 = vmmov 0   ;;  %v747_v1 = vld [vmem:[#allocation2] sm:$0xff]  }
  0x45   : > { %675 = vmatprep.subr.bf16.mxu0 %v844_v0  ;;  %691 = vmatprep.subr.bf16.mxu1 %v844_v0  ;;  %vm409_vm1 = vcmask 1042432   ;;  %v748_v2 = vld [vmem:[#allocation2 + $0x8] ss:$0 sps:$4 sm:$0x77]   ;;  %vm399_vm2 = vcmask 179200  }
  0x46   : > { %679 = vmatprep.mubr.msk.bf16.mxu0 %vm845_vm0, %v844_v0  ;;  %683 = vmatprep.mubr.msk.bf16.mxu1 %vm845_vm0, %v844_v0  ;;  %s1013_s15 = smov (!%p325_p3, %s830_s15), 1  ;;  %v411_v3 = vsel %vm409_vm1, %v748_v2, 0  ;;  %v664_v7 = vld [vmem:[#allocation4] ss:$0 sm:$0xff] }
  0x47   : > { %s695_s20 = smul.u32 24, %s1013_s15  ;;  %676 = vmatpush3.bf16.msra.mxu0 %v747_v1  ;;  %693 = vmatpush3.bf16.msra.mxu1 %v747_v1  ;;  %s669_s10 = sshll.u32 %s1013_s15, 5 }
  0x48   : > { %677 = vmatprep.subr.bf16.mxu0 %v844_v0  ;;  %692 = vmatprep.subr.bf16.mxu1 %v844_v0  ;;  %s363_s13 = scalar_lea.vmem %s999_s4, %s669_s10 }
  0x49   : > { %s668_s24 = sadd.s32 16, %s695_s20  ;;  %s332_s6 = scalar_lea.vmem %s995_s0, %s695_s20 }
  0x4a   : > { %s348_s9 = scalar_lea.vmem %s996_s1, %s668_s24  ;;  %v749_v4 = vld [vmem:[%s332_s6] sm:$0xff]   ;;  %v750_v5 = vld [vmem:[%s332_s6 + $0x8] sm:$0xff]  }
  0x4b   : > { %678 = vmatpush3.bf16.msra.mxu0 %v411_v3  ;;  %694 = vmatpush3.bf16.msra.mxu1 %v411_v3  ;;  %v751_v6 = vld [vmem:[%s348_s9] sm:$0xff]  }
  0x4e   : > { %680 = vmatmul.mubr.msk.bf16.vlgmr.msra.gmra.mrb[0].mxu0 %vm399_vm2, %v749_v4  ;;  %684 = vmatmul.mubr.msk.bf16.vlgmr.msra.gmra.mrb[0].mxu1 %vm399_vm2, %v750_v5 }
  0x4f   : > { %687 = vmatprep.mubr.msk.bf16.mxu1 %vm845_vm0, %v844_v0 }
  0x56   : > { %688 = vmatmul.mubr.msk.bf16.gmra.mrb[4].mxu1 %vm399_vm2, %v751_v6 }
 0x121   : > { %v447_v8 = vpop.f32.mrb[0].mxu0  ;;  %v455_v9 = vpop.f32.mrb[0].mxu1 }
 0x122   : > { %v479_v10 = vadd.f32 %v664_v7, %v447_v8  ;;  %v481_v11 = vadd.f32 %v664_v7, %v455_v9  ;;  %v681_v12 = vpop.f32.mrb[1].mxu0  ;;  %v685_v13 = vpop.f32.mrb[1].mxu1 }
 0x123   : > { %v450_v14 = vpop.f32.mrb[2].mxu0  ;;  %v458_v15 = vpop.f32.mrb[2].mxu1 }
 0x124   : > { %vm483_vm3 = vcmp.ge.f32.partialorder %v479_v10, 0.0  ;;  %v487_v16 = vmul.f32 0.1, %v479_v10  ;;  %vm485_vm4 = vcmp.ge.f32.partialorder %v481_v11, 0.0  ;;  %v489_v17 = vmul.f32 0.1, %v481_v11 }
 0x125   : > { %v480_v18 = vadd.f32 %v664_v7, %v450_v14  ;;  %v482_v19 = vadd.f32 %v664_v7, %v458_v15  ;;  %v682_v20 = vpop.f32.mrb[3].mxu0  ;;  %v686_v21 = vpop.f32.mrb[3].mxu1 }
 0x126   : > { %v491_v22 = vsel %vm483_vm3, %v479_v10, %v487_v16  ;;  %v493_v23 = vsel %vm485_vm4, %v481_v11, %v489_v17 }
 0x127   : > { %495 = vst [vmem:[%s363_s13] sm:$0xff] %v491_v22  ;;  %497 = vst [vmem:[%s363_s13 + $0x10] sm:$0xff] %v493_v23  ;;  %vm484_vm5 = vcmp.ge.f32.partialorder %v480_v18, 0.0  ;;  %v488_v24 = vmul.f32 0.1, %v480_v18  ;;  %vm486_vm6 = vcmp.ge.f32.partialorder %v482_v19, 0.0 }
 0x128   : > { %v490_v25 = vmul.f32 0.1, %v482_v19 }
 0x129   : > { %v492_v26 = vsel %vm484_vm5, %v480_v18, %v488_v24  ;;  %v463_v28 = vpop.f32.mrb[4].mxu1 }
 0x12a   : > { %v494_v27 = vsel %vm486_vm6, %v482_v19, %v490_v25  ;;  %496 = vst [vmem:[%s363_s13 + $0x8] sm:$0xff] %v492_v26  ;;  %v689_v29 = vpop.f32.mrb[5].mxu1 }
 0x12b   : > { %498 = vst [vmem:[%s363_s13 + $0x18] sm:$0xff] %v494_v27  ;;  %v465_v30 = vpop.f32.mrb[6].mxu1 }
 0x12c   : > { %v690_v31 = vpop.f32.mrb[7].mxu1 }
 0x12d PF: > { %s16_s17 = sadd.s32 1, %s838_s17   ;;  %s1008_s15 = smov %s834_s16 }
 0x12e   : > { %p13_p6 = scmp.ge.s32.totalorder %s16_s17, 4   ;;  %s1009_s16 = smov %s1011_s19 }
 0x130   :  { %15 = sbr.rel (!%p13_p6) target bundleno = 3 (0x3), region = 80 }
 0x137   :  { %535 = vsyncpa [#allocation3], 1 }
 0x138   :  { %537 = vsyncpa [#allocation3 + $0x1], 1 }
 0x139   :  { %538 = vsyncpa [#allocation5], 1 }

// kernel: scale_discriminator_forward.8
= control target key start
LH: loop header
LB: loop body
LE: loop exit
PB: predicated region body
PF: predicated region fallthrough
CT: control target
= control target key end

     0   :  { %9 = vsyncpa [#allocation3], 0  ;;  %s3543_s0 = inlined_call_operand.vmem [shape: bf16[2,80,64], index: 0, kind: input, shape index: {}, may-alias: {0,1}]   ;;  %s3544_s1 = inlined_call_operand.vmem [shape: bf16[2,80,64], index: 1, kind: input, shape index: {}, may-alias: {0,1}]   ;;  %s3545_s2 = inlined_call_operand.hbm [shape: bf16[1,11,64,64], index: 2, kind: input, shape index: {}]   ;;  %s3546_s3 = inlined_call_operand.hbm [shape: f32[1,1,64], index: 3, kind: input, shape index: {}]   ;;  %s3547_s4 = inlined_call_operand.vmem [shape: f32[2,64,64], index: 4, kind: output, shape index: {}]  }
   0x1   :  { %10 = vsyncpa [#allocation5], 0  ;;  %s2919_s15 = smov 0   ;;  %s2921_s16 = smov 0  }
   0x2   :  { %s2923_s17 = smov 0  }
   0x3 LB: > { %s2161_s18 = sadd.s32 4294967295, %s2886_s17   ;;  %s35_s19 = sadd.s32 1, %s2882_s16  ;;  %s2886_s17 = sphi %s2923_s17, %s16_s17   ;;  %s2882_s16 = sphi %s2921_s16, %s3557_s16   ;;  %s2878_s15 = sphi %s2919_s15, %s3556_s15  }
   0x4   : > { %p37_p0 = scmp.ge.s32.totalorder %s35_s19, 2  ;;  %p2163_p1 = scmp.ge.s32.totalorder %s2886_s17, 1 }
   0x5   : > { %p182_p2 = scmp.lt.s32.totalorder %s2886_s17, 3  ;;  %p2944_p4 = scmp.eq.s32.totalorder %s2161_s18, 0 }
   0x6   : > { %s3559_s19 = smov (%p37_p0, %s35_s19), 0  ;;  %s2888_s22 = smov [#allocation2]  }
   0x7   : > { %p2940_p3 = pnand %p2163_p1, %p182_p2  ;;  %s197_s23 = sshll.u32 %s2888_s22, 4  ;;  %s198_s23 = int_to_ptr.vmem [resolvable:$true] %s197_s23 }
   0x8   : > { %s3552_s21 = scalar_select %p2944_p4, 1, 0 }
   0x9   : > { %s3551_s20 = scalar_select %p2940_p3, 1, 0 }
   0xa   : > { %p2709_p5 = pneg %p2940_p3  ;;  %s2889_s25 = smov [#allocation4]  }
   0xb   : > { %s213_s26 = sshll.u32 %s2889_s25, 4  ;;  %s2800_s29 = scalar_lea.hbm %s3545_s2, 5632  ;;  %s2956_s26 = int_to_ptr.vmem [resolvable:$true] %s213_s26 }
   0xc   : > { %p2952_p6 = pnand %p2944_p4, %p2709_p5  ;;  %p2801_p7 = scmp.ne.s32.totalorder %s3545_s2, %s2800_s29 }
   0xd   : > { %p2807_p11 = scmp.lt.u32.totalorder %s2800_s29, %s3545_s2 }
   0xe   : > { %p2802_p8 = pneg %p2952_p6 }
  0x10   : > { %p2803_p9 = pnand %p2802_p8, %p2801_p7 }
  0x12   : > { %p2804_p10 = pneg %p2803_p9 }
  0x14   : > { %p2809_p12 = pnand %p2807_p11, %p2804_p10 }
  0x16   : > { %2812 = shalt.err (!%p2809_p12)
}
  0x17   : > { %s2813_s8 = scalar_lea.vmem %s198_s23, 5632  ;;  %p2821_p2 = scmp.lt.s32.totalorder %s198_s23, %s198_s23 }
  0x18   : > { %p2814_p13 = scmp.ne.s32.totalorder %s198_s23, %s2813_s8  ;;  %p2822_p5 = scmp.lt.s32.totalorder %s2813_s8, %s2813_s8 }
  0x1a   : > { %p2816_p0 = pnand %p2814_p13, %p2802_p8  ;;  %p2823_p4 = por %p2822_p5, %p2821_p2 }
  0x1c   : > { %p2817_p1 = pneg %p2816_p0 }
  0x1e   : > { %p2824_p3 = pnand %p2823_p4, %p2817_p1 }
  0x20   : > { %2827 = shalt.err (!%p2824_p3)
}
  0x21   : > { %s2890_s9 = smov 64   ;;  %s2891_s10 = smov 4  }
  0x22   : > { %2712 = dma.hbm_to_vmem [thread:$0]  (!%p2952_p6), %s3545_s2, 5632, %s198_s23, [#allocation3], %s2890_s9, %s2890_s9, %s2891_s10  }
  0x23   : > { %s2828_s18 = scalar_lea.hbm %s3546_s3, 16 }
  0x24   : > { %p2829_p7 = scmp.ne.s32.totalorder %s3546_s3, %s2828_s18  ;;  %p2835_p9 = scmp.lt.u32.totalorder %s2828_s18, %s3546_s3 }
  0x26   : > { %p2831_p3 = pnand %p2829_p7, %p2802_p8 }
  0x28   : > { %p2832_p4 = pneg %p2831_p3 }
  0x2a   : > { %p2837_p10 = pnand %p2835_p9, %p2832_p4 }
  0x2c   : > { %2840 = shalt.err (!%p2837_p10)
}
  0x2d   : > { %s2841_s23 = scalar_lea.vmem %s2956_s26, 16  ;;  %s2848_s29 = scalar_lea.vmem %s2956_s26, 32 }
  0x2e   : > { %p2842_p11 = scmp.ne.s32.totalorder %s2956_s26, %s2841_s23  ;;  %p2849_p0 = scmp.lt.s32.totalorder %s2956_s26, %s2956_s26 }
  0x2f   : > { %p2850_p1 = scmp.lt.s32.totalorder %s2848_s29, %s2841_s23 }
  0x30   : > { %p2844_p12 = pnand %p2842_p11, %p2802_p8 }
  0x31   : > { %p2851_p2 = por %p2850_p1, %p2849_p0 }
  0x32   : > { %p2845_p13 = pneg %p2844_p12 }
  0x34   : > { %p2852_p5 = pnand %p2851_p2, %p2845_p13 }
  0x36   : > { %2855 = shalt.err (!%p2852_p5)
}
  0x37   : > { %2715 = dma.hbm_to_vmem [thread:$0]  (!%p2952_p6), %s3546_s3, 16, %s2956_s26, [#allocation5]  }
  0x38   : > { %p3554_p7 = scmp.ne.s32.totalorder %s3551_s20, 0 }
  0x39   : > { %p3555_p8 = scmp.ne.s32.totalorder (!%p3554_p7), %s3552_s21, 0 }
  0x3a   : > { %264 = sbr.rel (%p3554_p7) target bundleno = 529 (0x211), region = 36 }
  0x41   : > { %2869 = dma.done.wait (%p3555_p8), [#allocation3], 5632  }
  0x42   : > { %2871 = vsyncadd (%p3555_p8), [#allocation3], 4294961664 }
  0x43   : > { %2873 = dma.done.wait (%p3555_p8), [#allocation5], 16  }
  0x44   : > { %2875 = vsyncadd (%p3555_p8), [#allocation5], 4294967280  ;;  %p325_p3 = scmp.lt.s32.totalorder %s2878_s15, 1  ;;  %v2892_v0 = vmov 0.0   ;;  %vm2893_vm0 = vmmov 0   ;;  %v2751_v1 = vld [vmem:[#allocation2] sm:$0xff]  }
  0x45   : > { %2691 = vmatprep.subr.bf16.mxu1 %v2892_v0  ;;  %2383 = vmatprep.subr.bf16.mxu0 %v2892_v0  ;;  %v2752_v2 = vld [vmem:[#allocation2 + $0x8] sm:$0xff]   ;;  %v2753_v3 = vld [vmem:[#allocation2 + $0x10] sm:$0xff]   ;;  %v2754_v4 = vld [vmem:[#allocation2 + $0x18] sm:$0xff]   ;;  %vm433_vm1 = vcmask 523264   ;;  %vm790_vm2 = vcmask 1045504   ;;  %vm642_vm3 = vcmask 1046528  }
  0x46   : > { %2399 = vmatprep.mubr.msk.bf16.mxu1 %vm2893_vm0, %v2892_v0  ;;  %s3561_s15 = smov (!%p325_p3, %s2878_s15), 1  ;;  %2391 = vmatprep.mubr.msk.bf16.mxu0 %vm2893_vm0, %v2892_v0  ;;  %v2756_v6 = vld [vmem:[#allocation2 + $0x20] sm:$0xff]   ;;  %v2759_v9 = vld [vmem:[#allocation2 + $0x28] sm:$0xff]   ;;  %v2763_v13 = vld [vmem:[#allocation2 + $0x50] sm:$0xff]   ;;  %vm1086_vm4 = vcmask 1043456   ;;  %vm938_vm5 = vcmask 1044480  }
  0x47   : > { %s2699_s20 = smul.u32 40, %s3561_s15  ;;  %2695 = vmatpush3.bf16.msra.mxu1 %v2751_v1  ;;  %2384 = vmatpush3.bf16.msra.mxu0 %v2751_v1  ;;  %v2758_v8 = vld [vmem:[#allocation2 + $0x40] sm:$0xff]   ;;  %v2761_v10 = vld [vmem:[#allocation2 + $0x48] sm:$0xff]   ;;  %v2764_v14 = vld [vmem:[#allocation2 + $0x30] sm:$0xff]   ;;  %vm1382_vm6 = vcmask 1041408   ;;  %vm1234_vm7 = vcmask 1042432  }
  0x48   : > { %2692 = vmatprep.subr.bf16.mxu1 %v2892_v0  ;;  %2385 = vmatprep.subr.bf16.mxu0 %v2892_v0  ;;  %v2766_v15 = vld [vmem:[#allocation2 + $0x58] sm:$0xff]   ;;  %v2769_v18 = vld [vmem:[#allocation2 + $0x80] sm:$0xff]   ;;  %v2771_v19 = vld [vmem:[#allocation2 + $0x88] sm:$0xff]   ;;  %vm1530_vm8 = vcmask 1040384   ;;  %s2283_s12 = sshll.u32 %s3561_s15, 6 }
  0x49   : > { %s3032_s26 = scalar_lea.vmem %s3543_s0, %s2699_s20  ;;  %s3036_s6 = sadd.s32 32, %s2699_s20  ;;  %v2767_v16 = vld [vmem:[#allocation2 + $0x38] sm:$0xff]   ;;  %v2768_v20 = vld [vmem:[#allocation2 + $0x60] sm:$0xff]   ;;  %v2773_v21 = vld [vmem:[#allocation2 + $0x90] sm:$0xff]  }
  0x4a   : > { %v3041_v5 = vld [vmem:[%s3032_s26 + $0x10] sm:$0xff]   ;;  %v3044_v7 = vld [vmem:[%s3032_s26] sm:$0xff]   ;;  %s348_s9 = scalar_lea.vmem %s3544_s1, %s3036_s6  ;;  %v3060_v11 = vld [vmem:[%s3032_s26 + $0x18] sm:$0xff]   ;;  %s3493_s18 = scalar_lea.vmem %s3547_s4, %s2283_s12 }
  0x4b   : > { %2696 = vmatpush3.bf16.msra.mxu1 %v2752_v2  ;;  %2386 = vmatpush3.bf16.msra.mxu0 %v2752_v2  ;;  %v3066_v12 = vld [vmem:[%s3032_s26 + $0x8] sm:$0xff]   ;;  %v3085_v17 = vld [vmem:[%s348_s9] sm:$0xff]   ;;  %v2775_v23 = vld [vmem:[#allocation2 + $0x98] sm:$0xff]  }
  0x4c   : > { %2693 = vmatprep.subr.bf16.mxu1 %v2892_v0  ;;  %2387 = vmatprep.subr.bf16.mxu0 %v2892_v0  ;;  %v2770_v22 = vld [vmem:[#allocation2 + $0x68] sm:$0xff]   ;;  %v2772_v24 = vld [vmem:[#allocation2 + $0x70] sm:$0xff]   ;;  %v2774_v25 = vld [vmem:[#allocation2 + $0x78] sm:$0xff]  }
  0x4d   : > { %v2777_v26 = vld [vmem:[#allocation2 + $0xc0] sm:$0xff]   ;;  %v2779_v27 = vld [vmem:[#allocation2 + $0xc8] sm:$0xff]   ;;  %v2781_v29 = vld [vmem:[#allocation2 + $0xd0] sm:$0xff]  }
  0x4e   : > { %v2776_v28 = vld [vmem:[#allocation2 + $0xa0] sm:$0xff]   ;;  %v2778_v30 = vld [vmem:[#allocation2 + $0xa8] sm:$0xff]   ;;  %v2783_v31 = vld [vmem:[#allocation2 + $0xd8] sm:$0xff]  }
  0x4f   : > { %2697 = vmatpush3.bf16.msra.mxu1 %v2753_v3  ;;  %2388 = vmatpush3.bf16.msra.mxu0 %v2753_v3  ;;  %v2780_v32 = vld [vmem:[#allocation2 + $0xb0] sm:$0xff]   ;;  %v2782_v33 = vld [vmem:[#allocation2 + $0xb8] sm:$0xff]   ;;  %v2785_v34 = vld [vmem:[#allocation2 + $0x100] sm:$0xff]  }
  0x50   : > { %2694 = vmatprep.subr.bf16.mxu1 %v2892_v0  ;;  %2389 = vmatprep.subr.bf16.mxu0 %v2892_v0  ;;  %v2787_v35 = vld [vmem:[#allocation2 + $0x108] sm:$0xff]   ;;  %v2784_v36 = vld [vmem:[#allocation2 + $0xe0] sm:$0xff]   ;;  %v2789_v37 = vld [vmem:[#allocation2 + $0x110] sm:$0xff]  }
  0x51   : > { %v2786_v38 = vld [vmem:[#allocation2 + $0xe8] sm:$0xff]   ;;  %v2791_v39 = vld [vmem:[#allocation2 + $0x118] sm:$0xff]   ;;  %v2788_v40 = vld [vmem:[#allocation2 + $0xf0] sm:$0xff]  }
  0x52   : > { %v2790_v41 = vld [vmem:[#allocation2 + $0xf8] sm:$0xff]   ;;  %v2793_v42 = vld [vmem:[#allocation2 + $0x140] sm:$0xff]   ;;  %v2795_v43 = vld [vmem:[#allocation2 + $0x148] sm:$0xff]  }
  0x53   : > { %2698 = vmatpush3.bf16.msra.mxu1 %v2754_v4  ;;  %2390 = vmatpush3.bf16.msra.mxu0 %v2754_v4  ;;  %v2792_v44 = vld [vmem:[#allocation2 + $0x120] sm:$0xff]   ;;  %v2797_v45 = vld [vmem:[#allocation2 + $0x150] sm:$0xff]   ;;  %v2794_v46 = vld [vmem:[#allocation2 + $0x128] sm:$0xff]  }
  0x54   : > { %2411 = vmatprep.subr.bf16.mxu1 %v2892_v0  ;;  %2439 = vmatprep.subr.bf16.mxu0 %v2892_v0  ;;  %v2799_v47 = vld [vmem:[#allocation2 + $0x158] sm:$0xff]   ;;  %v2796_v48 = vld [vmem:[#allocation2 + $0x130] sm:$0xff]  }
  0x55   : > { %v2798_v49 = vld [vmem:[#allocation2 + $0x138] sm:$0xff]  }
  0x56   : > { %2400 = vmatmul.mubr.msk.bf16.vlgmr.msra.gmra.mrb[0].mxu1 %vm433_vm1, %v3041_v5  ;;  %2392 = vmatmul.mubr.msk.bf16.vlgmr.msra.gmra.mrb[0].mxu0 %vm433_vm1, %v3044_v7 }
  0x57   : > { %2412 = vmatpush3.bf16.msra.mxu1 %v2756_v6  ;;  %2440 = vmatpush3.bf16.msra.mxu0 %v2758_v8 }
  0x58   : > { %2413 = vmatprep.subr.bf16.mxu1 %v2892_v0  ;;  %2403 = vmatprep.mubr.msk.bf16.mxu1 %vm2893_vm0, %v2892_v0 }
  0x59   : > { %2441 = vmatprep.subr.bf16.mxu0 %v2892_v0  ;;  %2395 = vmatprep.mubr.msk.bf16.mxu0 %vm2893_vm0, %v2892_v0 }
  0x5b   : > { %2414 = vmatpush3.bf16.msra.mxu1 %v2759_v9  ;;  %2442 = vmatpush3.bf16.msra.mxu0 %v2761_v10 }
  0x5c   : > { %2443 = vmatprep.subr.bf16.mxu0 %v2892_v0  ;;  %2415 = vmatprep.subr.bf16.mxu1 %v2892_v0 }
  0x5e   : > { %2404 = vmatmul.mubr.msk.bf16.gmra.mrb[4].mxu1 %vm433_vm1, %v3060_v11  ;;  %2396 = vmatmul.mubr.msk.bf16.gmra.mrb[4].mxu0 %vm433_vm1, %v3066_v12 }
  0x5f   : > { %2444 = vmatpush3.bf16.msra.mxu0 %v2763_v13  ;;  %2416 = vmatpush3.bf16.msra.mxu1 %v2764_v14 }
  0x60   : > { %2407 = vmatprep.mubr.msk.bf16.mxu1 %vm2893_vm0, %v2892_v0  ;;  %2445 = vmatprep.subr.bf16.mxu0 %v2892_v0 }
  0x61   : > { %2417 = vmatprep.subr.bf16.mxu1 %v2892_v0  ;;  %2447 = vmatprep.mubr.msk.bf16.mxu0 %vm2893_vm0, %v2892_v0 }
  0x63   : > { %2446 = vmatpush3.bf16.msra.mxu0 %v2766_v15  ;;  %2418 = vmatpush3.bf16.msra.mxu1 %v2767_v16 }
  0x64   : > { %2467 = vmatprep.subr.bf16.mxu1 %v2892_v0  ;;  %2495 = vmatprep.subr.bf16.mxu0 %v2892_v0 }
  0x66   : > { %2408 = vmatmul.mubr.msk.bf16.gmra.mrb[8].mxu1 %vm433_vm1, %v3085_v17  ;;  %2448 = vmatmul.mubr.msk.bf16.vlgmr.msra.gmra.mrb[8].mxu0 %vm433_vm1, %v3044_v7 }
  0x67   : > { %2419 = vmatprep.mubr.msk.bf16.mxu1 %vm2893_vm0, %v2892_v0  ;;  %2451 = vmatprep.mubr.msk.bf16.mxu0 %vm2893_vm0, %v2892_v0 }
  0x68   : > { %2496 = vmatpush3.bf16.msra.mxu0 %v2769_v18 }
  0x69   : > { %2497 = vmatprep.subr.bf16.mxu0 %v2892_v0 }
  0x6c   : > { %2498 = vmatpush3.bf16.msra.mxu0 %v2771_v19 }
  0x6d   : > { %2499 = vmatprep.subr.bf16.mxu0 %v2892_v0 }
  0x6e   : > { %2420 = vmatmul.mubr.msk.bf16.vlgmr.msra.gmra.mrb[12].mxu1 %vm433_vm1, %v3044_v7  ;;  %2452 = vmatmul.mubr.msk.bf16.gmra.mrb[12].mxu0 %vm433_vm1, %v3066_v12 }
  0x6f   : > { %2468 = vmatpush3.bf16.msra.mxu1 %v2768_v20  ;;  %2423 = vmatprep.mubr.msk.bf16.mxu1 %vm2893_vm0, %v2892_v0 }
  0x70   : > { %2455 = vmatprep.mubr.msk.bf16.mxu0 %vm2893_vm0, %v2892_v0  ;;  %2469 = vmatprep.subr.bf16.mxu1 %v2892_v0 }
  0x71   : > { %2500 = vmatpush3.bf16.msra.mxu0 %v2773_v21 }
  0x72   : > { %2501 = vmatprep.subr.bf16.mxu0 %v2892_v0 }
  0x73   : > { %2470 = vmatpush3.bf16.msra.mxu1 %v2770_v22 }
  0x74   : > { %2471 = vmatprep.subr.bf16.mxu1 %v2892_v0 }
  0x75   : > { %2502 = vmatpush3.bf16.msra.mxu0 %v2775_v23 }
  0x76   : > { %2424 = vmatmul.mubr.msk.bf16.gmra.mrb[16].mxu1 %vm433_vm1, %v3066_v12  ;;  %2456 = vmatmul.mubr.msk.bf16.gmra.mrb[16].mxu0 %vm433_vm1, %v3041_v5 }
  0x77   : > { %2427 = vmatprep.mubr.msk.bf16.mxu1 %vm2893_vm0, %v2892_v0  ;;  %2459 = vmatprep.mubr.msk.bf16.mxu0 %vm2893_vm0, %v2892_v0 }
  0x78   : > { %2472 = vmatpush3.bf16.msra.mxu1 %v2772_v24  ;;  %2551 = vmatprep.subr.bf16.mxu0 %v2892_v0 }
  0x79   : > { %2473 = vmatprep.subr.bf16.mxu1 %v2892_v0 }
  0x7c   : > { %2474 = vmatpush3.bf16.msra.mxu1 %v2774_v25 }
  0x7d   : > { %2523 = vmatprep.subr.bf16.mxu1 %v2892_v0 }
  0x7e   : > { %2428 = vmatmul.mubr.msk.bf16.gmra.mrb[20].mxu1 %vm433_vm1, %v3041_v5  ;;  %2460 = vmatmul.mubr.msk.bf16.gmra.mrb[20].mxu0 %vm433_vm1, %v3060_v11 }
  0x7f   : > { %2431 = vmatprep.mubr.msk.bf16.mxu1 %vm2893_vm0, %v2892_v0  ;;  %2463 = vmatprep.mubr.msk.bf16.mxu0 %vm2893_vm0, %v2892_v0 }
  0x86   : > { %2432 = vmatmul.mubr.msk.bf16.gmra.mrb[24].mxu1 %vm433_vm1, %v3060_v11  ;;  %2464 = vmatmul.mubr.msk.bf16.gmra.mrb[24].mxu0 %vm433_vm1, %v3085_v17 }
  0x87   : > { %2435 = vmatprep.mubr.msk.bf16.mxu1 %vm2893_vm0, %v2892_v0  ;;  %2503 = vmatprep.mubr.msk.bf16.mxu0 %vm2893_vm0, %v2892_v0 }
  0x8e   : > { %2436 = vmatmul.mubr.msk.bf16.gmra.mrb[28].mxu1 %vm433_vm1, %v3085_v17  ;;  %2504 = vmatmul.mubr.msk.bf16.vlgmr.msra.gmra.mrb[28].mxu0 %vm433_vm1, %v3044_v7 }
  0x8f   : > { %2475 = vmatprep.mubr.msk.bf16.mxu1 %vm2893_vm0, %v2892_v0  ;;  %2507 = vmatprep.mubr.msk.bf16.mxu0 %vm2893_vm0, %v2892_v0 }
  0x90   : > { %2552 = vmatpush3.bf16.msra.mxu0 %v2777_v26 }
  0x91   : > { %2553 = vmatprep.subr.bf16.mxu0 %v2892_v0 }
  0x94   : > { %2554 = vmatpush3.bf16.msra.mxu0 %v2779_v27 }
  0x95   : > { %2555 = vmatprep.subr.bf16.mxu0 %v2892_v0 }
  0x96   : > { %2476 = vmatmul.mubr.msk.bf16.vlgmr.msra.gmra.mrb[32].mxu1 %vm433_vm1, %v3044_v7  ;;  %2508 = vmatmul.mubr.msk.bf16.gmra.mrb[32].mxu0 %vm433_vm1, %v3066_v12 }
  0x97   : > { %2524 = vmatpush3.bf16.msra.mxu1 %v2776_v28  ;;  %2479 = vmatprep.mubr.msk.bf16.mxu1 %vm2893_vm0, %v2892_v0 }
  0x98   : > { %2511 = vmatprep.mubr.msk.bf16.mxu0 %vm2893_vm0, %v2892_v0  ;;  %2525 = vmatprep.subr.bf16.mxu1 %v2892_v0 }
  0x99   : > { %2556 = vmatpush3.bf16.msra.mxu0 %v2781_v29 }
  0x9a   : > { %2557 = vmatprep.subr.bf16.mxu0 %v2892_v0 }
  0x9b   : > { %2526 = vmatpush3.bf16.msra.mxu1 %v2778_v30 }
  0x9c   : > { %2527 = vmatprep.subr.bf16.mxu1 %v2892_v0 }
  0x9d   : > { %2558 = vmatpush3.bf16.msra.mxu0 %v2783_v31 }
  0x9e   : > { %2480 = vmatmul.mubr.msk.bf16.gmra.mrb[36].mxu1 %vm433_vm1, %v3066_v12  ;;  %2512 = vmatmul.mubr.msk.bf16.gmra.mrb[36].mxu0 %vm433_vm1, %v3041_v5 }
  0x9f   : > { %2483 = vmatprep.mubr.msk.bf16.mxu1 %vm2893_vm0, %v2892_v0  ;;  %2515 = vmatprep.mubr.msk.bf16.mxu0 %vm2893_vm0, %v2892_v0 }
  0xa0   : > { %2528 = vmatpush3.bf16.msra.mxu1 %v2780_v32  ;;  %2607 = vmatprep.subr.bf16.mxu0 %v2892_v0 }
  0xa1   : > { %2529 = vmatprep.subr.bf16.mxu1 %v2892_v0 }
  0xa4   : > { %2530 = vmatpush3.bf16.msra.mxu1 %v2782_v33 }
  0xa5   : > { %2579 = vmatprep.subr.bf16.mxu1 %v2892_v0 }
  0xa6   : > { %2484 = vmatmul.mubr.msk.bf16.gmra.mrb[40].mxu1 %vm433_vm1, %v3041_v5  ;;  %2516 = vmatmul.mubr.msk.bf16.gmra.mrb[40].mxu0 %vm433_vm1, %v3060_v11 }
  0xa7   : > { %2487 = vmatprep.mubr.msk.bf16.mxu1 %vm2893_vm0, %v2892_v0  ;;  %2519 = vmatprep.mubr.msk.bf16.mxu0 %vm2893_vm0, %v2892_v0 }
  0xae   : > { %2488 = vmatmul.mubr.msk.bf16.gmra.mrb[44].mxu1 %vm433_vm1, %v3060_v11  ;;  %2520 = vmatmul.mubr.msk.bf16.gmra.mrb[44].mxu0 %vm433_vm1, %v3085_v17 }
  0xaf   : > { %2491 = vmatprep.mubr.msk.bf16.mxu1 %vm2893_vm0, %v2892_v0  ;;  %2559 = vmatprep.mubr.msk.bf16.mxu0 %vm2893_vm0, %v2892_v0 }
  0xb6   : > { %2492 = vmatmul.mubr.msk.bf16.gmra.mrb[48].mxu1 %vm433_vm1, %v3085_v17  ;;  %2560 = vmatmul.mubr.msk.bf16.vlgmr.msra.gmra.mrb[48].mxu0 %vm433_vm1, %v3044_v7 }
  0xb7   : > { %2531 = vmatprep.mubr.msk.bf16.mxu1 %vm2893_vm0, %v2892_v0  ;;  %2563 = vmatprep.mubr.msk.bf16.mxu0 %vm2893_vm0, %v2892_v0 }
  0xb8   : > { %2608 = vmatpush3.bf16.msra.mxu0 %v2785_v34 }
  0xb9   : > { %2609 = vmatprep.subr.bf16.mxu0 %v2892_v0 }
  0xbc   : > { %2610 = vmatpush3.bf16.msra.mxu0 %v2787_v35 }
  0xbd   : > { %2611 = vmatprep.subr.bf16.mxu0 %v2892_v0 }
  0xbe   : > { %2532 = vmatmul.mubr.msk.bf16.vlgmr.msra.gmra.mrb[52].mxu1 %vm433_vm1, %v3044_v7  ;;  %2564 = vmatmul.mubr.msk.bf16.gmra.mrb[52].mxu0 %vm433_vm1, %v3066_v12 }
  0xbf   : > { %2580 = vmatpush3.bf16.msra.mxu1 %v2784_v36  ;;  %2535 = vmatprep.mubr.msk.bf16.mxu1 %vm2893_vm0, %v2892_v0 }
  0xc0   : > { %2567 = vmatprep.mubr.msk.bf16.mxu0 %vm2893_vm0, %v2892_v0  ;;  %2581 = vmatprep.subr.bf16.mxu1 %v2892_v0 }
  0xc1   : > { %2612 = vmatpush3.bf16.msra.mxu0 %v2789_v37 }
  0xc2   : > { %2613 = vmatprep.subr.bf16.mxu0 %v2892_v0 }
  0xc3   : > { %2582 = vmatpush3.bf16.msra.mxu1 %v2786_v38 }
  0xc4   : > { %2583 = vmatprep.subr.bf16.mxu1 %v2892_v0 }
  0xc5   : > { %2614 = vmatpush3.bf16.msra.mxu0 %v2791_v39 }
  0xc6   : > { %2536 = vmatmul.mubr.msk.bf16.gmra.mrb[56].mxu1 %vm433_vm1, %v3066_v12  ;;  %2568 = vmatmul.mubr.msk.bf16.gmra.mrb[56].mxu0 %vm433_vm1, %v3041_v5 }
  0xc7   : > { %2539 = vmatprep.mubr.msk.bf16.mxu1 %vm2893_vm0, %v2892_v0  ;;  %2571 = vmatprep.mubr.msk.bf16.mxu0 %vm2893_vm0, %v2892_v0 }
  0xc8   : > { %2584 = vmatpush3.bf16.msra.mxu1 %v2788_v40  ;;  %2663 = vmatprep.subr.bf16.mxu0 %v2892_v0 }
  0xc9   : > { %2585 = vmatprep.subr.bf16.mxu1 %v2892_v0 }
  0xcc   : > { %2586 = vmatpush3.bf16.msra.mxu1 %v2790_v41 }
  0xcd   : > { %2635 = vmatprep.subr.bf16.mxu1 %v2892_v0 }
  0xce   : > { %2540 = vmatmul.mubr.msk.bf16.gmra.mrb[60].mxu1 %vm433_vm1, %v3041_v5  ;;  %2572 = vmatmul.mubr.msk.bf16.gmra.mrb[60].mxu0 %vm433_vm1, %v3060_v11 }
  0xcf   : > { %2543 = vmatprep.mubr.msk.bf16.mxu1 %vm2893_vm0, %v2892_v0  ;;  %2575 = vmatprep.mubr.msk.bf16.mxu0 %vm2893_vm0, %v2892_v0 }
  0xd6   : > { %2544 = vmatmul.mubr.msk.bf16.gmra.mrb[64].mxu1 %vm433_vm1, %v3060_v11  ;;  %2576 = vmatmul.mubr.msk.bf16.gmra.mrb[64].mxu0 %vm433_vm1, %v3085_v17 }
  0xd7   : > { %2547 = vmatprep.mubr.msk.bf16.mxu1 %vm2893_vm0, %v2892_v0  ;;  %2615 = vmatprep.mubr.msk.bf16.mxu0 %vm2893_vm0, %v2892_v0 }
  0xde   : > { %2548 = vmatmul.mubr.msk.bf16.gmra.mrb[68].mxu1 %vm433_vm1, %v3085_v17  ;;  %2616 = vmatmul.mubr.msk.bf16.vlgmr.msra.gmra.mrb[68].mxu0 %vm433_vm1, %v3044_v7 }
  0xdf   : > { %2587 = vmatprep.mubr.msk.bf16.mxu1 %vm2893_vm0, %v2892_v0  ;;  %2619 = vmatprep.mubr.msk.bf16.mxu0 %vm2893_vm0, %v2892_v0 }
  0xe0   : > { %2664 = vmatpush3.bf16.msra.mxu0 %v2793_v42 }
  0xe1   : > { %2665 = vmatprep.subr.bf16.mxu0 %v2892_v0 }
  0xe4   : > { %2666 = vmatpush3.bf16.msra.mxu0 %v2795_v43 }
  0xe5   : > { %2667 = vmatprep.subr.bf16.mxu0 %v2892_v0 }
  0xe6   : > { %2588 = vmatmul.mubr.msk.bf16.vlgmr.msra.gmra.mrb[72].mxu1 %vm433_vm1, %v3044_v7  ;;  %2620 = vmatmul.mubr.msk.bf16.gmra.mrb[72].mxu0 %vm433_vm1, %v3066_v12 }
  0xe7   : > { %2636 = vmatpush3.bf16.msra.mxu1 %v2792_v44  ;;  %2591 = vmatprep.mubr.msk.bf16.mxu1 %vm2893_vm0, %v2892_v0 }
  0xe8   : > { %2623 = vmatprep.mubr.msk.bf16.mxu0 %vm2893_vm0, %v2892_v0  ;;  %2637 = vmatprep.subr.bf16.mxu1 %v2892_v0 }
  0xe9   : > { %2668 = vmatpush3.bf16.msra.mxu0 %v2797_v45 }
  0xea   : > { %2669 = vmatprep.subr.bf16.mxu0 %v2892_v0 }
  0xeb   : > { %2638 = vmatpush3.bf16.msra.mxu1 %v2794_v46 }
  0xec   : > { %2639 = vmatprep.subr.bf16.mxu1 %v2892_v0 }
  0xed   : > { %2670 = vmatpush3.bf16.msra.mxu0 %v2799_v47 }
  0xee   : > { %2592 = vmatmul.mubr.msk.bf16.gmra.mrb[76].mxu1 %vm433_vm1, %v3066_v12  ;;  %2624 = vmatmul.mubr.msk.bf16.gmra.mrb[76].mxu0 %vm433_vm1, %v3041_v5 }
  0xef   : > { %2595 = vmatprep.mubr.msk.bf16.mxu1 %vm2893_vm0, %v2892_v0  ;;  %2627 = vmatprep.mubr.msk.bf16.mxu0 %vm2893_vm0, %v2892_v0 }
  0xf0   : > { %2640 = vmatpush3.bf16.msra.mxu1 %v2796_v48 }
  0xf1   : > { %2641 = vmatprep.subr.bf16.mxu1 %v2892_v0 }
  0xf4   : > { %2642 = vmatpush3.bf16.msra.mxu1 %v2798_v49 }
  0xf6   : > { %2596 = vmatmul.mubr.msk.bf16.gmra.mrb[80].mxu1 %vm433_vm1, %v3041_v5  ;;  %2628 = vmatmul.mubr.msk.bf16.gmra.mrb[80].mxu0 %vm433_vm1, %v3060_v11 }
  0xf7   : > { %2599 = vmatprep.mubr.msk.bf16.mxu1 %vm2893_vm0, %v2892_v0  ;;  %2631 = vmatprep.mubr.msk.bf16.mxu0 %vm2893_vm0, %v2892_v0 }
  0xfe   : > { %2600 = vmatmul.mubr.msk.bf16.gmra.mrb[84].mxu1 %vm433_vm1, %v3060_v11  ;;  %2632 = vmatmul.mubr.msk.bf16.gmra.mrb[84].mxu0 %vm433_vm1, %v3085_v17 }
  0xff   : > { %2603 = vmatprep.mubr.msk.bf16.mxu1 %vm2893_vm0, %v2892_v0  ;;  %2671 = vmatprep.mubr.msk.bf16.mxu0 %vm2893_vm0, %v2892_v0 }
 0x106   : > { %2604 = vmatmul.mubr.msk.bf16.gmra.mrb[88].mxu1 %vm433_vm1, %v3085_v17  ;;  %2672 = vmatmul.mubr.msk.bf16.vlgmr.msra.gmra.mrb[88].mxu0 %vm433_vm1, %v3044_v7 }
 0x107   : > { %2643 = vmatprep.mubr.msk.bf16.mxu1 %vm2893_vm0, %v2892_v0  ;;  %2675 = vmatprep.mubr.msk.bf16.mxu0 %vm2893_vm0, %v2892_v0 }
 0x10e   : > { %2644 = vmatmul.mubr.msk.bf16.vlgmr.msra.gmra.mrb[92].mxu1 %vm433_vm1, %v3044_v7  ;;  %2676 = vmatmul.mubr.msk.bf16.gmra.mrb[92].mxu0 %vm433_vm1, %v3066_v12 }
 0x10f   : > { %2647 = vmatprep.mubr.msk.bf16.mxu1 %vm2893_vm0, %v2892_v0  ;;  %2679 = vmatprep.mubr.msk.bf16.mxu0 %vm2893_vm0, %v2892_v0 }
 0x116   : > { %2648 = vmatmul.mubr.msk.bf16.gmra.mrb[96].mxu1 %vm433_vm1, %v3066_v12  ;;  %2680 = vmatmul.mubr.msk.bf16.gmra.mrb[96].mxu0 %vm433_vm1, %v3041_v5 }
 0x117   : > { %2651 = vmatprep.mubr.msk.bf16.mxu1 %vm2893_vm0, %v2892_v0  ;;  %2683 = vmatprep.mubr.msk.bf16.mxu0 %vm2893_vm0, %v2892_v0 }
 0x11e   : > { %2652 = vmatmul.mubr.msk.bf16.gmra.mrb[100].mxu1 %vm433_vm1, %v3041_v5  ;;  %2684 = vmatmul.mubr.msk.bf16.gmra.mrb[100].mxu0 %vm433_vm1, %v3060_v11 }
 0x11f   : > { %2655 = vmatprep.mubr.msk.bf16.mxu1 %vm2893_vm0, %v2892_v0  ;;  %2687 = vmatprep.mubr.msk.bf16.mxu0 %vm2893_vm0, %v2892_v0 }
 0x126   : > { %2656 = vmatmul.mubr.msk.bf16.gmra.mrb[104].mxu1 %vm433_vm1, %v3060_v11  ;;  %2688 = vmatmul.mubr.msk.bf16.gmra.mrb[104].mxu0 %vm433_vm1, %v3085_v17 }
 0x127   : > { %2659 = vmatprep.mubr.msk.bf16.mxu1 %vm2893_vm0, %v2892_v0 }
 0x129   : > { %v3317_v50 = vpop.f32.mrb[0].mxu1  ;;  %v483_v51 = vpop.f32.mrb[0].mxu0 }
 0x12a   : > { %v2401_v52 = vpop.f32.mrb[1].mxu1  ;;  %v2393_v53 = vpop.f32.mrb[1].mxu0 }
 0x12b   : > { %v3319_v54 = vpop.f32.mrb[2].mxu1  ;;  %v486_v55 = vpop.f32.mrb[2].mxu0 }
 0x12c   : > { %v2402_v56 = vpop.f32.mrb[3].mxu1  ;;  %v2394_v57 = vpop.f32.mrb[3].mxu0 }
 0x12e   : > { %2660 = vmatmul.mubr.msk.bf16.gmra.mrb[108].mxu1 %vm433_vm1, %v3085_v17 }
 0x131   : > { %v3323_v58 = vpop.f32.mrb[4].mxu1  ;;  %v491_v59 = vpop.f32.mrb[4].mxu0 }
 0x132   : > { %v2405_v60 = vpop.f32.mrb[5].mxu1  ;;  %v2397_v61 = vpop.f32.mrb[5].mxu0 }
 0x133   : > { %v3325_v62 = vpop.f32.mrb[6].mxu1  ;;  %v3327_v63 = vpop.f32.mrb[6].mxu0 }
 0x134   : > { %v2406_v0 = vpop.f32.mrb[7].mxu1  ;;  %v2398_v1 = vpop.f32.mrb[7].mxu0 }
 0x139   : > { %v515_v2 = vpop.f32.mrb[8].mxu1  ;;  %v743_v3 = vpop.f32.mrb[8].mxu0 }
 0x13a   : > { %v2409_v4 = vpop.f32.mrb[9].mxu1  ;;  %v791_v5 = vrot.slane %v743_v3, 2  ;;  %v2449_v6 = vpop.f32.mrb[9].mxu0 }
 0x13b   : > { %v517_v7 = vpop.f32.mrb[10].mxu1  ;;  %v746_v8 = vpop.f32.mrb[10].mxu0 }
 0x13c   : > { %v2410_v9 = vpop.f32.mrb[11].mxu1  ;;  %v792_v10 = vrot.slane %v746_v8, 2  ;;  %v2450_v11 = vpop.f32.mrb[11].mxu0 }
 0x13e   : > { %v793_v12 = vsel %vm790_vm2, %v791_v5, %v792_v10 }
 0x141   : > { %v595_v13 = vpop.f32.mrb[12].mxu1  ;;  %v751_v14 = vpop.f32.mrb[12].mxu0 }
 0x142   : > { %v2421_v15 = vpop.f32.mrb[13].mxu1  ;;  %v794_v16 = vrot.slane %v751_v14, 2  ;;  %v2453_v17 = vpop.f32.mrb[13].mxu0  ;;  %v643_v20 = vrot.slane %v595_v13, 1 }
 0x143   : > { %v598_v18 = vpop.f32.mrb[14].mxu1  ;;  %v754_v19 = vpop.f32.mrb[14].mxu0 }
 0x144   : > { %v644_v21 = vrot.slane %v598_v18, 1  ;;  %v2422_v22 = vpop.f32.mrb[15].mxu1  ;;  %v795_v23 = vsel %vm790_vm2, %v792_v10, %v794_v16  ;;  %v796_v24 = vrot.slane %v754_v19, 2  ;;  %v2454_v25 = vpop.f32.mrb[15].mxu0 }
 0x146   : > { %v645_v26 = vsel %vm642_vm3, %v643_v20, %v644_v21  ;;  %v797_v27 = vsel %vm790_vm2, %v794_v16, %v796_v24 }
 0x147   : > { %v668_v28 = vadd.f32 %v645_v26, %v483_v51 }
 0x149   : > { %v603_v29 = vpop.f32.mrb[16].mxu1  ;;  %v759_v30 = vpop.f32.mrb[16].mxu0  ;;  %v3333_v31 = vadd.f32 %v793_v12, %v668_v28 }
 0x14a   : > { %v646_v32 = vrot.slane %v603_v29, 1  ;;  %v2425_v33 = vpop.f32.mrb[17].mxu1  ;;  %v798_v34 = vrot.slane %v759_v30, 2  ;;  %v2457_v35 = vpop.f32.mrb[17].mxu0 }
 0x14b   : > { %v606_v36 = vpop.f32.mrb[18].mxu1  ;;  %v762_v37 = vpop.f32.mrb[18].mxu0 }
 0x14c   : > { %v647_v38 = vsel %vm642_vm3, %v644_v21, %v646_v32  ;;  %v648_v39 = vrot.slane %v606_v36, 1  ;;  %v2426_v40 = vpop.f32.mrb[19].mxu1  ;;  %v799_v41 = vsel %vm790_vm2, %v796_v24, %v798_v34  ;;  %v800_v42 = vrot.slane %v762_v37, 2  ;;  %v2458_v43 = vpop.f32.mrb[19].mxu0 }
 0x14d   : > { %v669_v44 = vadd.f32 %v647_v38, %v486_v55 }
 0x14e   : > { %v649_v45 = vsel %vm642_vm3, %v646_v32, %v648_v39  ;;  %v801_v46 = vsel %vm790_vm2, %v798_v34, %v800_v42 }
 0x14f   : > { %v670_v47 = vadd.f32 %v649_v45, %v491_v59  ;;  %v3339_v48 = vadd.f32 %v795_v23, %v669_v44 }
 0x151   : > { %v611_v49 = vpop.f32.mrb[20].mxu1  ;;  %v767_v51 = vpop.f32.mrb[20].mxu0  ;;  %v3341_v52 = vadd.f32 %v797_v27, %v670_v47 }
 0x152   : > { %v650_v53 = vrot.slane %v611_v49, 1  ;;  %v2429_v56 = vpop.f32.mrb[21].mxu1  ;;  %v802_v57 = vrot.slane %v767_v51, 2  ;;  %v2461_v60 = vpop.f32.mrb[21].mxu0 }
 0x153   : > { %v614_v61 = vpop.f32.mrb[22].mxu1  ;;  %v770_v0 = vpop.f32.mrb[22].mxu0 }
 0x154   : > { %v651_v1 = vsel %vm642_vm3, %v648_v39, %v650_v53  ;;  %v652_v55 = vrot.slane %v614_v61, 1  ;;  %v2430_v2 = vpop.f32.mrb[23].mxu1  ;;  %v803_v3 = vsel %vm790_vm2, %v800_v42, %v802_v57  ;;  %v804_v4 = vrot.slane %v770_v0, 2  ;;  %v2462_v59 = vpop.f32.mrb[23].mxu0 }
 0x155   : > { %v671_v5 = vadd.f32 %v651_v1, %v3327_v63 }
 0x156   : > { %v653_v6 = vsel %vm642_vm3, %v650_v53, %v652_v55  ;;  %v805_v7 = vsel %vm790_vm2, %v802_v57, %v804_v4 }
 0x157   : > { %v672_v8 = vadd.f32 %v653_v6, %v3317_v50  ;;  %v3349_v9 = vadd.f32 %v799_v41, %v671_v5 }
 0x159   : > { %v619_v10 = vpop.f32.mrb[24].mxu1  ;;  %v775_v11 = vpop.f32.mrb[24].mxu0  ;;  %v3351_v12 = vadd.f32 %v801_v46, %v672_v8 }
 0x15a   : > { %v654_v13 = vrot.slane %v619_v10, 1  ;;  %v2433_v14 = vpop.f32.mrb[25].mxu1  ;;  %v806_v15 = vrot.slane %v775_v11, 2  ;;  %v2465_v16 = vpop.f32.mrb[25].mxu0 }
 0x15b   : > { %v622_v17 = vpop.f32.mrb[26].mxu1  ;;  %v778_v18 = vpop.f32.mrb[26].mxu0 }
 0x15c   : > { %v655_v63 = vsel %vm642_vm3, %v652_v55, %v654_v13  ;;  %v656_v19 = vrot.slane %v622_v17, 1  ;;  %v2434_v20 = vpop.f32.mrb[27].mxu1  ;;  %v807_v21 = vsel %vm790_vm2, %v804_v4, %v806_v15  ;;  %v2466_v22 = vpop.f32.mrb[27].mxu0 }
 0x15d   : > { %v673_v50 = vadd.f32 %v655_v63, %v3319_v54 }
 0x15e   : > { %v657_v23 = vsel %vm642_vm3, %v654_v13, %v656_v19 }
 0x15f   : > { %v674_v24 = vadd.f32 %v657_v23, %v3323_v58  ;;  %v3358_v25 = vadd.f32 %v803_v3, %v673_v50 }
 0x161   : > { %v627_v26 = vpop.f32.mrb[28].mxu1  ;;  %v1039_v27 = vpop.f32.mrb[28].mxu0  ;;  %v3360_v28 = vadd.f32 %v805_v7, %v674_v24 }
 0x162   : > { %v658_v29 = vrot.slane %v627_v26, 1  ;;  %v2437_v30 = vpop.f32.mrb[29].mxu1  ;;  %v1087_v32 = vrot.slane %v1039_v27, 4  ;;  %v2505_v33 = vpop.f32.mrb[29].mxu0 }
 0x163   : > { %v630_v34 = vpop.f32.mrb[30].mxu1  ;;  %v1042_v35 = vpop.f32.mrb[30].mxu0 }
 0x164   : > { %v659_v36 = vsel %vm642_vm3, %v656_v19, %v658_v29  ;;  %v2438_v54 = vpop.f32.mrb[31].mxu1  ;;  %v1088_v37 = vrot.slane %v1042_v35, 4  ;;  %v2506_v38 = vpop.f32.mrb[31].mxu0 }
 0x165   : > { %v675_v58 = vadd.f32 %v659_v36, %v3325_v62 }
 0x166   : > { %v1089_v39 = vsel %vm1086_vm4, %v1087_v32, %v1088_v37 }
 0x167   : > { %v3365_v40 = vadd.f32 %v807_v21, %v675_v58 }
 0x169   : > { %v891_v41 = vpop.f32.mrb[32].mxu1  ;;  %v1047_v42 = vpop.f32.mrb[32].mxu0 }
 0x16a   : > { %v2477_v43 = vpop.f32.mrb[33].mxu1  ;;  %v1090_v44 = vrot.slane %v1047_v42, 4  ;;  %v2509_v45 = vpop.f32.mrb[33].mxu0  ;;  %v939_v49 = vrot.slane %v891_v41, 3 }
 0x16b   : > { %v894_v46 = vpop.f32.mrb[34].mxu1  ;;  %v1050_v47 = vpop.f32.mrb[34].mxu0 }
 0x16c   : > { %v940_v51 = vrot.slane %v894_v46, 3  ;;  %v2478_v53 = vpop.f32.mrb[35].mxu1  ;;  %v1091_v56 = vsel %vm1086_vm4, %v1088_v37, %v1090_v44  ;;  %v1092_v57 = vrot.slane %v1050_v47, 4  ;;  %v2510_v60 = vpop.f32.mrb[35].mxu0 }
 0x16e   : > { %v941_v62 = vsel %vm938_vm5, %v939_v49, %v940_v51  ;;  %v1093_v61 = vsel %vm1086_vm4, %v1090_v44, %v1092_v57 }
 0x16f   : > { %v964_v0 = vadd.f32 %v941_v62, %v3333_v31 }
 0x171   : > { %v899_v1 = vpop.f32.mrb[36].mxu1  ;;  %v1055_v55 = vpop.f32.mrb[36].mxu0  ;;  %v3371_v2 = vadd.f32 %v1089_v39, %v964_v0 }
 0x172   : > { %v942_v3 = vrot.slane %v899_v1, 3  ;;  %v2481_v4 = vpop.f32.mrb[37].mxu1  ;;  %v1094_v59 = vrot.slane %v1055_v55, 4  ;;  %v2513_v5 = vpop.f32.mrb[37].mxu0 }
 0x173   : > { %v902_v6 = vpop.f32.mrb[38].mxu1  ;;  %v1058_v7 = vpop.f32.mrb[38].mxu0 }
 0x174   : > { %v943_v8 = vsel %vm938_vm5, %v940_v51, %v942_v3  ;;  %v944_v10 = vrot.slane %v902_v6, 3  ;;  %v2482_v11 = vpop.f32.mrb[39].mxu1  ;;  %v1095_v13 = vsel %vm1086_vm4, %v1092_v57, %v1094_v59  ;;  %v1096_v14 = vrot.slane %v1058_v7, 4  ;;  %v2514_v15 = vpop.f32.mrb[39].mxu0 }
 0x175   : > { %v965_v31 = vadd.f32 %v943_v8, %v3339_v48 }
 0x176   : > { %v945_v16 = vsel %vm938_vm5, %v942_v3, %v944_v10  ;;  %v1097_v17 = vsel %vm1086_vm4, %v1094_v59, %v1096_v14 }
 0x177   : > { %v966_v18 = vadd.f32 %v945_v16, %v3341_v52  ;;  %v3379_v63 = vadd.f32 %v1091_v56, %v965_v31 }
 0x179   : > { %v907_v19 = vpop.f32.mrb[40].mxu1  ;;  %v1063_v20 = vpop.f32.mrb[40].mxu0  ;;  %v3381_v21 = vadd.f32 %v1093_v61, %v966_v18 }
 0x17a   : > { %v946_v22 = vrot.slane %v907_v19, 3  ;;  %v2485_v50 = vpop.f32.mrb[41].mxu1  ;;  %v1098_v23 = vrot.slane %v1063_v20, 4  ;;  %v2517_v24 = vpop.f32.mrb[41].mxu0 }
 0x17b   : > { %v910_v26 = vpop.f32.mrb[42].mxu1  ;;  %v1066_v27 = vpop.f32.mrb[42].mxu0 }
 0x17c   : > { %v947_v48 = vsel %vm938_vm5, %v944_v10, %v946_v22  ;;  %v948_v29 = vrot.slane %v910_v26, 3  ;;  %v2486_v30 = vpop.f32.mrb[43].mxu1  ;;  %v1099_v32 = vsel %vm1086_vm4, %v1096_v14, %v1098_v23  ;;  %v1100_v33 = vrot.slane %v1066_v27, 4  ;;  %v2518_v52 = vpop.f32.mrb[43].mxu0 }
 0x17d   : > { %v967_v34 = vadd.f32 %v947_v48, %v3349_v9 }
 0x17e   : > { %v949_v35 = vsel %vm938_vm5, %v946_v22, %v948_v29  ;;  %v1101_v36 = vsel %vm1086_vm4, %v1098_v23, %v1100_v33 }
 0x17f   : > { %v968_v54 = vadd.f32 %v949_v35, %v3351_v12  ;;  %v3389_v37 = vadd.f32 %v1095_v13, %v967_v34 }
 0x181   : > { %v915_v38 = vpop.f32.mrb[44].mxu1  ;;  %v1071_v58 = vpop.f32.mrb[44].mxu0  ;;  %v3391_v39 = vadd.f32 %v1097_v17, %v968_v54 }
 0x182   : > { %v950_v41 = vrot.slane %v915_v38, 3  ;;  %v2489_v42 = vpop.f32.mrb[45].mxu1  ;;  %v1102_v43 = vrot.slane %v1071_v58, 4  ;;  %v2521_v44 = vpop.f32.mrb[45].mxu0 }
 0x183   : > { %v918_v45 = vpop.f32.mrb[46].mxu1  ;;  %v1074_v46 = vpop.f32.mrb[46].mxu0 }
 0x184   : > { %v951_v9 = vsel %vm938_vm5, %v948_v29, %v950_v41  ;;  %v952_v47 = vrot.slane %v918_v45, 3  ;;  %v2490_v49 = vpop.f32.mrb[47].mxu1  ;;  %v1103_v51 = vsel %vm1086_vm4, %v1100_v33, %v1102_v43  ;;  %v2522_v53 = vpop.f32.mrb[47].mxu0 }
 0x185   : > { %v969_v12 = vadd.f32 %v951_v9, %v3358_v25 }
 0x186   : > { %v953_v56 = vsel %vm938_vm5, %v950_v41, %v952_v47 }
 0x187   : > { %v970_v57 = vadd.f32 %v953_v56, %v3360_v28  ;;  %v3398_v60 = vadd.f32 %v1099_v32, %v969_v12 }
 0x189   : > { %v923_v62 = vpop.f32.mrb[48].mxu1  ;;  %v1335_v61 = vpop.f32.mrb[48].mxu0  ;;  %v3400_v0 = vadd.f32 %v1101_v36, %v970_v57 }
 0x18a   : > { %v954_v1 = vrot.slane %v923_v62, 3  ;;  %v2493_v55 = vpop.f32.mrb[49].mxu1  ;;  %v1383_v3 = vrot.slane %v1335_v61, 6  ;;  %v2561_v4 = vpop.f32.mrb[49].mxu0 }
 0x18b   : > { %v926_v59 = vpop.f32.mrb[50].mxu1  ;;  %v1338_v5 = vpop.f32.mrb[50].mxu0 }
 0x18c   : > { %v955_v6 = vsel %vm938_vm5, %v952_v47, %v954_v1  ;;  %v2494_v25 = vpop.f32.mrb[51].mxu1  ;;  %v1384_v7 = vrot.slane %v1338_v5, 6  ;;  %v2562_v8 = vpop.f32.mrb[51].mxu0 }
 0x18d   : > { %v971_v28 = vadd.f32 %v955_v6, %v3365_v40 }
 0x18e   : > { %v1385_v10 = vsel %vm1382_vm6, %v1383_v3, %v1384_v7 }
 0x18f   : > { %v3405_v11 = vadd.f32 %v1103_v51, %v971_v28 }
 0x191   : > { %v1187_v13 = vpop.f32.mrb[52].mxu1  ;;  %v1343_v14 = vpop.f32.mrb[52].mxu0 }
 0x192   : > { %v2533_v15 = vpop.f32.mrb[53].mxu1  ;;  %v1386_v31 = vrot.slane %v1343_v14, 6  ;;  %v2565_v16 = vpop.f32.mrb[53].mxu0  ;;  %v1235_v19 = vrot.slane %v1187_v13, 5 }
 0x193   : > { %v1190_v17 = vpop.f32.mrb[54].mxu1  ;;  %v1346_v18 = vpop.f32.mrb[54].mxu0 }
 0x194   : > { %v1236_v20 = vrot.slane %v1190_v17, 5  ;;  %v2534_v22 = vpop.f32.mrb[55].mxu1  ;;  %v1387_v50 = vsel %vm1382_vm6, %v1384_v7, %v1386_v31  ;;  %v1388_v23 = vrot.slane %v1346_v18, 6  ;;  %v2566_v24 = vpop.f32.mrb[55].mxu0 }
 0x196   : > { %v1237_v40 = vsel %vm1234_vm7, %v1235_v19, %v1236_v20  ;;  %v1389_v26 = vsel %vm1382_vm6, %v1386_v31, %v1388_v23 }
 0x197   : > { %v1260_v27 = vadd.f32 %v1237_v40, %v3371_v2 }
 0x199   : > { %v1195_v48 = vpop.f32.mrb[56].mxu1  ;;  %v1351_v29 = vpop.f32.mrb[56].mxu0  ;;  %v3411_v30 = vadd.f32 %v1385_v10, %v1260_v27 }
 0x19a   : > { %v1238_v32 = vrot.slane %v1195_v48, 5  ;;  %v2537_v33 = vpop.f32.mrb[57].mxu1  ;;  %v1390_v52 = vrot.slane %v1351_v29, 6  ;;  %v2569_v34 = vpop.f32.mrb[57].mxu0 }
 0x19b   : > { %v1198_v35 = vpop.f32.mrb[58].mxu1  ;;  %v1354_v36 = vpop.f32.mrb[58].mxu0 }
 0x19c   : > { %v1239_v54 = vsel %vm1234_vm7, %v1236_v20, %v1238_v32  ;;  %v1240_v38 = vrot.slane %v1198_v35, 5  ;;  %v2538_v58 = vpop.f32.mrb[59].mxu1  ;;  %v1391_v41 = vsel %vm1382_vm6, %v1388_v23, %v1390_v52  ;;  %v1392_v42 = vrot.slane %v1354_v36, 6  ;;  %v2570_v43 = vpop.f32.mrb[59].mxu0 }
 0x19d   : > { %v1261_v2 = vadd.f32 %v1239_v54, %v3379_v63 }
 0x19e   : > { %v1241_v44 = vsel %vm1234_vm7, %v1238_v32, %v1240_v38  ;;  %v1393_v45 = vsel %vm1382_vm6, %v1390_v52, %v1392_v42 }
 0x19f   : > { %v1262_v46 = vadd.f32 %v1241_v44, %v3381_v21  ;;  %v3419_v9 = vadd.f32 %v1387_v50, %v1261_v2 }
 0x1a1   : > { %v1203_v47 = vpop.f32.mrb[60].mxu1  ;;  %v1359_v49 = vpop.f32.mrb[60].mxu0  ;;  %v3421_v51 = vadd.f32 %v1389_v26, %v1262_v46 }
 0x1a2   : > { %v1242_v53 = vrot.slane %v1203_v47, 5  ;;  %v2541_v12 = vpop.f32.mrb[61].mxu1  ;;  %v1394_v56 = vrot.slane %v1359_v49, 6  ;;  %v2573_v57 = vpop.f32.mrb[61].mxu0 }
 0x1a3   : > { %v1206_v62 = vpop.f32.mrb[62].mxu1  ;;  %v1362_v61 = vpop.f32.mrb[62].mxu0 }
 0x1a4   : > { %v1243_v63 = vsel %vm1234_vm7, %v1240_v38, %v1242_v53  ;;  %v1244_v1 = vrot.slane %v1206_v62, 5  ;;  %v2542_v55 = vpop.f32.mrb[63].mxu1  ;;  %v1395_v3 = vsel %vm1382_vm6, %v1392_v42, %v1394_v56  ;;  %v1396_v4 = vrot.slane %v1362_v61, 6  ;;  %v2574_v21 = vpop.f32.mrb[63].mxu0 }
 0x1a5   : > { %v1263_v59 = vadd.f32 %v1243_v63, %v3389_v37 }
 0x1a6   : > { %v1245_v5 = vsel %vm1234_vm7, %v1242_v53, %v1244_v1  ;;  %v1397_v6 = vsel %vm1382_vm6, %v1394_v56, %v1396_v4 }
 0x1a7   : > { %v1264_v25 = vadd.f32 %v1245_v5, %v3391_v39  ;;  %v3429_v7 = vadd.f32 %v1391_v41, %v1263_v59 }
 0x1a9   : > { %v1211_v8 = vpop.f32.mrb[64].mxu1  ;;  %v1367_v28 = vpop.f32.mrb[64].mxu0  ;;  %v3431_v10 = vadd.f32 %v1393_v45, %v1264_v25 }
 0x1aa   : > { %v1246_v13 = vrot.slane %v1211_v8, 5  ;;  %v2545_v14 = vpop.f32.mrb[65].mxu1  ;;  %v1398_v15 = vrot.slane %v1367_v28, 6  ;;  %v2577_v31 = vpop.f32.mrb[65].mxu0 }
 0x1ab   : > { %v1214_v16 = vpop.f32.mrb[66].mxu1  ;;  %v1370_v17 = vpop.f32.mrb[66].mxu0 }
 0x1ac   : > { %v1247_v37 = vsel %vm1234_vm7, %v1244_v1, %v1246_v13  ;;  %v1248_v18 = vrot.slane %v1214_v16, 5  ;;  %v2546_v19 = vpop.f32.mrb[67].mxu1  ;;  %v1399_v20 = vsel %vm1382_vm6, %v1396_v4, %v1398_v15  ;;  %v2578_v22 = vpop.f32.mrb[67].mxu0 }
 0x1ad   : > { %v1265_v39 = vadd.f32 %v1247_v37, %v3398_v60 }
 0x1ae   : > { %v1249_v50 = vsel %vm1234_vm7, %v1246_v13, %v1248_v18 }
 0x1af   : > { %v1266_v23 = vadd.f32 %v1249_v50, %v3400_v0  ;;  %v3438_v24 = vadd.f32 %v1395_v3, %v1265_v39 }
 0x1b1   : > { %v1219_v40 = vpop.f32.mrb[68].mxu1  ;;  %v1631_v26 = vpop.f32.mrb[68].mxu0  ;;  %v3440_v27 = vadd.f32 %v1397_v6, %v1266_v23 }
 0x1b2   : > { %v1250_v48 = vrot.slane %v1219_v40, 5  ;;  %v2549_v29 = vpop.f32.mrb[69].mxu1  ;;  %v2617_v32 = vpop.f32.mrb[69].mxu0 }
 0x1b3   : > { %v1222_v33 = vpop.f32.mrb[70].mxu1  ;;  %v1633_v52 = vpop.f32.mrb[70].mxu0 }
 0x1b4   : > { %v1251_v34 = vsel %vm1234_vm7, %v1248_v18, %v1250_v48  ;;  %v2550_v35 = vpop.f32.mrb[71].mxu1  ;;  %v2618_v36 = vpop.f32.mrb[71].mxu0 }
 0x1b5   : > { %v1267_v60 = vadd.f32 %v1251_v34, %v3405_v11 }
 0x1b7   : > { %v3444_v54 = vadd.f32 %v1399_v20, %v1267_v60 }
 0x1b9   : > { %v1483_v0 = vpop.f32.mrb[72].mxu1  ;;  %v1638_v38 = vpop.f32.mrb[72].mxu0 }
 0x1ba   : > { %v2589_v58 = vpop.f32.mrb[73].mxu1  ;;  %v2621_v41 = vpop.f32.mrb[73].mxu0  ;;  %v1531_v2 = vrot.slane %v1483_v0, 7 }
 0x1bb   : > { %v1486_v42 = vpop.f32.mrb[74].mxu1  ;;  %v1641_v43 = vpop.f32.mrb[74].mxu0 }
 0x1bc   : > { %v1532_v44 = vrot.slane %v1486_v42, 7  ;;  %v2590_v45 = vpop.f32.mrb[75].mxu1  ;;  %v2622_v46 = vpop.f32.mrb[75].mxu0 }
 0x1be   : > { %v1533_v47 = vsel %vm1530_vm8, %v1531_v2, %v1532_v44 }
 0x1bf   : > { %v1556_v49 = vadd.f32 %v1533_v47, %v3411_v30 }
 0x1c1   : > { %v3448_v53 = vadd.f32 %v1633_v52, %v1556_v49  ;;  %v1491_v11 = vpop.f32.mrb[76].mxu1  ;;  %v1646_v12 = vpop.f32.mrb[76].mxu0 }
 0x1c2   : > { %v1534_v56 = vrot.slane %v1491_v11, 7  ;;  %v2593_v57 = vpop.f32.mrb[77].mxu1  ;;  %v2625_v62 = vpop.f32.mrb[77].mxu0 }
 0x1c3   : > { %v1494_v61 = vpop.f32.mrb[78].mxu1  ;;  %v1649_v63 = vpop.f32.mrb[78].mxu0 }
 0x1c4   : > { %v1535_v1 = vsel %vm1530_vm8, %v1532_v44, %v1534_v56  ;;  %v1536_v55 = vrot.slane %v1494_v61, 7  ;;  %v2594_v3 = vpop.f32.mrb[79].mxu1  ;;  %v2626_v4 = vpop.f32.mrb[79].mxu0 }
 0x1c5   : > { %v1557_v21 = vadd.f32 %v1535_v1, %v3419_v9 }
 0x1c6   : > { %v1537_v59 = vsel %vm1530_vm8, %v1534_v56, %v1536_v55 }
 0x1c7   : > { %v3453_v5 = vadd.f32 %v1638_v38, %v1557_v21  ;;  %v1558_v30 = vadd.f32 %v1537_v59, %v3421_v51 }
 0x1c9   : > { %v3456_v6 = vadd.f32 %v1641_v43, %v1558_v30  ;;  %v1499_v25 = vpop.f32.mrb[80].mxu1  ;;  %v1654_v8 = vpop.f32.mrb[80].mxu0 }
 0x1ca   : > { %v1538_v28 = vrot.slane %v1499_v25, 7  ;;  %v2597_v13 = vpop.f32.mrb[81].mxu1  ;;  %v2629_v14 = vpop.f32.mrb[81].mxu0 }
 0x1cb   : > { %v1502_v15 = vpop.f32.mrb[82].mxu1  ;;  %v1657_v31 = vpop.f32.mrb[82].mxu0 }
 0x1cc   : > { %v1539_v16 = vsel %vm1530_vm8, %v1536_v55, %v1538_v28  ;;  %v1540_v17 = vrot.slane %v1502_v15, 7  ;;  %v2598_v37 = vpop.f32.mrb[83].mxu1  ;;  %v2630_v9 = vpop.f32.mrb[83].mxu0 }
 0x1cd   : > { %v1559_v18 = vadd.f32 %v1539_v16, %v3429_v7 }
 0x1ce   : > { %v1541_v19 = vsel %vm1530_vm8, %v1538_v28, %v1540_v17 }
 0x1cf   : > { %v3461_v20 = vadd.f32 %v1646_v12, %v1559_v18  ;;  %v1560_v51 = vadd.f32 %v1541_v19, %v3431_v10  ;;  %v3483_v19 = vld [vmem:[#allocation4] ss:$0 sm:$0xff] }
 0x1d1   : > { %v3464_v22 = vadd.f32 %v1649_v63, %v1560_v51  ;;  %v1507_v39 = vpop.f32.mrb[84].mxu1  ;;  %v1662_v50 = vpop.f32.mrb[84].mxu0 }
 0x1d2   : > { %v1542_v23 = vrot.slane %v1507_v39, 7  ;;  %v2601_v40 = vpop.f32.mrb[85].mxu1  ;;  %v2633_v26 = vpop.f32.mrb[85].mxu0 }
 0x1d3   : > { %v1510_v48 = vpop.f32.mrb[86].mxu1  ;;  %v1665_v29 = vpop.f32.mrb[86].mxu0 }
 0x1d4   : > { %v1543_v32 = vsel %vm1530_vm8, %v1540_v17, %v1542_v23  ;;  %v1544_v33 = vrot.slane %v1510_v48, 7  ;;  %v2602_v52 = vpop.f32.mrb[87].mxu1  ;;  %v2634_v7 = vpop.f32.mrb[87].mxu0 }
 0x1d5   : > { %v1561_v34 = vadd.f32 %v1543_v32, %v3438_v24 }
 0x1d6   : > { %v1545_v35 = vsel %vm1530_vm8, %v1542_v23, %v1544_v33 }
 0x1d7   : > { %v3469_v36 = vadd.f32 %v1654_v8, %v1561_v34  ;;  %v1562_v10 = vadd.f32 %v1545_v35, %v3440_v27 }
 0x1d9   : > { %v3472_v60 = vadd.f32 %v1657_v31, %v1562_v10  ;;  %v1515_v0 = vpop.f32.mrb[88].mxu1  ;;  %v1890_v38 = vpop.f32.mrb[88].mxu0 }
 0x1da   : > { %v1546_v58 = vrot.slane %v1515_v0, 7  ;;  %v2605_v41 = vpop.f32.mrb[89].mxu1  ;;  %v2673_v42 = vpop.f32.mrb[89].mxu0 }
 0x1db   : > { %v1518_v43 = vpop.f32.mrb[90].mxu1  ;;  %v1892_v2 = vpop.f32.mrb[90].mxu0 }
 0x1dc   : > { %v1547_v44 = vsel %vm1530_vm8, %v1544_v33, %v1546_v58  ;;  %v2606_v45 = vpop.f32.mrb[91].mxu1  ;;  %v2674_v46 = vpop.f32.mrb[91].mxu0  ;;  %v1937_v49 = vrot.slane %v1892_v2, 2 }
 0x1dd   : > { %v1563_v24 = vadd.f32 %v1547_v44, %v3444_v54 }
 0x1df   : > { %v3476_v47 = vadd.f32 %v1662_v50, %v1563_v24 }
 0x1e1   : > { %v1743_v11 = vpop.f32.mrb[92].mxu1  ;;  %v1897_v27 = vpop.f32.mrb[92].mxu0 }
 0x1e2   : > { %v2645_v12 = vpop.f32.mrb[93].mxu1  ;;  %v1938_v56 = vrot.slane %v1897_v27, 2  ;;  %v2677_v57 = vpop.f32.mrb[93].mxu0 }
 0x1e3   : > { %v1745_v62 = vpop.f32.mrb[94].mxu1  ;;  %v1900_v61 = vpop.f32.mrb[94].mxu0 }
 0x1e4   : > { %v2646_v63 = vpop.f32.mrb[95].mxu1  ;;  %v1939_v1 = vsel %vm790_vm2, %v1937_v49, %v1938_v56  ;;  %v1940_v55 = vrot.slane %v1900_v61, 2  ;;  %v2678_v3 = vpop.f32.mrb[95].mxu0  ;;  %v1790_v54 = vrot.slane %v1745_v62, 1 }
 0x1e6   : > { %v1941_v4 = vsel %vm790_vm2, %v1938_v56, %v1940_v55 }
 0x1e9   : > { %v1750_v21 = vpop.f32.mrb[96].mxu1  ;;  %v1905_v59 = vpop.f32.mrb[96].mxu0 }
 0x1ea   : > { %v1791_v30 = vrot.slane %v1750_v21, 1  ;;  %v2649_v25 = vpop.f32.mrb[97].mxu1  ;;  %v1942_v8 = vrot.slane %v1905_v59, 2  ;;  %v2681_v28 = vpop.f32.mrb[97].mxu0 }
 0x1eb   : > { %v1753_v13 = vpop.f32.mrb[98].mxu1  ;;  %v1908_v14 = vpop.f32.mrb[98].mxu0 }
 0x1ec   : > { %v1792_v15 = vsel %vm642_vm3, %v1790_v54, %v1791_v30  ;;  %v1793_v31 = vrot.slane %v1753_v13, 1  ;;  %v2650_v16 = vpop.f32.mrb[99].mxu1  ;;  %v1943_v17 = vsel %vm790_vm2, %v1940_v55, %v1942_v8  ;;  %v1944_v37 = vrot.slane %v1908_v14, 2  ;;  %v2682_v9 = vpop.f32.mrb[99].mxu0 }
 0x1ed   : > { %v1815_v18 = vadd.f32 %v1792_v15, %v3448_v53 }
 0x1ee   : > { %v1794_v51 = vsel %vm642_vm3, %v1791_v30, %v1793_v31  ;;  %v1945_v39 = vsel %vm790_vm2, %v1942_v8, %v1944_v37 }
 0x1ef   : > { %v1962_v50 = vadd.f32 %v1939_v1, %v1815_v18  ;;  %v1816_v23 = vadd.f32 %v1794_v51, %v3453_v5 }
 0x1f1   : > { %v1977_v40 = vadd.f32 %v3483_v19, %v1962_v50  ;;  %v1963_v26 = vadd.f32 %v1941_v4, %v1816_v23  ;;  %v1758_v48 = vpop.f32.mrb[100].mxu1  ;;  %v1913_v29 = vpop.f32.mrb[100].mxu0 }
 0x1f2   : > { %v1795_v32 = vrot.slane %v1758_v48, 1  ;;  %v2653_v33 = vpop.f32.mrb[101].mxu1  ;;  %v1946_v52 = vrot.slane %v1913_v29, 2  ;;  %v2685_v7 = vpop.f32.mrb[101].mxu0 }
 0x1f3   : > { %vm1985_vm9 = vcmp.ge.f32.partialorder %v1977_v40, 0.0  ;;  %v1993_v53 = vmul.f32 0.1, %v1977_v40  ;;  %v1978_v5 = vadd.f32 %v3483_v19, %v1963_v26  ;;  %v1761_v34 = vpop.f32.mrb[102].mxu1  ;;  %v1916_v35 = vpop.f32.mrb[102].mxu0 }
 0x1f4   : > { %v1796_v10 = vsel %vm642_vm3, %v1793_v31, %v1795_v32  ;;  %v1797_v0 = vrot.slane %v1761_v34, 1  ;;  %v2654_v38 = vpop.f32.mrb[103].mxu1  ;;  %v1947_v58 = vsel %vm790_vm2, %v1944_v37, %v1946_v52  ;;  %v1948_v41 = vrot.slane %v1916_v35, 2  ;;  %v2686_v42 = vpop.f32.mrb[103].mxu0 }
 0x1f5   : > { %v2001_v43 = vsel %vm1985_vm9, %v1977_v40, %v1993_v53  ;;  %vm1986_vm10 = vcmp.ge.f32.partialorder %v1978_v5, 0.0  ;;  %v1994_v2 = vmul.f32 0.1, %v1978_v5  ;;  %v1817_v44 = vadd.f32 %v1796_v10, %v3456_v6 }
 0x1f6   : > { %2009 = vst.msk [vmem:[%s3493_s18] sm:$0xff] %vm433_vm1, %v2001_v43  ;;  %v1798_v45 = vsel %vm642_vm3, %v1795_v32, %v1797_v0  ;;  %v1949_v46 = vsel %vm790_vm2, %v1946_v52, %v1948_v41 }
 0x1f7   : > { %v2002_v24 = vsel %vm1986_vm10, %v1978_v5, %v1994_v2  ;;  %v1964_v49 = vadd.f32 %v1943_v17, %v1817_v44  ;;  %v1818_v11 = vadd.f32 %v1798_v45, %v3461_v20 }
 0x1f8   : > { %2010 = vst.msk [vmem:[%s3493_s18 + $0x8] sm:$0xff] %vm433_vm1, %v2002_v24 }
 0x1f9   : > { %v1979_v27 = vadd.f32 %v3483_v19, %v1964_v49  ;;  %v1965_v12 = vadd.f32 %v1945_v39, %v1818_v11  ;;  %v1766_v56 = vpop.f32.mrb[104].mxu1  ;;  %v1921_v57 = vpop.f32.mrb[104].mxu0 }
 0x1fa   : > { %v1799_v62 = vrot.slane %v1766_v56, 1  ;;  %v2657_v61 = vpop.f32.mrb[105].mxu1  ;;  %v1950_v6 = vrot.slane %v1921_v57, 2  ;;  %v2689_v63 = vpop.f32.mrb[105].mxu0 }
 0x1fb   : > { %vm1987_vm11 = vcmp.ge.f32.partialorder %v1979_v27, 0.0  ;;  %v1995_v1 = vmul.f32 0.1, %v1979_v27  ;;  %v1980_v55 = vadd.f32 %v3483_v19, %v1965_v12  ;;  %v1769_v3 = vpop.f32.mrb[106].mxu1  ;;  %v1924_v4 = vpop.f32.mrb[106].mxu0 }
 0x1fc   : > { %v1800_v20 = vsel %vm642_vm3, %v1797_v0, %v1799_v62  ;;  %v1801_v21 = vrot.slane %v1769_v3, 1  ;;  %v2658_v59 = vpop.f32.mrb[107].mxu1  ;;  %v1951_v54 = vsel %vm790_vm2, %v1948_v41, %v1950_v6  ;;  %v1952_v30 = vrot.slane %v1924_v4, 2  ;;  %v2690_v25 = vpop.f32.mrb[107].mxu0 }
 0x1fd   : > { %v2003_v8 = vsel %vm1987_vm11, %v1979_v27, %v1995_v1  ;;  %vm1988_vm12 = vcmp.ge.f32.partialorder %v1980_v55, 0.0  ;;  %v1996_v28 = vmul.f32 0.1, %v1980_v55  ;;  %v1819_v13 = vadd.f32 %v1800_v20, %v3464_v22 }
 0x1fe   : > { %2011 = vst.msk [vmem:[%s3493_s18 + $0x10] sm:$0xff] %vm433_vm1, %v2003_v8  ;;  %v1802_v14 = vsel %vm642_vm3, %v1799_v62, %v1801_v21  ;;  %v1953_v15 = vsel %vm790_vm2, %v1950_v6, %v1952_v30 }
 0x1ff   : > { %v2004_v31 = vsel %vm1988_vm12, %v1980_v55, %v1996_v28  ;;  %v1966_v16 = vadd.f32 %v1947_v58, %v1819_v13  ;;  %v1820_v17 = vadd.f32 %v1802_v14, %v3469_v36 }
 0x200   : > { %2012 = vst.msk [vmem:[%s3493_s18 + $0x18] sm:$0xff] %vm433_vm1, %v2004_v31 }
 0x201   : > { %v1981_v37 = vadd.f32 %v3483_v19, %v1966_v16  ;;  %v1967_v9 = vadd.f32 %v1949_v46, %v1820_v17  ;;  %v1774_v18 = vpop.f32.mrb[108].mxu1 }
 0x202   : > { %v1803_v51 = vrot.slane %v1774_v18, 1  ;;  %v2661_v39 = vpop.f32.mrb[109].mxu1 }
 0x203   : > { %vm1989_vm13 = vcmp.ge.f32.partialorder %v1981_v37, 0.0  ;;  %v1997_v22 = vmul.f32 0.1, %v1981_v37  ;;  %v1982_v50 = vadd.f32 %v3483_v19, %v1967_v9  ;;  %v1777_v23 = vpop.f32.mrb[110].mxu1 }
 0x204   : > { %v1804_v40 = vsel %vm642_vm3, %v1801_v21, %v1803_v51  ;;  %v1805_v26 = vrot.slane %v1777_v23, 1  ;;  %v2662_v48 = vpop.f32.mrb[111].mxu1 }
 0x205   : > { %v2005_v36 = vsel %vm1989_vm13, %v1981_v37, %v1997_v22  ;;  %vm1990_vm14 = vcmp.ge.f32.partialorder %v1982_v50, 0.0  ;;  %v1998_v29 = vmul.f32 0.1, %v1982_v50  ;;  %v1821_v32 = vadd.f32 %v1804_v40, %v3472_v60 }
 0x206   : > { %2013 = vst.msk [vmem:[%s3493_s18 + $0x20] sm:$0xff] %vm433_vm1, %v2005_v36  ;;  %v1806_v33 = vsel %vm642_vm3, %v1803_v51, %v1805_v26 }
 0x207   : > { %v2006_v52 = vsel %vm1990_vm14, %v1982_v50, %v1998_v29  ;;  %v1968_v7 = vadd.f32 %v1951_v54, %v1821_v32  ;;  %v1822_v53 = vadd.f32 %v1806_v33, %v3476_v47 }
 0x208   : > { %2014 = vst.msk [vmem:[%s3493_s18 + $0x28] sm:$0xff] %vm433_vm1, %v2006_v52 }
 0x209   : > { %v1983_v5 = vadd.f32 %v3483_v19, %v1968_v7  ;;  %v1969_v34 = vadd.f32 %v1953_v15, %v1822_v53 }
 0x20b   : > { %vm1991_vm15 = vcmp.ge.f32.partialorder %v1983_v5, 0.0  ;;  %v1999_v35 = vmul.f32 0.1, %v1983_v5  ;;  %v1984_v10 = vadd.f32 %v3483_v19, %v1969_v34 }
 0x20d   : > { %v2007_v0 = vsel %vm1991_vm15, %v1983_v5, %v1999_v35  ;;  %vm1992_vm0 = vcmp.ge.f32.partialorder %v1984_v10, 0.0  ;;  %v2000_v60 = vmul.f32 0.1, %v1984_v10 }
 0x20e   : > { %2015 = vst.msk [vmem:[%s3493_s18 + $0x30] sm:$0xff] %vm433_vm1, %v2007_v0 }
 0x20f   : > { %v2008_v38 = vsel %vm1992_vm0, %v1984_v10, %v2000_v60 }
 0x210   : > { %2016 = vst.msk [vmem:[%s3493_s18 + $0x38] sm:$0xff] %vm433_vm1, %v2008_v38 }
 0x211 PF: > { %s16_s17 = sadd.s32 1, %s2886_s17   ;;  %s3556_s15 = smov %s2882_s16 }
 0x212   : > { %p13_p6 = scmp.ge.s32.totalorder %s16_s17, 4   ;;  %s3557_s16 = smov %s3559_s19 }
 0x214   :  { %15 = sbr.rel (!%p13_p6) target bundleno = 3 (0x3), region = 90 }
 0x21b   :  { %2053 = vsyncpa [#allocation3], 1 }
 0x21c   :  { %2055 = vsyncpa [#allocation3 + $0x1], 1 }
 0x21d   :  { %2056 = vsyncpa [#allocation5], 1 }

// kernel: scale_discriminator_forward.9
= control target key start
LH: loop header
LB: loop body
LE: loop exit
PB: predicated region body
PF: predicated region fallthrough
CT: control target
= control target key end

     0   :  { %s3338_s0 = inlined_call_operand.vmem [shape: bf16[2,32,256], index: 0, kind: input, shape index: {}, may-alias: {0,1}]   ;;  %s3339_s1 = inlined_call_operand.vmem [shape: bf16[2,32,256], index: 1, kind: input, shape index: {}, may-alias: {0,1}]   ;;  %s3340_s2 = inlined_call_operand.hbm [shape: bf16[2,11,128,128], index: 2, kind: input, shape index: {}]   ;;  %s3341_s3 = inlined_call_operand.hbm [shape: f32[2,1,128], index: 3, kind: input, shape index: {}]   ;;  %s3342_s4 = inlined_call_operand.vmem [shape: f32[2,16,256], index: 4, kind: output, shape index: {}]  }
   0x1   :  { %3346 = sst [smem:[#allocation14_spill]] %s3338_s0 }
   0x2   :  { %9 = vsyncpa [#allocation5], 0 }
   0x3   :  { %11 = vsyncpa [#allocation5 + $0x1], 0 }
   0x4   :  { %12 = vsyncpa [#allocation7], 0 }
   0x5   :  { %14 = vsyncpa [#allocation7 + $0x1], 0  ;;  %s2968_s15 = smov 0   ;;  %s2970_s16 = smov 0  }
   0x6   :  { %s2972_s17 = smov 0   ;;  %s2974_s18 = smov 0  }
   0x7   :  { %s2976_s19 = smov 0   ;;  %s2978_s20 = smov 0  }
   0x8   :  { %s2980_s21 = smov 0   ;;  %s2982_s22 = smov 0  }
   0x9   :  { %s2984_s23 = smov 0   ;;  %s2986_s24 = smov 0  }
   0xa LB: > { %s2012_s25 = sadd.s32 4294967295, %s2937_s24   ;;  %s35_s26 = sadd.s32 1, %s2929_s22  ;;  %s2937_s24 = sphi %s2986_s24, %s20_s24   ;;  %s2933_s23 = sphi %s2984_s23, %s3368_s23   ;;  %s2929_s22 = sphi %s2982_s22, %s3367_s22   ;;  %s2925_s21 = sphi %s2980_s21, %s3366_s21   ;;  %s2921_s20 = sphi %s2978_s20, %s3365_s20   ;;  %s2917_s19 = sphi %s2976_s19, %s3364_s19   ;;  %s2913_s18 = sphi %s2974_s18, %s3363_s18   ;;  %s2909_s17 = sphi %s2972_s17, %s3362_s17   ;;  %s2905_s16 = sphi %s2970_s16, %s3361_s16   ;;  %s2901_s15 = sphi %s2968_s15, %s3360_s15  }
   0xb   : > { %p37_p0 = scmp.ge.s32.totalorder %s35_s26, 2  ;;  %s39_s27 = sadd.s32 1, %s2933_s23 }
   0xc   : > { %s50_s28 = sadd.s32 1, %s2917_s19  ;;  %p57_p1 = scmp.ne.s32.totalorder %s2917_s19, %s2913_s18 }
   0xd   : > { %s3370_s26 = smov (%p37_p0, %s35_s26), 0  ;;  %s3372_s27 = smov (!%p37_p0, %s39_s27), %s2933_s23 }
   0xe   : > { %3347 = sst [smem:[#allocation11_spill]] %s3370_s26  ;;  %s46_s29 = ssub.s32 %s2929_s22, %s3370_s26 }
   0xf   : > { %p58_p2 = scmp.eq.s32.totalorder %s2937_s24, 0  ;;  %p41_p3 = scmp.ge.s32.totalorder %s3372_s27, 2 }
  0x10   : > { %p106_p4 = scmp.eq.s32.totalorder %s46_s29, 0  ;;  %s108_s5 = sadd.s32 1, %s2909_s17 }
  0x11   : > { %p3033_p5 = por %p58_p2, %p57_p1  ;;  %s3374_s27 = smov (%p41_p3, %s3372_s27), 0 }
  0x12   : > { %3349 = sst [smem:[#allocation12_spill]] %s3374_s27  ;;  %s43_s7 = ssub.s32 %s2933_s23, %s3374_s27 }
  0x13   : > { %s3041_s6 = scalar_select %p106_p4, %s2909_s17, %s108_s5  }
  0x14   : > { %p115_p6 = scmp.ne.s32.totalorder %s2909_s17, %s2905_s16  ;;  %s47_s8 = sor.u32 %s46_s29, %s43_s7 }
  0x15   : > { %p121_p7 = scmp.ne.s32.totalorder %s2905_s16, %s2901_s15  ;;  %p48_p8 = scmp.eq.s32.totalorder %s47_s8, 0 }
  0x16   : > { %p3049_p9 = por %p115_p6, %p58_p2  ;;  %p122_p10 = scmp.eq.s32.totalorder %s2012_s25, 0 }
  0x17   : > { %p175_p11 = scmp.eq.s32.totalorder %s2012_s25, 3  ;;  %p2015_p0 = scmp.ge.s32.totalorder %s2937_s24, 4 }
  0x18   : > { %s3054_s10 = scalar_select %p48_p8, %s2917_s19, %s50_s28  }
  0x19   : > { %p3056_p12 = por %p122_p10, %p121_p7  ;;  %p3063_p13 = por %p175_p11, %p57_p1 }
  0x1a   : > { %3351 = sst [smem:[#allocation13_spill]] %s3054_s10  ;;  %197 = sbr.rel (%p2015_p0) target bundleno = 101 (0x65), region = 16 }
  0x1b   : > { %s3352_s11 = scalar_select %p3056_p12, 1, 0 }
  0x1c   : > { %s3353_s12 = scalar_select %p3063_p13, 1, 0 }
  0x21   : > { %200 = sbr.rel (!%p3033_p5) target bundleno = 44 (0x2c), region = 20  ;;  %s202_s13 = sand.u32 (%p3033_p5), 1, %s2917_s19  }
  0x22   : > { %s2017_s14 = sshll.u32 (%p3033_p5), %s2933_s23, 3  ;;  %s2016_s15 = sshll.u32 (%p3033_p5), %s202_s13, 3 }
  0x23   : > { %s209_s25 = sadd.s32 (%p3033_p5), %s2929_s22, %s2017_s14  ;;  %s3354_s0 = sld [smem:[#allocation14_spill]] (%p3033_p5) }
  0x24   : > { %s2018_s28 = sshll.u32 (%p3033_p5), %s209_s25, 2  ;;  %s204_s8 = scalar_lea.vmem (%p3033_p5), [#allocation2], %s2016_s15 }
  0x29   : > { %s211_s7 = scalar_lea.vmem %s3354_s0, %s2018_s28 }
  0x2a   : > { %v227_v0 = vld [vmem:[%s211_s7] sm:$0xf]  ;;  %v229_v1 = vld [vmem:[%s211_s7 + $0x8] sm:$0xf] }
  0x2b   : > { %228 = vst [vmem:[%s204_s8] sm:$0xf] %v227_v0  ;;  %230 = vst [vmem:[%s204_s8 + $0x4] sm:$0xf] %v229_v1 }
  0x2c PF: > { %257 = sbr.rel (!%p3033_p5) target bundleno = 51 (0x33), region = 61  ;;  %s259_s27 = sand.u32 (%p3033_p5), 1, %s2917_s19  }
  0x2d   : > { %s2020_s13 = sshll.u32 (%p3033_p5), %s2933_s23, 3  ;;  %s2019_s14 = sshll.u32 (%p3033_p5), %s259_s27, 3 }
  0x2e   : > { %s1898_s25 = sadd.s32 (%p3033_p5), %s2929_s22, %s2020_s13  ;;  %s261_s15 = scalar_lea.vmem (%p3033_p5), [#allocation3], %s2019_s14 }
  0x2f   : > { %s2021_s26 = sshll.u32 (%p3033_p5), %s1898_s25, 2 }
  0x30   : > { %s1900_s28 = scalar_lea.vmem (%p3033_p5), %s3339_s1, %s2021_s26 }
  0x31   : > { %v2022_v2 = vld [vmem:[%s1900_s28 + $0x10] sm:$0xf] (%p3033_p5)  ;;  %v2023_v3 = vld [vmem:[%s1900_s28 + $0x18] sm:$0xf] (%p3033_p5) }
  0x32   : > { %286 = vst [vmem:[%s261_s15] sm:$0xf] (%p3033_p5), %v2022_v2  ;;  %288 = vst [vmem:[%s261_s15 + $0x4] sm:$0xf] (%p3033_p5), %v2023_v3 }
  0x33 PF: > { %s3085_s30 = sand.u32 1, %s2909_s17   ;;  %s2617_s27 = smul.u32 11264, %s2929_s22 }
  0x34   : > { %s2616_s5 = smul.u32 704, %s3085_s30  ;;  %s317_s14 = scalar_lea.sflag [#allocation5], %s3085_s30 }
  0x35   : > { %s3092_s10 = scalar_lea.hbm %s3340_s2, %s2617_s27  ;;  %s2799_s15 = scalar_lea.hbm %s3340_s2, 22528 }
  0x36   : > { %s320_s26 = scalar_lea.vmem [#allocation4], %s2616_s5  ;;  %s2795_s25 = scalar_lea.hbm %s3092_s10, 11264 }
  0x37   : > { %s327_s13 = sshll.u32 %s320_s26, 4  ;;  %p2796_p1 = scmp.ne.s32.totalorder %s3092_s10, %s2795_s25  ;;  %s3094_s13 = int_to_ptr.vmem [resolvable:$true] %s327_s13 }
  0x38   : > { %p2800_p4 = scmp.lt.u32.totalorder %s3092_s10, %s3340_s2  ;;  %p2801_p5 = scmp.lt.u32.totalorder %s2799_s15, %s2795_s25 }
  0x39   : > { %p2797_p2 = pnand %p2796_p1, %p3049_p9  ;;  %p2803_p7 = scmp.lt.u32.totalorder %s2795_s25, %s3092_s10 }
  0x3a   : > { %p2802_p6 = por %p2801_p5, %p2800_p4 }
  0x3b   : > { %p2798_p3 = pneg %p2797_p2 }
  0x3c   : > { %p2804_p8 = por %p2803_p7, %p2802_p6 }
  0x3e   : > { %p2805_p10 = pnand %p2804_p8, %p2798_p3 }
  0x40   : > { %2808 = shalt.err (!%p2805_p10)
}
  0x41   : > { %s2809_s5 = scalar_lea.vmem %s3094_s13, 11264  ;;  %s2939_s8 = smov [#allocation4]  }
  0x42   : > { %p2810_p11 = scmp.ne.s32.totalorder %s3094_s13, %s2809_s5  ;;  %s2813_s26 = sshll.u32 %s2939_s8, 4  ;;  %s2814_s26 = int_to_ptr.vmem [resolvable:$false] %s2813_s26 }
  0x43   : > { %s2815_s29 = scalar_lea.vmem %s2814_s26, 22528  ;;  %p2816_p2 = scmp.lt.s32.totalorder %s3094_s13, %s2814_s26 }
  0x44   : > { %p2811_p0 = pnand %p2810_p11, %p3049_p9  ;;  %p2817_p13 = scmp.lt.s32.totalorder %s2815_s29, %s2809_s5 }
  0x46   : > { %p2812_p1 = pneg %p2811_p0  ;;  %p2818_p4 = por %p2817_p13, %p2816_p2 }
  0x48   : > { %p2819_p5 = pnand %p2818_p4, %p2812_p1 }
  0x4a   : > { %2822 = shalt.err (!%p2819_p5)
}
  0x4b   : > { %s2940_s25 = smov 64   ;;  %s2941_s28 = smov 4  }
  0x4c   : > { %2619 = dma.hbm_to_vmem [thread:$0]  (%p3049_p9), %s3092_s10, 11264, %s3094_s13, %s317_s14, %s2940_s25, %s2940_s25, %s2941_s28  }
  0x4d   : > { %s2025_s15 = sshll.u32 %s2929_s22, 4  ;;  %s340_s27 = scalar_lea.vmem [#allocation6], %s3085_s30 }
  0x4e   : > { %s347_s7 = sshll.u32 %s340_s27, 4  ;;  %s3125_s26 = scalar_lea.hbm %s3341_s3, %s2025_s15  ;;  %s348_s7 = int_to_ptr.vmem [resolvable:$true] %s347_s7 }
  0x4f   : > { %s338_s29 = scalar_lea.sflag [#allocation7], %s3085_s30  ;;  %s2823_s0 = scalar_lea.hbm %s3125_s26, 16 }
  0x50   : > { %p2824_p13 = scmp.ne.s32.totalorder %s3125_s26, %s2823_s0  ;;  %s2827_s14 = scalar_lea.hbm %s3341_s3, 32 }
  0x51   : > { %p2828_p7 = scmp.lt.u32.totalorder %s3125_s26, %s3341_s3  ;;  %p2829_p8 = scmp.lt.u32.totalorder %s2827_s14, %s2823_s0 }
  0x52   : > { %p2825_p3 = pnand %p2824_p13, %p3049_p9  ;;  %p2831_p11 = scmp.lt.u32.totalorder %s2823_s0, %s3125_s26 }
  0x53   : > { %p2830_p10 = por %p2829_p8, %p2828_p7 }
  0x54   : > { %p2826_p6 = pneg %p2825_p3 }
  0x55   : > { %p2832_p0 = por %p2831_p11, %p2830_p10 }
  0x57   : > { %p2833_p1 = pnand %p2832_p0, %p2826_p6 }
  0x59   : > { %2836 = shalt.err (!%p2833_p1)
}
  0x5a   : > { %s2837_s30 = scalar_lea.vmem %s348_s7, 16  ;;  %s2942_s15 = smov [#allocation6]  }
  0x5b   : > { %p2838_p2 = scmp.ne.s32.totalorder %s348_s7, %s2837_s30  ;;  %s2841_s27 = sshll.u32 %s2942_s15, 4  ;;  %s2842_s27 = int_to_ptr.vmem [resolvable:$false] %s2841_s27 }
  0x5c   : > { %s2843_s5 = scalar_lea.vmem %s2842_s27, 32  ;;  %p2844_p13 = scmp.lt.s32.totalorder %s348_s7, %s2842_s27 }
  0x5d   : > { %p2839_p4 = pnand %p2838_p2, %p3049_p9  ;;  %p2845_p3 = scmp.lt.s32.totalorder %s2843_s5, %s2837_s30 }
  0x5f   : > { %p2840_p5 = pneg %p2839_p4  ;;  %p2846_p12 = por %p2845_p3, %p2844_p13 }
  0x61   : > { %p2847_p7 = pnand %p2846_p12, %p2840_p5 }
  0x63   : > { %2850 = shalt.err (!%p2847_p7)
}
  0x64   : > { %2620 = dma.hbm_to_vmem [thread:$0]  (%p3049_p9), %s3125_s26, 16, %s348_s7, %s338_s29  }
  0x65 PF: > { %p2026_p6 = scmp.ge.s32.totalorder %s2937_s24, 1  ;;  %p352_p8 = scmp.lt.s32.totalorder %s2937_s24, 5 }
  0x67   : > { %p353_p10 = pnand %p2026_p6, %p352_p8 }
  0x68   : > { %s359_s0 = sand.u32 (!%p353_p10), 1, %s2913_s18   ;;  %s3149_s8 = sand.u32 (!%p353_p10), 1, %s2905_s16  }
  0x69   : > { %356 = sbr.rel (%p353_p10) target bundleno = 542 (0x21e), region = 110  ;;  %s3153_s9 = sshll.u32 (!%p353_p10), %s359_s0, 3 }
  0x6a   : > { %s2618_s7 = smul.u32 (!%p353_p10), 704, %s3149_s8  ;;  %s361_s26 = scalar_lea.vmem (!%p353_p10), [#allocation2], %s3153_s9 }
  0x6b   : > { %s368_s29 = scalar_lea.vmem (!%p353_p10), [#allocation3], %s3153_s9  ;;  %s373_s10 = scalar_lea.sflag (!%p353_p10), [#allocation5], %s3149_s8 }
  0x6c   : > { %s3159_s13 = scalar_lea.vmem (!%p353_p10), [#allocation4], %s2618_s7  ;;  %p3355_p9 = scmp.ne.s32.totalorder (!%p353_p10), %s3352_s11, 0 }
  0x70   : > { %2892 = dma.done.wait (%p3355_p9), %s373_s10, 11264  }
  0x71   : > { %2894 = vsyncadd (%p3355_p9), %s373_s10, 4294956032  ;;  %s382_s14 = scalar_lea.sflag [#allocation7], %s3149_s8  ;;  %s384_s25 = scalar_lea.vmem [#allocation6], %s3149_s8 }
  0x72   : > { %2896 = dma.done.wait (%p3355_p9), %s382_s14, 16  }
  0x73   : > { %2898 = vsyncadd (%p3355_p9), %s382_s14, 4294967280  ;;  %v2705_v4 = vld [vmem:[%s3159_s13] sm:$0xff]   ;;  %v2707_v6 = vld [vmem:[%s3159_s13 + $0x8] sm:$0xff]   ;;  %vm670_vm0 = vcmask 1046528   ;;  %vm796_vm1 = vcmask 1045504   ;;  %vm922_vm2 = vcmask 1044480  }
  0x74   : > { %v2706_v5 = vld [vmem:[%s3159_s13 + $0x40] sm:$0xff]   ;;  %2396 = vmatprep.subr.bf16.mxu0 %v2705_v4  ;;  %v2708_v7 = vld [vmem:[%s3159_s13 + $0x48] sm:$0xff]   ;;  %v2709_v8 = vld [vmem:[%s3159_s13 + $0x10] sm:$0xff]   ;;  %vm1048_vm3 = vcmask 1043456   ;;  %vm1174_vm4 = vcmask 1042432   ;;  %vm1300_vm5 = vcmask 1041408  }
  0x75   : > { %2416 = vmatprep.subr.bf16.mxu1 %v2706_v5  ;;  %2397 = vmatpush3.bf16.msra.mxu0 %v2705_v4  ;;  %v2710_v9 = vld [vmem:[%s3159_s13 + $0x50] sm:$0xff]   ;;  %v2711_v10 = vld [vmem:[%s3159_s13 + $0x18] sm:$0xff]   ;;  %v2713_v12 = vld [vmem:[%s3159_s13 + $0x20] sm:$0xff]   ;;  %vm1426_vm6 = vcmask 1040384   ;;  %s2029_s11 = sshll.u32 %s359_s0, 4  ;;  %p3356_p12 = scmp.ne.s32.totalorder %s3353_s12, 0 }
  0x76   : > { %2417 = vmatpush3.bf16.msra.mxu1 %v2706_v5  ;;  %2398 = vmatprep.subr.bf16.mxu0 %v2707_v6  ;;  %v2712_v11 = vld [vmem:[%s3159_s13 + $0x58] sm:$0xff]   ;;  %v2714_v13 = vld [vmem:[%s3159_s13 + $0x60] sm:$0xff]   ;;  %v2715_v14 = vld [vmem:[%s3159_s13 + $0x28] sm:$0xff]   ;;  %s419_s28 = scalar_lea.vmem [#allocation8], %s2029_s11  ;;  %s2282_s30 = sshll.u32 (%p3356_p12), %s2925_s21, 2 }
  0x77   : > { %2418 = vmatprep.subr.bf16.mxu1 %v2708_v7  ;;  %v3184_v15 = vld [vmem:[%s361_s26] sm:$0xff]   ;;  %v2717_v17 = vld [vmem:[%s3159_s13 + $0x30] sm:$0xff]   ;;  %v2719_v19 = vld [vmem:[%s3159_s13 + $0x38] sm:$0xff]   ;;  %s1828_s18 = sadd.s32 (%p3356_p12), %s2921_s20, %s2282_s30 }
  0x78   : > { %v2716_v16 = vld [vmem:[%s3159_s13 + $0x68] sm:$0xff]   ;;  %2412 = vmatprep.mubr.bf16.mxu0 %v3184_v15  ;;  %2432 = vmatprep.mubr.bf16.mxu1 %v3184_v15  ;;  %v2718_v18 = vld [vmem:[%s3159_s13 + $0x70] sm:$0xff]   ;;  %v2720_v20 = vld [vmem:[%s3159_s13 + $0x78] sm:$0xff]   ;;  %s2283_s15 = sshll.u32 (%p3356_p12), %s1828_s18, 3 }
  0x79   : > { %2399 = vmatpush3.bf16.msra.mxu0 %v2707_v6  ;;  %v2723_v21 = vld [vmem:[%s3159_s13 + $0x80] sm:$0xff]   ;;  %v3197_v23 = vld [vmem:[%s368_s29] sm:$0xff]   ;;  %v2725_v24 = vld [vmem:[%s3159_s13 + $0x88] sm:$0xff]   ;;  %s1830_s0 = scalar_lea.vmem (%p3356_p12), %s3342_s4, %s2283_s15 }
  0x7a   : > { %2419 = vmatpush3.bf16.msra.mxu1 %v2708_v7  ;;  %2400 = vmatprep.subr.bf16.mxu0 %v2709_v8  ;;  %v2724_v22 = vld [vmem:[%s3159_s13 + $0xc0] sm:$0xff]   ;;  %v2726_v25 = vld [vmem:[%s3159_s13 + $0xc8] sm:$0xff]   ;;  %v2727_v26 = vld [vmem:[%s3159_s13 + $0x90] sm:$0xff]  }
  0x7b   : > { %2420 = vmatprep.subr.bf16.mxu1 %v2710_v9  ;;  %v2728_v27 = vld [vmem:[%s3159_s13 + $0xd0] sm:$0xff]   ;;  %v2729_v28 = vld [vmem:[%s3159_s13 + $0x98] sm:$0xff]   ;;  %v2731_v30 = vld [vmem:[%s3159_s13 + $0xa0] sm:$0xff]  }
  0x7c   : > { %v2730_v29 = vld [vmem:[%s3159_s13 + $0xd8] sm:$0xff]   ;;  %v2732_v31 = vld [vmem:[%s3159_s13 + $0xe0] sm:$0xff]   ;;  %v2733_v32 = vld [vmem:[%s3159_s13 + $0xa8] sm:$0xff]  }
  0x7d   : > { %2401 = vmatpush3.bf16.msra.mxu0 %v2709_v8  ;;  %v2734_v33 = vld [vmem:[%s3159_s13 + $0xe8] sm:$0xff]   ;;  %v2735_v34 = vld [vmem:[%s3159_s13 + $0xb0] sm:$0xff]   ;;  %v2737_v36 = vld [vmem:[%s3159_s13 + $0xb8] sm:$0xff]  }
  0x7e   : > { %2421 = vmatpush3.bf16.msra.mxu1 %v2710_v9  ;;  %2402 = vmatprep.subr.bf16.mxu0 %v2711_v10  ;;  %v2736_v35 = vld [vmem:[%s3159_s13 + $0xf0] sm:$0xff]   ;;  %v2738_v37 = vld [vmem:[%s3159_s13 + $0xf8] sm:$0xff]   ;;  %v2739_v38 = vld [vmem:[%s3159_s13 + $0x100] sm:$0xff]  }
  0x7f   : > { %2422 = vmatprep.subr.bf16.mxu1 %v2712_v11  ;;  %v2740_v39 = vld [vmem:[%s3159_s13 + $0x140] sm:$0xff]   ;;  %v2741_v40 = vld [vmem:[%s3159_s13 + $0x108] sm:$0xff]   ;;  %v2743_v42 = vld [vmem:[%s3159_s13 + $0x110] sm:$0xff]  }
  0x80   : > { %v2742_v41 = vld [vmem:[%s3159_s13 + $0x148] sm:$0xff]   ;;  %v2744_v43 = vld [vmem:[%s3159_s13 + $0x150] sm:$0xff]   ;;  %v2745_v44 = vld [vmem:[%s3159_s13 + $0x118] sm:$0xff]  }
  0x81   : > { %2403 = vmatpush3.bf16.msra.mxu0 %v2711_v10  ;;  %v2746_v45 = vld [vmem:[%s3159_s13 + $0x158] sm:$0xff]   ;;  %v2747_v46 = vld [vmem:[%s3159_s13 + $0x120] sm:$0xff]   ;;  %v2749_v48 = vld [vmem:[%s3159_s13 + $0x128] sm:$0xff]  }
  0x82   : > { %2423 = vmatpush3.bf16.msra.mxu1 %v2712_v11  ;;  %2404 = vmatprep.subr.bf16.mxu0 %v2713_v12  ;;  %v2748_v47 = vld [vmem:[%s3159_s13 + $0x160] sm:$0xff]   ;;  %v2750_v49 = vld [vmem:[%s3159_s13 + $0x168] sm:$0xff]   ;;  %v2751_v50 = vld [vmem:[%s3159_s13 + $0x130] sm:$0xff]  }
  0x83   : > { %2424 = vmatprep.subr.bf16.mxu1 %v2714_v13  ;;  %v2752_v51 = vld [vmem:[%s3159_s13 + $0x170] sm:$0xff]   ;;  %v2753_v52 = vld [vmem:[%s3159_s13 + $0x138] sm:$0xff]   ;;  %v2755_v54 = vld [vmem:[%s3159_s13 + $0x180] sm:$0xff]  }
  0x84   : > { %v2754_v53 = vld [vmem:[%s3159_s13 + $0x178] sm:$0xff]   ;;  %v2756_v55 = vld [vmem:[%s3159_s13 + $0x1c0] sm:$0xff]   ;;  %v2757_v56 = vld [vmem:[%s3159_s13 + $0x188] sm:$0xff]  }
  0x85   : > { %2405 = vmatpush3.bf16.msra.mxu0 %v2713_v12  ;;  %v2758_v57 = vld [vmem:[%s3159_s13 + $0x1c8] sm:$0xff]   ;;  %v2759_v58 = vld [vmem:[%s3159_s13 + $0x190] sm:$0xff]   ;;  %v2761_v60 = vld [vmem:[%s3159_s13 + $0x198] sm:$0xff]  }
  0x86   : > { %2425 = vmatpush3.bf16.msra.mxu1 %v2714_v13  ;;  %2406 = vmatprep.subr.bf16.mxu0 %v2715_v14  ;;  %v2760_v59 = vld [vmem:[%s3159_s13 + $0x1d0] sm:$0xff]   ;;  %v2762_v61 = vld [vmem:[%s3159_s13 + $0x1d8] sm:$0xff]   ;;  %v2763_v62 = vld [vmem:[%s3159_s13 + $0x1a0] sm:$0xff]  }
  0x87   : > { %2426 = vmatprep.subr.bf16.mxu1 %v2716_v16  ;;  %v2764_v63 = vld [vmem:[%s3159_s13 + $0x1e0] sm:$0xff]   ;;  %v2765_v0 = vld [vmem:[%s3159_s13 + $0x1a8] sm:$0xff]   ;;  %v2767_v2 = vld [vmem:[%s3159_s13 + $0x1b0] sm:$0xff]  }
  0x88   : > { %v2766_v1 = vld [vmem:[%s3159_s13 + $0x1e8] sm:$0xff]   ;;  %v2768_v3 = vld [vmem:[%s3159_s13 + $0x1f0] sm:$0xff]   ;;  %v2769_v4 = vld [vmem:[%s3159_s13 + $0x1b8] sm:$0xff]  }
  0x89   : > { %2407 = vmatpush3.bf16.msra.mxu0 %v2715_v14  ;;  %v2770_v5 = vld [vmem:[%s3159_s13 + $0x1f8] sm:$0xff]   ;;  %v2771_v6 = vld [vmem:[%s3159_s13 + $0x200] sm:$0xff]   ;;  %v2773_v8 = vld [vmem:[%s3159_s13 + $0x208] sm:$0xff]  }
  0x8a   : > { %2427 = vmatpush3.bf16.msra.mxu1 %v2716_v16  ;;  %2408 = vmatprep.subr.bf16.mxu0 %v2717_v17  ;;  %v2772_v7 = vld [vmem:[%s3159_s13 + $0x240] sm:$0xff]   ;;  %v2774_v9 = vld [vmem:[%s3159_s13 + $0x248] sm:$0xff]   ;;  %v2775_v10 = vld [vmem:[%s3159_s13 + $0x210] sm:$0xff]  }
  0x8b   : > { %2428 = vmatprep.subr.bf16.mxu1 %v2718_v18  ;;  %v2776_v11 = vld [vmem:[%s3159_s13 + $0x250] sm:$0xff]   ;;  %v2777_v12 = vld [vmem:[%s3159_s13 + $0x218] sm:$0xff]   ;;  %v2779_v14 = vld [vmem:[%s3159_s13 + $0x220] sm:$0xff]  }
  0x8c   : > { %v2778_v13 = vld [vmem:[%s3159_s13 + $0x258] sm:$0xff]   ;;  %v2780_v16 = vld [vmem:[%s3159_s13 + $0x260] sm:$0xff]  }
  0x8d   : > { %2409 = vmatpush3.bf16.msra.mxu0 %v2717_v17  ;;  %v2781_v17 = vld [vmem:[%s3159_s13 + $0x228] sm:$0xff]  }
  0x8e   : > { %2429 = vmatpush3.bf16.msra.mxu1 %v2718_v18  ;;  %2410 = vmatprep.subr.bf16.mxu0 %v2719_v19  ;;  %v2782_v18 = vld [vmem:[%s3159_s13 + $0x268] sm:$0xff]  }
  0x8f   : > { %2430 = vmatprep.subr.bf16.mxu1 %v2720_v20 }
  0x91   : > { %2411 = vmatpush3.bf16.msra.mxu0 %v2719_v19  ;;  %v2783_v19 = vld [vmem:[%s3159_s13 + $0x230] sm:$0xff]  }
  0x92   : > { %2431 = vmatpush3.bf16.msra.mxu1 %v2720_v20  ;;  %2436 = vmatprep.subr.bf16.mxu0 %v2723_v21  ;;  %v2784_v20 = vld [vmem:[%s3159_s13 + $0x270] sm:$0xff]  }
  0x93   : > { %2456 = vmatprep.subr.bf16.mxu1 %v2724_v22 }
  0x94   : > { %2413 = vmatmul.mubr.bf16.vlgmr.msra.gmra.mrb[0].mxu0 %v3197_v23 }
  0x95   : > { %2433 = vmatmul.mubr.bf16.vlgmr.msra.gmra.mrb[0].mxu1 %v3197_v23  ;;  %2437 = vmatpush3.bf16.msra.mxu0 %v2723_v21  ;;  %v2785_v21 = vld [vmem:[%s3159_s13 + $0x238] sm:$0xff]  }
  0x96   : > { %2457 = vmatpush3.bf16.msra.mxu1 %v2724_v22  ;;  %2438 = vmatprep.subr.bf16.mxu0 %v2725_v24  ;;  %v2786_v22 = vld [vmem:[%s3159_s13 + $0x278] sm:$0xff]  }
  0x97   : > { %2458 = vmatprep.subr.bf16.mxu1 %v2726_v25  ;;  %2452 = vmatprep.mubr.bf16.mxu0 %v3184_v15 }
  0x98   : > { %2472 = vmatprep.mubr.bf16.mxu1 %v3184_v15 }
  0x99   : > { %2439 = vmatpush3.bf16.msra.mxu0 %v2725_v24  ;;  %v2787_v24 = vld [vmem:[%s3159_s13 + $0x280] sm:$0xff]  }
  0x9a   : > { %2459 = vmatpush3.bf16.msra.mxu1 %v2726_v25  ;;  %2440 = vmatprep.subr.bf16.mxu0 %v2727_v26  ;;  %v2788_v25 = vld [vmem:[%s3159_s13 + $0x288] sm:$0xff]  }
  0x9b   : > { %2460 = vmatprep.subr.bf16.mxu1 %v2728_v27 }
  0x9d   : > { %2441 = vmatpush3.bf16.msra.mxu0 %v2727_v26  ;;  %v2789_v26 = vld [vmem:[%s3159_s13 + $0x290] sm:$0xff]  }
  0x9e   : > { %2461 = vmatpush3.bf16.msra.mxu1 %v2728_v27  ;;  %2442 = vmatprep.subr.bf16.mxu0 %v2729_v28  ;;  %v2790_v27 = vld [vmem:[%s3159_s13 + $0x298] sm:$0xff]  }
  0x9f   : > { %2462 = vmatprep.subr.bf16.mxu1 %v2730_v29 }
  0xa1   : > { %2443 = vmatpush3.bf16.msra.mxu0 %v2729_v28  ;;  %v2791_v28 = vld [vmem:[%s3159_s13 + $0x2a0] sm:$0xff]  }
  0xa2   : > { %2463 = vmatpush3.bf16.msra.mxu1 %v2730_v29  ;;  %2444 = vmatprep.subr.bf16.mxu0 %v2731_v30  ;;  %v2792_v29 = vld [vmem:[%s3159_s13 + $0x2a8] sm:$0xff]  }
  0xa3   : > { %2464 = vmatprep.subr.bf16.mxu1 %v2732_v31 }
  0xa5   : > { %2445 = vmatpush3.bf16.msra.mxu0 %v2731_v30  ;;  %v2793_v30 = vld [vmem:[%s3159_s13 + $0x2b0] sm:$0xff]  }
  0xa6   : > { %2465 = vmatpush3.bf16.msra.mxu1 %v2732_v31  ;;  %2446 = vmatprep.subr.bf16.mxu0 %v2733_v32  ;;  %v2794_v31 = vld [vmem:[%s3159_s13 + $0x2b8] sm:$0xff]  }
  0xa7   : > { %2466 = vmatprep.subr.bf16.mxu1 %v2734_v33 }
  0xa9   : > { %2447 = vmatpush3.bf16.msra.mxu0 %v2733_v32 }
  0xaa   : > { %2467 = vmatpush3.bf16.msra.mxu1 %v2734_v33  ;;  %2448 = vmatprep.subr.bf16.mxu0 %v2735_v34 }
  0xab   : > { %2468 = vmatprep.subr.bf16.mxu1 %v2736_v35 }
  0xad   : > { %2449 = vmatpush3.bf16.msra.mxu0 %v2735_v34 }
  0xae   : > { %2469 = vmatpush3.bf16.msra.mxu1 %v2736_v35  ;;  %2450 = vmatprep.subr.bf16.mxu0 %v2737_v36 }
  0xaf   : > { %2470 = vmatprep.subr.bf16.mxu1 %v2738_v37 }
  0xb1   : > { %2451 = vmatpush3.bf16.msra.mxu0 %v2737_v36 }
  0xb2   : > { %2471 = vmatpush3.bf16.msra.mxu1 %v2738_v37  ;;  %2476 = vmatprep.subr.bf16.mxu0 %v2739_v38 }
  0xb3   : > { %2496 = vmatprep.subr.bf16.mxu1 %v2740_v39 }
  0xb4   : > { %2453 = vmatmul.mubr.bf16.vlgmr.msra.gmra.mrb[4].mxu0 %v3197_v23 }
  0xb5   : > { %2473 = vmatmul.mubr.bf16.vlgmr.msra.gmra.mrb[4].mxu1 %v3197_v23  ;;  %2477 = vmatpush3.bf16.msra.mxu0 %v2739_v38 }
  0xb6   : > { %2497 = vmatpush3.bf16.msra.mxu1 %v2740_v39  ;;  %2478 = vmatprep.subr.bf16.mxu0 %v2741_v40 }
  0xb7   : > { %2498 = vmatprep.subr.bf16.mxu1 %v2742_v41  ;;  %2492 = vmatprep.mubr.bf16.mxu0 %v3184_v15 }
  0xb8   : > { %2512 = vmatprep.mubr.bf16.mxu1 %v3184_v15 }
  0xb9   : > { %2479 = vmatpush3.bf16.msra.mxu0 %v2741_v40 }
  0xba   : > { %2499 = vmatpush3.bf16.msra.mxu1 %v2742_v41  ;;  %2480 = vmatprep.subr.bf16.mxu0 %v2743_v42 }
  0xbb   : > { %2500 = vmatprep.subr.bf16.mxu1 %v2744_v43 }
  0xbd   : > { %2481 = vmatpush3.bf16.msra.mxu0 %v2743_v42 }
  0xbe   : > { %2501 = vmatpush3.bf16.msra.mxu1 %v2744_v43  ;;  %2482 = vmatprep.subr.bf16.mxu0 %v2745_v44 }
  0xbf   : > { %2502 = vmatprep.subr.bf16.mxu1 %v2746_v45 }
  0xc1   : > { %2483 = vmatpush3.bf16.msra.mxu0 %v2745_v44 }
  0xc2   : > { %2503 = vmatpush3.bf16.msra.mxu1 %v2746_v45  ;;  %2484 = vmatprep.subr.bf16.mxu0 %v2747_v46 }
  0xc3   : > { %2504 = vmatprep.subr.bf16.mxu1 %v2748_v47 }
  0xc5   : > { %2485 = vmatpush3.bf16.msra.mxu0 %v2747_v46 }
  0xc6   : > { %2505 = vmatpush3.bf16.msra.mxu1 %v2748_v47  ;;  %2486 = vmatprep.subr.bf16.mxu0 %v2749_v48 }
  0xc7   : > { %2506 = vmatprep.subr.bf16.mxu1 %v2750_v49 }
  0xc9   : > { %2487 = vmatpush3.bf16.msra.mxu0 %v2749_v48 }
  0xca   : > { %2507 = vmatpush3.bf16.msra.mxu1 %v2750_v49  ;;  %2488 = vmatprep.subr.bf16.mxu0 %v2751_v50 }
  0xcb   : > { %2508 = vmatprep.subr.bf16.mxu1 %v2752_v51 }
  0xcd   : > { %2489 = vmatpush3.bf16.msra.mxu0 %v2751_v50 }
  0xce   : > { %2509 = vmatpush3.bf16.msra.mxu1 %v2752_v51  ;;  %2490 = vmatprep.subr.bf16.mxu0 %v2753_v52 }
  0xcf   : > { %2510 = vmatprep.subr.bf16.mxu1 %v2754_v53 }
  0xd1   : > { %2491 = vmatpush3.bf16.msra.mxu0 %v2753_v52 }
  0xd2   : > { %2511 = vmatpush3.bf16.msra.mxu1 %v2754_v53  ;;  %2516 = vmatprep.subr.bf16.mxu0 %v2755_v54 }
  0xd3   : > { %2536 = vmatprep.subr.bf16.mxu1 %v2756_v55 }
  0xd4   : > { %2493 = vmatmul.mubr.bf16.vlgmr.msra.gmra.mrb[8].mxu0 %v3197_v23 }
  0xd5   : > { %2513 = vmatmul.mubr.bf16.vlgmr.msra.gmra.mrb[8].mxu1 %v3197_v23  ;;  %2517 = vmatpush3.bf16.msra.mxu0 %v2755_v54 }
  0xd6   : > { %2537 = vmatpush3.bf16.msra.mxu1 %v2756_v55  ;;  %2518 = vmatprep.subr.bf16.mxu0 %v2757_v56 }
  0xd7   : > { %2538 = vmatprep.subr.bf16.mxu1 %v2758_v57  ;;  %2532 = vmatprep.mubr.bf16.mxu0 %v3184_v15 }
  0xd8   : > { %2552 = vmatprep.mubr.bf16.mxu1 %v3184_v15 }
  0xd9   : > { %2519 = vmatpush3.bf16.msra.mxu0 %v2757_v56 }
  0xda   : > { %2539 = vmatpush3.bf16.msra.mxu1 %v2758_v57  ;;  %2520 = vmatprep.subr.bf16.mxu0 %v2759_v58 }
  0xdb   : > { %2540 = vmatprep.subr.bf16.mxu1 %v2760_v59 }
  0xdd   : > { %2521 = vmatpush3.bf16.msra.mxu0 %v2759_v58 }
  0xde   : > { %2541 = vmatpush3.bf16.msra.mxu1 %v2760_v59  ;;  %2522 = vmatprep.subr.bf16.mxu0 %v2761_v60 }
  0xdf   : > { %2542 = vmatprep.subr.bf16.mxu1 %v2762_v61 }
  0xe1   : > { %2523 = vmatpush3.bf16.msra.mxu0 %v2761_v60 }
  0xe2   : > { %2543 = vmatpush3.bf16.msra.mxu1 %v2762_v61  ;;  %2524 = vmatprep.subr.bf16.mxu0 %v2763_v62 }
  0xe3   : > { %2544 = vmatprep.subr.bf16.mxu1 %v2764_v63 }
  0xe5   : > { %2525 = vmatpush3.bf16.msra.mxu0 %v2763_v62 }
  0xe6   : > { %2545 = vmatpush3.bf16.msra.mxu1 %v2764_v63  ;;  %2526 = vmatprep.subr.bf16.mxu0 %v2765_v0 }
  0xe7   : > { %2546 = vmatprep.subr.bf16.mxu1 %v2766_v1 }
  0xe9   : > { %2527 = vmatpush3.bf16.msra.mxu0 %v2765_v0 }
  0xea   : > { %2547 = vmatpush3.bf16.msra.mxu1 %v2766_v1  ;;  %2528 = vmatprep.subr.bf16.mxu0 %v2767_v2 }
  0xeb   : > { %2548 = vmatprep.subr.bf16.mxu1 %v2768_v3 }
  0xed   : > { %2529 = vmatpush3.bf16.msra.mxu0 %v2767_v2 }
  0xee   : > { %2549 = vmatpush3.bf16.msra.mxu1 %v2768_v3  ;;  %2530 = vmatprep.subr.bf16.mxu0 %v2769_v4 }
  0xef   : > { %2550 = vmatprep.subr.bf16.mxu1 %v2770_v5 }
  0xf1   : > { %2531 = vmatpush3.bf16.msra.mxu0 %v2769_v4 }
  0xf2   : > { %2551 = vmatpush3.bf16.msra.mxu1 %v2770_v5  ;;  %2556 = vmatprep.subr.bf16.mxu0 %v2771_v6 }
  0xf3   : > { %2576 = vmatprep.subr.bf16.mxu1 %v2772_v7 }
  0xf4   : > { %2533 = vmatmul.mubr.bf16.vlgmr.msra.gmra.mrb[12].mxu0 %v3197_v23 }
  0xf5   : > { %2553 = vmatmul.mubr.bf16.vlgmr.msra.gmra.mrb[12].mxu1 %v3197_v23  ;;  %2557 = vmatpush3.bf16.msra.mxu0 %v2771_v6 }
  0xf6   : > { %2577 = vmatpush3.bf16.msra.mxu1 %v2772_v7  ;;  %2558 = vmatprep.subr.bf16.mxu0 %v2773_v8 }
  0xf7   : > { %2578 = vmatprep.subr.bf16.mxu1 %v2774_v9  ;;  %2572 = vmatprep.mubr.bf16.mxu0 %v3184_v15 }
  0xf8   : > { %2592 = vmatprep.mubr.bf16.mxu1 %v3184_v15 }
  0xf9   : > { %2559 = vmatpush3.bf16.msra.mxu0 %v2773_v8 }
  0xfa   : > { %2579 = vmatpush3.bf16.msra.mxu1 %v2774_v9  ;;  %2560 = vmatprep.subr.bf16.mxu0 %v2775_v10 }
  0xfb   : > { %2580 = vmatprep.subr.bf16.mxu1 %v2776_v11 }
  0xfd   : > { %2561 = vmatpush3.bf16.msra.mxu0 %v2775_v10 }
  0xfe   : > { %2581 = vmatpush3.bf16.msra.mxu1 %v2776_v11  ;;  %2562 = vmatprep.subr.bf16.mxu0 %v2777_v12 }
  0xff   : > { %2582 = vmatprep.subr.bf16.mxu1 %v2778_v13 }
 0x101   : > { %2563 = vmatpush3.bf16.msra.mxu0 %v2777_v12 }
 0x102   : > { %2583 = vmatpush3.bf16.msra.mxu1 %v2778_v13  ;;  %2564 = vmatprep.subr.bf16.mxu0 %v2779_v14 }
 0x103   : > { %2584 = vmatprep.subr.bf16.mxu1 %v2780_v16 }
 0x105   : > { %2565 = vmatpush3.bf16.msra.mxu0 %v2779_v14 }
 0x106   : > { %2585 = vmatpush3.bf16.msra.mxu1 %v2780_v16  ;;  %2566 = vmatprep.subr.bf16.mxu0 %v2781_v17 }
 0x107   : > { %2586 = vmatprep.subr.bf16.mxu1 %v2782_v18 }
 0x109   : > { %2567 = vmatpush3.bf16.msra.mxu0 %v2781_v17 }
 0x10a   : > { %2587 = vmatpush3.bf16.msra.mxu1 %v2782_v18  ;;  %2568 = vmatprep.subr.bf16.mxu0 %v2783_v19 }
 0x10b   : > { %2588 = vmatprep.subr.bf16.mxu1 %v2784_v20 }
 0x10d   : > { %2569 = vmatpush3.bf16.msra.mxu0 %v2783_v19 }
 0x10e   : > { %2589 = vmatpush3.bf16.msra.mxu1 %v2784_v20  ;;  %2570 = vmatprep.subr.bf16.mxu0 %v2785_v21 }
 0x10f   : > { %2590 = vmatprep.subr.bf16.mxu1 %v2786_v22 }
 0x111   : > { %2571 = vmatpush3.bf16.msra.mxu0 %v2785_v21 }
 0x112   : > { %2591 = vmatpush3.bf16.msra.mxu1 %v2786_v22  ;;  %2596 = vmatprep.subr.bf16.mxu0 %v2787_v24 }
 0x114   : > { %2573 = vmatmul.mubr.bf16.vlgmr.msra.gmra.mrb[16].mxu0 %v3197_v23 }
 0x115   : > { %2593 = vmatmul.mubr.bf16.vlgmr.msra.gmra.mrb[16].mxu1 %v3197_v23  ;;  %2597 = vmatpush3.bf16.msra.mxu0 %v2787_v24 }
 0x116   : > { %2598 = vmatprep.subr.bf16.mxu0 %v2788_v25  ;;  %2612 = vmatprep.mubr.bf16.mxu0 %v3184_v15 }
 0x119   : > { %2599 = vmatpush3.bf16.msra.mxu0 %v2788_v25 }
 0x11a   : > { %2600 = vmatprep.subr.bf16.mxu0 %v2789_v26 }
 0x11d   : > { %2601 = vmatpush3.bf16.msra.mxu0 %v2789_v26 }
 0x11e   : > { %2602 = vmatprep.subr.bf16.mxu0 %v2790_v27 }
 0x121   : > { %2603 = vmatpush3.bf16.msra.mxu0 %v2790_v27 }
 0x122   : > { %2604 = vmatprep.subr.bf16.mxu0 %v2791_v28 }
 0x125   : > { %2605 = vmatpush3.bf16.msra.mxu0 %v2791_v28 }
 0x126   : > { %2606 = vmatprep.subr.bf16.mxu0 %v2792_v29 }
 0x129   : > { %2607 = vmatpush3.bf16.msra.mxu0 %v2792_v29 }
 0x12a   : > { %2608 = vmatprep.subr.bf16.mxu0 %v2793_v30 }
 0x12d   : > { %2609 = vmatpush3.bf16.msra.mxu0 %v2793_v30 }
 0x12e   : > { %2610 = vmatprep.subr.bf16.mxu0 %v2794_v31 }
 0x131   : > { %2611 = vmatpush3.bf16.msra.mxu0 %v2794_v31 }
 0x134   : > { %2613 = vmatmul.mubr.bf16.vlgmr.msra.gmra.mrb[20].mxu0 %v3197_v23 }
 0x167   : > { %v2414_v15 = vpop.f32.mrb[0].mxu0 }
 0x168   : > { %v2434_v32 = vpop.f32.mrb[0].mxu1  ;;  %v539_v33 = vpop.f32.mrb[1].mxu0 }
 0x169   : > { %v653_v34 = vpop.f32.mrb[1].mxu1  ;;  %v2415_v35 = vpop.f32.mrb[2].mxu0  ;;  %v674_v36 = vrot.slane %v2434_v32, 1 }
 0x16a   : > { %v671_v37 = vrot.slane %v653_v34, 1  ;;  %v2435_v38 = vpop.f32.mrb[2].mxu1  ;;  %v542_v39 = vpop.f32.mrb[3].mxu0 }
 0x16b   : > { %v656_v40 = vpop.f32.mrb[3].mxu1 }
 0x16c   : > { %v672_v41 = vrot.slane %v656_v40, 1 }
 0x16e   : > { %v673_v42 = vsel %vm670_vm0, %v671_v37, %v672_v41  ;;  %v675_v43 = vsel %vm670_vm0, %v672_v41, %v674_v36 }
 0x16f   : > { %v678_v44 = vadd.f32 %v673_v42, %v539_v33  ;;  %v679_v45 = vadd.f32 %v675_v43, %v542_v39 }
 0x187   : > { %v2454_v46 = vpop.f32.mrb[4].mxu0 }
 0x188   : > { %v779_v23 = vpop.f32.mrb[5].mxu0  ;;  %v2474_v47 = vpop.f32.mrb[4].mxu1  ;;  %v800_v54 = vrot.slane %v2454_v46, 2 }
 0x189   : > { %v2455_v48 = vpop.f32.mrb[6].mxu0  ;;  %v905_v49 = vpop.f32.mrb[5].mxu1  ;;  %v926_v50 = vrot.slane %v2474_v47, 3  ;;  %v797_v55 = vrot.slane %v779_v23, 2 }
 0x18a   : > { %v782_v51 = vpop.f32.mrb[7].mxu0  ;;  %v923_v52 = vrot.slane %v905_v49, 3  ;;  %v2475_v53 = vpop.f32.mrb[6].mxu1 }
 0x18b   : > { %v798_v56 = vrot.slane %v782_v51, 2  ;;  %v908_v57 = vpop.f32.mrb[7].mxu1 }
 0x18c   : > { %v924_v58 = vrot.slane %v908_v57, 3 }
 0x18d   : > { %v799_v59 = vsel %vm796_vm1, %v797_v55, %v798_v56  ;;  %v801_v60 = vsel %vm796_vm1, %v798_v56, %v800_v54 }
 0x18e   : > { %v804_v61 = vadd.f32 %v799_v59, %v678_v44  ;;  %v805_v62 = vadd.f32 %v801_v60, %v679_v45  ;;  %v925_v63 = vsel %vm922_vm2, %v923_v52, %v924_v58  ;;  %v927_v0 = vsel %vm922_vm2, %v924_v58, %v926_v50 }
 0x190   : > { %v930_v1 = vadd.f32 %v925_v63, %v804_v61  ;;  %v931_v2 = vadd.f32 %v927_v0, %v805_v62 }
 0x1a7   : > { %v2494_v3 = vpop.f32.mrb[8].mxu0 }
 0x1a8   : > { %v1031_v4 = vpop.f32.mrb[9].mxu0  ;;  %v2514_v5 = vpop.f32.mrb[8].mxu1  ;;  %v1052_v12 = vrot.slane %v2494_v3, 4 }
 0x1a9   : > { %v2495_v6 = vpop.f32.mrb[10].mxu0  ;;  %v1157_v7 = vpop.f32.mrb[9].mxu1  ;;  %v1178_v8 = vrot.slane %v2514_v5, 5  ;;  %v1049_v13 = vrot.slane %v1031_v4, 4 }
 0x1aa   : > { %v1034_v9 = vpop.f32.mrb[11].mxu0  ;;  %v1175_v10 = vrot.slane %v1157_v7, 5  ;;  %v2515_v11 = vpop.f32.mrb[10].mxu1 }
 0x1ab   : > { %v1050_v14 = vrot.slane %v1034_v9, 4  ;;  %v1160_v16 = vpop.f32.mrb[11].mxu1 }
 0x1ac   : > { %v1176_v17 = vrot.slane %v1160_v16, 5 }
 0x1ad   : > { %v1051_v18 = vsel %vm1048_vm3, %v1049_v13, %v1050_v14  ;;  %v1053_v19 = vsel %vm1048_vm3, %v1050_v14, %v1052_v12 }
 0x1ae   : > { %v1056_v20 = vadd.f32 %v1051_v18, %v930_v1  ;;  %v1057_v21 = vadd.f32 %v1053_v19, %v931_v2  ;;  %v1177_v22 = vsel %vm1174_vm4, %v1175_v10, %v1176_v17  ;;  %v1179_v24 = vsel %vm1174_vm4, %v1176_v17, %v1178_v8  ;;  %v2280_v8 = vld [vmem:[%s384_s25] ss:$0 sm:$0xff] }
 0x1b0   : > { %v1182_v25 = vadd.f32 %v1177_v22, %v1056_v20  ;;  %v1183_v26 = vadd.f32 %v1179_v24, %v1057_v21 }
 0x1c7   : > { %v2534_v27 = vpop.f32.mrb[12].mxu0 }
 0x1c8   : > { %v1283_v28 = vpop.f32.mrb[13].mxu0  ;;  %v2554_v29 = vpop.f32.mrb[12].mxu1  ;;  %v1304_v35 = vrot.slane %v2534_v27, 6 }
 0x1c9   : > { %v2535_v30 = vpop.f32.mrb[14].mxu0  ;;  %v1409_v31 = vpop.f32.mrb[13].mxu1  ;;  %v1430_v15 = vrot.slane %v2554_v29, 7  ;;  %v1301_v36 = vrot.slane %v1283_v28, 6 }
 0x1ca   : > { %v1286_v32 = vpop.f32.mrb[15].mxu0  ;;  %v1427_v33 = vrot.slane %v1409_v31, 7  ;;  %v2555_v34 = vpop.f32.mrb[14].mxu1 }
 0x1cb   : > { %v1302_v37 = vrot.slane %v1286_v32, 6  ;;  %v1412_v38 = vpop.f32.mrb[15].mxu1 }
 0x1cc   : > { %v1428_v39 = vrot.slane %v1412_v38, 7 }
 0x1cd   : > { %v1303_v40 = vsel %vm1300_vm5, %v1301_v36, %v1302_v37  ;;  %v1305_v41 = vsel %vm1300_vm5, %v1302_v37, %v1304_v35 }
 0x1ce   : > { %v1309_v42 = vadd.f32 %v1305_v41, %v1183_v26  ;;  %v1431_v43 = vsel %vm1426_vm6, %v1428_v39, %v1430_v15  ;;  %v1308_v44 = vadd.f32 %v1303_v40, %v1182_v25  ;;  %v1429_v45 = vsel %vm1426_vm6, %v1427_v33, %v1428_v39 }
 0x1d0   : > { %v1435_v46 = vadd.f32 %v1431_v43, %v1309_v42  ;;  %v1434_v23 = vadd.f32 %v1429_v45, %v1308_v44 }
 0x1e7   : > { %v2574_v47 = vpop.f32.mrb[16].mxu0 }
 0x1e8   : > { %v1549_v48 = vadd.f32 %v2574_v47, %v1435_v46  ;;  %v2594_v49 = vpop.f32.mrb[16].mxu1  ;;  %v1535_v50 = vpop.f32.mrb[17].mxu0 }
 0x1e9   : > { %v1667_v51 = vrot.slane %v2594_v49, 1  ;;  %v1649_v52 = vpop.f32.mrb[17].mxu1  ;;  %v2575_v53 = vpop.f32.mrb[18].mxu0 }
 0x1ea   : > { %v2595_v54 = vpop.f32.mrb[18].mxu1  ;;  %v1537_v55 = vpop.f32.mrb[19].mxu0 }
 0x1eb   : > { %v1669_v56 = vrot.slane %v2595_v54, 1  ;;  %v1548_v57 = vadd.f32 %v1537_v55, %v1434_v23  ;;  %v1651_v58 = vpop.f32.mrb[19].mxu1 }
 0x1ec   : > { %v1666_v59 = vrot.slane %v1651_v58, 1 }
 0x1ed   : > { %v1670_v60 = vsel %vm670_vm0, %v1667_v51, %v1669_v56 }
 0x1ee   : > { %v1674_v61 = vadd.f32 %v1670_v60, %v1549_v48  ;;  %v1668_v62 = vsel %vm670_vm0, %v1666_v59, %v1667_v51 }
 0x1ef   : > { %v1673_v63 = vadd.f32 %v1668_v62, %v1548_v57 }
 0x207   : > { %v2614_v0 = vpop.f32.mrb[20].mxu0 }
 0x208   : > { %v1774_v1 = vpop.f32.mrb[21].mxu0  ;;  %v1792_v3 = vrot.slane %v2614_v0, 2 }
 0x209   : > { %v2615_v2 = vpop.f32.mrb[22].mxu0 }
 0x20a   : > { %v1794_v4 = vrot.slane %v2615_v2, 2  ;;  %v1776_v5 = vpop.f32.mrb[23].mxu0 }
 0x20b   : > { %v1791_v6 = vrot.slane %v1776_v5, 2 }
 0x20c   : > { %v1795_v7 = vsel %vm796_vm1, %v1792_v3, %v1794_v4 }
 0x20d   : > { %v1799_v9 = vadd.f32 %v1795_v7, %v1674_v61  ;;  %v1793_v10 = vsel %vm796_vm1, %v1791_v6, %v1792_v3 }
 0x20e   : > { %v1798_v11 = vadd.f32 %v1793_v10, %v1673_v63 }
 0x20f   : > { %v1808_v12 = vadd.f32 %v2280_v8, %v1799_v9  ;;  %1823 = sbr.rel (!%p3356_p12) target bundleno = 542 (0x21e), region = 130 }
 0x210   : > { %v1807_v13 = vadd.f32 %v2280_v8, %v1798_v11 }
 0x211   : > { %vm1810_vm7 = vcmp.ge.f32.partialorder %v1808_v12, 0.0  ;;  %v1812_v14 = vmul.f32 0.1, %v1808_v12 }
 0x212   : > { %vm1809_vm8 = vcmp.ge.f32.partialorder %v1807_v13, 0.0  ;;  %v1811_v16 = vmul.f32 0.1, %v1807_v13 }
 0x213   : > { %v1814_v17 = vsel %vm1810_vm7, %v1808_v12, %v1812_v14 }
 0x214   : > { %1816 = vst [vmem:[%s419_s28 + $0x8] sm:$0xff] %v1814_v17  ;;  %v1813_v18 = vsel %vm1809_vm8, %v1807_v13, %v1811_v16 }
 0x215   : > { %1815 = vst [vmem:[%s419_s28] sm:$0xff] %v1813_v18 }
 0x21b   : > { %v1862_v20 = vld [vmem:[%s419_s28 + $0x8] sm:$0xff] }
 0x21c   : > { %v1860_v19 = vld [vmem:[%s419_s28] sm:$0xff]  ;;  %1863 = vst [vmem:[%s1830_s0 + $0x10] sm:$0xff] %v1862_v20 }
 0x21d   : > { %1861 = vst [vmem:[%s1830_s0] sm:$0xff] %v1860_v19 }
 0x21e PF: > { %s20_s24 = sadd.s32 1, %s2937_s24   ;;  %s3357_s21 = sld [smem:[#allocation13_spill]] }
 0x21f   : > { %p17_p11 = scmp.ge.s32.totalorder %s20_s24, 6   ;;  %s3358_s12 = sld [smem:[#allocation11_spill]] }
 0x220   : > { %s3359_s8 = sld [smem:[#allocation12_spill]]  ;;  %s3360_s15 = smov %s2905_s16 }
 0x221   : > { %s3361_s16 = smov %s2909_s17  ;;  %s3362_s17 = smov %s3041_s6 }
 0x222   : > { %s3363_s18 = smov %s2917_s19  ;;  %s3365_s20 = smov %s2929_s22 }
 0x223   :  { %19 = sbr.rel (!%p17_p11) target bundleno = 10 (0xa), region = 235 }
 0x224   : > { %s3364_s19 = smov %s3357_s21  ;;  %s3366_s21 = smov %s2933_s23 }
 0x225   : > { %s3367_s22 = smov %s3358_s12 }
 0x226   : > { %s3368_s23 = smov %s3359_s8 }
 0x22a   :  { %1879 = vsyncpa [#allocation5], 1 }
 0x22b   :  { %1881 = vsyncpa [#allocation5 + $0x1], 1 }
 0x22c   :  { %1882 = vsyncpa [#allocation7], 1 }
 0x22d   :  { %1884 = vsyncpa [#allocation7 + $0x1], 1 }

// kernel: scale_discriminator_forward.10
= control target key start
LH: loop header
LB: loop body
LE: loop exit
PB: predicated region body
PF: predicated region fallthrough
CT: control target
= control target key end

     0   :  { %s3338_s0 = inlined_call_operand.vmem [shape: bf16[2,32,1024], index: 0, kind: input, shape index: {}, may-alias: {0,1}]   ;;  %s3339_s1 = inlined_call_operand.vmem [shape: bf16[2,32,1024], index: 1, kind: input, shape index: {}, may-alias: {0,1}]   ;;  %s3340_s2 = inlined_call_operand.hbm [shape: bf16[8,11,128,128], index: 2, kind: input, shape index: {}]   ;;  %s3341_s3 = inlined_call_operand.hbm [shape: f32[8,1,128], index: 3, kind: input, shape index: {}]   ;;  %s3342_s4 = inlined_call_operand.vmem [shape: f32[2,16,1024], index: 4, kind: output, shape index: {}]  }
   0x1   :  { %3346 = sst [smem:[#allocation14_spill]] %s3338_s0 }
   0x2   :  { %9 = vsyncpa [#allocation5], 0 }
   0x3   :  { %11 = vsyncpa [#allocation5 + $0x1], 0 }
   0x4   :  { %12 = vsyncpa [#allocation7], 0 }
   0x5   :  { %14 = vsyncpa [#allocation7 + $0x1], 0  ;;  %s2968_s15 = smov 0   ;;  %s2970_s16 = smov 0  }
   0x6   :  { %s2972_s17 = smov 0   ;;  %s2974_s18 = smov 0  }
   0x7   :  { %s2976_s19 = smov 0   ;;  %s2978_s20 = smov 0  }
   0x8   :  { %s2980_s21 = smov 0   ;;  %s2982_s22 = smov 0  }
   0x9   :  { %s2984_s23 = smov 0   ;;  %s2986_s24 = smov 0  }
   0xa LB: > { %s2012_s25 = sadd.s32 4294967295, %s2937_s24   ;;  %s35_s26 = sadd.s32 1, %s2929_s22  ;;  %s2937_s24 = sphi %s2986_s24, %s20_s24   ;;  %s2933_s23 = sphi %s2984_s23, %s3368_s23   ;;  %s2929_s22 = sphi %s2982_s22, %s3367_s22   ;;  %s2925_s21 = sphi %s2980_s21, %s3366_s21   ;;  %s2921_s20 = sphi %s2978_s20, %s3365_s20   ;;  %s2917_s19 = sphi %s2976_s19, %s3364_s19   ;;  %s2913_s18 = sphi %s2974_s18, %s3363_s18   ;;  %s2909_s17 = sphi %s2972_s17, %s3362_s17   ;;  %s2905_s16 = sphi %s2970_s16, %s3361_s16   ;;  %s2901_s15 = sphi %s2968_s15, %s3360_s15  }
   0xb   : > { %p37_p0 = scmp.ge.s32.totalorder %s35_s26, 8  ;;  %s39_s27 = sadd.s32 1, %s2933_s23 }
   0xc   : > { %s50_s28 = sadd.s32 1, %s2917_s19  ;;  %p57_p1 = scmp.ne.s32.totalorder %s2917_s19, %s2913_s18 }
   0xd   : > { %s3370_s26 = smov (%p37_p0, %s35_s26), 0  ;;  %s3372_s27 = smov (!%p37_p0, %s39_s27), %s2933_s23 }
   0xe   : > { %3347 = sst [smem:[#allocation11_spill]] %s3370_s26  ;;  %s46_s29 = ssub.s32 %s2929_s22, %s3370_s26 }
   0xf   : > { %p58_p2 = scmp.eq.s32.totalorder %s2937_s24, 0  ;;  %p41_p3 = scmp.ge.s32.totalorder %s3372_s27, 2 }
  0x10   : > { %p106_p4 = scmp.eq.s32.totalorder %s46_s29, 0  ;;  %s108_s5 = sadd.s32 1, %s2909_s17 }
  0x11   : > { %p3033_p5 = por %p58_p2, %p57_p1  ;;  %s3374_s27 = smov (%p41_p3, %s3372_s27), 0 }
  0x12   : > { %3349 = sst [smem:[#allocation12_spill]] %s3374_s27  ;;  %s43_s7 = ssub.s32 %s2933_s23, %s3374_s27 }
  0x13   : > { %s3041_s6 = scalar_select %p106_p4, %s2909_s17, %s108_s5  }
  0x14   : > { %p115_p6 = scmp.ne.s32.totalorder %s2909_s17, %s2905_s16  ;;  %s47_s8 = sor.u32 %s46_s29, %s43_s7 }
  0x15   : > { %p121_p7 = scmp.ne.s32.totalorder %s2905_s16, %s2901_s15  ;;  %p48_p8 = scmp.eq.s32.totalorder %s47_s8, 0 }
  0x16   : > { %p3049_p9 = por %p115_p6, %p58_p2  ;;  %p122_p10 = scmp.eq.s32.totalorder %s2012_s25, 0 }
  0x17   : > { %p175_p11 = scmp.eq.s32.totalorder %s2012_s25, 15  ;;  %p2015_p0 = scmp.ge.s32.totalorder %s2937_s24, 16 }
  0x18   : > { %s3054_s10 = scalar_select %p48_p8, %s2917_s19, %s50_s28  }
  0x19   : > { %p3056_p12 = por %p122_p10, %p121_p7  ;;  %p3063_p13 = por %p175_p11, %p57_p1 }
  0x1a   : > { %3351 = sst [smem:[#allocation13_spill]] %s3054_s10  ;;  %197 = sbr.rel (%p2015_p0) target bundleno = 103 (0x67), region = 16 }
  0x1b   : > { %s3352_s11 = scalar_select %p3056_p12, 1, 0 }
  0x1c   : > { %s3353_s12 = scalar_select %p3063_p13, 1, 0 }
  0x21   : > { %200 = sbr.rel (!%p3033_p5) target bundleno = 45 (0x2d), region = 20  ;;  %s202_s13 = sand.u32 (%p3033_p5), 1, %s2917_s19  }
  0x22   : > { %s2017_s14 = sshll.u32 (%p3033_p5), %s2933_s23, 5  ;;  %s2016_s15 = sshll.u32 (%p3033_p5), %s202_s13, 3 }
  0x23   : > { %s209_s25 = sadd.s32 (%p3033_p5), %s2929_s22, %s2017_s14  ;;  %s3354_s0 = sld [smem:[#allocation14_spill]] (%p3033_p5) }
  0x24   : > { %s2018_s28 = sshll.u32 (%p3033_p5), %s209_s25, 2  ;;  %s204_s8 = scalar_lea.vmem (%p3033_p5), [#allocation2], %s2016_s15 }
  0x29   : > { %s211_s7 = scalar_lea.vmem %s3354_s0, %s2018_s28 }
  0x2a   : > { %v227_v0 = vld [vmem:[%s211_s7] sm:$0xf] }
  0x2b   : > { %v229_v1 = vld [vmem:[%s211_s7 + $0x20] sm:$0xf]  ;;  %228 = vst [vmem:[%s204_s8] sm:$0xf] %v227_v0 }
  0x2c   : > { %230 = vst [vmem:[%s204_s8 + $0x4] sm:$0xf] %v229_v1 }
  0x2d PF: > { %257 = sbr.rel (!%p3033_p5) target bundleno = 53 (0x35), region = 61  ;;  %s259_s27 = sand.u32 (%p3033_p5), 1, %s2917_s19  }
  0x2e   : > { %s2020_s13 = sshll.u32 (%p3033_p5), %s2933_s23, 5  ;;  %s2019_s14 = sshll.u32 (%p3033_p5), %s259_s27, 3 }
  0x2f   : > { %s1898_s25 = sadd.s32 (%p3033_p5), %s2929_s22, %s2020_s13  ;;  %s261_s15 = scalar_lea.vmem (%p3033_p5), [#allocation3], %s2019_s14 }
  0x30   : > { %s2021_s26 = sshll.u32 (%p3033_p5), %s1898_s25, 2 }
  0x31   : > { %s1900_s28 = scalar_lea.vmem (%p3033_p5), %s3339_s1, %s2021_s26 }
  0x32   : > { %v2022_v2 = vld [vmem:[%s1900_s28 + $0x40] sm:$0xf] (%p3033_p5) }
  0x33   : > { %v2023_v3 = vld [vmem:[%s1900_s28 + $0x60] sm:$0xf] (%p3033_p5)  ;;  %286 = vst [vmem:[%s261_s15] sm:$0xf] (%p3033_p5), %v2022_v2 }
  0x34   : > { %288 = vst [vmem:[%s261_s15 + $0x4] sm:$0xf] %v2023_v3 }
  0x35 PF: > { %s3085_s30 = sand.u32 1, %s2909_s17   ;;  %s2617_s27 = smul.u32 11264, %s2929_s22 }
  0x36   : > { %s2616_s5 = smul.u32 704, %s3085_s30  ;;  %s317_s14 = scalar_lea.sflag [#allocation5], %s3085_s30 }
  0x37   : > { %s3092_s10 = scalar_lea.hbm %s3340_s2, %s2617_s27  ;;  %s2799_s15 = scalar_lea.hbm %s3340_s2, 90112 }
  0x38   : > { %s320_s26 = scalar_lea.vmem [#allocation4], %s2616_s5  ;;  %s2795_s25 = scalar_lea.hbm %s3092_s10, 11264 }
  0x39   : > { %s327_s13 = sshll.u32 %s320_s26, 4  ;;  %p2796_p1 = scmp.ne.s32.totalorder %s3092_s10, %s2795_s25  ;;  %s3094_s13 = int_to_ptr.vmem [resolvable:$true] %s327_s13 }
  0x3a   : > { %p2800_p4 = scmp.lt.u32.totalorder %s3092_s10, %s3340_s2  ;;  %p2801_p5 = scmp.lt.u32.totalorder %s2799_s15, %s2795_s25 }
  0x3b   : > { %p2797_p2 = pnand %p2796_p1, %p3049_p9  ;;  %p2803_p7 = scmp.lt.u32.totalorder %s2795_s25, %s3092_s10 }
  0x3c   : > { %p2802_p6 = por %p2801_p5, %p2800_p4 }
  0x3d   : > { %p2798_p3 = pneg %p2797_p2 }
  0x3e   : > { %p2804_p8 = por %p2803_p7, %p2802_p6 }
  0x40   : > { %p2805_p10 = pnand %p2804_p8, %p2798_p3 }
  0x42   : > { %2808 = shalt.err (!%p2805_p10)
}
  0x43   : > { %s2809_s5 = scalar_lea.vmem %s3094_s13, 11264  ;;  %s2939_s8 = smov [#allocation4]  }
  0x44   : > { %p2810_p11 = scmp.ne.s32.totalorder %s3094_s13, %s2809_s5  ;;  %s2813_s26 = sshll.u32 %s2939_s8, 4  ;;  %s2814_s26 = int_to_ptr.vmem [resolvable:$false] %s2813_s26 }
  0x45   : > { %s2815_s29 = scalar_lea.vmem %s2814_s26, 22528  ;;  %p2816_p2 = scmp.lt.s32.totalorder %s3094_s13, %s2814_s26 }
  0x46   : > { %p2811_p0 = pnand %p2810_p11, %p3049_p9  ;;  %p2817_p13 = scmp.lt.s32.totalorder %s2815_s29, %s2809_s5 }
  0x48   : > { %p2812_p1 = pneg %p2811_p0  ;;  %p2818_p4 = por %p2817_p13, %p2816_p2 }
  0x4a   : > { %p2819_p5 = pnand %p2818_p4, %p2812_p1 }
  0x4c   : > { %2822 = shalt.err (!%p2819_p5)
}
  0x4d   : > { %s2940_s25 = smov 64   ;;  %s2941_s28 = smov 4  }
  0x4e   : > { %2619 = dma.hbm_to_vmem [thread:$0]  (%p3049_p9), %s3092_s10, 11264, %s3094_s13, %s317_s14, %s2940_s25, %s2940_s25, %s2941_s28  }
  0x4f   : > { %s2025_s15 = sshll.u32 %s2929_s22, 4  ;;  %s340_s27 = scalar_lea.vmem [#allocation6], %s3085_s30 }
  0x50   : > { %s347_s7 = sshll.u32 %s340_s27, 4  ;;  %s3125_s26 = scalar_lea.hbm %s3341_s3, %s2025_s15  ;;  %s348_s7 = int_to_ptr.vmem [resolvable:$true] %s347_s7 }
  0x51   : > { %s338_s29 = scalar_lea.sflag [#allocation7], %s3085_s30  ;;  %s2823_s0 = scalar_lea.hbm %s3125_s26, 16 }
  0x52   : > { %p2824_p13 = scmp.ne.s32.totalorder %s3125_s26, %s2823_s0  ;;  %s2827_s14 = scalar_lea.hbm %s3341_s3, 128 }
  0x53   : > { %p2828_p7 = scmp.lt.u32.totalorder %s3125_s26, %s3341_s3  ;;  %p2829_p8 = scmp.lt.u32.totalorder %s2827_s14, %s2823_s0 }
  0x54   : > { %p2825_p3 = pnand %p2824_p13, %p3049_p9  ;;  %p2831_p11 = scmp.lt.u32.totalorder %s2823_s0, %s3125_s26 }
  0x55   : > { %p2830_p10 = por %p2829_p8, %p2828_p7 }
  0x56   : > { %p2826_p6 = pneg %p2825_p3 }
  0x57   : > { %p2832_p0 = por %p2831_p11, %p2830_p10 }
  0x59   : > { %p2833_p1 = pnand %p2832_p0, %p2826_p6 }
  0x5b   : > { %2836 = shalt.err (!%p2833_p1)
}
  0x5c   : > { %s2837_s30 = scalar_lea.vmem %s348_s7, 16  ;;  %s2942_s15 = smov [#allocation6]  }
  0x5d   : > { %p2838_p2 = scmp.ne.s32.totalorder %s348_s7, %s2837_s30  ;;  %s2841_s27 = sshll.u32 %s2942_s15, 4  ;;  %s2842_s27 = int_to_ptr.vmem [resolvable:$false] %s2841_s27 }
  0x5e   : > { %s2843_s5 = scalar_lea.vmem %s2842_s27, 32  ;;  %p2844_p13 = scmp.lt.s32.totalorder %s348_s7, %s2842_s27 }
  0x5f   : > { %p2839_p4 = pnand %p2838_p2, %p3049_p9  ;;  %p2845_p3 = scmp.lt.s32.totalorder %s2843_s5, %s2837_s30 }
  0x61   : > { %p2840_p5 = pneg %p2839_p4  ;;  %p2846_p12 = por %p2845_p3, %p2844_p13 }
  0x63   : > { %p2847_p7 = pnand %p2846_p12, %p2840_p5 }
  0x65   : > { %2850 = shalt.err (!%p2847_p7)
}
  0x66   : > { %2620 = dma.hbm_to_vmem [thread:$0]  (%p3049_p9), %s3125_s26, 16, %s348_s7, %s338_s29  }
  0x67 PF: > { %p2026_p6 = scmp.ge.s32.totalorder %s2937_s24, 1  ;;  %p352_p8 = scmp.lt.s32.totalorder %s2937_s24, 17 }
  0x69   : > { %p353_p10 = pnand %p2026_p6, %p352_p8 }
  0x6a   : > { %s359_s0 = sand.u32 (!%p353_p10), 1, %s2913_s18   ;;  %s3149_s8 = sand.u32 (!%p353_p10), 1, %s2905_s16  }
  0x6b   : > { %356 = sbr.rel (%p353_p10) target bundleno = 544 (0x220), region = 110  ;;  %s3153_s9 = sshll.u32 (!%p353_p10), %s359_s0, 3 }
  0x6c   : > { %s2618_s7 = smul.u32 (!%p353_p10), 704, %s3149_s8  ;;  %s361_s26 = scalar_lea.vmem (!%p353_p10), [#allocation2], %s3153_s9 }
  0x6d   : > { %s368_s29 = scalar_lea.vmem (!%p353_p10), [#allocation3], %s3153_s9  ;;  %s373_s10 = scalar_lea.sflag (!%p353_p10), [#allocation5], %s3149_s8 }
  0x6e   : > { %s3159_s13 = scalar_lea.vmem (!%p353_p10), [#allocation4], %s2618_s7  ;;  %p3355_p9 = scmp.ne.s32.totalorder (!%p353_p10), %s3352_s11, 0 }
  0x72   : > { %2892 = dma.done.wait (%p3355_p9), %s373_s10, 11264  }
  0x73   : > { %2894 = vsyncadd (%p3355_p9), %s373_s10, 4294956032  ;;  %s382_s14 = scalar_lea.sflag [#allocation7], %s3149_s8  ;;  %s384_s25 = scalar_lea.vmem [#allocation6], %s3149_s8 }
  0x74   : > { %2896 = dma.done.wait (%p3355_p9), %s382_s14, 16  }
  0x75   : > { %2898 = vsyncadd (%p3355_p9), %s382_s14, 4294967280  ;;  %v2705_v4 = vld [vmem:[%s3159_s13] sm:$0xff]   ;;  %v2707_v6 = vld [vmem:[%s3159_s13 + $0x8] sm:$0xff]   ;;  %vm670_vm0 = vcmask 1046528   ;;  %vm796_vm1 = vcmask 1045504   ;;  %vm922_vm2 = vcmask 1044480  }
  0x76   : > { %v2706_v5 = vld [vmem:[%s3159_s13 + $0x40] sm:$0xff]   ;;  %2396 = vmatprep.subr.bf16.mxu0 %v2705_v4  ;;  %v2708_v7 = vld [vmem:[%s3159_s13 + $0x48] sm:$0xff]   ;;  %v2709_v8 = vld [vmem:[%s3159_s13 + $0x10] sm:$0xff]   ;;  %vm1048_vm3 = vcmask 1043456   ;;  %vm1174_vm4 = vcmask 1042432   ;;  %vm1300_vm5 = vcmask 1041408  }
  0x77   : > { %2416 = vmatprep.subr.bf16.mxu1 %v2706_v5  ;;  %2397 = vmatpush3.bf16.msra.mxu0 %v2705_v4  ;;  %v2710_v9 = vld [vmem:[%s3159_s13 + $0x50] sm:$0xff]   ;;  %v2711_v10 = vld [vmem:[%s3159_s13 + $0x18] sm:$0xff]   ;;  %v2713_v12 = vld [vmem:[%s3159_s13 + $0x20] sm:$0xff]   ;;  %vm1426_vm6 = vcmask 1040384   ;;  %s2029_s11 = sshll.u32 %s359_s0, 4  ;;  %p3356_p12 = scmp.ne.s32.totalorder %s3353_s12, 0 }
  0x78   : > { %2417 = vmatpush3.bf16.msra.mxu1 %v2706_v5  ;;  %2398 = vmatprep.subr.bf16.mxu0 %v2707_v6  ;;  %v2712_v11 = vld [vmem:[%s3159_s13 + $0x58] sm:$0xff]   ;;  %v2714_v13 = vld [vmem:[%s3159_s13 + $0x60] sm:$0xff]   ;;  %v2715_v14 = vld [vmem:[%s3159_s13 + $0x28] sm:$0xff]   ;;  %s419_s28 = scalar_lea.vmem [#allocation8], %s2029_s11  ;;  %s2282_s30 = sshll.u32 (%p3356_p12), %s2925_s21, 4 }
  0x79   : > { %2418 = vmatprep.subr.bf16.mxu1 %v2708_v7  ;;  %v3184_v15 = vld [vmem:[%s361_s26] sm:$0xff]   ;;  %v2717_v17 = vld [vmem:[%s3159_s13 + $0x30] sm:$0xff]   ;;  %v2719_v19 = vld [vmem:[%s3159_s13 + $0x38] sm:$0xff]   ;;  %s1828_s18 = sadd.s32 (%p3356_p12), %s2921_s20, %s2282_s30 }
  0x7a   : > { %v2716_v16 = vld [vmem:[%s3159_s13 + $0x68] sm:$0xff]   ;;  %2412 = vmatprep.mubr.bf16.mxu0 %v3184_v15  ;;  %2432 = vmatprep.mubr.bf16.mxu1 %v3184_v15  ;;  %v2718_v18 = vld [vmem:[%s3159_s13 + $0x70] sm:$0xff]   ;;  %v2720_v20 = vld [vmem:[%s3159_s13 + $0x78] sm:$0xff]   ;;  %s2283_s15 = sshll.u32 (%p3356_p12), %s1828_s18, 3 }
  0x7b   : > { %2399 = vmatpush3.bf16.msra.mxu0 %v2707_v6  ;;  %v2723_v21 = vld [vmem:[%s3159_s13 + $0x80] sm:$0xff]   ;;  %v3197_v23 = vld [vmem:[%s368_s29] sm:$0xff]   ;;  %v2725_v24 = vld [vmem:[%s3159_s13 + $0x88] sm:$0xff]   ;;  %s1830_s0 = scalar_lea.vmem (%p3356_p12), %s3342_s4, %s2283_s15 }
  0x7c   : > { %2419 = vmatpush3.bf16.msra.mxu1 %v2708_v7  ;;  %2400 = vmatprep.subr.bf16.mxu0 %v2709_v8  ;;  %v2724_v22 = vld [vmem:[%s3159_s13 + $0xc0] sm:$0xff]   ;;  %v2726_v25 = vld [vmem:[%s3159_s13 + $0xc8] sm:$0xff]   ;;  %v2727_v26 = vld [vmem:[%s3159_s13 + $0x90] sm:$0xff]  }
  0x7d   : > { %2420 = vmatprep.subr.bf16.mxu1 %v2710_v9  ;;  %v2728_v27 = vld [vmem:[%s3159_s13 + $0xd0] sm:$0xff]   ;;  %v2729_v28 = vld [vmem:[%s3159_s13 + $0x98] sm:$0xff]   ;;  %v2731_v30 = vld [vmem:[%s3159_s13 + $0xa0] sm:$0xff]  }
  0x7e   : > { %v2730_v29 = vld [vmem:[%s3159_s13 + $0xd8] sm:$0xff]   ;;  %v2732_v31 = vld [vmem:[%s3159_s13 + $0xe0] sm:$0xff]   ;;  %v2733_v32 = vld [vmem:[%s3159_s13 + $0xa8] sm:$0xff]  }
  0x7f   : > { %2401 = vmatpush3.bf16.msra.mxu0 %v2709_v8  ;;  %v2734_v33 = vld [vmem:[%s3159_s13 + $0xe8] sm:$0xff]   ;;  %v2735_v34 = vld [vmem:[%s3159_s13 + $0xb0] sm:$0xff]   ;;  %v2737_v36 = vld [vmem:[%s3159_s13 + $0xb8] sm:$0xff]  }
  0x80   : > { %2421 = vmatpush3.bf16.msra.mxu1 %v2710_v9  ;;  %2402 = vmatprep.subr.bf16.mxu0 %v2711_v10  ;;  %v2736_v35 = vld [vmem:[%s3159_s13 + $0xf0] sm:$0xff]   ;;  %v2738_v37 = vld [vmem:[%s3159_s13 + $0xf8] sm:$0xff]   ;;  %v2739_v38 = vld [vmem:[%s3159_s13 + $0x100] sm:$0xff]  }
  0x81   : > { %2422 = vmatprep.subr.bf16.mxu1 %v2712_v11  ;;  %v2740_v39 = vld [vmem:[%s3159_s13 + $0x140] sm:$0xff]   ;;  %v2741_v40 = vld [vmem:[%s3159_s13 + $0x108] sm:$0xff]   ;;  %v2743_v42 = vld [vmem:[%s3159_s13 + $0x110] sm:$0xff]  }
  0x82   : > { %v2742_v41 = vld [vmem:[%s3159_s13 + $0x148] sm:$0xff]   ;;  %v2744_v43 = vld [vmem:[%s3159_s13 + $0x150] sm:$0xff]   ;;  %v2745_v44 = vld [vmem:[%s3159_s13 + $0x118] sm:$0xff]  }
  0x83   : > { %2403 = vmatpush3.bf16.msra.mxu0 %v2711_v10  ;;  %v2746_v45 = vld [vmem:[%s3159_s13 + $0x158] sm:$0xff]   ;;  %v2747_v46 = vld [vmem:[%s3159_s13 + $0x120] sm:$0xff]   ;;  %v2749_v48 = vld [vmem:[%s3159_s13 + $0x128] sm:$0xff]  }
  0x84   : > { %2423 = vmatpush3.bf16.msra.mxu1 %v2712_v11  ;;  %2404 = vmatprep.subr.bf16.mxu0 %v2713_v12  ;;  %v2748_v47 = vld [vmem:[%s3159_s13 + $0x160] sm:$0xff]   ;;  %v2750_v49 = vld [vmem:[%s3159_s13 + $0x168] sm:$0xff]   ;;  %v2751_v50 = vld [vmem:[%s3159_s13 + $0x130] sm:$0xff]  }
  0x85   : > { %2424 = vmatprep.subr.bf16.mxu1 %v2714_v13  ;;  %v2752_v51 = vld [vmem:[%s3159_s13 + $0x170] sm:$0xff]   ;;  %v2753_v52 = vld [vmem:[%s3159_s13 + $0x138] sm:$0xff]   ;;  %v2755_v54 = vld [vmem:[%s3159_s13 + $0x180] sm:$0xff]  }
  0x86   : > { %v2754_v53 = vld [vmem:[%s3159_s13 + $0x178] sm:$0xff]   ;;  %v2756_v55 = vld [vmem:[%s3159_s13 + $0x1c0] sm:$0xff]   ;;  %v2757_v56 = vld [vmem:[%s3159_s13 + $0x188] sm:$0xff]  }
  0x87   : > { %2405 = vmatpush3.bf16.msra.mxu0 %v2713_v12  ;;  %v2758_v57 = vld [vmem:[%s3159_s13 + $0x1c8] sm:$0xff]   ;;  %v2759_v58 = vld [vmem:[%s3159_s13 + $0x190] sm:$0xff]   ;;  %v2761_v60 = vld [vmem:[%s3159_s13 + $0x198] sm:$0xff]  }
  0x88   : > { %2425 = vmatpush3.bf16.msra.mxu1 %v2714_v13  ;;  %2406 = vmatprep.subr.bf16.mxu0 %v2715_v14  ;;  %v2760_v59 = vld [vmem:[%s3159_s13 + $0x1d0] sm:$0xff]   ;;  %v2762_v61 = vld [vmem:[%s3159_s13 + $0x1d8] sm:$0xff]   ;;  %v2763_v62 = vld [vmem:[%s3159_s13 + $0x1a0] sm:$0xff]  }
  0x89   : > { %2426 = vmatprep.subr.bf16.mxu1 %v2716_v16  ;;  %v2764_v63 = vld [vmem:[%s3159_s13 + $0x1e0] sm:$0xff]   ;;  %v2765_v0 = vld [vmem:[%s3159_s13 + $0x1a8] sm:$0xff]   ;;  %v2767_v2 = vld [vmem:[%s3159_s13 + $0x1b0] sm:$0xff]  }
  0x8a   : > { %v2766_v1 = vld [vmem:[%s3159_s13 + $0x1e8] sm:$0xff]   ;;  %v2768_v3 = vld [vmem:[%s3159_s13 + $0x1f0] sm:$0xff]   ;;  %v2769_v4 = vld [vmem:[%s3159_s13 + $0x1b8] sm:$0xff]  }
  0x8b   : > { %2407 = vmatpush3.bf16.msra.mxu0 %v2715_v14  ;;  %v2770_v5 = vld [vmem:[%s3159_s13 + $0x1f8] sm:$0xff]   ;;  %v2771_v6 = vld [vmem:[%s3159_s13 + $0x200] sm:$0xff]   ;;  %v2773_v8 = vld [vmem:[%s3159_s13 + $0x208] sm:$0xff]  }
  0x8c   : > { %2427 = vmatpush3.bf16.msra.mxu1 %v2716_v16  ;;  %2408 = vmatprep.subr.bf16.mxu0 %v2717_v17  ;;  %v2772_v7 = vld [vmem:[%s3159_s13 + $0x240] sm:$0xff]   ;;  %v2774_v9 = vld [vmem:[%s3159_s13 + $0x248] sm:$0xff]   ;;  %v2775_v10 = vld [vmem:[%s3159_s13 + $0x210] sm:$0xff]  }
  0x8d   : > { %2428 = vmatprep.subr.bf16.mxu1 %v2718_v18  ;;  %v2776_v11 = vld [vmem:[%s3159_s13 + $0x250] sm:$0xff]   ;;  %v2777_v12 = vld [vmem:[%s3159_s13 + $0x218] sm:$0xff]   ;;  %v2779_v14 = vld [vmem:[%s3159_s13 + $0x220] sm:$0xff]  }
  0x8e   : > { %v2778_v13 = vld [vmem:[%s3159_s13 + $0x258] sm:$0xff]   ;;  %v2780_v16 = vld [vmem:[%s3159_s13 + $0x260] sm:$0xff]  }
  0x8f   : > { %2409 = vmatpush3.bf16.msra.mxu0 %v2717_v17  ;;  %v2781_v17 = vld [vmem:[%s3159_s13 + $0x228] sm:$0xff]  }
  0x90   : > { %2429 = vmatpush3.bf16.msra.mxu1 %v2718_v18  ;;  %2410 = vmatprep.subr.bf16.mxu0 %v2719_v19  ;;  %v2782_v18 = vld [vmem:[%s3159_s13 + $0x268] sm:$0xff]  }
  0x91   : > { %2430 = vmatprep.subr.bf16.mxu1 %v2720_v20 }
  0x93   : > { %2411 = vmatpush3.bf16.msra.mxu0 %v2719_v19  ;;  %v2783_v19 = vld [vmem:[%s3159_s13 + $0x230] sm:$0xff]  }
  0x94   : > { %2431 = vmatpush3.bf16.msra.mxu1 %v2720_v20  ;;  %2436 = vmatprep.subr.bf16.mxu0 %v2723_v21  ;;  %v2784_v20 = vld [vmem:[%s3159_s13 + $0x270] sm:$0xff]  }
  0x95   : > { %2456 = vmatprep.subr.bf16.mxu1 %v2724_v22 }
  0x96   : > { %2413 = vmatmul.mubr.bf16.vlgmr.msra.gmra.mrb[0].mxu0 %v3197_v23 }
  0x97   : > { %2433 = vmatmul.mubr.bf16.vlgmr.msra.gmra.mrb[0].mxu1 %v3197_v23  ;;  %2437 = vmatpush3.bf16.msra.mxu0 %v2723_v21  ;;  %v2785_v21 = vld [vmem:[%s3159_s13 + $0x238] sm:$0xff]  }
  0x98   : > { %2457 = vmatpush3.bf16.msra.mxu1 %v2724_v22  ;;  %2438 = vmatprep.subr.bf16.mxu0 %v2725_v24  ;;  %v2786_v22 = vld [vmem:[%s3159_s13 + $0x278] sm:$0xff]  }
  0x99   : > { %2458 = vmatprep.subr.bf16.mxu1 %v2726_v25  ;;  %2452 = vmatprep.mubr.bf16.mxu0 %v3184_v15 }
  0x9a   : > { %2472 = vmatprep.mubr.bf16.mxu1 %v3184_v15 }
  0x9b   : > { %2439 = vmatpush3.bf16.msra.mxu0 %v2725_v24  ;;  %v2787_v24 = vld [vmem:[%s3159_s13 + $0x280] sm:$0xff]  }
  0x9c   : > { %2459 = vmatpush3.bf16.msra.mxu1 %v2726_v25  ;;  %2440 = vmatprep.subr.bf16.mxu0 %v2727_v26  ;;  %v2788_v25 = vld [vmem:[%s3159_s13 + $0x288] sm:$0xff]  }
  0x9d   : > { %2460 = vmatprep.subr.bf16.mxu1 %v2728_v27 }
  0x9f   : > { %2441 = vmatpush3.bf16.msra.mxu0 %v2727_v26  ;;  %v2789_v26 = vld [vmem:[%s3159_s13 + $0x290] sm:$0xff]  }
  0xa0   : > { %2461 = vmatpush3.bf16.msra.mxu1 %v2728_v27  ;;  %2442 = vmatprep.subr.bf16.mxu0 %v2729_v28  ;;  %v2790_v27 = vld [vmem:[%s3159_s13 + $0x298] sm:$0xff]  }
  0xa1   : > { %2462 = vmatprep.subr.bf16.mxu1 %v2730_v29 }
  0xa3   : > { %2443 = vmatpush3.bf16.msra.mxu0 %v2729_v28  ;;  %v2791_v28 = vld [vmem:[%s3159_s13 + $0x2a0] sm:$0xff]  }
  0xa4   : > { %2463 = vmatpush3.bf16.msra.mxu1 %v2730_v29  ;;  %2444 = vmatprep.subr.bf16.mxu0 %v2731_v30  ;;  %v2792_v29 = vld [vmem:[%s3159_s13 + $0x2a8] sm:$0xff]  }
  0xa5   : > { %2464 = vmatprep.subr.bf16.mxu1 %v2732_v31 }
  0xa7   : > { %2445 = vmatpush3.bf16.msra.mxu0 %v2731_v30  ;;  %v2793_v30 = vld [vmem:[%s3159_s13 + $0x2b0] sm:$0xff]  }
  0xa8   : > { %2465 = vmatpush3.bf16.msra.mxu1 %v2732_v31  ;;  %2446 = vmatprep.subr.bf16.mxu0 %v2733_v32  ;;  %v2794_v31 = vld [vmem:[%s3159_s13 + $0x2b8] sm:$0xff]  }
  0xa9   : > { %2466 = vmatprep.subr.bf16.mxu1 %v2734_v33 }
  0xab   : > { %2447 = vmatpush3.bf16.msra.mxu0 %v2733_v32 }
  0xac   : > { %2467 = vmatpush3.bf16.msra.mxu1 %v2734_v33  ;;  %2448 = vmatprep.subr.bf16.mxu0 %v2735_v34 }
  0xad   : > { %2468 = vmatprep.subr.bf16.mxu1 %v2736_v35 }
  0xaf   : > { %2449 = vmatpush3.bf16.msra.mxu0 %v2735_v34 }
  0xb0   : > { %2469 = vmatpush3.bf16.msra.mxu1 %v2736_v35  ;;  %2450 = vmatprep.subr.bf16.mxu0 %v2737_v36 }
  0xb1   : > { %2470 = vmatprep.subr.bf16.mxu1 %v2738_v37 }
  0xb3   : > { %2451 = vmatpush3.bf16.msra.mxu0 %v2737_v36 }
  0xb4   : > { %2471 = vmatpush3.bf16.msra.mxu1 %v2738_v37  ;;  %2476 = vmatprep.subr.bf16.mxu0 %v2739_v38 }
  0xb5   : > { %2496 = vmatprep.subr.bf16.mxu1 %v2740_v39 }
  0xb6   : > { %2453 = vmatmul.mubr.bf16.vlgmr.msra.gmra.mrb[4].mxu0 %v3197_v23 }
  0xb7   : > { %2473 = vmatmul.mubr.bf16.vlgmr.msra.gmra.mrb[4].mxu1 %v3197_v23  ;;  %2477 = vmatpush3.bf16.msra.mxu0 %v2739_v38 }
  0xb8   : > { %2497 = vmatpush3.bf16.msra.mxu1 %v2740_v39  ;;  %2478 = vmatprep.subr.bf16.mxu0 %v2741_v40 }
  0xb9   : > { %2498 = vmatprep.subr.bf16.mxu1 %v2742_v41  ;;  %2492 = vmatprep.mubr.bf16.mxu0 %v3184_v15 }
  0xba   : > { %2512 = vmatprep.mubr.bf16.mxu1 %v3184_v15 }
  0xbb   : > { %2479 = vmatpush3.bf16.msra.mxu0 %v2741_v40 }
  0xbc   : > { %2499 = vmatpush3.bf16.msra.mxu1 %v2742_v41  ;;  %2480 = vmatprep.subr.bf16.mxu0 %v2743_v42 }
  0xbd   : > { %2500 = vmatprep.subr.bf16.mxu1 %v2744_v43 }
  0xbf   : > { %2481 = vmatpush3.bf16.msra.mxu0 %v2743_v42 }
  0xc0   : > { %2501 = vmatpush3.bf16.msra.mxu1 %v2744_v43  ;;  %2482 = vmatprep.subr.bf16.mxu0 %v2745_v44 }
  0xc1   : > { %2502 = vmatprep.subr.bf16.mxu1 %v2746_v45 }
  0xc3   : > { %2483 = vmatpush3.bf16.msra.mxu0 %v2745_v44 }
  0xc4   : > { %2503 = vmatpush3.bf16.msra.mxu1 %v2746_v45  ;;  %2484 = vmatprep.subr.bf16.mxu0 %v2747_v46 }
  0xc5   : > { %2504 = vmatprep.subr.bf16.mxu1 %v2748_v47 }
  0xc7   : > { %2485 = vmatpush3.bf16.msra.mxu0 %v2747_v46 }
  0xc8   : > { %2505 = vmatpush3.bf16.msra.mxu1 %v2748_v47  ;;  %2486 = vmatprep.subr.bf16.mxu0 %v2749_v48 }
  0xc9   : > { %2506 = vmatprep.subr.bf16.mxu1 %v2750_v49 }
  0xcb   : > { %2487 = vmatpush3.bf16.msra.mxu0 %v2749_v48 }
  0xcc   : > { %2507 = vmatpush3.bf16.msra.mxu1 %v2750_v49  ;;  %2488 = vmatprep.subr.bf16.mxu0 %v2751_v50 }
  0xcd   : > { %2508 = vmatprep.subr.bf16.mxu1 %v2752_v51 }
  0xcf   : > { %2489 = vmatpush3.bf16.msra.mxu0 %v2751_v50 }
  0xd0   : > { %2509 = vmatpush3.bf16.msra.mxu1 %v2752_v51  ;;  %2490 = vmatprep.subr.bf16.mxu0 %v2753_v52 }
  0xd1   : > { %2510 = vmatprep.subr.bf16.mxu1 %v2754_v53 }
  0xd3   : > { %2491 = vmatpush3.bf16.msra.mxu0 %v2753_v52 }
  0xd4   : > { %2511 = vmatpush3.bf16.msra.mxu1 %v2754_v53  ;;  %2516 = vmatprep.subr.bf16.mxu0 %v2755_v54 }
  0xd5   : > { %2536 = vmatprep.subr.bf16.mxu1 %v2756_v55 }
  0xd6   : > { %2493 = vmatmul.mubr.bf16.vlgmr.msra.gmra.mrb[8].mxu0 %v3197_v23 }
  0xd7   : > { %2513 = vmatmul.mubr.bf16.vlgmr.msra.gmra.mrb[8].mxu1 %v3197_v23  ;;  %2517 = vmatpush3.bf16.msra.mxu0 %v2755_v54 }
  0xd8   : > { %2537 = vmatpush3.bf16.msra.mxu1 %v2756_v55  ;;  %2518 = vmatprep.subr.bf16.mxu0 %v2757_v56 }
  0xd9   : > { %2538 = vmatprep.subr.bf16.mxu1 %v2758_v57  ;;  %2532 = vmatprep.mubr.bf16.mxu0 %v3184_v15 }
  0xda   : > { %2552 = vmatprep.mubr.bf16.mxu1 %v3184_v15 }
  0xdb   : > { %2519 = vmatpush3.bf16.msra.mxu0 %v2757_v56 }
  0xdc   : > { %2539 = vmatpush3.bf16.msra.mxu1 %v2758_v57  ;;  %2520 = vmatprep.subr.bf16.mxu0 %v2759_v58 }
  0xdd   : > { %2540 = vmatprep.subr.bf16.mxu1 %v2760_v59 }
  0xdf   : > { %2521 = vmatpush3.bf16.msra.mxu0 %v2759_v58 }
  0xe0   : > { %2541 = vmatpush3.bf16.msra.mxu1 %v2760_v59  ;;  %2522 = vmatprep.subr.bf16.mxu0 %v2761_v60 }
  0xe1   : > { %2542 = vmatprep.subr.bf16.mxu1 %v2762_v61 }
  0xe3   : > { %2523 = vmatpush3.bf16.msra.mxu0 %v2761_v60 }
  0xe4   : > { %2543 = vmatpush3.bf16.msra.mxu1 %v2762_v61  ;;  %2524 = vmatprep.subr.bf16.mxu0 %v2763_v62 }
  0xe5   : > { %2544 = vmatprep.subr.bf16.mxu1 %v2764_v63 }
  0xe7   : > { %2525 = vmatpush3.bf16.msra.mxu0 %v2763_v62 }
  0xe8   : > { %2545 = vmatpush3.bf16.msra.mxu1 %v2764_v63  ;;  %2526 = vmatprep.subr.bf16.mxu0 %v2765_v0 }
  0xe9   : > { %2546 = vmatprep.subr.bf16.mxu1 %v2766_v1 }
  0xeb   : > { %2527 = vmatpush3.bf16.msra.mxu0 %v2765_v0 }
  0xec   : > { %2547 = vmatpush3.bf16.msra.mxu1 %v2766_v1  ;;  %2528 = vmatprep.subr.bf16.mxu0 %v2767_v2 }
  0xed   : > { %2548 = vmatprep.subr.bf16.mxu1 %v2768_v3 }
  0xef   : > { %2529 = vmatpush3.bf16.msra.mxu0 %v2767_v2 }
  0xf0   : > { %2549 = vmatpush3.bf16.msra.mxu1 %v2768_v3  ;;  %2530 = vmatprep.subr.bf16.mxu0 %v2769_v4 }
  0xf1   : > { %2550 = vmatprep.subr.bf16.mxu1 %v2770_v5 }
  0xf3   : > { %2531 = vmatpush3.bf16.msra.mxu0 %v2769_v4 }
  0xf4   : > { %2551 = vmatpush3.bf16.msra.mxu1 %v2770_v5  ;;  %2556 = vmatprep.subr.bf16.mxu0 %v2771_v6 }
  0xf5   : > { %2576 = vmatprep.subr.bf16.mxu1 %v2772_v7 }
  0xf6   : > { %2533 = vmatmul.mubr.bf16.vlgmr.msra.gmra.mrb[12].mxu0 %v3197_v23 }
  0xf7   : > { %2553 = vmatmul.mubr.bf16.vlgmr.msra.gmra.mrb[12].mxu1 %v3197_v23  ;;  %2557 = vmatpush3.bf16.msra.mxu0 %v2771_v6 }
  0xf8   : > { %2577 = vmatpush3.bf16.msra.mxu1 %v2772_v7  ;;  %2558 = vmatprep.subr.bf16.mxu0 %v2773_v8 }
  0xf9   : > { %2578 = vmatprep.subr.bf16.mxu1 %v2774_v9  ;;  %2572 = vmatprep.mubr.bf16.mxu0 %v3184_v15 }
  0xfa   : > { %2592 = vmatprep.mubr.bf16.mxu1 %v3184_v15 }
  0xfb   : > { %2559 = vmatpush3.bf16.msra.mxu0 %v2773_v8 }
  0xfc   : > { %2579 = vmatpush3.bf16.msra.mxu1 %v2774_v9  ;;  %2560 = vmatprep.subr.bf16.mxu0 %v2775_v10 }
  0xfd   : > { %2580 = vmatprep.subr.bf16.mxu1 %v2776_v11 }
  0xff   : > { %2561 = vmatpush3.bf16.msra.mxu0 %v2775_v10 }
 0x100   : > { %2581 = vmatpush3.bf16.msra.mxu1 %v2776_v11  ;;  %2562 = vmatprep.subr.bf16.mxu0 %v2777_v12 }
 0x101   : > { %2582 = vmatprep.subr.bf16.mxu1 %v2778_v13 }
 0x103   : > { %2563 = vmatpush3.bf16.msra.mxu0 %v2777_v12 }
 0x104   : > { %2583 = vmatpush3.bf16.msra.mxu1 %v2778_v13  ;;  %2564 = vmatprep.subr.bf16.mxu0 %v2779_v14 }
 0x105   : > { %2584 = vmatprep.subr.bf16.mxu1 %v2780_v16 }
 0x107   : > { %2565 = vmatpush3.bf16.msra.mxu0 %v2779_v14 }
 0x108   : > { %2585 = vmatpush3.bf16.msra.mxu1 %v2780_v16  ;;  %2566 = vmatprep.subr.bf16.mxu0 %v2781_v17 }
 0x109   : > { %2586 = vmatprep.subr.bf16.mxu1 %v2782_v18 }
 0x10b   : > { %2567 = vmatpush3.bf16.msra.mxu0 %v2781_v17 }
 0x10c   : > { %2587 = vmatpush3.bf16.msra.mxu1 %v2782_v18  ;;  %2568 = vmatprep.subr.bf16.mxu0 %v2783_v19 }
 0x10d   : > { %2588 = vmatprep.subr.bf16.mxu1 %v2784_v20 }
 0x10f   : > { %2569 = vmatpush3.bf16.msra.mxu0 %v2783_v19 }
 0x110   : > { %2589 = vmatpush3.bf16.msra.mxu1 %v2784_v20  ;;  %2570 = vmatprep.subr.bf16.mxu0 %v2785_v21 }
 0x111   : > { %2590 = vmatprep.subr.bf16.mxu1 %v2786_v22 }
 0x113   : > { %2571 = vmatpush3.bf16.msra.mxu0 %v2785_v21 }
 0x114   : > { %2591 = vmatpush3.bf16.msra.mxu1 %v2786_v22  ;;  %2596 = vmatprep.subr.bf16.mxu0 %v2787_v24 }
 0x116   : > { %2573 = vmatmul.mubr.bf16.vlgmr.msra.gmra.mrb[16].mxu0 %v3197_v23 }
 0x117   : > { %2593 = vmatmul.mubr.bf16.vlgmr.msra.gmra.mrb[16].mxu1 %v3197_v23  ;;  %2597 = vmatpush3.bf16.msra.mxu0 %v2787_v24 }
 0x118   : > { %2598 = vmatprep.subr.bf16.mxu0 %v2788_v25  ;;  %2612 = vmatprep.mubr.bf16.mxu0 %v3184_v15 }
 0x11b   : > { %2599 = vmatpush3.bf16.msra.mxu0 %v2788_v25 }
 0x11c   : > { %2600 = vmatprep.subr.bf16.mxu0 %v2789_v26 }
 0x11f   : > { %2601 = vmatpush3.bf16.msra.mxu0 %v2789_v26 }
 0x120   : > { %2602 = vmatprep.subr.bf16.mxu0 %v2790_v27 }
 0x123   : > { %2603 = vmatpush3.bf16.msra.mxu0 %v2790_v27 }
 0x124   : > { %2604 = vmatprep.subr.bf16.mxu0 %v2791_v28 }
 0x127   : > { %2605 = vmatpush3.bf16.msra.mxu0 %v2791_v28 }
 0x128   : > { %2606 = vmatprep.subr.bf16.mxu0 %v2792_v29 }
 0x12b   : > { %2607 = vmatpush3.bf16.msra.mxu0 %v2792_v29 }
 0x12c   : > { %2608 = vmatprep.subr.bf16.mxu0 %v2793_v30 }
 0x12f   : > { %2609 = vmatpush3.bf16.msra.mxu0 %v2793_v30 }
 0x130   : > { %2610 = vmatprep.subr.bf16.mxu0 %v2794_v31 }
 0x133   : > { %2611 = vmatpush3.bf16.msra.mxu0 %v2794_v31 }
 0x136   : > { %2613 = vmatmul.mubr.bf16.vlgmr.msra.gmra.mrb[20].mxu0 %v3197_v23 }
 0x169   : > { %v2414_v15 = vpop.f32.mrb[0].mxu0 }
 0x16a   : > { %v2434_v32 = vpop.f32.mrb[0].mxu1  ;;  %v539_v33 = vpop.f32.mrb[1].mxu0 }
 0x16b   : > { %v653_v34 = vpop.f32.mrb[1].mxu1  ;;  %v2415_v35 = vpop.f32.mrb[2].mxu0  ;;  %v674_v36 = vrot.slane %v2434_v32, 1 }
 0x16c   : > { %v671_v37 = vrot.slane %v653_v34, 1  ;;  %v2435_v38 = vpop.f32.mrb[2].mxu1  ;;  %v542_v39 = vpop.f32.mrb[3].mxu0 }
 0x16d   : > { %v656_v40 = vpop.f32.mrb[3].mxu1 }
 0x16e   : > { %v672_v41 = vrot.slane %v656_v40, 1 }
 0x170   : > { %v673_v42 = vsel %vm670_vm0, %v671_v37, %v672_v41  ;;  %v675_v43 = vsel %vm670_vm0, %v672_v41, %v674_v36 }
 0x171   : > { %v678_v44 = vadd.f32 %v673_v42, %v539_v33  ;;  %v679_v45 = vadd.f32 %v675_v43, %v542_v39 }
 0x189   : > { %v2454_v46 = vpop.f32.mrb[4].mxu0 }
 0x18a   : > { %v779_v23 = vpop.f32.mrb[5].mxu0  ;;  %v2474_v47 = vpop.f32.mrb[4].mxu1  ;;  %v800_v54 = vrot.slane %v2454_v46, 2 }
 0x18b   : > { %v2455_v48 = vpop.f32.mrb[6].mxu0  ;;  %v905_v49 = vpop.f32.mrb[5].mxu1  ;;  %v926_v50 = vrot.slane %v2474_v47, 3  ;;  %v797_v55 = vrot.slane %v779_v23, 2 }
 0x18c   : > { %v782_v51 = vpop.f32.mrb[7].mxu0  ;;  %v923_v52 = vrot.slane %v905_v49, 3  ;;  %v2475_v53 = vpop.f32.mrb[6].mxu1 }
 0x18d   : > { %v798_v56 = vrot.slane %v782_v51, 2  ;;  %v908_v57 = vpop.f32.mrb[7].mxu1 }
 0x18e   : > { %v924_v58 = vrot.slane %v908_v57, 3 }
 0x18f   : > { %v799_v59 = vsel %vm796_vm1, %v797_v55, %v798_v56  ;;  %v801_v60 = vsel %vm796_vm1, %v798_v56, %v800_v54 }
 0x190   : > { %v804_v61 = vadd.f32 %v799_v59, %v678_v44  ;;  %v805_v62 = vadd.f32 %v801_v60, %v679_v45  ;;  %v925_v63 = vsel %vm922_vm2, %v923_v52, %v924_v58  ;;  %v927_v0 = vsel %vm922_vm2, %v924_v58, %v926_v50 }
 0x192   : > { %v930_v1 = vadd.f32 %v925_v63, %v804_v61  ;;  %v931_v2 = vadd.f32 %v927_v0, %v805_v62 }
 0x1a9   : > { %v2494_v3 = vpop.f32.mrb[8].mxu0 }
 0x1aa   : > { %v1031_v4 = vpop.f32.mrb[9].mxu0  ;;  %v2514_v5 = vpop.f32.mrb[8].mxu1  ;;  %v1052_v12 = vrot.slane %v2494_v3, 4 }
 0x1ab   : > { %v2495_v6 = vpop.f32.mrb[10].mxu0  ;;  %v1157_v7 = vpop.f32.mrb[9].mxu1  ;;  %v1178_v8 = vrot.slane %v2514_v5, 5  ;;  %v1049_v13 = vrot.slane %v1031_v4, 4 }
 0x1ac   : > { %v1034_v9 = vpop.f32.mrb[11].mxu0  ;;  %v1175_v10 = vrot.slane %v1157_v7, 5  ;;  %v2515_v11 = vpop.f32.mrb[10].mxu1 }
 0x1ad   : > { %v1050_v14 = vrot.slane %v1034_v9, 4  ;;  %v1160_v16 = vpop.f32.mrb[11].mxu1 }
 0x1ae   : > { %v1176_v17 = vrot.slane %v1160_v16, 5 }
 0x1af   : > { %v1051_v18 = vsel %vm1048_vm3, %v1049_v13, %v1050_v14  ;;  %v1053_v19 = vsel %vm1048_vm3, %v1050_v14, %v1052_v12 }
 0x1b0   : > { %v1056_v20 = vadd.f32 %v1051_v18, %v930_v1  ;;  %v1057_v21 = vadd.f32 %v1053_v19, %v931_v2  ;;  %v1177_v22 = vsel %vm1174_vm4, %v1175_v10, %v1176_v17  ;;  %v1179_v24 = vsel %vm1174_vm4, %v1176_v17, %v1178_v8  ;;  %v2280_v8 = vld [vmem:[%s384_s25] ss:$0 sm:$0xff] }
 0x1b2   : > { %v1182_v25 = vadd.f32 %v1177_v22, %v1056_v20  ;;  %v1183_v26 = vadd.f32 %v1179_v24, %v1057_v21 }
 0x1c9   : > { %v2534_v27 = vpop.f32.mrb[12].mxu0 }
 0x1ca   : > { %v1283_v28 = vpop.f32.mrb[13].mxu0  ;;  %v2554_v29 = vpop.f32.mrb[12].mxu1  ;;  %v1304_v35 = vrot.slane %v2534_v27, 6 }
 0x1cb   : > { %v2535_v30 = vpop.f32.mrb[14].mxu0  ;;  %v1409_v31 = vpop.f32.mrb[13].mxu1  ;;  %v1430_v15 = vrot.slane %v2554_v29, 7  ;;  %v1301_v36 = vrot.slane %v1283_v28, 6 }
 0x1cc   : > { %v1286_v32 = vpop.f32.mrb[15].mxu0  ;;  %v1427_v33 = vrot.slane %v1409_v31, 7  ;;  %v2555_v34 = vpop.f32.mrb[14].mxu1 }
 0x1cd   : > { %v1302_v37 = vrot.slane %v1286_v32, 6  ;;  %v1412_v38 = vpop.f32.mrb[15].mxu1 }
 0x1ce   : > { %v1428_v39 = vrot.slane %v1412_v38, 7 }
 0x1cf   : > { %v1303_v40 = vsel %vm1300_vm5, %v1301_v36, %v1302_v37  ;;  %v1305_v41 = vsel %vm1300_vm5, %v1302_v37, %v1304_v35 }
 0x1d0   : > { %v1309_v42 = vadd.f32 %v1305_v41, %v1183_v26  ;;  %v1431_v43 = vsel %vm1426_vm6, %v1428_v39, %v1430_v15  ;;  %v1308_v44 = vadd.f32 %v1303_v40, %v1182_v25  ;;  %v1429_v45 = vsel %vm1426_vm6, %v1427_v33, %v1428_v39 }
 0x1d2   : > { %v1435_v46 = vadd.f32 %v1431_v43, %v1309_v42  ;;  %v1434_v23 = vadd.f32 %v1429_v45, %v1308_v44 }
 0x1e9   : > { %v2574_v47 = vpop.f32.mrb[16].mxu0 }
 0x1ea   : > { %v1549_v48 = vadd.f32 %v2574_v47, %v1435_v46  ;;  %v2594_v49 = vpop.f32.mrb[16].mxu1  ;;  %v1535_v50 = vpop.f32.mrb[17].mxu0 }
 0x1eb   : > { %v1667_v51 = vrot.slane %v2594_v49, 1  ;;  %v1649_v52 = vpop.f32.mrb[17].mxu1  ;;  %v2575_v53 = vpop.f32.mrb[18].mxu0 }
 0x1ec   : > { %v2595_v54 = vpop.f32.mrb[18].mxu1  ;;  %v1537_v55 = vpop.f32.mrb[19].mxu0 }
 0x1ed   : > { %v1669_v56 = vrot.slane %v2595_v54, 1  ;;  %v1548_v57 = vadd.f32 %v1537_v55, %v1434_v23  ;;  %v1651_v58 = vpop.f32.mrb[19].mxu1 }
 0x1ee   : > { %v1666_v59 = vrot.slane %v1651_v58, 1 }
 0x1ef   : > { %v1670_v60 = vsel %vm670_vm0, %v1667_v51, %v1669_v56 }
 0x1f0   : > { %v1674_v61 = vadd.f32 %v1670_v60, %v1549_v48  ;;  %v1668_v62 = vsel %vm670_vm0, %v1666_v59, %v1667_v51 }
 0x1f1   : > { %v1673_v63 = vadd.f32 %v1668_v62, %v1548_v57 }
 0x209   : > { %v2614_v0 = vpop.f32.mrb[20].mxu0 }
 0x20a   : > { %v1774_v1 = vpop.f32.mrb[21].mxu0  ;;  %v1792_v3 = vrot.slane %v2614_v0, 2 }
 0x20b   : > { %v2615_v2 = vpop.f32.mrb[22].mxu0 }
 0x20c   : > { %v1794_v4 = vrot.slane %v2615_v2, 2  ;;  %v1776_v5 = vpop.f32.mrb[23].mxu0 }
 0x20d   : > { %v1791_v6 = vrot.slane %v1776_v5, 2 }
 0x20e   : > { %v1795_v7 = vsel %vm796_vm1, %v1792_v3, %v1794_v4 }
 0x20f   : > { %v1799_v9 = vadd.f32 %v1795_v7, %v1674_v61  ;;  %v1793_v10 = vsel %vm796_vm1, %v1791_v6, %v1792_v3 }
 0x210   : > { %v1798_v11 = vadd.f32 %v1793_v10, %v1673_v63 }
 0x211   : > { %v1808_v12 = vadd.f32 %v2280_v8, %v1799_v9  ;;  %1823 = sbr.rel (!%p3356_p12) target bundleno = 544 (0x220), region = 130 }
 0x212   : > { %v1807_v13 = vadd.f32 %v2280_v8, %v1798_v11 }
 0x213   : > { %vm1810_vm7 = vcmp.ge.f32.partialorder %v1808_v12, 0.0  ;;  %v1812_v14 = vmul.f32 0.1, %v1808_v12 }
 0x214   : > { %vm1809_vm8 = vcmp.ge.f32.partialorder %v1807_v13, 0.0  ;;  %v1811_v16 = vmul.f32 0.1, %v1807_v13 }
 0x215   : > { %v1814_v17 = vsel %vm1810_vm7, %v1808_v12, %v1812_v14 }
 0x216   : > { %1816 = vst [vmem:[%s419_s28 + $0x8] sm:$0xff] %v1814_v17  ;;  %v1813_v18 = vsel %vm1809_vm8, %v1807_v13, %v1811_v16 }
 0x217   : > { %1815 = vst [vmem:[%s419_s28] sm:$0xff] %v1813_v18 }
 0x21d   : > { %v1862_v20 = vld [vmem:[%s419_s28 + $0x8] sm:$0xff] }
 0x21e   : > { %v1860_v19 = vld [vmem:[%s419_s28] sm:$0xff]  ;;  %1863 = vst [vmem:[%s1830_s0 + $0x40] sm:$0xff] %v1862_v20 }
 0x21f   : > { %1861 = vst [vmem:[%s1830_s0] sm:$0xff] %v1860_v19 }
 0x220 PF: > { %s20_s24 = sadd.s32 1, %s2937_s24   ;;  %s3357_s21 = sld [smem:[#allocation13_spill]] }
 0x221   : > { %p17_p11 = scmp.ge.s32.totalorder %s20_s24, 18   ;;  %s3358_s12 = sld [smem:[#allocation11_spill]] }
 0x222   : > { %s3359_s8 = sld [smem:[#allocation12_spill]]  ;;  %s3360_s15 = smov %s2905_s16 }
 0x223   : > { %s3361_s16 = smov %s2909_s17  ;;  %s3362_s17 = smov %s3041_s6 }
 0x224   : > { %s3363_s18 = smov %s2917_s19  ;;  %s3365_s20 = smov %s2929_s22 }
 0x225   :  { %19 = sbr.rel (!%p17_p11) target bundleno = 10 (0xa), region = 235 }
 0x226   : > { %s3364_s19 = smov %s3357_s21  ;;  %s3366_s21 = smov %s2933_s23 }
 0x227   : > { %s3367_s22 = smov %s3358_s12 }
 0x228   : > { %s3368_s23 = smov %s3359_s8 }
 0x22c   :  { %1879 = vsyncpa [#allocation5], 1 }
 0x22d   :  { %1881 = vsyncpa [#allocation5 + $0x1], 1 }
 0x22e   :  { %1882 = vsyncpa [#allocation7], 1 }
 0x22f   :  { %1884 = vsyncpa [#allocation7 + $0x1], 1 }

// kernel: scale_discriminator_forward.13
= control target key start
LH: loop header
LB: loop body
LE: loop exit
PB: predicated region body
PF: predicated region fallthrough
CT: control target
= control target key end

     0   :  { %s1129_s17 = smov 0   ;;  %s1131_s18 = smov 0   ;;  %s1460_s0 = inlined_call_operand.vmem [shape: bf16[2,32,1024], index: 0, kind: input, shape index: {}, may-alias: {0,1}]   ;;  %s1461_s1 = inlined_call_operand.vmem [shape: bf16[2,32,1024], index: 1, kind: input, shape index: {}, may-alias: {0,1}]   ;;  %s1462_s2 = inlined_call_operand.vmem [shape: bf16[1,3,1,1024], index: 2, kind: input, shape index: {}]   ;;  %s1463_s3 = inlined_call_operand.<no memory space> [shape: f32[1,1,1], index: 3, kind: input, shape index: {}]   ;;  %s1464_s4 = inlined_call_operand.vmem [shape: f32[2,16,1], index: 4, kind: output, shape index: {}]  }
   0x1   :  { %v9_v0 = vstv %s1463_s3  ;;  %s1133_s19 = smov 0  }
   0x2   :  { %10 = vst [vmem:[#allocation2] sm:$0x1] %v9_v0 }
   0x3 LB: > { %s35_s3 = sadd.s32 1, %s1095_s18  ;;  %p1020_p0 = scmp.ge.s32.totalorder %s1099_s19, 1  ;;  %s1099_s19 = sphi %s1133_s19, %s16_s19   ;;  %s1095_s18 = sphi %s1131_s18, %s1485_s18   ;;  %s1091_s17 = sphi %s1129_s17, %s1484_s17  }
   0x4   : > { %p37_p1 = scmp.ge.s32.totalorder %s35_s3, 2  ;;  %p234_p2 = scmp.lt.s32.totalorder %s1099_s19, 3 }
   0x6   : > { %s1487_s3 = smov (%p37_p1, %s35_s3), 0  ;;  %p235_p3 = pnand %p1020_p0, %p234_p2 }
   0x8   : > { %238 = sbr.rel (%p235_p3) target bundleno = 231 (0xe7), region = 36 }
   0xf   : > { %p291_p4 = scmp.lt.s32.totalorder %s1091_s17, 1  ;;  %v459_v1 = vlaneseq  ;;  %v1044_v2 = vld [vmem:[%s1462_s2 + $0x10] sm:$0xff]  ;;  %v1043_v6 = vld [vmem:[%s1462_s2 + $0x8] sm:$0xff]  ;;  %vm699_vm0 = vcmask 1046528   ;;  %vm841_vm1 = vcmask 1045504   ;;  %vm860_vm2 = vcmask 7168  }
  0x10   : > { %v711_v4 = vunpack.c.l.bf16 %v1044_v2  ;;  %v712_v5 = vunpack.c.h.bf16 %v1044_v2  ;;  %v569_v15 = vunpack.c.l.bf16 %v1043_v6  ;;  %v1170_v16 = vunpack.c.h.bf16 %v1043_v6 }
  0x11   : > { %s1489_s17 = smov (!%p291_p4, %s1091_s17), 1  ;;  %v460_v3 = vshrl.u32 %v459_v1, 7 }
  0x12   : > { %s1048_s24 = sshll.u32 %s1489_s17, 7  ;;  %s1051_s8 = sshll.u32 %s1489_s17, 4 }
  0x13   : > { %v1156_v7 = vsub.s32 0, %v460_v3  ;;  %v1158_v8 = vsub.s32 2, %v460_v3  ;;  %v1160_v9 = vsub.s32 4, %v460_v3  ;;  %v1162_v10 = vsub.s32 6, %v460_v3  ;;  %s299_s27 = scalar_lea.vmem %s1460_s0, %s1048_s24  ;;  %s1050_s28 = sadd.s32 64, %s1048_s24 }
  0x14   : > { %v334_v11 = vld [vmem:[%s299_s27] sm:$0xff]  ;;  %v335_v12 = vld [vmem:[%s299_s27 + $0x8] sm:$0xff]  ;;  %v336_v13 = vld [vmem:[%s299_s27 + $0x10] sm:$0xff]  ;;  %s1261_s5 = scalar_lea.vmem %s1461_s1, %s1050_s28  ;;  %s332_s11 = scalar_lea.vmem %s1464_s4, %s1051_s8 }
  0x15   : > { %v718_v14 = vrot.slane %v711_v4, %v1156_v7  ;;  %v337_v17 = vld [vmem:[%s299_s27 + $0x18] sm:$0xff]  ;;  %v338_v18 = vld [vmem:[%s299_s27 + $0x20] sm:$0xff]  ;;  %v339_v19 = vld [vmem:[%s299_s27 + $0x28] sm:$0xff]  ;;  %v722_v20 = vrot.slane %v711_v4, %v1158_v8  ;;  %v726_v21 = vrot.slane %v711_v4, %v1160_v9  ;;  %v730_v22 = vrot.slane %v711_v4, %v1162_v10 }
  0x16   : > { %v734_v23 = vrot.slane %v712_v5, %v1156_v7  ;;  %v340_v24 = vld [vmem:[%s299_s27 + $0x30] sm:$0xff]  ;;  %v341_v25 = vld [vmem:[%s299_s27 + $0x38] sm:$0xff]  ;;  %v1176_v26 = vcombine.low %v334_v11, %v338_v18  ;;  %v1178_v27 = vcombine.high %v334_v11, %v338_v18  ;;  %v1180_v28 = vcombine.low %v335_v12, %v339_v19 }
  0x17   : > { %v1182_v29 = vcombine.high %v335_v12, %v339_v19  ;;  %v1184_v30 = vcombine.low %v336_v13, %v340_v24  ;;  %v1186_v31 = vcombine.high %v336_v13, %v340_v24  ;;  %v1188_v32 = vcombine.low %v337_v17, %v341_v25  ;;  %v343_v19 = vld [vmem:[%s1261_s5 + $0x8] sm:$0xff] }
  0x18   : > { %v1190_v33 = vcombine.high %v337_v17, %v341_v25  ;;  %v1193_v34 = vunpack.c.l.bf16 %v1176_v26  ;;  %v1196_v35 = vunpack.c.l.bf16 %v1178_v27  ;;  %v1199_v36 = vunpack.c.l.bf16 %v1180_v28 }
  0x19   : > { %v738_v37 = vrot.slane %v712_v5, %v1158_v8  ;;  %v1203_v38 = vunpack.c.l.bf16 %v1182_v29  ;;  %v1206_v39 = vunpack.c.l.bf16 %v1184_v30  ;;  %v742_v40 = vrot.slane %v712_v5, %v1160_v9 }
  0x1a   : > { %1472 = vst [vmem:[#allocation3_spill] sm:$0xff] %v1193_v34  ;;  %1473 = vst [vmem:[#allocation4_spill] sm:$0xff] %v1196_v35  ;;  %v746_v41 = vrot.slane %v712_v5, %v1162_v10  ;;  %v1211_v42 = vrot.slane %v718_v14, %v1156_v7  ;;  %v1214_v43 = vrot.slane %v722_v20, %v1156_v7  ;;  %v1223_v46 = vunpack.c.l.bf16 %v1186_v31  ;;  %v342_v14 = vld [vmem:[%s1261_s5] sm:$0xff] }
  0x1b   : > { %1474 = vst [vmem:[#allocation5_spill] sm:$0xff] %v1199_v36  ;;  %1475 = vst [vmem:[#allocation6_spill] sm:$0xff] %v1203_v38  ;;  %v1217_v44 = vrot.slane %v726_v21, %v1156_v7  ;;  %v1220_v45 = vrot.slane %v730_v22, %v1156_v7  ;;  %v1226_v47 = vunpack.c.l.bf16 %v1188_v32  ;;  %v1229_v48 = vunpack.c.l.bf16 %v1190_v33  ;;  %v346_v20 = vld [vmem:[%s1261_s5 + $0x20] sm:$0xff]  ;;  %v347_v21 = vld [vmem:[%s1261_s5 + $0x28] sm:$0xff] }
  0x1c   : > { %1476 = vst [vmem:[#allocation7_spill] sm:$0xff] %v1206_v39  ;;  %v1232_v49 = vrot.slane %v734_v23, %v1156_v7  ;;  %v1237_v50 = vrot.slane %v738_v37, %v1156_v7  ;;  %v787_v51 = vmul.f32 %v1211_v42, %v1193_v34  ;;  %v788_v52 = vmul.f32 %v1214_v43, %v1196_v35  ;;  %v344_v37 = vld [vmem:[%s1261_s5 + $0x10] sm:$0xff] }
  0x1d   : > { %v789_v53 = vmul.f32 %v1217_v44, %v1199_v36  ;;  %v1246_v54 = vrot.slane %v742_v40, %v1156_v7  ;;  %v1249_v55 = vrot.slane %v746_v41, %v1156_v7  ;;  %v790_v56 = vmul.f32 %v1220_v45, %v1203_v38  ;;  %v348_v40 = vld [vmem:[%s1261_s5 + $0x30] sm:$0xff] }
  0x1e   : > { %v791_v57 = vmul.f32 %v1232_v49, %v1206_v39  ;;  %v811_v58 = vadd.f32 %v788_v52, %v787_v51  ;;  %v576_v59 = vrot.slane %v569_v15, %v1156_v7  ;;  %v580_v60 = vrot.slane %v569_v15, %v1158_v8 }
  0x1f   : > { %1477 = vst [vmem:[#allocation8_spill] sm:$0xff] %v1249_v55  ;;  %v584_v61 = vrot.slane %v569_v15, %v1160_v9  ;;  %v588_v62 = vrot.slane %v569_v15, %v1162_v10  ;;  %v592_v63 = vrot.slane %v1170_v16, %v1156_v7  ;;  %v596_v0 = vrot.slane %v1170_v16, %v1158_v8 }
  0x20   : > { %v600_v1 = vrot.slane %v1170_v16, %v1160_v9  ;;  %v812_v2 = vadd.f32 %v811_v58, %v789_v53  ;;  %v604_v3 = vrot.slane %v1170_v16, %v1162_v10  ;;  %v1273_v4 = vrot.slane %v576_v59, %v1156_v7  ;;  %v349_v58 = vld [vmem:[%s1261_s5 + $0x38] sm:$0xff] }
  0x21   : > { %v1276_v5 = vrot.slane %v580_v60, %v1156_v7  ;;  %v792_v6 = vmul.f32 %v1237_v50, %v1223_v46  ;;  %v1281_v11 = vrot.slane %v584_v61, %v1156_v7  ;;  %v1284_v12 = vrot.slane %v588_v62, %v1156_v7 }
  0x22   : > { %v1287_v13 = vrot.slane %v592_v63, %v1156_v7  ;;  %v793_v15 = vmul.f32 %v1246_v54, %v1226_v47  ;;  %v794_v16 = vmul.f32 %v1249_v55, %v1229_v48  ;;  %v813_v17 = vadd.f32 %v812_v2, %v790_v56  ;;  %v345_v56 = vld [vmem:[%s1261_s5 + $0x18] sm:$0xff] }
  0x23   : > { %v645_v18 = vmul.f32 %v1273_v4, %v1193_v34  ;;  %v1300_v22 = vrot.slane %v596_v0, %v1156_v7  ;;  %v1303_v23 = vrot.slane %v600_v1, %v1156_v7  ;;  %v646_v24 = vmul.f32 %v1276_v5, %v1196_v35 }
  0x24   : > { %v647_v25 = vmul.f32 %v1281_v11, %v1199_v36  ;;  %v814_v41 = vadd.f32 %v813_v17, %v791_v57  ;;  %v1312_v51 = vrot.slane %v604_v3, %v1156_v7  ;;  %v648_v52 = vmul.f32 %v1284_v12, %v1203_v38  ;;  %v454_v57 = vld [vmem:[%s1462_s2] sm:$0xff] }
  0x25   : > { %v649_v53 = vmul.f32 %v1287_v13, %v1206_v39  ;;  %v669_v59 = vadd.f32 %v646_v24, %v645_v18  ;;  %v1035_v60 = vcombine.low %v342_v14, %v346_v20  ;;  %v1036_v61 = vcombine.high %v342_v14, %v346_v20 }
  0x26   : > { %v1037_v62 = vcombine.low %v343_v19, %v347_v21  ;;  %v815_v63 = vadd.f32 %v814_v41, %v792_v6  ;;  %v1038_v0 = vcombine.high %v343_v19, %v347_v21  ;;  %v1039_v1 = vcombine.low %v344_v37, %v348_v40 }
  0x27   : > { %v1040_v2 = vcombine.high %v344_v37, %v348_v40  ;;  %v670_v3 = vadd.f32 %v669_v59, %v647_v25  ;;  %v1041_v17 = vcombine.low %v345_v56, %v349_v58  ;;  %v1042_v38 = vcombine.high %v345_v56, %v349_v58 }
  0x28   : > { %v446_v36 = vunpack.c.l.bf16 %v1035_v60  ;;  %v816_v35 = vadd.f32 %v815_v63, %v793_v15  ;;  %v447_v39 = vunpack.c.l.bf16 %v1036_v61  ;;  %v448_v34 = vunpack.c.l.bf16 %v1037_v62 }
  0x29   : > { %v449_v55 = vunpack.c.l.bf16 %v1038_v0  ;;  %v650_v14 = vmul.f32 %v1300_v22, %v1223_v46  ;;  %v671_v18 = vadd.f32 %v670_v3, %v648_v52  ;;  %v450_v6 = vunpack.c.l.bf16 %v1039_v1 }
  0x2a   : > { %v1325_v19 = vunpack.c.l.bf16 %v454_v57  ;;  %v817_v20 = vadd.f32 %v816_v35, %v794_v16  ;;  %v451_v21 = vunpack.c.l.bf16 %v1040_v2  ;;  %v661_v24 = vmul.f32 %v1273_v4, %v446_v36 }
  0x2b   : > { %v662_v25 = vmul.f32 %v1276_v5, %v447_v39  ;;  %v651_v37 = vmul.f32 %v1303_v23, %v1226_v47  ;;  %v652_v15 = vmul.f32 %v1312_v51, %v1229_v48  ;;  %v672_v40 = vadd.f32 %v671_v18, %v649_v53 }
  0x2c   : > { %v663_v41 = vmul.f32 %v1281_v11, %v448_v34  ;;  %818 = vadd.xlane.f32.xlu1 %v817_v20  ;;  %v452_v52 = vunpack.c.l.bf16 %v1041_v17  ;;  %v453_v56 = vunpack.c.l.bf16 %v1042_v38  ;;  %v664_v58 = vmul.f32 %v1284_v12, %v449_v55 }
  0x2d   : > { %v687_v35 = vadd.f32 %v662_v25, %v661_v24  ;;  %v673_v16 = vadd.f32 %v672_v40, %v650_v14  ;;  %v1336_v59 = vunpack.c.h.bf16 %v1176_v26  ;;  %v1339_v60 = vunpack.c.h.bf16 %v1178_v27 }
  0x2e   : > { %v1342_v61 = vunpack.c.h.bf16 %v1180_v28  ;;  %v665_v53 = vmul.f32 %v1287_v13, %v450_v6  ;;  %v666_v62 = vmul.f32 %v1300_v22, %v451_v21  ;;  %v1347_v38 = vunpack.c.h.bf16 %v1182_v29 }
  0x2f   : > { %v688_v63 = vadd.f32 %v687_v35, %v663_v41  ;;  %v674_v0 = vadd.f32 %v673_v16, %v651_v37  ;;  %v1350_v1 = vunpack.c.h.bf16 %v1184_v30  ;;  %v1353_v26 = vunpack.c.h.bf16 %v1186_v31 }
  0x30   : > { %v653_v27 = vmul.f32 %v1273_v4, %v1336_v59  ;;  %v1358_v2 = vunpack.c.h.bf16 %v1188_v32  ;;  %v654_v3 = vmul.f32 %v1276_v5, %v1339_v60  ;;  %v655_v29 = vmul.f32 %v1281_v11, %v1342_v61 }
  0x31   : > { %v689_v28 = vadd.f32 %v688_v63, %v664_v58  ;;  %v675_v17 = vadd.f32 %v674_v0, %v652_v15  ;;  %v667_v30 = vmul.f32 %v1303_v23, %v452_v52  ;;  %v1366_v14 = vunpack.c.h.bf16 %v1190_v33  ;;  %v1478_v0 = vld [vmem:[#allocation8_spill] sm:$0xff] }
  0x32   : > { %v1368_v31 = vunpack.c.h.bf16 %v454_v57  ;;  %v656_v4 = vmul.f32 %v1284_v12, %v1347_v38  ;;  %v678_v32 = vadd.f32 %v654_v3, %v653_v27  ;;  %v803_v20 = vmul.f32 %v1211_v42, %v446_v36 }
  0x33   : > { %v690_v18 = vadd.f32 %v689_v28, %v665_v53  ;;  %676 = vadd.xlane.f32.xlu0 %v675_v17  ;;  %v668_v5 = vmul.f32 %v1312_v51, %v453_v56  ;;  %v657_v11 = vmul.f32 %v1287_v13, %v1350_v1  ;;  %v804_v24 = vmul.f32 %v1214_v43, %v447_v39 }
  0x34   : > { %v805_v33 = vmul.f32 %v1217_v44, %v448_v34  ;;  %v658_v57 = vmul.f32 %v1300_v22, %v1353_v26  ;;  %v659_v12 = vmul.f32 %v1303_v23, %v1358_v2  ;;  %v679_v37 = vadd.f32 %v678_v32, %v655_v29 }
  0x35   : > { %v691_v25 = vadd.f32 %v690_v18, %v666_v62  ;;  %v806_v36 = vmul.f32 %v1220_v45, %v449_v55  ;;  %v829_v15 = vadd.f32 %v804_v24, %v803_v20  ;;  %v795_v40 = vmul.f32 %v1211_v42, %v1336_v59 }
  0x36   : > { %v796_v13 = vmul.f32 %v1214_v43, %v1339_v60  ;;  %v660_v34 = vmul.f32 %v1312_v51, %v1366_v14  ;;  %v680_v41 = vadd.f32 %v679_v37, %v656_v4  ;;  %v797_v22 = vmul.f32 %v1217_v44, %v1342_v61 }
  0x37   : > { %v692_v39 = vadd.f32 %v691_v25, %v667_v30  ;;  %v807_v23 = vmul.f32 %v1232_v49, %v450_v6  ;;  %v808_v58 = vmul.f32 %v1237_v50, %v451_v21  ;;  %v809_v55 = vmul.f32 %v1246_v54, %v452_v52 }
  0x38   : > { %v830_v35 = vadd.f32 %v829_v15, %v805_v33  ;;  %v681_v42 = vadd.f32 %v680_v41, %v657_v11  ;;  %v798_v43 = vmul.f32 %v1220_v45, %v1347_v38  ;;  %v820_v53 = vadd.f32 %v796_v13, %v795_v40 }
  0x39   : > { %v693_v16 = vadd.f32 %v692_v39, %v668_v5  ;;  %v462_v51 = vrot.slane %v1325_v19, %v1156_v7  ;;  %v466_v44 = vrot.slane %v1325_v19, %v1158_v8  ;;  %v470_v6 = vrot.slane %v1325_v19, %v1160_v9 }
  0x3a   : > { %v831_v62 = vadd.f32 %v830_v35, %v806_v36  ;;  %v682_v21 = vadd.f32 %v681_v42, %v658_v57  ;;  %v799_v52 = vmul.f32 %v1232_v49, %v1350_v1  ;;  %v821_v63 = vadd.f32 %v820_v53, %v797_v22 }
  0x3b   : > { %694 = vadd.xlane.f32.xlu1 %v693_v16  ;;  %v474_v45 = vrot.slane %v1325_v19, %v1162_v10  ;;  %v810_v27 = vmul.f32 %v1478_v0, %v453_v56  ;;  %v800_v3 = vmul.f32 %v1237_v50, %v1353_v26  ;;  %v478_v29 = vrot.slane %v1368_v31, %v1156_v7 }
  0x3c   : > { %v832_v28 = vadd.f32 %v831_v62, %v807_v23  ;;  %v683_v17 = vadd.f32 %v682_v21, %v659_v12  ;;  %v822_v30 = vadd.f32 %v821_v63, %v798_v43  ;;  %v502_v18 = vrot.slane %v462_v51, %v1156_v7  ;;  %v1483_v43 = vld [vmem:[#allocation7_spill] sm:$0xff] }
  0x3d   : > { %v506_v4 = vrot.slane %v466_v44, %v1156_v7  ;;  %v482_v32 = vrot.slane %v1368_v31, %v1158_v8  ;;  %v510_v19 = vrot.slane %v470_v6, %v1156_v7  ;;  %v514_v56 = vrot.slane %v474_v45, %v1156_v7 }
  0x3e   : > { %v833_v49 = vadd.f32 %v832_v28, %v808_v58  ;;  %v684_v20 = vadd.f32 %v683_v17, %v660_v34  ;;  %v801_v50 = vmul.f32 %v1246_v54, %v1358_v2  ;;  %v823_v5 = vadd.f32 %v822_v30, %v799_v52  ;;  %v1480_v34 = vld [vmem:[#allocation4_spill] sm:$0xff] }
  0x3f   : > { %v802_v24 = vmul.f32 %v1478_v0, %v1366_v14  ;;  %v539_v33 = vmul.f32 %v502_v18, %v1336_v59  ;;  %v540_v25 = vmul.f32 %v506_v4, %v1339_v60  ;;  %v486_v8 = vrot.slane %v1368_v31, %v1160_v9  ;;  %v1479_v60 = vld [vmem:[#allocation3_spill] sm:$0xff]  ;;  %v1481_v9 = vld [vmem:[#allocation5_spill] sm:$0xff] }
  0x40   : > { %v834_v11 = vadd.f32 %v833_v49, %v809_v55  ;;  %685 = vadd.xlane.f32.xlu0 %v684_v20  ;;  %v824_v57 = vadd.f32 %v823_v5, %v800_v3  ;;  %v518_v12 = vrot.slane %v478_v29, %v1156_v7  ;;  %v541_v37 = vmul.f32 %v510_v19, %v1342_v61  ;;  %v1045_v20 = vld [vmem:[#allocation2] ss:$0 sm:$0xff] }
  0x41   : > { %v490_v54 = vrot.slane %v1368_v31, %v1162_v10  ;;  %v522_v15 = vrot.slane %v482_v32, %v1156_v7  ;;  %v542_v40 = vmul.f32 %v514_v56, %v1347_v38  ;;  %v556_v13 = vadd.f32 %v540_v25, %v539_v33  ;;  %v1482_v10 = vld [vmem:[#allocation6_spill] sm:$0xff] }
  0x42   : > { %v835_v36 = vadd.f32 %v834_v11, %v810_v27  ;;  %v825_v59 = vadd.f32 %v824_v57, %v801_v50  ;;  %v531_v39 = vmul.f32 %v502_v18, %v1479_v60  ;;  %v532_v41 = vmul.f32 %v506_v4, %v1480_v34 }
  0x43   : > { %v533_v22 = vmul.f32 %v510_v19, %v1481_v9  ;;  %v526_v61 = vrot.slane %v486_v8, %v1156_v7  ;;  %v543_v58 = vmul.f32 %v518_v12, %v1350_v1  ;;  %v557_v55 = vadd.f32 %v556_v13, %v541_v37 }
  0x44   : > { %836 = vadd.xlane.f32.xlu1 %v835_v36  ;;  %v826_v23 = vadd.f32 %v825_v59, %v802_v24  ;;  %v534_v31 = vmul.f32 %v514_v56, %v1482_v10  ;;  %v547_v35 = vadd.f32 %v532_v41, %v531_v39  ;;  %v530_v38 = vrot.slane %v490_v54, %v1156_v7 }
  0x45   : > { %v544_v16 = vmul.f32 %v522_v15, %v1353_v26  ;;  %v558_v42 = vadd.f32 %v557_v55, %v542_v40  ;;  %v535_v53 = vmul.f32 %v518_v12, %v1483_v43  ;;  %v545_v51 = vmul.f32 %v526_v61, %v1358_v2 }
  0x46   : > { %827 = vadd.xlane.f32.xlu0 %v826_v23  ;;  %v548_v62 = vadd.f32 %v547_v35, %v533_v22  ;;  %v536_v6 = vmul.f32 %v522_v15, %v1223_v46  ;;  %v546_v1 = vmul.f32 %v530_v38, %v1366_v14  ;;  %v537_v63 = vmul.f32 %v526_v61, %v1226_v47 }
  0x47   : > { %v559_v44 = vadd.f32 %v558_v42, %v543_v58  ;;  %v538_v7 = vmul.f32 %v530_v38, %v1229_v48 }
  0x48   : > { %v549_v21 = vadd.f32 %v548_v62, %v534_v31 }
  0x49   : > { %v560_v52 = vadd.f32 %v559_v44, %v544_v16 }
  0x4a   : > { %v550_v45 = vadd.f32 %v549_v21, %v535_v53 }
  0x4b   : > { %v561_v0 = vadd.f32 %v560_v52, %v545_v51 }
  0x4c   : > { %v551_v26 = vadd.f32 %v550_v45, %v536_v6 }
  0x4d   : > { %v562_v27 = vadd.f32 %v561_v0, %v546_v1 }
  0x4e   : > { %v552_v28 = vadd.f32 %v551_v26, %v537_v63 }
  0x4f   : > { %563 = vadd.xlane.f32.xlu1 %v562_v27 }
  0x50   : > { %v553_v3 = vadd.f32 %v552_v28, %v538_v7 }
  0x52   : > { %554 = vadd.xlane.f32.xlu0 %v553_v3 }
  0xb9   : > { %v819_v2 = vpop.xlane.xlu1 %818 }
  0xba   : > { %v842_v5 = vrot.slane %v819_v2, 2 }
  0xc0   : > { %v677_v29 = vpop.xlane.xlu0 %676 }
  0xc1   : > { %v700_v19 = vrot.slane %v677_v29, 1 }
  0xc8   : > { %v695_v46 = vpop.xlane.xlu1 %694 }
  0xc9   : > { %v703_v18 = vrot.slane %v695_v46, 1 }
  0xcd   : > { %v686_v17 = vpop.xlane.xlu0 %685 }
  0xce   : > { %v701_v4 = vrot.slane %v686_v17, 1 }
  0xd0   : > { %v704_v32 = vsel %vm699_vm0, %v701_v4, %v703_v18  ;;  %v702_v24 = vsel %vm699_vm0, %v700_v19, %v701_v4 }
  0xd1   : > { %v837_v30 = vpop.xlane.xlu1 %836 }
  0xd2   : > { %v845_v47 = vrot.slane %v837_v30, 2 }
  0xd3   : > { %v828_v14 = vpop.xlane.xlu0 %827 }
  0xd4   : > { %v843_v49 = vrot.slane %v828_v14, 2 }
  0xd6   : > { %v846_v50 = vsel %vm841_vm1, %v843_v49, %v845_v47  ;;  %v844_v8 = vsel %vm841_vm1, %v842_v5, %v843_v49 }
  0xdc   : > { %v564_v48 = vpop.xlane.xlu1 %563 }
  0xdd   : > { %v708_v56 = vadd.f32 %v704_v32, %v564_v48 }
  0xdf   : > { %v850_v11 = vadd.f32 %v846_v50, %v708_v56  ;;  %v555_v33 = vpop.xlane.xlu0 %554 }
  0xe0   : > { %v707_v25 = vadd.f32 %v702_v24, %v555_v33 }
  0xe1   : > { %v859_v57 = vadd.f32 %v1045_v20, %v850_v11 }
  0xe2   : > { %v849_v12 = vadd.f32 %v844_v8, %v707_v25 }
  0xe3   : > { %862 = vst.msk [vmem:[%s332_s11 + $0x8] sm:$0xff] %vm860_vm2, %v859_v57 }
  0xe4   : > { %v858_v37 = vadd.f32 %v1045_v20, %v849_v12 }
  0xe6   : > { %861 = vst.msk [vmem:[%s332_s11] sm:$0xff] %vm860_vm2, %v858_v37 }
  0xe7 PF: > { %s16_s19 = sadd.s32 1, %s1099_s19   ;;  %s1484_s17 = smov %s1095_s18 }
  0xe8   : > { %p13_p5 = scmp.ge.s32.totalorder %s16_s19, 4   ;;  %s1485_s18 = smov %s1487_s3 }
  0xea   :  { %15 = sbr.rel (!%p13_p5) target bundleno = 3 (0x3), region = 77 }

// kernel: scale_discriminator_forward.11
= control target key start
LH: loop header
LB: loop body
LE: loop exit
PB: predicated region body
PF: predicated region fallthrough
CT: control target
= control target key end

     0   :  { %s6747_s15 = smov 0   ;;  %s6749_s16 = smov 0   ;;  %s7427_s0 = inlined_call_operand.vmem [shape: bf16[2,32,4096], index: 0, kind: input, shape index: {}, may-alias: {0,1}]   ;;  %s7428_s1 = inlined_call_operand.vmem [shape: bf16[2,32,4096], index: 1, kind: input, shape index: {}, may-alias: {0,1}]   ;;  %s7429_s2 = inlined_call_operand.vmem [shape: bf16[8,11,512,128], index: 2, kind: input, shape index: {}]   ;;  %s7430_s3 = inlined_call_operand.vmem [shape: f32[8,1,128], index: 3, kind: input, shape index: {}]   ;;  %s7431_s4 = inlined_call_operand.vmem [shape: f32[2,16,1024], index: 4, kind: output, shape index: {}]  }
   0x1   :  { %s6751_s17 = smov 0   ;;  %s6753_s18 = smov 0  }
   0x2   :  { %s6755_s19 = smov 0   ;;  %s6757_s20 = smov 0  }
   0x3   :  { %s6759_s21 = smov 0  }
   0x4 LB: > { %s29_s22 = sadd.s32 1, %s6712_s19  ;;  %s33_s23 = sadd.s32 1, %s6716_s20  ;;  %s6720_s21 = sphi %s6759_s21, %s14_s21   ;;  %s6716_s20 = sphi %s6757_s20, %s7439_s20   ;;  %s6712_s19 = sphi %s6755_s19, %s7438_s19   ;;  %s6708_s18 = sphi %s6753_s18, %s7437_s18   ;;  %s6704_s17 = sphi %s6751_s17, %s7436_s17   ;;  %s6700_s16 = sphi %s6749_s16, %s7435_s16   ;;  %s6696_s15 = sphi %s6747_s15, %s7434_s15  }
   0x5   : > { %p31_p0 = scmp.ge.s32.totalorder %s29_s22, 8  ;;  %s4586_s24 = sadd.s32 4294967295, %s6720_s21  }
   0x6   : > { %p51_p1 = scmp.ne.s32.totalorder %s6700_s16, %s6696_s15  ;;  %p52_p2 = scmp.eq.s32.totalorder %s6720_s21, 0 }
   0x7   : > { %s7441_s22 = smov (%p31_p0, %s29_s22), 0  ;;  %s7443_s23 = smov (!%p31_p0, %s33_s23), %s6716_s20 }
   0x8   : > { %p35_p3 = scmp.ge.s32.totalorder %s7443_s23, 2  ;;  %p169_p4 = scmp.eq.s32.totalorder %s4586_s24, 15 }
   0x9   : > { %s40_s25 = ssub.s32 %s6712_s19, %s7441_s22  ;;  %p6793_p5 = por %p52_p2, %p51_p1 }
   0xa   : > { %s7445_s23 = smov (%p35_p3, %s7443_s23), 0  ;;  %p6799_p6 = por %p169_p4, %p51_p1 }
   0xb   : > { %s37_s28 = ssub.s32 %s6716_s20, %s7445_s23  ;;  %s44_s30 = sadd.s32 1, %s6700_s16 }
   0xc   : > { %s41_s29 = sor.u32 %s40_s25, %s37_s28  ;;  %p4589_p8 = scmp.ge.s32.totalorder %s6720_s21, 16 }
   0xd   : > { %p42_p7 = scmp.eq.s32.totalorder %s41_s29, 0 }
   0xe   : > { %191 = sbr.rel (%p4589_p8) target bundleno = 39 (0x27), region = 16 }
   0xf   : > { %s6807_s5 = scalar_select %p42_p7, %s6700_s16, %s44_s30  }
  0x15   : > { %194 = sbr.rel (!%p6793_p5) target bundleno = 30 (0x1e), region = 20  ;;  %s196_s6 = sand.u32 (%p6793_p5), 1, %s6700_s16  }
  0x16   : > { %s4591_s7 = sshll.u32 (%p6793_p5), %s6712_s19, 2  ;;  %s4590_s8 = sshll.u32 (%p6793_p5), %s196_s6, 5 }
  0x17   : > { %s4592_s9 = sshll.u32 (%p6793_p5), %s6716_s20, 7  ;;  %s198_s24 = scalar_lea.vmem (%p6793_p5), [#allocation2], %s4590_s8 }
  0x18   : > { %s204_s10 = sadd.s32 (%p6793_p5), %s4592_s9, %s4591_s7 }
  0x19   : > { %s4593_s11 = sshll.u32 (%p6793_p5), %s204_s10, 2 }
  0x1a   : > { %s206_s14 = scalar_lea.vmem (%p6793_p5), %s7427_s0, %s4593_s11 }
  0x1b   : > { %v219_v0 = vld [vmem:[%s206_s14] sm:$0xff] (%p6793_p5)  ;;  %v221_v1 = vld [vmem:[%s206_s14 + $0x8] sm:$0xff] (%p6793_p5) }
  0x1c   : > { %v223_v2 = vld [vmem:[%s206_s14 + $0x80] sm:$0xff]  ;;  %220 = vst [vmem:[%s198_s24] sm:$0xff] %v219_v0  ;;  %222 = vst [vmem:[%s198_s24 + $0x8] sm:$0xff] %v221_v1  ;;  %v225_v3 = vld [vmem:[%s206_s14 + $0x88] sm:$0xff] }
  0x1d   : > { %224 = vst [vmem:[%s198_s24 + $0x10] sm:$0xff] %v223_v2  ;;  %226 = vst [vmem:[%s198_s24 + $0x18] sm:$0xff] %v225_v3 }
  0x1e PF: > { %232 = sbr.rel (!%p6793_p5) target bundleno = 39 (0x27), region = 43  ;;  %s234_s25 = sand.u32 (%p6793_p5), 1, %s6700_s16  }
  0x1f   : > { %s4595_s28 = sshll.u32 (%p6793_p5), %s6712_s19, 2  ;;  %s4594_s29 = sshll.u32 (%p6793_p5), %s234_s25, 5 }
  0x20   : > { %s4596_s30 = sshll.u32 (%p6793_p5), %s6716_s20, 7  ;;  %s236_s11 = scalar_lea.vmem (%p6793_p5), [#allocation3], %s4594_s29 }
  0x21   : > { %s4488_s6 = sadd.s32 (%p6793_p5), %s4596_s30, %s4595_s28 }
  0x22   : > { %s4597_s7 = sshll.u32 (%p6793_p5), %s4488_s6, 2 }
  0x23   : > { %s4490_s10 = scalar_lea.vmem (%p6793_p5), %s7428_s1, %s4597_s7 }
  0x24   : > { %v4598_v4 = vld [vmem:[%s4490_s10 + $0x100] sm:$0xff] (%p6793_p5)  ;;  %v4599_v5 = vld [vmem:[%s4490_s10 + $0x108] sm:$0xff] (%p6793_p5) }
  0x25   : > { %v4600_v6 = vld [vmem:[%s4490_s10 + $0x180] sm:$0xff]  ;;  %259 = vst [vmem:[%s236_s11] sm:$0xff] %v4598_v4  ;;  %261 = vst [vmem:[%s236_s11 + $0x8] sm:$0xff] %v4599_v5  ;;  %v4601_v7 = vld [vmem:[%s4490_s10 + $0x188] sm:$0xff] }
  0x26   : > { %263 = vst [vmem:[%s236_s11 + $0x10] sm:$0xff] %v4600_v6  ;;  %265 = vst [vmem:[%s236_s11 + $0x18] sm:$0xff] %v4601_v7 }
  0x27 PF: > { %p4602_p9 = scmp.ge.s32.totalorder %s6720_s21, 1  ;;  %p284_p10 = scmp.lt.s32.totalorder %s6720_s21, 17 }
  0x29   : > { %p285_p11 = pnand %p4602_p9, %p284_p10 }
  0x2a   : > { %p339_p12 = scmp.lt.s32.totalorder (!%p285_p11), %s6704_s17, 7  ;;  %s291_s26 = sand.u32 (!%p285_p11), 1, %s6696_s15   ;;  %vm1105_vm0 = vcmask (!%p285_p11), 1046528   ;;  %vm1471_vm1 = vcmask (!%p285_p11), 1045504   ;;  %vm1837_vm2 = vcmask (!%p285_p11), 1044480   ;;  %vm2203_vm3 = vcmask (!%p285_p11), 1043456  }
  0x2b   : > { %288 = sbr.rel (%p285_p11) target bundleno = 656 (0x290), region = 74  ;;  %s4603_s12 = sshll.u32 (!%p285_p11), %s291_s26, 5  ;;  %vm2569_vm4 = vcmask (!%p285_p11), 1042432   ;;  %vm2935_vm5 = vcmask (!%p285_p11), 1041408   ;;  %vm3301_vm6 = vcmask (!%p285_p11), 1040384  }
  0x2c   : > { %s6836_s24 = scalar_lea.vmem (!%p285_p11), [#allocation2], %s4603_s12  ;;  %s6850_s30 = scalar_lea.vmem (!%p285_p11), [#allocation3], %s4603_s12 }
  0x2d   : > { %v6839_v8 = vld [vmem:[%s6836_s24 + $0x4] ss:$16 sps:$4 sm:$0xff] (!%p285_p11)   ;;  %v6842_v9 = vld [vmem:[%s6836_s24 + $0xc] ss:$16 sps:$4 sm:$0xff] (!%p285_p11)   ;;  %v6884_v40 = vld [vmem:[%s6836_s24] ss:$16 sps:$4 sm:$0xff] (!%p285_p11)  }
  0x2e   : > { %685 = vmatprep.mubr.bf16.mxu0 (!%p285_p11), %v6839_v8  ;;  %732 = vmatprep.mubr.bf16.mxu1 (!%p285_p11), %v6842_v9  ;;  %v6888_v42 = vld [vmem:[%s6836_s24 + $0x8] ss:$16 sps:$4 sm:$0xff] (!%p285_p11)   ;;  %v6916_v2 = vld [vmem:[%s6850_s30 + $0x4] ss:$16 sps:$4 sm:$0xff] (!%p285_p11)   ;;  %v6919_v3 = vld [vmem:[%s6850_s30 + $0xc] ss:$16 sps:$4 sm:$0xff] (!%p285_p11)  }
  0x2f   : > { %v6926_v6 = vld [vmem:[%s6850_s30] ss:$16 sps:$4 sm:$0xff] (!%p285_p11)   ;;  %v6929_v7 = vld [vmem:[%s6850_s30 + $0x8] ss:$16 sps:$4 sm:$0xff] (!%p285_p11)   ;;  %s4605_s8 = sshll.u32 (!%p285_p11), %s291_s26, 4 }
  0x30   : > { %s333_s10 = scalar_lea.vmem (!%p285_p11), [#allocation4], %s4605_s8 }
  0x32   : > { %s6833_s13 = scalar_select %p339_p12, %s6704_s17, 7 }
  0x33   : > { %s5609_s15 = sshll.u32 (%p6799_p6), %s6708_s18, 4 }
  0x34   : > { %s6229_s14 = smul.u32 2816, %s6833_s13  ;;  %s346_s9 = scalar_lea.vmem %s7430_s3, %s6833_s13 }
  0x35   : > { %s4422_s11 = sadd.s32 (%p6799_p6), %s6704_s17, %s5609_s15 }
  0x36   : > { %s6847_s29 = scalar_lea.vmem %s7429_s2, %s6229_s14  ;;  %s5610_s26 = sshll.u32 (%p6799_p6), %s4422_s11, 3 }
  0x37   : > { %v6286_v10 = vld [vmem:[%s6847_s29 + $0x40] sm:$0xff]   ;;  %v6290_v14 = vld [vmem:[%s6847_s29 + $0x48] sm:$0xff]   ;;  %v6294_v18 = vld [vmem:[%s6847_s29 + $0x50] sm:$0xff]   ;;  %s4424_s14 = scalar_lea.vmem (%p6799_p6), %s7431_s4, %s5610_s26 }
  0x38   : > { %v6287_v11 = vld [vmem:[%s6847_s29 + $0xc0] sm:$0xff]   ;;  %5613 = vmatprep.subr.bf16.mxu0 %v6286_v10  ;;  %v6291_v15 = vld [vmem:[%s6847_s29 + $0xc8] sm:$0xff]   ;;  %v6295_v19 = vld [vmem:[%s6847_s29 + $0xd0] sm:$0xff]  }
  0x39   : > { %v6288_v12 = vld [vmem:[%s6847_s29] sm:$0xff]   ;;  %5641 = vmatprep.subr.bf16.mxu1 %v6287_v11  ;;  %v6292_v16 = vld [vmem:[%s6847_s29 + $0x8] sm:$0xff]   ;;  %v6296_v20 = vld [vmem:[%s6847_s29 + $0x10] sm:$0xff]  }
  0x3a   : > { %v6289_v13 = vld [vmem:[%s6847_s29 + $0x80] sm:$0xff]   ;;  %5614 = vmatpush3.bf16.msra.mxu0 %v6288_v12  ;;  %v6293_v17 = vld [vmem:[%s6847_s29 + $0x88] sm:$0xff]   ;;  %v6297_v21 = vld [vmem:[%s6847_s29 + $0x90] sm:$0xff]  }
  0x3b   : > { %5642 = vmatpush3.bf16.msra.mxu1 %v6289_v13  ;;  %5615 = vmatprep.subr.bf16.mxu0 %v6290_v14  ;;  %v6298_v22 = vld [vmem:[%s6847_s29 + $0x58] sm:$0xff]   ;;  %v6302_v26 = vld [vmem:[%s6847_s29 + $0x60] sm:$0xff]   ;;  %v6306_v30 = vld [vmem:[%s6847_s29 + $0x68] sm:$0xff]  }
  0x3c   : > { %5643 = vmatprep.subr.bf16.mxu1 %v6291_v15  ;;  %v6299_v23 = vld [vmem:[%s6847_s29 + $0xd8] sm:$0xff]   ;;  %v6303_v27 = vld [vmem:[%s6847_s29 + $0xe0] sm:$0xff]   ;;  %v6307_v31 = vld [vmem:[%s6847_s29 + $0xe8] sm:$0xff]  }
  0x3d   : > { %v6300_v24 = vld [vmem:[%s6847_s29 + $0x18] sm:$0xff]   ;;  %v6304_v28 = vld [vmem:[%s6847_s29 + $0x20] sm:$0xff]   ;;  %v6308_v32 = vld [vmem:[%s6847_s29 + $0x28] sm:$0xff]  }
  0x3e   : > { %5616 = vmatpush3.bf16.msra.mxu0 %v6292_v16  ;;  %v6301_v25 = vld [vmem:[%s6847_s29 + $0x98] sm:$0xff]   ;;  %v6305_v29 = vld [vmem:[%s6847_s29 + $0xa0] sm:$0xff]   ;;  %v6309_v33 = vld [vmem:[%s6847_s29 + $0xa8] sm:$0xff]  }
  0x3f   : > { %5644 = vmatpush3.bf16.msra.mxu1 %v6293_v17  ;;  %5617 = vmatprep.subr.bf16.mxu0 %v6294_v18  ;;  %v6310_v34 = vld [vmem:[%s6847_s29 + $0x70] sm:$0xff]   ;;  %v6314_v38 = vld [vmem:[%s6847_s29 + $0x78] sm:$0xff]   ;;  %v6324_v44 = vld [vmem:[%s6847_s29 + $0x140] sm:$0xff]  }
  0x40   : > { %5645 = vmatprep.subr.bf16.mxu1 %v6295_v19  ;;  %v6311_v35 = vld [vmem:[%s6847_s29 + $0xf0] sm:$0xff]   ;;  %v6315_v39 = vld [vmem:[%s6847_s29 + $0xf8] sm:$0xff]   ;;  %v6325_v45 = vld [vmem:[%s6847_s29 + $0x1c0] sm:$0xff]  }
  0x41   : > { %v6312_v36 = vld [vmem:[%s6847_s29 + $0x30] sm:$0xff]   ;;  %v6316_v41 = vld [vmem:[%s6847_s29 + $0x38] sm:$0xff]   ;;  %v6326_v46 = vld [vmem:[%s6847_s29 + $0x100] sm:$0xff]  }
  0x42   : > { %5618 = vmatpush3.bf16.msra.mxu0 %v6296_v20  ;;  %v6313_v37 = vld [vmem:[%s6847_s29 + $0xb0] sm:$0xff]   ;;  %v6317_v43 = vld [vmem:[%s6847_s29 + $0xb8] sm:$0xff]   ;;  %v6327_v47 = vld [vmem:[%s6847_s29 + $0x180] sm:$0xff]  }
  0x43   : > { %5646 = vmatpush3.bf16.msra.mxu1 %v6297_v21  ;;  %5619 = vmatprep.subr.bf16.mxu0 %v6298_v22  ;;  %v6328_v48 = vld [vmem:[%s6847_s29 + $0x148] sm:$0xff]   ;;  %v6332_v52 = vld [vmem:[%s6847_s29 + $0x150] sm:$0xff]   ;;  %v6336_v56 = vld [vmem:[%s6847_s29 + $0x158] sm:$0xff]  }
  0x44   : > { %5647 = vmatprep.subr.bf16.mxu1 %v6299_v23  ;;  %v6329_v49 = vld [vmem:[%s6847_s29 + $0x1c8] sm:$0xff]   ;;  %v6333_v53 = vld [vmem:[%s6847_s29 + $0x1d0] sm:$0xff]   ;;  %v6337_v57 = vld [vmem:[%s6847_s29 + $0x1d8] sm:$0xff]  }
  0x45   : > { %v6330_v50 = vld [vmem:[%s6847_s29 + $0x108] sm:$0xff]   ;;  %v6334_v54 = vld [vmem:[%s6847_s29 + $0x110] sm:$0xff]   ;;  %v6338_v58 = vld [vmem:[%s6847_s29 + $0x118] sm:$0xff]  }
  0x46   : > { %5620 = vmatpush3.bf16.msra.mxu0 %v6300_v24  ;;  %v6331_v51 = vld [vmem:[%s6847_s29 + $0x188] sm:$0xff]   ;;  %v6335_v55 = vld [vmem:[%s6847_s29 + $0x190] sm:$0xff]   ;;  %v6339_v59 = vld [vmem:[%s6847_s29 + $0x198] sm:$0xff]  }
  0x47   : > { %5648 = vmatpush3.bf16.msra.mxu1 %v6301_v25  ;;  %5621 = vmatprep.subr.bf16.mxu0 %v6302_v26  ;;  %v6340_v60 = vld [vmem:[%s6847_s29 + $0x160] sm:$0xff]   ;;  %v6344_v0 = vld [vmem:[%s6847_s29 + $0x168] sm:$0xff]   ;;  %v6354_v10 = vld [vmem:[%s6847_s29 + $0x170] sm:$0xff]  }
  0x48   : > { %5649 = vmatprep.subr.bf16.mxu1 %v6303_v27  ;;  %v6341_v61 = vld [vmem:[%s6847_s29 + $0x1e0] sm:$0xff]   ;;  %v6345_v1 = vld [vmem:[%s6847_s29 + $0x1e8] sm:$0xff]   ;;  %v6355_v11 = vld [vmem:[%s6847_s29 + $0x1f0] sm:$0xff]  }
  0x49   : > { %v6342_v62 = vld [vmem:[%s6847_s29 + $0x120] sm:$0xff]   ;;  %v6350_v4 = vld [vmem:[%s6847_s29 + $0x128] sm:$0xff]   ;;  %v6356_v12 = vld [vmem:[%s6847_s29 + $0x130] sm:$0xff]  }
  0x4a   : > { %5622 = vmatpush3.bf16.msra.mxu0 %v6304_v28  ;;  %v6343_v63 = vld [vmem:[%s6847_s29 + $0x1a0] sm:$0xff]   ;;  %v6351_v5 = vld [vmem:[%s6847_s29 + $0x1a8] sm:$0xff]   ;;  %v6357_v13 = vld [vmem:[%s6847_s29 + $0x1b0] sm:$0xff]  }
  0x4b   : > { %5650 = vmatpush3.bf16.msra.mxu1 %v6305_v29  ;;  %5623 = vmatprep.subr.bf16.mxu0 %v6306_v30  ;;  %v6358_v14 = vld [vmem:[%s6847_s29 + $0x178] sm:$0xff]   ;;  %v6362_v18 = vld [vmem:[%s6847_s29 + $0x240] sm:$0xff]   ;;  %v6366_v22 = vld [vmem:[%s6847_s29 + $0x248] sm:$0xff]  }
  0x4c   : > { %5651 = vmatprep.subr.bf16.mxu1 %v6307_v31  ;;  %v6359_v15 = vld [vmem:[%s6847_s29 + $0x1f8] sm:$0xff]   ;;  %v6363_v19 = vld [vmem:[%s6847_s29 + $0x2c0] sm:$0xff]   ;;  %v6367_v23 = vld [vmem:[%s6847_s29 + $0x2c8] sm:$0xff]  }
  0x4d   : > { %v6360_v16 = vld [vmem:[%s6847_s29 + $0x138] sm:$0xff]   ;;  %v6364_v20 = vld [vmem:[%s6847_s29 + $0x200] sm:$0xff]   ;;  %v6368_v24 = vld [vmem:[%s6847_s29 + $0x208] sm:$0xff]  }
  0x4e   : > { %5624 = vmatpush3.bf16.msra.mxu0 %v6308_v32  ;;  %v6361_v17 = vld [vmem:[%s6847_s29 + $0x1b8] sm:$0xff]   ;;  %v6365_v21 = vld [vmem:[%s6847_s29 + $0x280] sm:$0xff]   ;;  %v6369_v25 = vld [vmem:[%s6847_s29 + $0x288] sm:$0xff]  }
  0x4f   : > { %5652 = vmatpush3.bf16.msra.mxu1 %v6309_v33  ;;  %5625 = vmatprep.subr.bf16.mxu0 %v6310_v34  ;;  %v6370_v26 = vld [vmem:[%s6847_s29 + $0x250] sm:$0xff]   ;;  %v6374_v30 = vld [vmem:[%s6847_s29 + $0x258] sm:$0xff]   ;;  %v6378_v34 = vld [vmem:[%s6847_s29 + $0x260] sm:$0xff]  }
  0x50   : > { %5653 = vmatprep.subr.bf16.mxu1 %v6311_v35  ;;  %v6371_v27 = vld [vmem:[%s6847_s29 + $0x2d0] sm:$0xff]   ;;  %v6375_v31 = vld [vmem:[%s6847_s29 + $0x2d8] sm:$0xff]   ;;  %v6379_v35 = vld [vmem:[%s6847_s29 + $0x2e0] sm:$0xff]  }
  0x51   : > { %v6372_v28 = vld [vmem:[%s6847_s29 + $0x210] sm:$0xff]   ;;  %v6376_v32 = vld [vmem:[%s6847_s29 + $0x218] sm:$0xff]  }
  0x52   : > { %5626 = vmatpush3.bf16.msra.mxu0 %v6312_v36  ;;  %v6373_v29 = vld [vmem:[%s6847_s29 + $0x290] sm:$0xff]   ;;  %v6377_v33 = vld [vmem:[%s6847_s29 + $0x298] sm:$0xff]   ;;  %v6380_v36 = vld [vmem:[%s6847_s29 + $0x220] sm:$0xff]  }
  0x53   : > { %5654 = vmatpush3.bf16.msra.mxu1 %v6313_v37  ;;  %5627 = vmatprep.subr.bf16.mxu0 %v6314_v38  ;;  %v6381_v37 = vld [vmem:[%s6847_s29 + $0x2a0] sm:$0xff]   ;;  %v6382_v38 = vld [vmem:[%s6847_s29 + $0x268] sm:$0xff]  }
  0x54   : > { %5655 = vmatprep.subr.bf16.mxu1 %v6315_v39  ;;  %v6383_v39 = vld [vmem:[%s6847_s29 + $0x2e8] sm:$0xff]  }
  0x56   : > { %5628 = vmatpush3.bf16.msra.mxu0 %v6316_v41  ;;  %v6384_v41 = vld [vmem:[%s6847_s29 + $0x228] sm:$0xff]  }
  0x57   : > { %5656 = vmatpush3.bf16.msra.mxu1 %v6317_v43  ;;  %5669 = vmatprep.subr.bf16.mxu0 %v6324_v44  ;;  %v6385_v43 = vld [vmem:[%s6847_s29 + $0x2a8] sm:$0xff]   ;;  %v6386_v44 = vld [vmem:[%s6847_s29 + $0x270] sm:$0xff]  }
  0x58   : > { %5697 = vmatprep.subr.bf16.mxu1 %v6325_v45  ;;  %v6387_v45 = vld [vmem:[%s6847_s29 + $0x2f0] sm:$0xff]  }
  0x59   : > { %686 = vmatmul.mubr.bf16.vlgmr.msra.gmra.mrb[0].mxu0 %v6884_v40 }
  0x5a   : > { %733 = vmatmul.mubr.bf16.vlgmr.msra.gmra.mrb[0].mxu1 %v6888_v42  ;;  %5670 = vmatpush3.bf16.msra.mxu0 %v6326_v46  ;;  %v6388_v46 = vld [vmem:[%s6847_s29 + $0x230] sm:$0xff]  }
  0x5b   : > { %5698 = vmatpush3.bf16.msra.mxu1 %v6327_v47  ;;  %5671 = vmatprep.subr.bf16.mxu0 %v6328_v48  ;;  %v6389_v47 = vld [vmem:[%s6847_s29 + $0x2b0] sm:$0xff]   ;;  %v6390_v48 = vld [vmem:[%s6847_s29 + $0x278] sm:$0xff]  }
  0x5c   : > { %5699 = vmatprep.subr.bf16.mxu1 %v6329_v49  ;;  %693 = vmatprep.mubr.bf16.mxu0 %v6916_v2  ;;  %v6391_v49 = vld [vmem:[%s6847_s29 + $0x2f8] sm:$0xff]  }
  0x5d   : > { %740 = vmatprep.mubr.bf16.mxu1 %v6919_v3 }
  0x5e   : > { %5672 = vmatpush3.bf16.msra.mxu0 %v6330_v50  ;;  %v6392_v50 = vld [vmem:[%s6847_s29 + $0x238] sm:$0xff]  }
  0x5f   : > { %5700 = vmatpush3.bf16.msra.mxu1 %v6331_v51  ;;  %5673 = vmatprep.subr.bf16.mxu0 %v6332_v52  ;;  %v6393_v51 = vld [vmem:[%s6847_s29 + $0x2b8] sm:$0xff]   ;;  %v6394_v52 = vld [vmem:[%s6847_s29 + $0x340] sm:$0xff]  }
  0x60   : > { %5701 = vmatprep.subr.bf16.mxu1 %v6333_v53  ;;  %v6395_v53 = vld [vmem:[%s6847_s29 + $0x3c0] sm:$0xff]  }
  0x61   : > { %694 = vmatmul.mubr.bf16.gmra.mrb[4].mxu0 %v6926_v6 }
  0x62   : > { %5674 = vmatpush3.bf16.msra.mxu0 %v6334_v54  ;;  %741 = vmatmul.mubr.bf16.gmra.mrb[4].mxu1 %v6929_v7  ;;  %v6396_v54 = vld [vmem:[%s6847_s29 + $0x300] sm:$0xff]  }
  0x63   : > { %5702 = vmatpush3.bf16.msra.mxu1 %v6335_v55  ;;  %5675 = vmatprep.subr.bf16.mxu0 %v6336_v56  ;;  %v6397_v55 = vld [vmem:[%s6847_s29 + $0x380] sm:$0xff]   ;;  %v6398_v56 = vld [vmem:[%s6847_s29 + $0x348] sm:$0xff]  }
  0x64   : > { %5703 = vmatprep.subr.bf16.mxu1 %v6337_v57  ;;  %1038 = vmatprep.mubr.bf16.mxu0 %v6839_v8  ;;  %v6399_v57 = vld [vmem:[%s6847_s29 + $0x3c8] sm:$0xff]  }
  0x65   : > { %1086 = vmatprep.mubr.bf16.mxu1 %v6842_v9 }
  0x66   : > { %5676 = vmatpush3.bf16.msra.mxu0 %v6338_v58  ;;  %v6400_v58 = vld [vmem:[%s6847_s29 + $0x308] sm:$0xff]  }
  0x67   : > { %5704 = vmatpush3.bf16.msra.mxu1 %v6339_v59  ;;  %5677 = vmatprep.subr.bf16.mxu0 %v6340_v60  ;;  %v6401_v59 = vld [vmem:[%s6847_s29 + $0x388] sm:$0xff]   ;;  %v6402_v60 = vld [vmem:[%s6847_s29 + $0x350] sm:$0xff]  }
  0x68   : > { %5705 = vmatprep.subr.bf16.mxu1 %v6341_v61  ;;  %v6403_v61 = vld [vmem:[%s6847_s29 + $0x3d0] sm:$0xff]  }
  0x6a   : > { %5678 = vmatpush3.bf16.msra.mxu0 %v6342_v62  ;;  %v6404_v62 = vld [vmem:[%s6847_s29 + $0x310] sm:$0xff]  }
  0x6b   : > { %5706 = vmatpush3.bf16.msra.mxu1 %v6343_v63  ;;  %5679 = vmatprep.subr.bf16.mxu0 %v6344_v0  ;;  %v6405_v63 = vld [vmem:[%s6847_s29 + $0x390] sm:$0xff]   ;;  %v6406_v0 = vld [vmem:[%s6847_s29 + $0x358] sm:$0xff]  }
  0x6c   : > { %5707 = vmatprep.subr.bf16.mxu1 %v6345_v1  ;;  %v6407_v1 = vld [vmem:[%s6847_s29 + $0x3d8] sm:$0xff]  }
  0x6e   : > { %5680 = vmatpush3.bf16.msra.mxu0 %v6350_v4  ;;  %v6408_v4 = vld [vmem:[%s6847_s29 + $0x318] sm:$0xff]  }
  0x6f   : > { %5708 = vmatpush3.bf16.msra.mxu1 %v6351_v5  ;;  %5681 = vmatprep.subr.bf16.mxu0 %v6354_v10  ;;  %v6409_v5 = vld [vmem:[%s6847_s29 + $0x398] sm:$0xff]   ;;  %v6410_v10 = vld [vmem:[%s6847_s29 + $0x360] sm:$0xff]  }
  0x70   : > { %5709 = vmatprep.subr.bf16.mxu1 %v6355_v11  ;;  %v6411_v11 = vld [vmem:[%s6847_s29 + $0x3e0] sm:$0xff]  }
  0x72   : > { %5682 = vmatpush3.bf16.msra.mxu0 %v6356_v12  ;;  %v6412_v12 = vld [vmem:[%s6847_s29 + $0x320] sm:$0xff]  }
  0x73   : > { %5710 = vmatpush3.bf16.msra.mxu1 %v6357_v13  ;;  %5683 = vmatprep.subr.bf16.mxu0 %v6358_v14  ;;  %v6414_v13 = vld [vmem:[%s6847_s29 + $0x368] sm:$0xff]  }
  0x74   : > { %5711 = vmatprep.subr.bf16.mxu1 %v6359_v15  ;;  %v6416_v14 = vld [vmem:[%s6847_s29 + $0x328] sm:$0xff]  }
  0x75   : > { %v6417_v15 = vld [vmem:[%s6847_s29 + $0x3a8] sm:$0xff]  }
  0x76   : > { %5684 = vmatpush3.bf16.msra.mxu0 %v6360_v16  ;;  %v6418_v16 = vld [vmem:[%s6847_s29 + $0x370] sm:$0xff]  }
  0x77   : > { %5712 = vmatpush3.bf16.msra.mxu1 %v6361_v17  ;;  %5725 = vmatprep.subr.bf16.mxu0 %v6362_v18  ;;  %v6419_v17 = vld [vmem:[%s6847_s29 + $0x3f0] sm:$0xff]  }
  0x78   : > { %5753 = vmatprep.subr.bf16.mxu1 %v6363_v19  ;;  %v6420_v18 = vld [vmem:[%s6847_s29 + $0x330] sm:$0xff]  }
  0x79   : > { %1039 = vmatmul.mubr.bf16.vlgmr.msra.gmra.mrb[8].mxu0 %v6884_v40  ;;  %v6421_v19 = vld [vmem:[%s6847_s29 + $0x3b0] sm:$0xff]  }
  0x7a   : > { %1087 = vmatmul.mubr.bf16.vlgmr.msra.gmra.mrb[8].mxu1 %v6888_v42  ;;  %5726 = vmatpush3.bf16.msra.mxu0 %v6364_v20  ;;  %v6422_v20 = vld [vmem:[%s6847_s29 + $0x378] sm:$0xff]  }
  0x7b   : > { %5754 = vmatpush3.bf16.msra.mxu1 %v6365_v21  ;;  %1046 = vmatprep.mubr.bf16.mxu0 %v6916_v2  ;;  %v6423_v21 = vld [vmem:[%s6847_s29 + $0x3f8] sm:$0xff]  }
  0x7c   : > { %5727 = vmatprep.subr.bf16.mxu0 %v6366_v22  ;;  %1094 = vmatprep.mubr.bf16.mxu1 %v6919_v3  ;;  %v6424_v22 = vld [vmem:[%s6847_s29 + $0x338] sm:$0xff]  }
  0x7d   : > { %5755 = vmatprep.subr.bf16.mxu1 %v6367_v23  ;;  %v6425_v23 = vld [vmem:[%s6847_s29 + $0x3b8] sm:$0xff]  }
  0x7e   : > { %5728 = vmatpush3.bf16.msra.mxu0 %v6368_v24  ;;  %v6426_v24 = vld [vmem:[%s6847_s29 + $0x440] sm:$0xff]  }
  0x7f   : > { %5756 = vmatpush3.bf16.msra.mxu1 %v6369_v25  ;;  %5729 = vmatprep.subr.bf16.mxu0 %v6370_v26  ;;  %v6427_v25 = vld [vmem:[%s6847_s29 + $0x4c0] sm:$0xff]  }
  0x80   : > { %5757 = vmatprep.subr.bf16.mxu1 %v6371_v27  ;;  %v6428_v26 = vld [vmem:[%s6847_s29 + $0x400] sm:$0xff]  }
  0x81   : > { %1047 = vmatmul.mubr.bf16.gmra.mrb[12].mxu0 %v6926_v6  ;;  %v6429_v27 = vld [vmem:[%s6847_s29 + $0x480] sm:$0xff]  }
  0x82   : > { %1095 = vmatmul.mubr.bf16.gmra.mrb[12].mxu1 %v6929_v7  ;;  %5730 = vmatpush3.bf16.msra.mxu0 %v6372_v28  ;;  %v6430_v28 = vld [vmem:[%s6847_s29 + $0x448] sm:$0xff]  }
  0x83   : > { %5758 = vmatpush3.bf16.msra.mxu1 %v6373_v29  ;;  %1404 = vmatprep.mubr.bf16.mxu0 %v6839_v8  ;;  %v6431_v29 = vld [vmem:[%s6847_s29 + $0x4c8] sm:$0xff]  }
  0x84   : > { %5731 = vmatprep.subr.bf16.mxu0 %v6374_v30  ;;  %1452 = vmatprep.mubr.bf16.mxu1 %v6842_v9  ;;  %v6432_v30 = vld [vmem:[%s6847_s29 + $0x408] sm:$0xff]  }
  0x85   : > { %5759 = vmatprep.subr.bf16.mxu1 %v6375_v31  ;;  %v6434_v31 = vld [vmem:[%s6847_s29 + $0x450] sm:$0xff]  }
  0x86   : > { %5732 = vmatpush3.bf16.msra.mxu0 %v6376_v32  ;;  %v6436_v32 = vld [vmem:[%s6847_s29 + $0x410] sm:$0xff]  }
  0x87   : > { %5760 = vmatpush3.bf16.msra.mxu1 %v6377_v33  ;;  %5733 = vmatprep.subr.bf16.mxu0 %v6378_v34  ;;  %v6437_v33 = vld [vmem:[%s6847_s29 + $0x490] sm:$0xff]   ;;  %v6438_v34 = vld [vmem:[%s6847_s29 + $0x458] sm:$0xff]  }
  0x88   : > { %5761 = vmatprep.subr.bf16.mxu1 %v6379_v35  ;;  %v6439_v35 = vld [vmem:[%s6847_s29 + $0x4d8] sm:$0xff]  }
  0x8a   : > { %5734 = vmatpush3.bf16.msra.mxu0 %v6380_v36  ;;  %v7044_v36 = vld [vmem:[%s6836_s24 + $0x4] ss:$16 sps:$4 sm:$0xff]  }
  0x8b   : > { %5762 = vmatpush3.bf16.msra.mxu1 %v6381_v37  ;;  %5735 = vmatprep.subr.bf16.mxu0 %v6382_v38  ;;  %v6440_v37 = vld [vmem:[%s6847_s29 + $0x418] sm:$0xff]  }
  0x8c   : > { %5763 = vmatprep.subr.bf16.mxu1 %v6383_v39  ;;  %v7049_v38 = vld [vmem:[%s6836_s24 + $0xc] ss:$16 sps:$4 sm:$0xff]  }
  0x8d   : > { %v6441_v39 = vld [vmem:[%s6847_s29 + $0x498] sm:$0xff]  }
  0x8e   : > { %5736 = vmatpush3.bf16.msra.mxu0 %v6384_v41  ;;  %v6442_v41 = vld [vmem:[%s6847_s29 + $0x460] sm:$0xff]  }
  0x8f   : > { %5764 = vmatpush3.bf16.msra.mxu1 %v6385_v43  ;;  %5737 = vmatprep.subr.bf16.mxu0 %v6386_v44  ;;  %v6443_v43 = vld [vmem:[%s6847_s29 + $0x4e0] sm:$0xff]  }
  0x90   : > { %5765 = vmatprep.subr.bf16.mxu1 %v6387_v45  ;;  %v6444_v44 = vld [vmem:[%s6847_s29 + $0x420] sm:$0xff]  }
  0x91   : > { %v6445_v45 = vld [vmem:[%s6847_s29 + $0x4a0] sm:$0xff]  }
  0x92   : > { %5738 = vmatpush3.bf16.msra.mxu0 %v6388_v46  ;;  %v6446_v46 = vld [vmem:[%s6847_s29 + $0x468] sm:$0xff]  }
  0x93   : > { %5766 = vmatpush3.bf16.msra.mxu1 %v6389_v47  ;;  %5739 = vmatprep.subr.bf16.mxu0 %v6390_v48  ;;  %v6447_v47 = vld [vmem:[%s6847_s29 + $0x4e8] sm:$0xff]  }
  0x94   : > { %5767 = vmatprep.subr.bf16.mxu1 %v6391_v49  ;;  %v6448_v48 = vld [vmem:[%s6847_s29 + $0x428] sm:$0xff]  }
  0x95   : > { %v6449_v49 = vld [vmem:[%s6847_s29 + $0x4a8] sm:$0xff]  }
  0x96   : > { %5740 = vmatpush3.bf16.msra.mxu0 %v6392_v50  ;;  %v6450_v50 = vld [vmem:[%s6847_s29 + $0x470] sm:$0xff]  }
  0x97   : > { %5768 = vmatpush3.bf16.msra.mxu1 %v6393_v51  ;;  %5781 = vmatprep.subr.bf16.mxu0 %v6394_v52  ;;  %v6451_v51 = vld [vmem:[%s6847_s29 + $0x4f0] sm:$0xff]  }
  0x98   : > { %5809 = vmatprep.subr.bf16.mxu1 %v6395_v53  ;;  %v6452_v52 = vld [vmem:[%s6847_s29 + $0x430] sm:$0xff]  }
  0x99   : > { %1405 = vmatmul.mubr.bf16.vlgmr.msra.gmra.mrb[16].mxu0 %v6884_v40  ;;  %v6453_v53 = vld [vmem:[%s6847_s29 + $0x4b0] sm:$0xff]  }
  0x9a   : > { %1453 = vmatmul.mubr.bf16.vlgmr.msra.gmra.mrb[16].mxu1 %v6888_v42  ;;  %5782 = vmatpush3.bf16.msra.mxu0 %v6396_v54  ;;  %v6454_v54 = vld [vmem:[%s6847_s29 + $0x478] sm:$0xff]  }
  0x9b   : > { %5810 = vmatpush3.bf16.msra.mxu1 %v6397_v55  ;;  %1412 = vmatprep.mubr.bf16.mxu0 %v6916_v2  ;;  %v6455_v55 = vld [vmem:[%s6847_s29 + $0x4f8] sm:$0xff]  }
  0x9c   : > { %5783 = vmatprep.subr.bf16.mxu0 %v6398_v56  ;;  %1460 = vmatprep.mubr.bf16.mxu1 %v6919_v3  ;;  %v6456_v56 = vld [vmem:[%s6847_s29 + $0x438] sm:$0xff]  }
  0x9d   : > { %5811 = vmatprep.subr.bf16.mxu1 %v6399_v57  ;;  %v6457_v57 = vld [vmem:[%s6847_s29 + $0x4b8] sm:$0xff]  }
  0x9e   : > { %5784 = vmatpush3.bf16.msra.mxu0 %v6400_v58  ;;  %v6458_v58 = vld [vmem:[%s6847_s29 + $0x540] sm:$0xff]  }
  0x9f   : > { %5812 = vmatpush3.bf16.msra.mxu1 %v6401_v59  ;;  %5785 = vmatprep.subr.bf16.mxu0 %v6402_v60  ;;  %v6459_v59 = vld [vmem:[%s6847_s29 + $0x5c0] sm:$0xff]  }
  0xa0   : > { %5813 = vmatprep.subr.bf16.mxu1 %v6403_v61  ;;  %v6460_v60 = vld [vmem:[%s6847_s29 + $0x500] sm:$0xff]  }
  0xa1   : > { %1413 = vmatmul.mubr.bf16.gmra.mrb[20].mxu0 %v6926_v6  ;;  %v7073_v61 = vld [vmem:[%s6836_s24] ss:$16 sps:$4 sm:$0xff]  }
  0xa2   : > { %1461 = vmatmul.mubr.bf16.gmra.mrb[20].mxu1 %v6929_v7  ;;  %5786 = vmatpush3.bf16.msra.mxu0 %v6404_v62  ;;  %v6461_v62 = vld [vmem:[%s6847_s29 + $0x580] sm:$0xff]  }
  0xa3   : > { %5814 = vmatpush3.bf16.msra.mxu1 %v6405_v63  ;;  %1770 = vmatprep.mubr.bf16.mxu0 %v6839_v8  ;;  %v6413_v8 = vld [vmem:[%s6847_s29 + $0x3a0] sm:$0xff]   ;;  %v7078_v63 = vld [vmem:[%s6836_s24 + $0x8] ss:$16 sps:$4 sm:$0xff]  }
  0xa4   : > { %5787 = vmatprep.subr.bf16.mxu0 %v6406_v0  ;;  %1818 = vmatprep.mubr.bf16.mxu1 %v6842_v9  ;;  %v6415_v9 = vld [vmem:[%s6847_s29 + $0x3e8] sm:$0xff]  }
  0xa5   : > { %5815 = vmatprep.subr.bf16.mxu1 %v6407_v1  ;;  %v6462_v0 = vld [vmem:[%s6847_s29 + $0x548] sm:$0xff]  }
  0xa6   : > { %5788 = vmatpush3.bf16.msra.mxu0 %v6408_v4  ;;  %v6463_v1 = vld [vmem:[%s6847_s29 + $0x5c8] sm:$0xff]  }
  0xa7   : > { %5816 = vmatpush3.bf16.msra.mxu1 %v6409_v5  ;;  %5789 = vmatprep.subr.bf16.mxu0 %v6410_v10  ;;  %v6464_v4 = vld [vmem:[%s6847_s29 + $0x508] sm:$0xff]   ;;  %v6466_v10 = vld [vmem:[%s6847_s29 + $0x550] sm:$0xff]  }
  0xa8   : > { %5817 = vmatprep.subr.bf16.mxu1 %v6411_v11  ;;  %v6465_v5 = vld [vmem:[%s6847_s29 + $0x588] sm:$0xff]   ;;  %v6467_v11 = vld [vmem:[%s6847_s29 + $0x5d0] sm:$0xff]  }
  0xaa   : > { %5790 = vmatpush3.bf16.msra.mxu0 %v6412_v12  ;;  %v6468_v12 = vld [vmem:[%s6847_s29 + $0x510] sm:$0xff]  }
  0xab   : > { %5818 = vmatpush3.bf16.msra.mxu1 %v6413_v8  ;;  %5791 = vmatprep.subr.bf16.mxu0 %v6414_v13  ;;  %v6471_v8 = vld [vmem:[%s6847_s29 + $0x5d8] sm:$0xff]  }
  0xac   : > { %5819 = vmatprep.subr.bf16.mxu1 %v6415_v9  ;;  %v6472_v13 = vld [vmem:[%s6847_s29 + $0x518] sm:$0xff]   ;;  %v6475_v9 = vld [vmem:[%s6847_s29 + $0x5e0] sm:$0xff]  }
  0xae   : > { %5792 = vmatpush3.bf16.msra.mxu0 %v6416_v14  ;;  %v6476_v14 = vld [vmem:[%s6847_s29 + $0x520] sm:$0xff]  }
  0xaf   : > { %5820 = vmatpush3.bf16.msra.mxu1 %v6417_v15  ;;  %5793 = vmatprep.subr.bf16.mxu0 %v6418_v16  ;;  %v6477_v15 = vld [vmem:[%s6847_s29 + $0x5a0] sm:$0xff]   ;;  %v6478_v16 = vld [vmem:[%s6847_s29 + $0x568] sm:$0xff]  }
  0xb0   : > { %5821 = vmatprep.subr.bf16.mxu1 %v6419_v17  ;;  %v6479_v17 = vld [vmem:[%s6847_s29 + $0x5e8] sm:$0xff]  }
  0xb2   : > { %5794 = vmatpush3.bf16.msra.mxu0 %v6420_v18  ;;  %v6480_v18 = vld [vmem:[%s6847_s29 + $0x528] sm:$0xff]  }
  0xb3   : > { %5822 = vmatpush3.bf16.msra.mxu1 %v6421_v19  ;;  %5795 = vmatprep.subr.bf16.mxu0 %v6422_v20  ;;  %v6481_v19 = vld [vmem:[%s6847_s29 + $0x5a8] sm:$0xff]   ;;  %v6482_v20 = vld [vmem:[%s6847_s29 + $0x570] sm:$0xff]  }
  0xb4   : > { %5823 = vmatprep.subr.bf16.mxu1 %v6423_v21  ;;  %v6483_v21 = vld [vmem:[%s6847_s29 + $0x5f0] sm:$0xff]  }
  0xb6   : > { %5796 = vmatpush3.bf16.msra.mxu0 %v6424_v22  ;;  %v6484_v22 = vld [vmem:[%s6847_s29 + $0x530] sm:$0xff]  }
  0xb7   : > { %5824 = vmatpush3.bf16.msra.mxu1 %v6425_v23  ;;  %5837 = vmatprep.subr.bf16.mxu0 %v6426_v24  ;;  %v6485_v23 = vld [vmem:[%s6847_s29 + $0x5b0] sm:$0xff]   ;;  %v6486_v24 = vld [vmem:[%s6847_s29 + $0x578] sm:$0xff]  }
  0xb8   : > { %5865 = vmatprep.subr.bf16.mxu1 %v6427_v25  ;;  %v6487_v25 = vld [vmem:[%s6847_s29 + $0x5f8] sm:$0xff]  }
  0xb9   : > { %1771 = vmatmul.mubr.bf16.vlgmr.msra.gmra.mrb[24].mxu0 %v6884_v40  ;;  %v6433_v40 = vld [vmem:[%s6847_s29 + $0x488] sm:$0xff]  }
  0xba   : > { %1819 = vmatmul.mubr.bf16.vlgmr.msra.gmra.mrb[24].mxu1 %v6888_v42  ;;  %5838 = vmatpush3.bf16.msra.mxu0 %v6428_v26  ;;  %v6435_v42 = vld [vmem:[%s6847_s29 + $0x4d0] sm:$0xff]   ;;  %v6488_v26 = vld [vmem:[%s6847_s29 + $0x538] sm:$0xff]  }
  0xbb   : > { %5866 = vmatpush3.bf16.msra.mxu1 %v6429_v27  ;;  %1778 = vmatprep.mubr.bf16.mxu0 %v6916_v2  ;;  %v6489_v27 = vld [vmem:[%s6847_s29 + $0x5b8] sm:$0xff]  }
  0xbc   : > { %5839 = vmatprep.subr.bf16.mxu0 %v6430_v28  ;;  %1826 = vmatprep.mubr.bf16.mxu1 %v6919_v3  ;;  %v6490_v28 = vld [vmem:[%s6847_s29 + $0x640] sm:$0xff]  }
  0xbd   : > { %5867 = vmatprep.subr.bf16.mxu1 %v6431_v29  ;;  %v6491_v29 = vld [vmem:[%s6847_s29 + $0x6c0] sm:$0xff]  }
  0xbe   : > { %5840 = vmatpush3.bf16.msra.mxu0 %v6432_v30  ;;  %v6492_v30 = vld [vmem:[%s6847_s29 + $0x600] sm:$0xff]  }
  0xbf   : > { %5868 = vmatpush3.bf16.msra.mxu1 %v6433_v40  ;;  %5841 = vmatprep.subr.bf16.mxu0 %v6434_v31  ;;  %v6493_v40 = vld [vmem:[%s6847_s29 + $0x680] sm:$0xff]   ;;  %v6494_v31 = vld [vmem:[%s6847_s29 + $0x648] sm:$0xff]  }
  0xc0   : > { %5869 = vmatprep.subr.bf16.mxu1 %v6435_v42  ;;  %v6495_v42 = vld [vmem:[%s6847_s29 + $0x6c8] sm:$0xff]  }
  0xc1   : > { %1779 = vmatmul.mubr.bf16.gmra.mrb[28].mxu0 %v6926_v6 }
  0xc2   : > { %1827 = vmatmul.mubr.bf16.gmra.mrb[28].mxu1 %v6929_v7  ;;  %5842 = vmatpush3.bf16.msra.mxu0 %v6436_v32  ;;  %v7124_v32 = vld [vmem:[%s6850_s30 + $0x4] ss:$16 sps:$4 sm:$0xff]  }
  0xc3   : > { %5870 = vmatpush3.bf16.msra.mxu1 %v6437_v33  ;;  %2136 = vmatprep.mubr.bf16.mxu0 %v7044_v36  ;;  %v6496_v33 = vld [vmem:[%s6847_s29 + $0x608] sm:$0xff]  }
  0xc4   : > { %5843 = vmatprep.subr.bf16.mxu0 %v6438_v34  ;;  %2184 = vmatprep.mubr.bf16.mxu1 %v7049_v38  ;;  %v7129_v34 = vld [vmem:[%s6850_s30 + $0xc] ss:$16 sps:$4 sm:$0xff]  }
  0xc5   : > { %5871 = vmatprep.subr.bf16.mxu1 %v6439_v35  ;;  %v6497_v35 = vld [vmem:[%s6847_s29 + $0x688] sm:$0xff]  }
  0xc6   : > { %5844 = vmatpush3.bf16.msra.mxu0 %v6440_v37  ;;  %v6498_v37 = vld [vmem:[%s6847_s29 + $0x650] sm:$0xff]  }
  0xc7   : > { %5872 = vmatpush3.bf16.msra.mxu1 %v6441_v39  ;;  %5845 = vmatprep.subr.bf16.mxu0 %v6442_v41  ;;  %v6499_v39 = vld [vmem:[%s6847_s29 + $0x6d0] sm:$0xff]  }
  0xc8   : > { %5873 = vmatprep.subr.bf16.mxu1 %v6443_v43  ;;  %v6500_v41 = vld [vmem:[%s6847_s29 + $0x610] sm:$0xff]  }
  0xc9   : > { %v7137_v43 = vld [vmem:[%s6850_s30] ss:$16 sps:$4 sm:$0xff]  }
  0xca   : > { %5846 = vmatpush3.bf16.msra.mxu0 %v6444_v44  ;;  %v6501_v44 = vld [vmem:[%s6847_s29 + $0x690] sm:$0xff]  }
  0xcb   : > { %5874 = vmatpush3.bf16.msra.mxu1 %v6445_v45  ;;  %5847 = vmatprep.subr.bf16.mxu0 %v6446_v46  ;;  %v7142_v45 = vld [vmem:[%s6850_s30 + $0x8] ss:$16 sps:$4 sm:$0xff]  }
  0xcc   : > { %5875 = vmatprep.subr.bf16.mxu1 %v6447_v47  ;;  %v6502_v46 = vld [vmem:[%s6847_s29 + $0x658] sm:$0xff]  }
  0xcd   : > { %v6503_v47 = vld [vmem:[%s6847_s29 + $0x6d8] sm:$0xff]  }
  0xce   : > { %5848 = vmatpush3.bf16.msra.mxu0 %v6448_v48  ;;  %v6504_v48 = vld [vmem:[%s6847_s29 + $0x618] sm:$0xff]  }
  0xcf   : > { %5876 = vmatpush3.bf16.msra.mxu1 %v6449_v49  ;;  %5849 = vmatprep.subr.bf16.mxu0 %v6450_v50  ;;  %v6505_v49 = vld [vmem:[%s6847_s29 + $0x698] sm:$0xff]   ;;  %v6506_v50 = vld [vmem:[%s6847_s29 + $0x660] sm:$0xff]  }
  0xd0   : > { %5877 = vmatprep.subr.bf16.mxu1 %v6451_v51  ;;  %v6507_v51 = vld [vmem:[%s6847_s29 + $0x6e0] sm:$0xff]  }
  0xd2   : > { %5850 = vmatpush3.bf16.msra.mxu0 %v6452_v52  ;;  %v6508_v52 = vld [vmem:[%s6847_s29 + $0x620] sm:$0xff]  }
  0xd3   : > { %5878 = vmatpush3.bf16.msra.mxu1 %v6453_v53  ;;  %5851 = vmatprep.subr.bf16.mxu0 %v6454_v54  ;;  %v6509_v53 = vld [vmem:[%s6847_s29 + $0x6a0] sm:$0xff]   ;;  %v6510_v54 = vld [vmem:[%s6847_s29 + $0x668] sm:$0xff]  }
  0xd4   : > { %5879 = vmatprep.subr.bf16.mxu1 %v6455_v55  ;;  %v6511_v55 = vld [vmem:[%s6847_s29 + $0x6e8] sm:$0xff]  }
  0xd6   : > { %5852 = vmatpush3.bf16.msra.mxu0 %v6456_v56  ;;  %v6512_v56 = vld [vmem:[%s6847_s29 + $0x628] sm:$0xff]  }
  0xd7   : > { %5880 = vmatpush3.bf16.msra.mxu1 %v6457_v57  ;;  %5893 = vmatprep.subr.bf16.mxu0 %v6458_v58  ;;  %v6513_v57 = vld [vmem:[%s6847_s29 + $0x6a8] sm:$0xff]   ;;  %v6514_v58 = vld [vmem:[%s6847_s29 + $0x670] sm:$0xff]  }
  0xd8   : > { %5921 = vmatprep.subr.bf16.mxu1 %v6459_v59  ;;  %v6515_v59 = vld [vmem:[%s6847_s29 + $0x6f0] sm:$0xff]  }
  0xd9   : > { %2137 = vmatmul.mubr.bf16.vlgmr.msra.gmra.mrb[32].mxu0 %v7073_v61 }
  0xda   : > { %2185 = vmatmul.mubr.bf16.vlgmr.msra.gmra.mrb[32].mxu1 %v7078_v63  ;;  %5894 = vmatpush3.bf16.msra.mxu0 %v6460_v60  ;;  %v6516_v60 = vld [vmem:[%s6847_s29 + $0x630] sm:$0xff]  }
  0xdb   : > { %5922 = vmatpush3.bf16.msra.mxu1 %v6461_v62  ;;  %2144 = vmatprep.mubr.bf16.mxu0 %v6916_v2  ;;  %v6469_v2 = vld [vmem:[%s6847_s29 + $0x590] sm:$0xff]  }
  0xdc   : > { %5895 = vmatprep.subr.bf16.mxu0 %v6462_v0  ;;  %2192 = vmatprep.mubr.bf16.mxu1 %v6919_v3  ;;  %v6470_v3 = vld [vmem:[%s6847_s29 + $0x558] sm:$0xff]   ;;  %v6517_v62 = vld [vmem:[%s6847_s29 + $0x6b0] sm:$0xff]  }
  0xdd   : > { %5923 = vmatprep.subr.bf16.mxu1 %v6463_v1  ;;  %v6518_v0 = vld [vmem:[%s6847_s29 + $0x678] sm:$0xff]  }
  0xde   : > { %5896 = vmatpush3.bf16.msra.mxu0 %v6464_v4  ;;  %v6519_v1 = vld [vmem:[%s6847_s29 + $0x6f8] sm:$0xff]  }
  0xdf   : > { %5924 = vmatpush3.bf16.msra.mxu1 %v6465_v5  ;;  %5897 = vmatprep.subr.bf16.mxu0 %v6466_v10  ;;  %v6520_v4 = vld [vmem:[%s6847_s29 + $0x638] sm:$0xff]   ;;  %v6522_v10 = vld [vmem:[%s6847_s29 + $0x740] sm:$0xff]  }
  0xe0   : > { %5925 = vmatprep.subr.bf16.mxu1 %v6467_v11  ;;  %v6521_v5 = vld [vmem:[%s6847_s29 + $0x6b8] sm:$0xff]   ;;  %v6523_v11 = vld [vmem:[%s6847_s29 + $0x7c0] sm:$0xff]  }
  0xe1   : > { %2145 = vmatmul.mubr.bf16.gmra.mrb[36].mxu0 %v6926_v6  ;;  %v6473_v6 = vld [vmem:[%s6847_s29 + $0x598] sm:$0xff]  }
  0xe2   : > { %2193 = vmatmul.mubr.bf16.gmra.mrb[36].mxu1 %v6929_v7  ;;  %5898 = vmatpush3.bf16.msra.mxu0 %v6468_v12  ;;  %v6474_v7 = vld [vmem:[%s6847_s29 + $0x560] sm:$0xff]  }
  0xe3   : > { %5926 = vmatpush3.bf16.msra.mxu1 %v6469_v2  ;;  %2502 = vmatprep.mubr.bf16.mxu0 %v7044_v36  ;;  %v6524_v12 = vld [vmem:[%s6847_s29 + $0x700] sm:$0xff]  }
  0xe4   : > { %5899 = vmatprep.subr.bf16.mxu0 %v6470_v3  ;;  %2550 = vmatprep.mubr.bf16.mxu1 %v7049_v38  ;;  %v6525_v2 = vld [vmem:[%s6847_s29 + $0x780] sm:$0xff]   ;;  %v6526_v3 = vld [vmem:[%s6847_s29 + $0x748] sm:$0xff]  }
  0xe5   : > { %5927 = vmatprep.subr.bf16.mxu1 %v6471_v8  ;;  %v6527_v8 = vld [vmem:[%s6847_s29 + $0x7c8] sm:$0xff]  }
  0xe6   : > { %5900 = vmatpush3.bf16.msra.mxu0 %v6472_v13  ;;  %v6528_v13 = vld [vmem:[%s6847_s29 + $0x708] sm:$0xff]  }
  0xe7   : > { %5928 = vmatpush3.bf16.msra.mxu1 %v6473_v6  ;;  %5901 = vmatprep.subr.bf16.mxu0 %v6474_v7  ;;  %v6529_v6 = vld [vmem:[%s6847_s29 + $0x788] sm:$0xff]   ;;  %v6530_v7 = vld [vmem:[%s6847_s29 + $0x750] sm:$0xff]  }
  0xe8   : > { %5929 = vmatprep.subr.bf16.mxu1 %v6475_v9  ;;  %v6531_v9 = vld [vmem:[%s6847_s29 + $0x7d0] sm:$0xff]  }
  0xea   : > { %5902 = vmatpush3.bf16.msra.mxu0 %v6476_v14  ;;  %v6532_v14 = vld [vmem:[%s6847_s29 + $0x710] sm:$0xff]  }
  0xeb   : > { %5930 = vmatpush3.bf16.msra.mxu1 %v6477_v15  ;;  %5903 = vmatprep.subr.bf16.mxu0 %v6478_v16  ;;  %v6533_v15 = vld [vmem:[%s6847_s29 + $0x790] sm:$0xff]   ;;  %v6534_v16 = vld [vmem:[%s6847_s29 + $0x758] sm:$0xff]  }
  0xec   : > { %5931 = vmatprep.subr.bf16.mxu1 %v6479_v17  ;;  %v6535_v17 = vld [vmem:[%s6847_s29 + $0x7d8] sm:$0xff]  }
  0xee   : > { %5904 = vmatpush3.bf16.msra.mxu0 %v6480_v18  ;;  %v6536_v18 = vld [vmem:[%s6847_s29 + $0x718] sm:$0xff]  }
  0xef   : > { %5932 = vmatpush3.bf16.msra.mxu1 %v6481_v19  ;;  %5905 = vmatprep.subr.bf16.mxu0 %v6482_v20  ;;  %v6537_v19 = vld [vmem:[%s6847_s29 + $0x798] sm:$0xff]   ;;  %v6538_v20 = vld [vmem:[%s6847_s29 + $0x760] sm:$0xff]  }
  0xf0   : > { %5933 = vmatprep.subr.bf16.mxu1 %v6483_v21  ;;  %v6539_v21 = vld [vmem:[%s6847_s29 + $0x7e0] sm:$0xff]  }
  0xf2   : > { %5906 = vmatpush3.bf16.msra.mxu0 %v6484_v22  ;;  %v6540_v22 = vld [vmem:[%s6847_s29 + $0x720] sm:$0xff]  }
  0xf3   : > { %5934 = vmatpush3.bf16.msra.mxu1 %v6485_v23  ;;  %5907 = vmatprep.subr.bf16.mxu0 %v6486_v24  ;;  %v6541_v23 = vld [vmem:[%s6847_s29 + $0x7a0] sm:$0xff]  }
  0xf4   : > { %5935 = vmatprep.subr.bf16.mxu1 %v6487_v25 }
  0xf6   : > { %5908 = vmatpush3.bf16.msra.mxu0 %v6488_v26  ;;  %v6542_v26 = vld [vmem:[%s6847_s29 + $0x768] sm:$0xff]  }
  0xf7   : > { %5936 = vmatpush3.bf16.msra.mxu1 %v6489_v27  ;;  %5949 = vmatprep.subr.bf16.mxu0 %v6490_v28 }
  0xf8   : > { %5977 = vmatprep.subr.bf16.mxu1 %v6491_v29 }
  0xf9   : > { %2503 = vmatmul.mubr.bf16.vlgmr.msra.gmra.mrb[40].mxu0 %v7073_v61 }
  0xfa   : > { %2551 = vmatmul.mubr.bf16.vlgmr.msra.gmra.mrb[40].mxu1 %v7078_v63  ;;  %5950 = vmatpush3.bf16.msra.mxu0 %v6492_v30 }
  0xfb   : > { %5978 = vmatpush3.bf16.msra.mxu1 %v6493_v40  ;;  %2510 = vmatprep.mubr.bf16.mxu0 %v7124_v32 }
  0xfc   : > { %5951 = vmatprep.subr.bf16.mxu0 %v6494_v31  ;;  %2558 = vmatprep.mubr.bf16.mxu1 %v7129_v34  ;;  %v6544_v31 = vld [vmem:[%s6847_s29 + $0x728] sm:$0xff]  }
  0xfd   : > { %5979 = vmatprep.subr.bf16.mxu1 %v6495_v42  ;;  %v6545_v42 = vld [vmem:[%s6847_s29 + $0x7a8] sm:$0xff]  }
  0xfe   : > { %5952 = vmatpush3.bf16.msra.mxu0 %v6496_v33 }
  0xff   : > { %5980 = vmatpush3.bf16.msra.mxu1 %v6497_v35  ;;  %5953 = vmatprep.subr.bf16.mxu0 %v6498_v37  ;;  %v6546_v37 = vld [vmem:[%s6847_s29 + $0x770] sm:$0xff]  }
 0x100   : > { %5981 = vmatprep.subr.bf16.mxu1 %v6499_v39 }
 0x101   : > { %2511 = vmatmul.mubr.bf16.gmra.mrb[44].mxu0 %v7137_v43 }
 0x102   : > { %2559 = vmatmul.mubr.bf16.gmra.mrb[44].mxu1 %v7142_v45  ;;  %5954 = vmatpush3.bf16.msra.mxu0 %v6500_v41 }
 0x103   : > { %5982 = vmatpush3.bf16.msra.mxu1 %v6501_v44  ;;  %2868 = vmatprep.mubr.bf16.mxu0 %v7044_v36 }
 0x104   : > { %5955 = vmatprep.subr.bf16.mxu0 %v6502_v46  ;;  %2916 = vmatprep.mubr.bf16.mxu1 %v7049_v38  ;;  %v6547_v46 = vld [vmem:[%s6847_s29 + $0x7f0] sm:$0xff]  }
 0x105   : > { %5983 = vmatprep.subr.bf16.mxu1 %v6503_v47 }
 0x106   : > { %5956 = vmatpush3.bf16.msra.mxu0 %v6504_v48  ;;  %v6548_v48 = vld [vmem:[%s6847_s29 + $0x730] sm:$0xff]  }
 0x107   : > { %5984 = vmatpush3.bf16.msra.mxu1 %v6505_v49  ;;  %5957 = vmatprep.subr.bf16.mxu0 %v6506_v50  ;;  %v6549_v49 = vld [vmem:[%s6847_s29 + $0x7b0] sm:$0xff]   ;;  %v6550_v50 = vld [vmem:[%s6847_s29 + $0x778] sm:$0xff]  }
 0x108   : > { %5985 = vmatprep.subr.bf16.mxu1 %v6507_v51  ;;  %v6551_v51 = vld [vmem:[%s6847_s29 + $0x7f8] sm:$0xff]  }
 0x10a   : > { %5958 = vmatpush3.bf16.msra.mxu0 %v6508_v52  ;;  %v6552_v52 = vld [vmem:[%s6847_s29 + $0x738] sm:$0xff]  }
 0x10b   : > { %5986 = vmatpush3.bf16.msra.mxu1 %v6509_v53  ;;  %5959 = vmatprep.subr.bf16.mxu0 %v6510_v54  ;;  %v6553_v53 = vld [vmem:[%s6847_s29 + $0x7b8] sm:$0xff]   ;;  %v6554_v54 = vld [vmem:[%s6847_s29 + $0x840] sm:$0xff]  }
 0x10c   : > { %5987 = vmatprep.subr.bf16.mxu1 %v6511_v55  ;;  %v6555_v55 = vld [vmem:[%s6847_s29 + $0x8c0] sm:$0xff]  }
 0x10e   : > { %5960 = vmatpush3.bf16.msra.mxu0 %v6512_v56  ;;  %v6556_v56 = vld [vmem:[%s6847_s29 + $0x800] sm:$0xff]  }
 0x10f   : > { %5988 = vmatpush3.bf16.msra.mxu1 %v6513_v57  ;;  %5961 = vmatprep.subr.bf16.mxu0 %v6514_v58  ;;  %v6557_v57 = vld [vmem:[%s6847_s29 + $0x880] sm:$0xff]   ;;  %v6558_v58 = vld [vmem:[%s6847_s29 + $0x848] sm:$0xff]  }
 0x110   : > { %5989 = vmatprep.subr.bf16.mxu1 %v6515_v59  ;;  %v6559_v59 = vld [vmem:[%s6847_s29 + $0x8c8] sm:$0xff]  }
 0x112   : > { %5962 = vmatpush3.bf16.msra.mxu0 %v6516_v60  ;;  %v6560_v60 = vld [vmem:[%s6847_s29 + $0x808] sm:$0xff]  }
 0x113   : > { %5990 = vmatpush3.bf16.msra.mxu1 %v6517_v62  ;;  %5963 = vmatprep.subr.bf16.mxu0 %v6518_v0  ;;  %v6562_v62 = vld [vmem:[%s6847_s29 + $0x850] sm:$0xff]  }
 0x114   : > { %5991 = vmatprep.subr.bf16.mxu1 %v6519_v1  ;;  %v6564_v0 = vld [vmem:[%s6847_s29 + $0x810] sm:$0xff]  }
 0x116   : > { %5964 = vmatpush3.bf16.msra.mxu0 %v6520_v4  ;;  %v6565_v4 = vld [vmem:[%s6847_s29 + $0x890] sm:$0xff]  }
 0x117   : > { %5992 = vmatpush3.bf16.msra.mxu1 %v6521_v5  ;;  %6005 = vmatprep.subr.bf16.mxu0 %v6522_v10 }
 0x118   : > { %6033 = vmatprep.subr.bf16.mxu1 %v6523_v11  ;;  %v6566_v11 = vld [vmem:[%s6847_s29 + $0x858] sm:$0xff]  }
 0x119   : > { %2869 = vmatmul.mubr.bf16.vlgmr.msra.gmra.mrb[48].mxu0 %v7073_v61 }
 0x11a   : > { %2917 = vmatmul.mubr.bf16.vlgmr.msra.gmra.mrb[48].mxu1 %v7078_v63  ;;  %6006 = vmatpush3.bf16.msra.mxu0 %v6524_v12  ;;  %v6567_v12 = vld [vmem:[%s6847_s29 + $0x8d8] sm:$0xff]  }
 0x11b   : > { %6034 = vmatpush3.bf16.msra.mxu1 %v6525_v2  ;;  %2876 = vmatprep.mubr.bf16.mxu0 %v7124_v32 }
 0x11c   : > { %6007 = vmatprep.subr.bf16.mxu0 %v6526_v3  ;;  %2924 = vmatprep.mubr.bf16.mxu1 %v7129_v34 }
 0x11d   : > { %6035 = vmatprep.subr.bf16.mxu1 %v6527_v8  ;;  %v7232_v8 = vld [vmem:[%s6836_s24 + $0x4] ss:$16 sps:$4 sm:$0xff]  }
 0x11e   : > { %6008 = vmatpush3.bf16.msra.mxu0 %v6528_v13 }
 0x11f   : > { %6036 = vmatpush3.bf16.msra.mxu1 %v6529_v6  ;;  %6009 = vmatprep.subr.bf16.mxu0 %v6530_v7 }
 0x120   : > { %6037 = vmatprep.subr.bf16.mxu1 %v6531_v9  ;;  %v6568_v9 = vld [vmem:[%s6847_s29 + $0x818] sm:$0xff]  }
 0x121   : > { %2877 = vmatmul.mubr.bf16.gmra.mrb[52].mxu0 %v7137_v43 }
 0x122   : > { %2925 = vmatmul.mubr.bf16.gmra.mrb[52].mxu1 %v7142_v45  ;;  %6010 = vmatpush3.bf16.msra.mxu0 %v6532_v14  ;;  %v7237_v14 = vld [vmem:[%s6836_s24 + $0xc] ss:$16 sps:$4 sm:$0xff]  }
 0x123   : > { %6038 = vmatpush3.bf16.msra.mxu1 %v6533_v15  ;;  %3234 = vmatprep.mubr.bf16.mxu0 %v7044_v36  ;;  %v6569_v15 = vld [vmem:[%s6847_s29 + $0x898] sm:$0xff]  }
 0x124   : > { %6011 = vmatprep.subr.bf16.mxu0 %v6534_v16  ;;  %3282 = vmatprep.mubr.bf16.mxu1 %v7049_v38  ;;  %v6543_v38 = vld [vmem:[%s6847_s29 + $0x7e8] sm:$0xff]   ;;  %v6570_v16 = vld [vmem:[%s6847_s29 + $0x860] sm:$0xff]  }
 0x125   : > { %6039 = vmatprep.subr.bf16.mxu1 %v6535_v17  ;;  %v6571_v17 = vld [vmem:[%s6847_s29 + $0x8e0] sm:$0xff]  }
 0x126   : > { %6012 = vmatpush3.bf16.msra.mxu0 %v6536_v18  ;;  %v6572_v18 = vld [vmem:[%s6847_s29 + $0x820] sm:$0xff]  }
 0x127   : > { %6040 = vmatpush3.bf16.msra.mxu1 %v6537_v19  ;;  %6013 = vmatprep.subr.bf16.mxu0 %v6538_v20  ;;  %v6573_v19 = vld [vmem:[%s6847_s29 + $0x8a0] sm:$0xff]   ;;  %v6574_v20 = vld [vmem:[%s6847_s29 + $0x868] sm:$0xff]  }
 0x128   : > { %6041 = vmatprep.subr.bf16.mxu1 %v6539_v21 }
 0x12a   : > { %6014 = vmatpush3.bf16.msra.mxu0 %v6540_v22  ;;  %v6575_v22 = vld [vmem:[%s6847_s29 + $0x8e8] sm:$0xff]  }
 0x12b   : > { %6042 = vmatpush3.bf16.msra.mxu1 %v6541_v23  ;;  %6015 = vmatprep.subr.bf16.mxu0 %v6542_v26 }
 0x12c   : > { %v5629_v24 = vpop.f32.mrb[0].mxu0  ;;  %6043 = vmatprep.subr.bf16.mxu1 %v6543_v38 }
 0x12d   : > { %v5657_v36 = vpop.f32.mrb[0].mxu1  ;;  %v5630_v25 = vpop.f32.mrb[1].mxu0 }
 0x12e   : > { %v5631_v27 = vadd.f32 %v5630_v25, %v5629_v24  ;;  %v5658_v28 = vpop.f32.mrb[1].mxu1  ;;  %v5632_v29 = vpop.f32.mrb[2].mxu0  ;;  %6016 = vmatpush3.bf16.msra.mxu0 %v6544_v31  ;;  %v6577_v25 = vld [vmem:[%s6847_s29 + $0x8a8] sm:$0xff]   ;;  %v6579_v31 = vld [vmem:[%s6847_s29 + $0x8f0] sm:$0xff]  }
 0x12f   : > { %v5659_v30 = vadd.f32 %v5658_v28, %v5657_v36  ;;  %v5660_v40 = vpop.f32.mrb[2].mxu1  ;;  %v5633_v33 = vpop.f32.mrb[3].mxu0  ;;  %6044 = vmatpush3.bf16.msra.mxu1 %v6545_v42  ;;  %6017 = vmatprep.subr.bf16.mxu0 %v6546_v37  ;;  %v6576_v36 = vld [vmem:[%s6847_s29 + $0x828] sm:$0xff]  }
 0x130   : > { %v5661_v35 = vpop.f32.mrb[3].mxu1  ;;  %v5634_v41 = vadd.f32 %v5633_v33, %v5632_v29  ;;  %6045 = vmatprep.subr.bf16.mxu1 %v6547_v46 }
 0x131   : > { %v7200_v39 = vadd.f32 %v5659_v30, %v5631_v27  ;;  %v5662_v44 = vadd.f32 %v5661_v35, %v5660_v40  ;;  %v6578_v40 = vld [vmem:[%s6847_s29 + $0x870] sm:$0xff]  }
 0x132   : > { %6018 = vmatpush3.bf16.msra.mxu0 %v6548_v48  ;;  %v6580_v35 = vld [vmem:[%s6847_s29 + $0x830] sm:$0xff]  }
 0x133   : > { %v7203_v47 = vadd.f32 %v5662_v44, %v5634_v41  ;;  %6046 = vmatpush3.bf16.msra.mxu1 %v6549_v49  ;;  %6019 = vmatprep.subr.bf16.mxu0 %v6550_v50  ;;  %v6581_v44 = vld [vmem:[%s6847_s29 + $0x8b0] sm:$0xff]   ;;  %v6582_v49 = vld [vmem:[%s6847_s29 + $0x878] sm:$0xff]  }
 0x134   : > { %6047 = vmatprep.subr.bf16.mxu1 %v6551_v51  ;;  %v5635_v1 = vpop.f32.mrb[4].mxu0  ;;  %v6583_v51 = vld [vmem:[%s6847_s29 + $0x8f8] sm:$0xff]  }
 0x135   : > { %v5663_v5 = vpop.f32.mrb[4].mxu1  ;;  %v5636_v10 = vpop.f32.mrb[5].mxu0 }
 0x136   : > { %6020 = vmatpush3.bf16.msra.mxu0 %v6552_v52  ;;  %v5664_v2 = vpop.f32.mrb[5].mxu1  ;;  %v5638_v3 = vpop.f32.mrb[6].mxu0  ;;  %v6588_v5 = vld [vmem:[%s6847_s29 + $0x900] sm:$0xff]  }
 0x137   : > { %6048 = vmatpush3.bf16.msra.mxu1 %v6553_v53  ;;  %6061 = vmatprep.subr.bf16.mxu0 %v6554_v54  ;;  %v5666_v13 = vpop.f32.mrb[6].mxu1  ;;  %v5639_v6 = vpop.f32.mrb[7].mxu0  ;;  %v7270_v3 = vld [vmem:[%s6836_s24 + $0x8] ss:$16 sps:$4 sm:$0xff]  }
 0x138   : > { %6089 = vmatprep.subr.bf16.mxu1 %v6555_v55  ;;  %v5667_v7 = vpop.f32.mrb[7].mxu1  ;;  %v6584_v55 = vld [vmem:[%s6847_s29 + $0x838] sm:$0xff]   ;;  %v6590_v13 = vld [vmem:[%s6847_s29 + $0x948] sm:$0xff]  }
 0x139   : > { %3235 = vmatmul.mubr.bf16.vlgmr.msra.gmra.mrb[56].mxu0 %v7073_v61  ;;  %v6561_v61 = vld [vmem:[%s6847_s29 + $0x888] sm:$0xff]  }
 0x13a   : > { %3283 = vmatmul.mubr.bf16.vlgmr.msra.gmra.mrb[56].mxu1 %v7078_v63  ;;  %6062 = vmatpush3.bf16.msra.mxu0 %v6556_v56  ;;  %v6563_v63 = vld [vmem:[%s6847_s29 + $0x8d0] sm:$0xff]   ;;  %v6591_v6 = vld [vmem:[%s6847_s29 + $0x9c8] sm:$0xff]  }
 0x13b   : > { %6090 = vmatpush3.bf16.msra.mxu1 %v6557_v57  ;;  %3242 = vmatprep.mubr.bf16.mxu0 %v7124_v32 }
 0x13c   : > { %6063 = vmatprep.subr.bf16.mxu0 %v6558_v58  ;;  %3290 = vmatprep.mubr.bf16.mxu1 %v7129_v34  ;;  %v6585_v58 = vld [vmem:[%s6847_s29 + $0x8b8] sm:$0xff]  }
 0x13d   : > { %6091 = vmatprep.subr.bf16.mxu1 %v6559_v59 }
 0x13e   : > { %6064 = vmatpush3.bf16.msra.mxu0 %v6560_v60 }
 0x13f   : > { %6092 = vmatpush3.bf16.msra.mxu1 %v6561_v61  ;;  %6065 = vmatprep.subr.bf16.mxu0 %v6562_v62  ;;  %v6586_v61 = vld [vmem:[%s6847_s29 + $0x940] sm:$0xff]  }
 0x140   : > { %6093 = vmatprep.subr.bf16.mxu1 %v6563_v63 }
 0x141   : > { %3243 = vmatmul.mubr.bf16.gmra.mrb[60].mxu0 %v7137_v43 }
 0x142   : > { %3291 = vmatmul.mubr.bf16.gmra.mrb[60].mxu1 %v7142_v45  ;;  %6066 = vmatpush3.bf16.msra.mxu0 %v6564_v0  ;;  %v6587_v0 = vld [vmem:[%s6847_s29 + $0x9c0] sm:$0xff]  }
 0x143   : > { %6094 = vmatpush3.bf16.msra.mxu1 %v6565_v4  ;;  %3600 = vmatprep.mubr.bf16.mxu0 %v7232_v8 }
 0x144   : > { %6067 = vmatprep.subr.bf16.mxu0 %v6566_v11  ;;  %6095 = vmatprep.subr.bf16.mxu1 %v6567_v12  ;;  %v7265_v11 = vld [vmem:[%s6836_s24] ss:$16 sps:$4 sm:$0xff]  }
 0x145   : > { %3647 = vmatprep.mubr.bf16.mxu1 %v7237_v14  ;;  %v6589_v12 = vld [vmem:[%s6847_s29 + $0x980] sm:$0xff]  }
 0x146   : > { %6068 = vmatpush3.bf16.msra.mxu0 %v6568_v9  ;;  %v6592_v9 = vld [vmem:[%s6847_s29 + $0x908] sm:$0xff]  }
 0x147   : > { %6096 = vmatpush3.bf16.msra.mxu1 %v6569_v15  ;;  %6069 = vmatprep.subr.bf16.mxu0 %v6570_v16  ;;  %v6593_v16 = vld [vmem:[%s6847_s29 + $0x988] sm:$0xff]  }
 0x148   : > { %6097 = vmatprep.subr.bf16.mxu1 %v6571_v17  ;;  %v6594_v17 = vld [vmem:[%s6847_s29 + $0x950] sm:$0xff]  }
 0x14a   : > { %6070 = vmatpush3.bf16.msra.mxu0 %v6572_v18  ;;  %v6595_v18 = vld [vmem:[%s6847_s29 + $0x9d0] sm:$0xff]  }
 0x14b   : > { %6098 = vmatpush3.bf16.msra.mxu1 %v6573_v19  ;;  %6071 = vmatprep.subr.bf16.mxu0 %v6574_v20  ;;  %v6599_v19 = vld [vmem:[%s6847_s29 + $0x9d8] sm:$0xff]  }
 0x14c   : > { %v5685_v21 = vpop.f32.mrb[8].mxu0  ;;  %6099 = vmatprep.subr.bf16.mxu1 %v6575_v22  ;;  %v6600_v20 = vld [vmem:[%s6847_s29 + $0x918] sm:$0xff]   ;;  %v6604_v22 = vld [vmem:[%s6847_s29 + $0x920] sm:$0xff]  }
 0x14d   : > { %v5713_v23 = vpop.f32.mrb[8].mxu1  ;;  %v5686_v24 = vpop.f32.mrb[9].mxu0 }
 0x14e   : > { %v5687_v26 = vadd.f32 %v5686_v24, %v5685_v21  ;;  %v5714_v38 = vpop.f32.mrb[9].mxu1  ;;  %v5688_v27 = vpop.f32.mrb[10].mxu0  ;;  %6072 = vmatpush3.bf16.msra.mxu0 %v6576_v36  ;;  %v6602_v21 = vld [vmem:[%s6847_s29 + $0x960] sm:$0xff]   ;;  %v6606_v24 = vld [vmem:[%s6847_s29 + $0x968] sm:$0xff]  }
 0x14f   : > { %v5715_v28 = vadd.f32 %v5714_v38, %v5713_v23  ;;  %v5716_v29 = vpop.f32.mrb[10].mxu1  ;;  %v5689_v30 = vpop.f32.mrb[11].mxu0  ;;  %6100 = vmatpush3.bf16.msra.mxu1 %v6577_v25  ;;  %6073 = vmatprep.subr.bf16.mxu0 %v6578_v40  ;;  %v6605_v23 = vld [vmem:[%s6847_s29 + $0x9a0] sm:$0xff]   ;;  %v6607_v25 = vld [vmem:[%s6847_s29 + $0x9e8] sm:$0xff]  }
 0x150   : > { %v5690_v42 = vadd.f32 %v5689_v30, %v5688_v27  ;;  %v5717_v33 = vpop.f32.mrb[11].mxu1  ;;  %6101 = vmatprep.subr.bf16.mxu1 %v6579_v31  ;;  %v6608_v30 = vld [vmem:[%s6847_s29 + $0x928] sm:$0xff]  }
 0x151   : > { %v1089_v37 = vadd.f32 %v5715_v28, %v5687_v26  ;;  %v5718_v41 = vadd.f32 %v5717_v33, %v5716_v29  ;;  %v6609_v40 = vld [vmem:[%s6847_s29 + $0x9a8] sm:$0xff]  }
 0x152   : > { %6074 = vmatpush3.bf16.msra.mxu0 %v6580_v35 }
 0x153   : > { %v1106_v46 = vrot.slane %v1089_v37, 1  ;;  %v1092_v48 = vadd.f32 %v5718_v41, %v5690_v42  ;;  %6102 = vmatpush3.bf16.msra.mxu1 %v6581_v44  ;;  %6075 = vmatprep.subr.bf16.mxu0 %v6582_v49  ;;  %v6610_v41 = vld [vmem:[%s6847_s29 + $0x970] sm:$0xff]  }
 0x154   : > { %v5691_v50 = vpop.f32.mrb[12].mxu0  ;;  %6103 = vmatprep.subr.bf16.mxu1 %v6583_v51  ;;  %v6612_v49 = vld [vmem:[%s6847_s29 + $0x930] sm:$0xff]  }
 0x155   : > { %v1107_v52 = vrot.slane %v1092_v48, 1  ;;  %v5719_v53 = vpop.f32.mrb[12].mxu1  ;;  %v5692_v54 = vpop.f32.mrb[13].mxu0  ;;  %v6611_v48 = vld [vmem:[%s6847_s29 + $0x9f0] sm:$0xff]  }
 0x156   : > { %v5693_v56 = vadd.f32 %v5692_v54, %v5691_v50  ;;  %v5720_v57 = vpop.f32.mrb[13].mxu1  ;;  %6076 = vmatpush3.bf16.msra.mxu0 %v6584_v55  ;;  %v5694_v62 = vpop.f32.mrb[14].mxu0  ;;  %v6614_v54 = vld [vmem:[%s6847_s29 + $0x978] sm:$0xff]  }
 0x157   : > { %v1108_v59 = vsel %vm1105_vm0, %v1106_v46, %v1107_v52  ;;  %v5721_v60 = vadd.f32 %v5720_v57, %v5719_v53  ;;  %6104 = vmatpush3.bf16.msra.mxu1 %v6585_v58  ;;  %v5722_v1 = vpop.f32.mrb[14].mxu1  ;;  %6117 = vmatprep.subr.bf16.mxu0 %v6586_v61  ;;  %v5695_v10 = vpop.f32.mrb[15].mxu0  ;;  %v6615_v58 = vld [vmem:[%s6847_s29 + $0x9f8] sm:$0xff]  }
 0x158   : > { %v7260_v63 = vadd.f32 %v1108_v59, %v7200_v39  ;;  %6145 = vmatprep.subr.bf16.mxu1 %v6587_v0  ;;  %v5723_v2 = vpop.f32.mrb[15].mxu1  ;;  %v6616_v61 = vld [vmem:[%s6847_s29 + $0x938] sm:$0xff]   ;;  %v6618_v10 = vld [vmem:[%s6847_s29 + $0xa40] sm:$0xff]  }
 0x159   : > { %v1097_v4 = vadd.f32 %v5721_v60, %v5693_v56  ;;  %3601 = vmatmul.mubr.bf16.vlgmr.msra.gmra.mrb[64].mxu0 %v7265_v11  ;;  %v6617_v1 = vld [vmem:[%s6847_s29 + $0x9b8] sm:$0xff]  }
 0x15a   : > { %3648 = vmatmul.mubr.bf16.vlgmr.msra.gmra.mrb[64].mxu1 %v7270_v3  ;;  %6118 = vmatpush3.bf16.msra.mxu0 %v6588_v5 }
 0x15b   : > { %v1109_v39 = vrot.slane %v1097_v4, 1  ;;  %6146 = vmatpush3.bf16.msra.mxu1 %v6589_v12  ;;  %3607 = vmatprep.mubr.bf16.mxu0 %v7124_v32  ;;  %v6596_v32 = vld [vmem:[%s6847_s29 + $0x910] sm:$0xff]  }
 0x15c   : > { %6119 = vmatprep.subr.bf16.mxu0 %v6590_v13  ;;  %3654 = vmatprep.mubr.bf16.mxu1 %v7129_v34  ;;  %v6597_v34 = vld [vmem:[%s6847_s29 + $0x990] sm:$0xff]  }
 0x15d   : > { %v1110_v7 = vsel %vm1105_vm0, %v1107_v52, %v1109_v39  ;;  %6147 = vmatprep.subr.bf16.mxu1 %v6591_v6  ;;  %v6613_v52 = vld [vmem:[%s6847_s29 + $0x9b0] sm:$0xff]   ;;  %v6619_v39 = vld [vmem:[%s6847_s29 + $0xac0] sm:$0xff]  }
 0x15e   : > { %v7280_v15 = vadd.f32 %v1110_v7, %v7203_v47  ;;  %6120 = vmatpush3.bf16.msra.mxu0 %v6592_v9  ;;  %v6598_v47 = vld [vmem:[%s6847_s29 + $0x958] sm:$0xff]   ;;  %v6620_v6 = vld [vmem:[%s6847_s29 + $0xa00] sm:$0xff]  }
 0x15f   : > { %6148 = vmatpush3.bf16.msra.mxu1 %v6593_v16  ;;  %6121 = vmatprep.subr.bf16.mxu0 %v6594_v17  ;;  %v6622_v16 = vld [vmem:[%s6847_s29 + $0xa48] sm:$0xff]  }
 0x160   : > { %6149 = vmatprep.subr.bf16.mxu1 %v6595_v18  ;;  %v6623_v18 = vld [vmem:[%s6847_s29 + $0xac8] sm:$0xff]  }
 0x161   : > { %3608 = vmatmul.mubr.bf16.gmra.mrb[68].mxu0 %v7137_v43  ;;  %v6601_v43 = vld [vmem:[%s6847_s29 + $0x998] sm:$0xff]  }
 0x162   : > { %3655 = vmatmul.mubr.bf16.gmra.mrb[68].mxu1 %v7142_v45  ;;  %6122 = vmatpush3.bf16.msra.mxu0 %v6596_v32  ;;  %v6603_v45 = vld [vmem:[%s6847_s29 + $0x9e0] sm:$0xff]  }
 0x163   : > { %6150 = vmatpush3.bf16.msra.mxu1 %v6597_v34  ;;  %3953 = vmatprep.mubr.bf16.mxu0 %v7232_v8  ;;  %v7325_v32 = vld [vmem:[%s6850_s30 + $0x4] ss:$16 sps:$4 sm:$0xff]  }
 0x164   : > { %6123 = vmatprep.subr.bf16.mxu0 %v6598_v47  ;;  %4001 = vmatprep.mubr.bf16.mxu1 %v7237_v14  ;;  %v6624_v47 = vld [vmem:[%s6847_s29 + $0xa08] sm:$0xff]  }
 0x165   : > { %6151 = vmatprep.subr.bf16.mxu1 %v6599_v19  ;;  %v7333_v19 = vld [vmem:[%s6850_s30 + $0xc] ss:$16 sps:$4 sm:$0xff]  }
 0x166   : > { %6124 = vmatpush3.bf16.msra.mxu0 %v6600_v20  ;;  %v6625_v20 = vld [vmem:[%s6847_s29 + $0xa88] sm:$0xff]  }
 0x167   : > { %6152 = vmatpush3.bf16.msra.mxu1 %v6601_v43  ;;  %6125 = vmatprep.subr.bf16.mxu0 %v6602_v21  ;;  %v6626_v43 = vld [vmem:[%s6847_s29 + $0xa50] sm:$0xff]  }
 0x168   : > { %6153 = vmatprep.subr.bf16.mxu1 %v6603_v45  ;;  %v6627_v21 = vld [vmem:[%s6847_s29 + $0xad0] sm:$0xff]  }
 0x169   : > { %v7341_v45 = vld [vmem:[%s6850_s30] ss:$16 sps:$4 sm:$0xff]  }
 0x16a   : > { %6126 = vmatpush3.bf16.msra.mxu0 %v6604_v22  ;;  %v6629_v22 = vld [vmem:[%s6847_s29 + $0xa90] sm:$0xff]  }
 0x16b   : > { %6154 = vmatpush3.bf16.msra.mxu1 %v6605_v23  ;;  %6127 = vmatprep.subr.bf16.mxu0 %v6606_v24  ;;  %v7346_v23 = vld [vmem:[%s6850_s30 + $0x8] ss:$16 sps:$4 sm:$0xff]  }
 0x16c   : > { %v5741_v36 = vpop.f32.mrb[16].mxu0  ;;  %6155 = vmatprep.subr.bf16.mxu1 %v6607_v25  ;;  %v6630_v24 = vld [vmem:[%s6847_s29 + $0xa58] sm:$0xff]  }
 0x16d   : > { %v5769_v26 = vpop.f32.mrb[16].mxu1  ;;  %v5742_v38 = vpop.f32.mrb[17].mxu0  ;;  %v6632_v25 = vld [vmem:[%s6847_s29 + $0xa18] sm:$0xff]  }
 0x16e   : > { %v5743_v27 = vadd.f32 %v5742_v38, %v5741_v36  ;;  %v5770_v28 = vpop.f32.mrb[17].mxu1  ;;  %v5744_v29 = vpop.f32.mrb[18].mxu0  ;;  %6128 = vmatpush3.bf16.msra.mxu0 %v6608_v30  ;;  %v6631_v36 = vld [vmem:[%s6847_s29 + $0xad8] sm:$0xff]   ;;  %v6634_v38 = vld [vmem:[%s6847_s29 + $0xa60] sm:$0xff]   ;;  %v6638_v30 = vld [vmem:[%s6847_s29 + $0xa68] sm:$0xff]  }
 0x16f   : > { %v5771_v31 = vadd.f32 %v5770_v28, %v5769_v26  ;;  %v5772_v42 = vpop.f32.mrb[18].mxu1  ;;  %v5745_v33 = vpop.f32.mrb[19].mxu0  ;;  %6156 = vmatpush3.bf16.msra.mxu1 %v6609_v40  ;;  %6129 = vmatprep.subr.bf16.mxu0 %v6610_v41  ;;  %v6633_v26 = vld [vmem:[%s6847_s29 + $0xa98] sm:$0xff]   ;;  %v6636_v28 = vld [vmem:[%s6847_s29 + $0xa20] sm:$0xff]  }
 0x170   : > { %v5746_v35 = vadd.f32 %v5745_v33, %v5744_v29  ;;  %v5773_v37 = vpop.f32.mrb[19].mxu1  ;;  %6157 = vmatprep.subr.bf16.mxu1 %v6611_v48  ;;  %v6637_v29 = vld [vmem:[%s6847_s29 + $0xaa0] sm:$0xff]   ;;  %v6639_v33 = vld [vmem:[%s6847_s29 + $0xae8] sm:$0xff]  }
 0x171   : > { %v1455_v44 = vadd.f32 %v5771_v31, %v5743_v27  ;;  %v5774_v46 = vadd.f32 %v5773_v37, %v5772_v42  ;;  %v6635_v27 = vld [vmem:[%s6847_s29 + $0xae0] sm:$0xff]   ;;  %v6640_v37 = vld [vmem:[%s6847_s29 + $0xa28] sm:$0xff]  }
 0x172   : > { %6130 = vmatpush3.bf16.msra.mxu0 %v6612_v49 }
 0x173   : > { %v1472_v50 = vrot.slane %v1455_v44, 2  ;;  %v1458_v51 = vadd.f32 %v5774_v46, %v5746_v35  ;;  %6158 = vmatpush3.bf16.msra.mxu1 %v6613_v52  ;;  %6131 = vmatprep.subr.bf16.mxu0 %v6614_v54  ;;  %v6641_v46 = vld [vmem:[%s6847_s29 + $0xaa8] sm:$0xff]   ;;  %v6643_v54 = vld [vmem:[%s6847_s29 + $0xaf0] sm:$0xff]  }
 0x174   : > { %v5747_v53 = vpop.f32.mrb[20].mxu0  ;;  %6159 = vmatprep.subr.bf16.mxu1 %v6615_v58  ;;  %v6645_v58 = vld [vmem:[%s6847_s29 + $0xab0] sm:$0xff]  }
 0x175   : > { %v1473_v55 = vrot.slane %v1458_v51, 2  ;;  %v5775_v56 = vpop.f32.mrb[20].mxu1  ;;  %v5748_v57 = vpop.f32.mrb[21].mxu0 }
 0x176   : > { %v5749_v59 = vadd.f32 %v5748_v57, %v5747_v53  ;;  %v5776_v60 = vpop.f32.mrb[21].mxu1  ;;  %v5750_v4 = vpop.f32.mrb[22].mxu0  ;;  %6132 = vmatpush3.bf16.msra.mxu0 %v6616_v61  ;;  %v6642_v53 = vld [vmem:[%s6847_s29 + $0xa70] sm:$0xff]  }
 0x177   : > { %v1474_v62 = vsel %vm1471_vm1, %v1472_v50, %v1473_v55  ;;  %v5777_v0 = vadd.f32 %v5776_v60, %v5775_v56  ;;  %v5778_v12 = vpop.f32.mrb[22].mxu1  ;;  %6160 = vmatpush3.bf16.msra.mxu1 %v6617_v1  ;;  %v5751_v13 = vpop.f32.mrb[23].mxu0  ;;  %6173 = vmatprep.subr.bf16.mxu0 %v6618_v10  ;;  %v6644_v57 = vld [vmem:[%s6847_s29 + $0xa30] sm:$0xff]   ;;  %v6647_v10 = vld [vmem:[%s6847_s29 + $0xaf8] sm:$0xff]  }
 0x178   : > { %v7313_v5 = vadd.f32 %v1474_v62, %v7260_v63  ;;  %v5779_v7 = vpop.f32.mrb[23].mxu1  ;;  %6201 = vmatprep.subr.bf16.mxu1 %v6619_v39  ;;  %v6621_v63 = vld [vmem:[%s6847_s29 + $0xa80] sm:$0xff]   ;;  %v6648_v39 = vld [vmem:[%s6847_s29 + $0xa38] sm:$0xff]  }
 0x179   : > { %v1463_v2 = vadd.f32 %v5777_v0, %v5749_v59  ;;  %3954 = vmatmul.mubr.bf16.vlgmr.msra.gmra.mrb[72].mxu0 %v7265_v11  ;;  %v6646_v0 = vld [vmem:[%s6847_s29 + $0xa78] sm:$0xff]  }
 0x17a   : > { %4002 = vmatmul.mubr.bf16.vlgmr.msra.gmra.mrb[72].mxu1 %v7270_v3  ;;  %6174 = vmatpush3.bf16.msra.mxu0 %v6620_v6  ;;  %v6649_v7 = vld [vmem:[%s6847_s29 + $0xab8] sm:$0xff]  }
 0x17b   : > { %v1475_v9 = vrot.slane %v1463_v2, 2  ;;  %6202 = vmatpush3.bf16.msra.mxu1 %v6621_v63  ;;  %3960 = vmatprep.mubr.bf16.mxu0 %v7325_v32 }
 0x17c   : > { %6175 = vmatprep.subr.bf16.mxu0 %v6622_v16  ;;  %4008 = vmatprep.mubr.bf16.mxu1 %v7333_v19 }
 0x17d   : > { %v1476_v17 = vsel %vm1471_vm1, %v1473_v55, %v1475_v9  ;;  %6203 = vmatprep.subr.bf16.mxu1 %v6623_v18 }
 0x17e   : > { %v7329_v34 = vadd.f32 %v1476_v17, %v7280_v15  ;;  %6176 = vmatpush3.bf16.msra.mxu0 %v6624_v47  ;;  %v6628_v15 = vld [vmem:[%s6847_s29 + $0xa10] sm:$0xff]  }
 0x17f   : > { %6204 = vmatpush3.bf16.msra.mxu1 %v6625_v20  ;;  %6177 = vmatprep.subr.bf16.mxu0 %v6626_v43 }
 0x180   : > { %6205 = vmatprep.subr.bf16.mxu1 %v6627_v21 }
 0x181   : > { %3961 = vmatmul.mubr.bf16.gmra.mrb[76].mxu0 %v7341_v45 }
 0x182   : > { %4009 = vmatmul.mubr.bf16.gmra.mrb[76].mxu1 %v7346_v23  ;;  %6178 = vmatpush3.bf16.msra.mxu0 %v6628_v15 }
 0x183   : > { %6206 = vmatpush3.bf16.msra.mxu1 %v6629_v22  ;;  %4318 = vmatprep.mubr.bf16.mxu0 %v7232_v8 }
 0x184   : > { %6179 = vmatprep.subr.bf16.mxu0 %v6630_v24  ;;  %4366 = vmatprep.mubr.bf16.mxu1 %v7237_v14 }
 0x185   : > { %6207 = vmatprep.subr.bf16.mxu1 %v6631_v36 }
 0x186   : > { %6180 = vmatpush3.bf16.msra.mxu0 %v6632_v25 }
 0x187   : > { %6208 = vmatpush3.bf16.msra.mxu1 %v6633_v26  ;;  %6181 = vmatprep.subr.bf16.mxu0 %v6634_v38 }
 0x188   : > { %6209 = vmatprep.subr.bf16.mxu1 %v6635_v27 }
 0x18a   : > { %6182 = vmatpush3.bf16.msra.mxu0 %v6636_v28 }
 0x18b   : > { %6210 = vmatpush3.bf16.msra.mxu1 %v6637_v29  ;;  %6183 = vmatprep.subr.bf16.mxu0 %v6638_v30 }
 0x18c   : > { %v5797_v8 = vpop.f32.mrb[24].mxu0  ;;  %6211 = vmatprep.subr.bf16.mxu1 %v6639_v33 }
 0x18d   : > { %v5825_v40 = vpop.f32.mrb[24].mxu1  ;;  %v5798_v31 = vpop.f32.mrb[25].mxu0 }
 0x18e   : > { %v5799_v14 = vadd.f32 %v5798_v31, %v5797_v8  ;;  %v5826_v42 = vpop.f32.mrb[25].mxu1  ;;  %v5800_v35 = vpop.f32.mrb[26].mxu0  ;;  %6184 = vmatpush3.bf16.msra.mxu0 %v6640_v37 }
 0x18f   : > { %v5827_v41 = vadd.f32 %v5826_v42, %v5825_v40  ;;  %v5828_v44 = vpop.f32.mrb[26].mxu1  ;;  %v5801_v48 = vpop.f32.mrb[27].mxu0  ;;  %6212 = vmatpush3.bf16.msra.mxu1 %v6641_v46  ;;  %6185 = vmatprep.subr.bf16.mxu0 %v6642_v53 }
 0x190   : > { %v5829_v49 = vpop.f32.mrb[27].mxu1  ;;  %v5802_v51 = vadd.f32 %v5801_v48, %v5800_v35  ;;  %6213 = vmatprep.subr.bf16.mxu1 %v6643_v54 }
 0x191   : > { %v1821_v50 = vadd.f32 %v5827_v41, %v5799_v14  ;;  %v5830_v52 = vadd.f32 %v5829_v49, %v5828_v44 }
 0x192   : > { %6186 = vmatpush3.bf16.msra.mxu0 %v6644_v57 }
 0x193   : > { %v1838_v55 = vrot.slane %v1821_v50, 3  ;;  %v1824_v56 = vadd.f32 %v5830_v52, %v5802_v51  ;;  %6214 = vmatpush3.bf16.msra.mxu1 %v6645_v58  ;;  %6187 = vmatprep.subr.bf16.mxu0 %v6646_v0 }
 0x194   : > { %v5803_v59 = vpop.f32.mrb[28].mxu0  ;;  %6215 = vmatprep.subr.bf16.mxu1 %v6647_v10 }
 0x195   : > { %v1839_v60 = vrot.slane %v1824_v56, 3  ;;  %v5831_v61 = vpop.f32.mrb[28].mxu1  ;;  %v5804_v62 = vpop.f32.mrb[29].mxu0 }
 0x196   : > { %v5805_v1 = vadd.f32 %v5804_v62, %v5803_v59  ;;  %v5832_v4 = vpop.f32.mrb[29].mxu1  ;;  %v5806_v13 = vpop.f32.mrb[30].mxu0  ;;  %6188 = vmatpush3.bf16.msra.mxu0 %v6648_v39 }
 0x197   : > { %v1840_v12 = vsel %vm1837_vm2, %v1838_v55, %v1839_v60  ;;  %v5833_v2 = vadd.f32 %v5832_v4, %v5831_v61  ;;  %v5834_v9 = vpop.f32.mrb[30].mxu1  ;;  %v5807_v16 = vpop.f32.mrb[31].mxu0  ;;  %6216 = vmatpush3.bf16.msra.mxu1 %v6649_v7 }
 0x198   : > { %v1845_v6 = vadd.f32 %v1840_v12, %v7313_v5  ;;  %v5835_v17 = vpop.f32.mrb[31].mxu1 }
 0x199   : > { %v1829_v63 = vadd.f32 %v5833_v2, %v5805_v1  ;;  %4319 = vmatmul.mubr.bf16.vlgmr.msra.gmra.mrb[80].mxu0 %v7265_v11 }
 0x19a   : > { %4367 = vmatmul.mubr.bf16.vlgmr.msra.gmra.mrb[80].mxu1 %v7270_v3  ;;  %4325 = vmatprep.mubr.bf16.mxu0 %v7325_v32 }
 0x19b   : > { %v1841_v18 = vrot.slane %v1829_v63, 3  ;;  %4373 = vmatprep.mubr.bf16.mxu1 %v7333_v19 }
 0x19d   : > { %v1842_v47 = vsel %vm1837_vm2, %v1839_v60, %v1841_v18 }
 0x19e   : > { %v1846_v20 = vadd.f32 %v1842_v47, %v7329_v34 }
 0x1a1   : > { %4326 = vmatmul.mubr.bf16.gmra.mrb[84].mxu0 %v7341_v45 }
 0x1a2   : > { %4374 = vmatmul.mubr.bf16.gmra.mrb[84].mxu1 %v7346_v23 }
 0x1ac   : > { %v5853_v5 = vpop.f32.mrb[32].mxu0 }
 0x1ad   : > { %v5881_v43 = vpop.f32.mrb[32].mxu1  ;;  %v5854_v21 = vpop.f32.mrb[33].mxu0 }
 0x1ae   : > { %v5855_v15 = vadd.f32 %v5854_v21, %v5853_v5  ;;  %v5882_v22 = vpop.f32.mrb[33].mxu1  ;;  %v5856_v11 = vpop.f32.mrb[34].mxu0 }
 0x1af   : > { %v5883_v24 = vadd.f32 %v5882_v22, %v5881_v43  ;;  %v5884_v36 = vpop.f32.mrb[34].mxu1  ;;  %v5857_v25 = vpop.f32.mrb[35].mxu0 }
 0x1b0   : > { %v5858_v3 = vadd.f32 %v5857_v25, %v5856_v11  ;;  %v5885_v26 = vpop.f32.mrb[35].mxu1 }
 0x1b1   : > { %v2187_v32 = vadd.f32 %v5883_v24, %v5855_v15  ;;  %v5886_v38 = vadd.f32 %v5885_v26, %v5884_v36 }
 0x1b3   : > { %v2190_v34 = vadd.f32 %v5886_v38, %v5858_v3  ;;  %v2204_v27 = vrot.slane %v2187_v32, 4 }
 0x1b4   : > { %v5859_v19 = vpop.f32.mrb[36].mxu0 }
 0x1b5   : > { %v2205_v45 = vrot.slane %v2190_v34, 4  ;;  %v5887_v28 = vpop.f32.mrb[36].mxu1  ;;  %v5860_v23 = vpop.f32.mrb[37].mxu0 }
 0x1b6   : > { %v5861_v29 = vadd.f32 %v5860_v23, %v5859_v19  ;;  %v5888_v8 = vpop.f32.mrb[37].mxu1  ;;  %v5862_v30 = vpop.f32.mrb[38].mxu0 }
 0x1b7   : > { %v2206_v40 = vsel %vm2203_vm3, %v2204_v27, %v2205_v45  ;;  %v5889_v31 = vadd.f32 %v5888_v8, %v5887_v28  ;;  %v5890_v14 = vpop.f32.mrb[38].mxu1  ;;  %v5863_v42 = vpop.f32.mrb[39].mxu0 }
 0x1b8   : > { %v2211_v33 = vadd.f32 %v2206_v40, %v1845_v6  ;;  %v5891_v35 = vpop.f32.mrb[39].mxu1 }
 0x1b9   : > { %v2195_v37 = vadd.f32 %v5889_v31, %v5861_v29 }
 0x1bb   : > { %v2207_v41 = vrot.slane %v2195_v37, 4 }
 0x1bd   : > { %v2208_v44 = vsel %vm2203_vm3, %v2205_v45, %v2207_v41 }
 0x1be   : > { %v2212_v46 = vadd.f32 %v2208_v44, %v1846_v20 }
 0x1cc   : > { %v5909_v48 = vpop.f32.mrb[40].mxu0 }
 0x1cd   : > { %v5937_v49 = vpop.f32.mrb[40].mxu1  ;;  %v5910_v50 = vpop.f32.mrb[41].mxu0 }
 0x1ce   : > { %v5911_v51 = vadd.f32 %v5910_v50, %v5909_v48  ;;  %v5938_v52 = vpop.f32.mrb[41].mxu1  ;;  %v5912_v53 = vpop.f32.mrb[42].mxu0 }
 0x1cf   : > { %v5939_v54 = vadd.f32 %v5938_v52, %v5937_v49  ;;  %v5940_v55 = vpop.f32.mrb[42].mxu1  ;;  %v5913_v56 = vpop.f32.mrb[43].mxu0 }
 0x1d0   : > { %v5914_v57 = vadd.f32 %v5913_v56, %v5912_v53  ;;  %v5941_v58 = vpop.f32.mrb[43].mxu1 }
 0x1d1   : > { %v2553_v59 = vadd.f32 %v5939_v54, %v5911_v51  ;;  %v5942_v60 = vadd.f32 %v5941_v58, %v5940_v55 }
 0x1d3   : > { %v2556_v61 = vadd.f32 %v5942_v60, %v5914_v57  ;;  %v2570_v0 = vrot.slane %v2553_v59, 5 }
 0x1d4   : > { %v5915_v62 = vpop.f32.mrb[44].mxu0 }
 0x1d5   : > { %v2571_v1 = vrot.slane %v2556_v61, 5  ;;  %v5943_v4 = vpop.f32.mrb[44].mxu1  ;;  %v5916_v10 = vpop.f32.mrb[45].mxu0 }
 0x1d6   : > { %v5917_v12 = vadd.f32 %v5916_v10, %v5915_v62  ;;  %v5944_v2 = vpop.f32.mrb[45].mxu1  ;;  %v5918_v39 = vpop.f32.mrb[46].mxu0 }
 0x1d7   : > { %v2572_v13 = vsel %vm2569_vm4, %v2570_v0, %v2571_v1  ;;  %v5945_v6 = vadd.f32 %v5944_v2, %v5943_v4  ;;  %v5946_v7 = vpop.f32.mrb[46].mxu1  ;;  %v5919_v9 = vpop.f32.mrb[47].mxu0 }
 0x1d8   : > { %v2577_v63 = vadd.f32 %v2572_v13, %v2211_v33  ;;  %v5947_v16 = vpop.f32.mrb[47].mxu1 }
 0x1d9   : > { %v2561_v17 = vadd.f32 %v5945_v6, %v5917_v12 }
 0x1db   : > { %v2573_v18 = vrot.slane %v2561_v17, 5 }
 0x1dd   : > { %v2574_v47 = vsel %vm2569_vm4, %v2571_v1, %v2573_v18 }
 0x1de   : > { %v2578_v20 = vadd.f32 %v2574_v47, %v2212_v46 }
 0x1ec   : > { %v5965_v5 = vpop.f32.mrb[48].mxu0 }
 0x1ed   : > { %v5993_v43 = vpop.f32.mrb[48].mxu1  ;;  %v5966_v21 = vpop.f32.mrb[49].mxu0 }
 0x1ee   : > { %v5967_v15 = vadd.f32 %v5966_v21, %v5965_v5  ;;  %v5994_v22 = vpop.f32.mrb[49].mxu1  ;;  %v5968_v11 = vpop.f32.mrb[50].mxu0 }
 0x1ef   : > { %v5995_v24 = vadd.f32 %v5994_v22, %v5993_v43  ;;  %v5996_v36 = vpop.f32.mrb[50].mxu1  ;;  %v5969_v25 = vpop.f32.mrb[51].mxu0 }
 0x1f0   : > { %v5970_v3 = vadd.f32 %v5969_v25, %v5968_v11  ;;  %v5997_v26 = vpop.f32.mrb[51].mxu1 }
 0x1f1   : > { %v2919_v32 = vadd.f32 %v5995_v24, %v5967_v15  ;;  %v5998_v38 = vadd.f32 %v5997_v26, %v5996_v36 }
 0x1f3   : > { %v2922_v34 = vadd.f32 %v5998_v38, %v5970_v3  ;;  %v2936_v27 = vrot.slane %v2919_v32, 6 }
 0x1f4   : > { %v5971_v19 = vpop.f32.mrb[52].mxu0 }
 0x1f5   : > { %v2937_v45 = vrot.slane %v2922_v34, 6  ;;  %v5999_v28 = vpop.f32.mrb[52].mxu1  ;;  %v5972_v23 = vpop.f32.mrb[53].mxu0 }
 0x1f6   : > { %v5973_v29 = vadd.f32 %v5972_v23, %v5971_v19  ;;  %v6000_v8 = vpop.f32.mrb[53].mxu1  ;;  %v5974_v30 = vpop.f32.mrb[54].mxu0 }
 0x1f7   : > { %v2938_v40 = vsel %vm2935_vm5, %v2936_v27, %v2937_v45  ;;  %v6001_v31 = vadd.f32 %v6000_v8, %v5999_v28  ;;  %v6002_v14 = vpop.f32.mrb[54].mxu1  ;;  %v5975_v42 = vpop.f32.mrb[55].mxu0 }
 0x1f8   : > { %v6003_v33 = vpop.f32.mrb[55].mxu1  ;;  %v2943_v35 = vadd.f32 %v2938_v40, %v2577_v63 }
 0x1f9   : > { %v2927_v37 = vadd.f32 %v6001_v31, %v5973_v29 }
 0x1fb   : > { %v2939_v41 = vrot.slane %v2927_v37, 6 }
 0x1fd   : > { %v2940_v44 = vsel %vm2935_vm5, %v2937_v45, %v2939_v41 }
 0x1fe   : > { %v2944_v46 = vadd.f32 %v2940_v44, %v2578_v20 }
 0x20c   : > { %v6021_v48 = vpop.f32.mrb[56].mxu0 }
 0x20d   : > { %v6049_v49 = vpop.f32.mrb[56].mxu1  ;;  %v6022_v50 = vpop.f32.mrb[57].mxu0 }
 0x20e   : > { %v6023_v51 = vadd.f32 %v6022_v50, %v6021_v48  ;;  %v6050_v52 = vpop.f32.mrb[57].mxu1  ;;  %v6024_v53 = vpop.f32.mrb[58].mxu0 }
 0x20f   : > { %v6051_v54 = vadd.f32 %v6050_v52, %v6049_v49  ;;  %v6052_v55 = vpop.f32.mrb[58].mxu1  ;;  %v6025_v56 = vpop.f32.mrb[59].mxu0 }
 0x210   : > { %v6026_v57 = vadd.f32 %v6025_v56, %v6024_v53  ;;  %v6053_v58 = vpop.f32.mrb[59].mxu1 }
 0x211   : > { %v3285_v59 = vadd.f32 %v6051_v54, %v6023_v51  ;;  %v6054_v60 = vadd.f32 %v6053_v58, %v6052_v55 }
 0x213   : > { %v3288_v61 = vadd.f32 %v6054_v60, %v6026_v57  ;;  %v3302_v0 = vrot.slane %v3285_v59, 7 }
 0x214   : > { %v6027_v62 = vpop.f32.mrb[60].mxu0 }
 0x215   : > { %v3303_v1 = vrot.slane %v3288_v61, 7  ;;  %v6055_v4 = vpop.f32.mrb[60].mxu1  ;;  %v6028_v10 = vpop.f32.mrb[61].mxu0 }
 0x216   : > { %v6029_v12 = vadd.f32 %v6028_v10, %v6027_v62  ;;  %v6056_v2 = vpop.f32.mrb[61].mxu1  ;;  %v6030_v39 = vpop.f32.mrb[62].mxu0 }
 0x217   : > { %v6057_v13 = vadd.f32 %v6056_v2, %v6055_v4  ;;  %v6058_v6 = vpop.f32.mrb[62].mxu1  ;;  %v6031_v7 = vpop.f32.mrb[63].mxu0  ;;  %v3304_v9 = vsel %vm3301_vm6, %v3302_v0, %v3303_v1 }
 0x218   : > { %v6059_v63 = vpop.f32.mrb[63].mxu1  ;;  %v3309_v16 = vadd.f32 %v3304_v9, %v2943_v35 }
 0x219   : > { %v3293_v17 = vadd.f32 %v6057_v13, %v6029_v12 }
 0x21b   : > { %v3305_v18 = vrot.slane %v3293_v17, 7 }
 0x21d   : > { %v3306_v47 = vsel %vm3301_vm6, %v3303_v1, %v3305_v18 }
 0x21e   : > { %v3310_v20 = vadd.f32 %v3306_v47, %v2944_v46 }
 0x22c   : > { %v6077_v5 = vpop.f32.mrb[64].mxu0 }
 0x22d   : > { %v6105_v43 = vpop.f32.mrb[64].mxu1  ;;  %v6078_v21 = vpop.f32.mrb[65].mxu0 }
 0x22e   : > { %v6106_v15 = vpop.f32.mrb[65].mxu1  ;;  %v6080_v22 = vpop.f32.mrb[66].mxu0 }
 0x22f   : > { %v6108_v11 = vpop.f32.mrb[66].mxu1  ;;  %v6081_v24 = vpop.f32.mrb[67].mxu0 }
 0x230   : > { %v6082_v36 = vadd.f32 %v6081_v24, %v6080_v22  ;;  %v6109_v25 = vpop.f32.mrb[67].mxu1 }
 0x231   : > { %v6110_v3 = vadd.f32 %v6109_v25, %v6108_v11 }
 0x233   : > { %v3652_v26 = vadd.f32 %v6110_v3, %v6082_v36 }
 0x234   : > { %v6083_v32 = vpop.f32.mrb[68].mxu0 }
 0x235   : > { %v3662_v38 = vadd.f32 %v3652_v26, %v3309_v16  ;;  %v6111_v34 = vpop.f32.mrb[68].mxu1  ;;  %v6084_v19 = vpop.f32.mrb[69].mxu0 }
 0x236   : > { %v6085_v27 = vadd.f32 %v6084_v19, %v6083_v32  ;;  %v6112_v45 = vpop.f32.mrb[69].mxu1  ;;  %v6086_v28 = vpop.f32.mrb[70].mxu0 }
 0x237   : > { %v6113_v23 = vadd.f32 %v6112_v45, %v6111_v34  ;;  %v6114_v29 = vpop.f32.mrb[70].mxu1  ;;  %v6087_v8 = vpop.f32.mrb[71].mxu0 }
 0x238   : > { %v6115_v30 = vpop.f32.mrb[71].mxu1  ;;  %v5607_v8 = vld [vmem:[%s346_s9] ss:$0 sm:$0xff] }
 0x239   : > { %v3657_v40 = vadd.f32 %v6113_v23, %v6085_v27 }
 0x23b   : > { %v3663_v31 = vadd.f32 %v3657_v40, %v3310_v20 }
 0x24c   : > { %v6133_v14 = vpop.f32.mrb[72].mxu0 }
 0x24d   : > { %v6161_v42 = vpop.f32.mrb[72].mxu1  ;;  %v6134_v33 = vpop.f32.mrb[73].mxu0 }
 0x24e   : > { %v6162_v35 = vpop.f32.mrb[73].mxu1  ;;  %v6136_v37 = vpop.f32.mrb[74].mxu0 }
 0x24f   : > { %v6164_v41 = vpop.f32.mrb[74].mxu1  ;;  %v6137_v44 = vpop.f32.mrb[75].mxu0 }
 0x250   : > { %v6138_v46 = vadd.f32 %v6137_v44, %v6136_v37  ;;  %v6165_v48 = vpop.f32.mrb[75].mxu1 }
 0x251   : > { %v6166_v49 = vadd.f32 %v6165_v48, %v6164_v41 }
 0x253   : > { %v4006_v50 = vadd.f32 %v6166_v49, %v6138_v46 }
 0x254   : > { %v6139_v51 = vpop.f32.mrb[76].mxu0 }
 0x255   : > { %v6167_v52 = vpop.f32.mrb[76].mxu1  ;;  %v6140_v53 = vpop.f32.mrb[77].mxu0  ;;  %v4020_v1 = vrot.slane %v4006_v50, 1 }
 0x256   : > { %v6141_v54 = vadd.f32 %v6140_v53, %v6139_v51  ;;  %v6168_v55 = vpop.f32.mrb[77].mxu1  ;;  %v6142_v56 = vpop.f32.mrb[78].mxu0 }
 0x257   : > { %v6169_v57 = vadd.f32 %v6168_v55, %v6167_v52  ;;  %v6170_v58 = vpop.f32.mrb[78].mxu1  ;;  %v6143_v59 = vpop.f32.mrb[79].mxu0 }
 0x258   : > { %v6144_v60 = vadd.f32 %v6143_v59, %v6142_v56  ;;  %v6171_v61 = vpop.f32.mrb[79].mxu1 }
 0x259   : > { %v4011_v62 = vadd.f32 %v6169_v57, %v6141_v54  ;;  %v6172_v0 = vadd.f32 %v6171_v61, %v6170_v58 }
 0x25b   : > { %v4021_v4 = vrot.slane %v4011_v62, 1  ;;  %v4014_v10 = vadd.f32 %v6172_v0, %v6144_v60 }
 0x25d   : > { %v4022_v12 = vsel %vm1105_vm0, %v4020_v1, %v4021_v4  ;;  %v4023_v2 = vrot.slane %v4014_v10, 1 }
 0x25e   : > { %v4027_v39 = vadd.f32 %v4022_v12, %v3662_v38 }
 0x25f   : > { %v4024_v13 = vsel %vm1105_vm0, %v4021_v4, %v4023_v2 }
 0x260   : > { %v4028_v6 = vadd.f32 %v4024_v13, %v3663_v31 }
 0x26c   : > { %v6189_v7 = vpop.f32.mrb[80].mxu0 }
 0x26d   : > { %v6217_v9 = vpop.f32.mrb[80].mxu1  ;;  %v6190_v63 = vpop.f32.mrb[81].mxu0 }
 0x26e   : > { %v6218_v16 = vpop.f32.mrb[81].mxu1  ;;  %v6192_v17 = vpop.f32.mrb[82].mxu0 }
 0x26f   : > { %v6220_v18 = vpop.f32.mrb[82].mxu1  ;;  %v6193_v47 = vpop.f32.mrb[83].mxu0 }
 0x270   : > { %v6194_v20 = vadd.f32 %v6193_v47, %v6192_v17  ;;  %v6221_v5 = vpop.f32.mrb[83].mxu1 }
 0x271   : > { %v6222_v43 = vadd.f32 %v6221_v5, %v6220_v18 }
 0x273   : > { %v4371_v21 = vadd.f32 %v6222_v43, %v6194_v20 }
 0x274   : > { %v6195_v15 = vpop.f32.mrb[84].mxu0 }
 0x275   : > { %v6223_v22 = vpop.f32.mrb[84].mxu1  ;;  %v6196_v11 = vpop.f32.mrb[85].mxu0  ;;  %v4385_v45 = vrot.slane %v4371_v21, 2 }
 0x276   : > { %v6197_v24 = vadd.f32 %v6196_v11, %v6195_v15  ;;  %v6224_v36 = vpop.f32.mrb[85].mxu1  ;;  %v6198_v25 = vpop.f32.mrb[86].mxu0 }
 0x277   : > { %v6225_v3 = vadd.f32 %v6224_v36, %v6223_v22  ;;  %v6226_v26 = vpop.f32.mrb[86].mxu1  ;;  %v6199_v32 = vpop.f32.mrb[87].mxu0 }
 0x278   : > { %v6200_v38 = vadd.f32 %v6199_v32, %v6198_v25  ;;  %v6227_v34 = vpop.f32.mrb[87].mxu1 }
 0x279   : > { %v4376_v19 = vadd.f32 %v6225_v3, %v6197_v24  ;;  %v6228_v27 = vadd.f32 %v6227_v34, %v6226_v26 }
 0x27b   : > { %v4386_v28 = vrot.slane %v4376_v19, 2  ;;  %v4379_v23 = vadd.f32 %v6228_v27, %v6200_v38 }
 0x27d   : > { %v4387_v29 = vsel %vm1471_vm1, %v4385_v45, %v4386_v28  ;;  %v4388_v30 = vrot.slane %v4379_v23, 2 }
 0x27e   : > { %v4392_v40 = vadd.f32 %v4387_v29, %v4027_v39 }
 0x27f   : > { %v4389_v31 = vsel %vm1471_vm1, %v4386_v28, %v4388_v30 }
 0x280   : > { %v4401_v14 = vadd.f32 %v5607_v8, %v4392_v40  ;;  %v4393_v42 = vadd.f32 %v4389_v31, %v4028_v6 }
 0x281   : > { %4417 = sbr.rel (!%p6799_p6) target bundleno = 656 (0x290), region = 86 }
 0x282   : > { %vm4403_vm7 = vcmp.ge.f32.partialorder %v4401_v14, 0.0  ;;  %v4405_v33 = vmul.f32 0.1, %v4401_v14  ;;  %v4402_v35 = vadd.f32 %v5607_v8, %v4393_v42 }
 0x284   : > { %v4407_v37 = vsel %vm4403_vm7, %v4401_v14, %v4405_v33  ;;  %vm4404_vm8 = vcmp.ge.f32.partialorder %v4402_v35, 0.0  ;;  %v4406_v41 = vmul.f32 0.1, %v4402_v35 }
 0x285   : > { %4409 = vst [vmem:[%s333_s10] sm:$0xff] %v4407_v37 }
 0x286   : > { %v4408_v44 = vsel %vm4404_vm8, %v4402_v35, %v4406_v41 }
 0x287   : > { %4410 = vst [vmem:[%s333_s10 + $0x8] sm:$0xff] %v4408_v44 }
 0x28c   : > { %v4454_v46 = vld [vmem:[%s333_s10] sm:$0xff] }
 0x28d   : > { %4455 = vst [vmem:[%s4424_s14] sm:$0xff] %v4454_v46 }
 0x28e   : > { %v4456_v48 = vld [vmem:[%s333_s10 + $0x8] sm:$0xff] }
 0x28f   : > { %4457 = vst [vmem:[%s4424_s14 + $0x40] sm:$0xff] %v4456_v48 }
 0x290 PF: > { %s14_s21 = sadd.s32 1, %s6720_s21   ;;  %s7434_s15 = smov %s6700_s16 }
 0x291   : > { %p11_p13 = scmp.ge.s32.totalorder %s14_s21, 18   ;;  %s7435_s16 = smov %s6807_s5 }
 0x292   : > { %s7436_s17 = smov %s6712_s19  ;;  %s7437_s18 = smov %s6716_s20 }
 0x293   : > { %s7438_s19 = smov %s7441_s22  ;;  %s7439_s20 = smov %s7445_s23 }
 0x294   :  { %13 = sbr.rel (!%p11_p13) target bundleno = 4 (0x4), region = 179 }

// kernel: scale_discriminator_forward.12
= control target key start
LH: loop header
LB: loop body
LE: loop exit
PB: predicated region body
PF: predicated region fallthrough
CT: control target
= control target key end

     0   :  { %9 = vsyncpa [#allocation3], 0  ;;  %s9119_s0 = inlined_call_operand.vmem [shape: bf16[2,32,1024], index: 0, kind: input, shape index: {}, may-alias: {0,1}]   ;;  %s9120_s1 = inlined_call_operand.vmem [shape: bf16[2,32,1024], index: 1, kind: input, shape index: {}, may-alias: {0,1}]   ;;  %s9121_s2 = inlined_call_operand.hbm [shape: bf16[4,5,1024,256], index: 2, kind: input, shape index: {}]   ;;  %s9122_s3 = inlined_call_operand.vmem [shape: f32[4,1,256], index: 3, kind: input, shape index: {}]   ;;  %s9123_s4 = inlined_call_operand.vmem [shape: f32[2,16,1024], index: 4, kind: output, shape index: {}]  }
   0x1   :  { %11 = vsyncpa [#allocation3 + $0x1], 0  ;;  %s8092_s15 = smov 0   ;;  %s8094_s16 = smov 0  }
   0x2   :  { %s8096_s17 = smov 0   ;;  %s8098_s18 = smov 0  }
   0x3   :  { %s8100_s19 = smov 0   ;;  %s8102_s20 = smov 0  }
   0x4   :  { %s8104_s21 = smov 0   ;;  %s8106_s22 = smov 0  }
   0x5   :  { %s8108_s23 = smov 0   ;;  %s8110_s24 = smov 0  }
   0x6 LB: > { %s5600_s25 = sadd.s32 4294967295, %s8062_s24   ;;  %s32_s26 = sadd.s32 1, %s8054_s22  ;;  %s8062_s24 = sphi %s8110_s24, %s17_s24   ;;  %s8058_s23 = sphi %s8108_s23, %s9141_s23   ;;  %s8054_s22 = sphi %s8106_s22, %s9140_s22   ;;  %s8050_s21 = sphi %s8104_s21, %s9139_s21   ;;  %s8046_s20 = sphi %s8102_s20, %s9138_s20   ;;  %s8042_s19 = sphi %s8100_s19, %s9137_s19   ;;  %s8038_s18 = sphi %s8098_s18, %s9136_s18   ;;  %s8034_s17 = sphi %s8096_s17, %s9135_s17   ;;  %s8030_s16 = sphi %s8094_s16, %s9134_s16   ;;  %s8026_s15 = sphi %s8092_s15, %s9133_s15  }
   0x7   : > { %p34_p0 = scmp.ge.s32.totalorder %s32_s26, 4  ;;  %s36_s27 = sadd.s32 1, %s8058_s23 }
   0x8   : > { %s101_s28 = sadd.s32 1, %s8042_s19  ;;  %p108_p1 = scmp.ne.s32.totalorder %s8042_s19, %s8038_s18 }
   0x9   : > { %s9143_s26 = smov (%p34_p0, %s32_s26), 0  ;;  %s9145_s27 = smov (!%p34_p0, %s36_s27), %s8058_s23 }
   0xa   : > { %s98_s29 = ssub.s32 %s8054_s22, %s9143_s26  ;;  %p109_p2 = scmp.eq.s32.totalorder %s8062_s24, 0 }
   0xb   : > { %p38_p3 = scmp.ge.s32.totalorder %s9145_s27, 2  ;;  %p99_p4 = scmp.eq.s32.totalorder %s98_s29, 0 }
   0xc   : > { %p8152_p5 = por %p109_p2, %p108_p1  ;;  %p114_p6 = scmp.ne.s32.totalorder %s8038_s18, %s8034_s17 }
   0xd   : > { %s9147_s27 = smov (%p38_p3, %s9145_s27), 0  ;;  %p115_p7 = scmp.eq.s32.totalorder %s5600_s25, 0 }
   0xe   : > { %9126 = sst [smem:[#allocation6_spill]] %s9147_s27  ;;  %s150_s6 = ssub.s32 %s8058_s23, %s9147_s27 }
   0xf   : > { %s8160_s5 = scalar_select %p99_p4, %s8042_s19, %s101_s28  }
  0x10   : > { %s154_s7 = sor.u32 %s150_s6, %s98_s29  ;;  %s157_s8 = sadd.s32 1, %s8030_s16 }
  0x11   : > { %p8165_p8 = por %p115_p7, %p114_p6  ;;  %p155_p9 = scmp.eq.s32.totalorder %s154_s7, 0 }
  0x12   : > { %p167_p10 = scmp.ne.s32.totalorder %s8030_s16, %s8026_s15  ;;  %p168_p11 = scmp.eq.s32.totalorder %s5600_s25, 7 }
  0x13   : > { %s8172_s10 = scalar_select %p155_p9, %s8030_s16, %s157_s8  }
  0x14   : > { %p8174_p12 = por %p168_p11, %p167_p10  ;;  %p6907_p13 = scmp.lt.s32.totalorder %s8062_s24, 8 }
  0x15   : > { %s224_s12 = sand.u32 1, %s8042_s19   ;;  %s6899_s14 = smul.u32 81920, %s8054_s22 }
  0x16   : > { %s9128_s11 = scalar_select %p8174_p12, 1, 0 }
  0x17   : > { %s6898_s13 = smul.u32 5120, %s224_s12  ;;  %p8183_p0 = pnand %p6907_p13, %p8152_p5 }
  0x18   : > { %s8190_s25 = scalar_lea.hbm %s9121_s2, %s6899_s14  ;;  %s8195_s30 = scalar_lea.sflag [#allocation3], %s224_s12 }
  0x19   : > { %s228_s6 = scalar_lea.vmem [#allocation2], %s6898_s13  ;;  %s7950_s8 = scalar_lea.hbm %s8190_s25, 81920 }
  0x1a   : > { %s235_s7 = sshll.u32 %s228_s6, 4  ;;  %p7951_p2 = scmp.ne.s32.totalorder %s8190_s25, %s7950_s8  ;;  %s8192_s7 = int_to_ptr.vmem [resolvable:$true] %s235_s7 }
  0x1b   : > { %p7952_p3 = pneg %p8183_p0  ;;  %s7955_s29 = scalar_lea.hbm %s9121_s2, 327680 }
  0x1c   : > { %p7956_p6 = scmp.lt.u32.totalorder %s8190_s25, %s9121_s2  ;;  %p7957_p7 = scmp.lt.u32.totalorder %s7955_s29, %s7950_s8 }
  0x1d   : > { %p7953_p4 = pnand %p7952_p3, %p7951_p2  ;;  %p7959_p10 = scmp.lt.u32.totalorder %s7950_s8, %s8190_s25 }
  0x1e   : > { %p7958_p9 = por %p7957_p7, %p7956_p6 }
  0x1f   : > { %p7954_p5 = pneg %p7953_p4 }
  0x20   : > { %p7960_p11 = por %p7959_p10, %p7958_p9 }
  0x22   : > { %p7961_p13 = pnand %p7960_p11, %p7954_p5 }
  0x24   : > { %7964 = shalt.err (!%p7961_p13)
}
  0x25   : > { %s7965_s12 = scalar_lea.vmem %s8192_s7, 81920  ;;  %s8064_s6 = smov [#allocation2]  }
  0x26   : > { %p7966_p2 = scmp.ne.s32.totalorder %s8192_s7, %s7965_s12  ;;  %s7970_s14 = sshll.u32 %s8064_s6, 4  ;;  %s7971_s14 = int_to_ptr.vmem [resolvable:$false] %s7970_s14 }
  0x27   : > { %s7972_s27 = scalar_lea.vmem %s7971_s14, 163840  ;;  %p7973_p12 = scmp.lt.s32.totalorder %s8192_s7, %s7971_s14 }
  0x28   : > { %p7968_p4 = pnand %p7966_p2, %p7952_p3  ;;  %p7974_p6 = scmp.lt.s32.totalorder %s7972_s27, %s7965_s12 }
  0x2a   : > { %p7969_p1 = pneg %p7968_p4  ;;  %p7975_p7 = por %p7974_p6, %p7973_p12 }
  0x2c   : > { %p7976_p9 = pnand %p7975_p7, %p7969_p1 }
  0x2e   : > { %7979 = shalt.err (!%p7976_p9)
}
  0x2f   : > { %s8065_s8 = smov 128   ;;  %s8066_s28 = smov 8  }
  0x30   : > { %6906 = dma.hbm_to_vmem [thread:$0]  (!%p8183_p0), %s8190_s25, 81920, %s8192_s7, %s8195_s30, %s8065_s8, %s8065_s8, %s8066_s28  }
  0x31   : > { %p250_p3 = scmp.lt.s32.totalorder %s8062_s24, 9  ;;  %p9130_p5 = scmp.ge.s32.totalorder %s8062_s24, 1 }
  0x33   : > { %p251_p10 = pnand %p9130_p5, %p250_p3 }
  0x34   : > { %s256_s29 = sand.u32 (!%p251_p10), 1, %s8038_s18  }
  0x35   : > { %254 = sbr.rel (%p251_p10) target bundleno = 945 (0x3b1), region = 36  ;;  %s257_s12 = scalar_lea.sflag (!%p251_p10), [#allocation3], %s256_s29 }
  0x36   : > { %s6900_s13 = smul.u32 (!%p251_p10), 5120, %s256_s29 }
  0x38   : > { %s8227_s6 = scalar_lea.vmem (!%p251_p10), [#allocation2], %s6900_s13 }
  0x3c   : > { %8021 = dma.done.wait (%p8165_p8), %s257_s12, 81920  }
  0x3d   : > { %8023 = vsyncadd (%p8165_p8), %s257_s12, 4294885376  ;;  %v6990_v0 = vld [vmem:[%s8227_s6 + $0x4] ss:$8 sps:$4 sm:$0xff]   ;;  %v6994_v2 = vld [vmem:[%s8227_s6] ss:$8 sps:$4 sm:$0xff]   ;;  %p310_p8 = scmp.lt.s32.totalorder %s8050_s21, 1 }
  0x3e   : > { %v6992_v1 = vld [vmem:[%s8227_s6 + $0x204] ss:$8 sps:$4 sm:$0xff]   ;;  %1203 = vmatprep.subr.bf16.mxu1 %v6990_v0  ;;  %v6995_v3 = vld [vmem:[%s8227_s6 + $0x200] ss:$8 sps:$4 sm:$0xff]   ;;  %v6996_v4 = vld [vmem:[%s8227_s6 + $0x14] ss:$8 sps:$4 sm:$0xff]  }
  0x3f   : > { %1301 = vmatprep.subr.bf16.mxu0 %v6992_v1  ;;  %1204 = vmatpush1.bf16.msra.mxu1 %v6994_v2  ;;  %v6998_v5 = vld [vmem:[%s8227_s6 + $0x214] ss:$8 sps:$4 sm:$0xff]   ;;  %v7000_v6 = vld [vmem:[%s8227_s6 + $0x10] ss:$8 sps:$4 sm:$0xff]   ;;  %v7002_v8 = vld [vmem:[%s8227_s6 + $0x24] ss:$8 sps:$4 sm:$0xff]  }
  0x40   : > { %1302 = vmatpush1.bf16.msra.mxu0 %v6995_v3  ;;  %1205 = vmatprep.subr.bf16.mxu1 %v6996_v4  ;;  %v7001_v7 = vld [vmem:[%s8227_s6 + $0x210] ss:$8 sps:$4 sm:$0xff]   ;;  %v7004_v9 = vld [vmem:[%s8227_s6 + $0x224] ss:$8 sps:$4 sm:$0xff]   ;;  %v7006_v10 = vld [vmem:[%s8227_s6 + $0x20] ss:$8 sps:$4 sm:$0xff]  }
  0x41   : > { %1303 = vmatprep.subr.bf16.mxu0 %v6998_v5  ;;  %v7007_v11 = vld [vmem:[%s8227_s6 + $0x220] ss:$8 sps:$4 sm:$0xff]   ;;  %v7008_v12 = vld [vmem:[%s8227_s6 + $0x34] ss:$8 sps:$4 sm:$0xff]   ;;  %v7012_v14 = vld [vmem:[%s8227_s6 + $0x30] ss:$8 sps:$4 sm:$0xff]  }
  0x42   : > { %v7010_v13 = vld [vmem:[%s8227_s6 + $0x234] ss:$8 sps:$4 sm:$0xff]   ;;  %v7013_v15 = vld [vmem:[%s8227_s6 + $0x230] ss:$8 sps:$4 sm:$0xff]   ;;  %v7014_v16 = vld [vmem:[%s8227_s6 + $0x44] ss:$8 sps:$4 sm:$0xff]  }
  0x43   : > { %1206 = vmatpush1.bf16.msra.mxu1 %v7000_v6  ;;  %v7016_v17 = vld [vmem:[%s8227_s6 + $0x244] ss:$8 sps:$4 sm:$0xff]   ;;  %v7018_v18 = vld [vmem:[%s8227_s6 + $0x40] ss:$8 sps:$4 sm:$0xff]   ;;  %v7020_v20 = vld [vmem:[%s8227_s6 + $0x54] ss:$8 sps:$4 sm:$0xff]  }
  0x44   : > { %1304 = vmatpush1.bf16.msra.mxu0 %v7001_v7  ;;  %1207 = vmatprep.subr.bf16.mxu1 %v7002_v8  ;;  %v7019_v19 = vld [vmem:[%s8227_s6 + $0x240] ss:$8 sps:$4 sm:$0xff]   ;;  %v7022_v21 = vld [vmem:[%s8227_s6 + $0x254] ss:$8 sps:$4 sm:$0xff]   ;;  %v7024_v22 = vld [vmem:[%s8227_s6 + $0x50] ss:$8 sps:$4 sm:$0xff]  }
  0x45   : > { %1305 = vmatprep.subr.bf16.mxu0 %v7004_v9  ;;  %v7025_v23 = vld [vmem:[%s8227_s6 + $0x250] ss:$8 sps:$4 sm:$0xff]   ;;  %v7026_v24 = vld [vmem:[%s8227_s6 + $0x64] ss:$8 sps:$4 sm:$0xff]   ;;  %v7030_v26 = vld [vmem:[%s8227_s6 + $0x60] ss:$8 sps:$4 sm:$0xff]  }
  0x46   : > { %v7028_v25 = vld [vmem:[%s8227_s6 + $0x264] ss:$8 sps:$4 sm:$0xff]   ;;  %v7031_v27 = vld [vmem:[%s8227_s6 + $0x260] ss:$8 sps:$4 sm:$0xff]   ;;  %v7032_v28 = vld [vmem:[%s8227_s6 + $0x74] ss:$8 sps:$4 sm:$0xff]  }
  0x47   : > { %1208 = vmatpush1.bf16.msra.mxu1 %v7006_v10  ;;  %v7034_v29 = vld [vmem:[%s8227_s6 + $0x274] ss:$8 sps:$4 sm:$0xff]   ;;  %v7036_v30 = vld [vmem:[%s8227_s6 + $0x70] ss:$8 sps:$4 sm:$0xff]   ;;  %v7038_v32 = vld [vmem:[%s8227_s6 + $0x84] ss:$8 sps:$4 sm:$0xff]  }
  0x48   : > { %1306 = vmatpush1.bf16.msra.mxu0 %v7007_v11  ;;  %1209 = vmatprep.subr.bf16.mxu1 %v7008_v12  ;;  %v7037_v31 = vld [vmem:[%s8227_s6 + $0x270] ss:$8 sps:$4 sm:$0xff]   ;;  %v7040_v33 = vld [vmem:[%s8227_s6 + $0x284] ss:$8 sps:$4 sm:$0xff]   ;;  %v7042_v34 = vld [vmem:[%s8227_s6 + $0x80] ss:$8 sps:$4 sm:$0xff]  }
  0x49   : > { %1307 = vmatprep.subr.bf16.mxu0 %v7010_v13  ;;  %v7043_v35 = vld [vmem:[%s8227_s6 + $0x280] ss:$8 sps:$4 sm:$0xff]   ;;  %v7044_v36 = vld [vmem:[%s8227_s6 + $0x94] ss:$8 sps:$4 sm:$0xff]   ;;  %s8272_s9 = scalar_select %p310_p8, %s8050_s21, 1  ;;  %vm2382_vm0 = vcmask 1046528  }
  0x4a   : > { %v7046_v37 = vld [vmem:[%s8227_s6 + $0x294] ss:$8 sps:$4 sm:$0xff]   ;;  %v7048_v38 = vld [vmem:[%s8227_s6 + $0x90] ss:$8 sps:$4 sm:$0xff]   ;;  %v7050_v40 = vld [vmem:[%s8227_s6 + $0xa4] ss:$8 sps:$4 sm:$0xff]  }
  0x4b   : > { %1210 = vmatpush1.bf16.msra.mxu1 %v7012_v14  ;;  %v7049_v39 = vld [vmem:[%s8227_s6 + $0x290] ss:$8 sps:$4 sm:$0xff]   ;;  %s6786_s17 = sshll.u32 %s8272_s9, 7  ;;  %v7052_v41 = vld [vmem:[%s8227_s6 + $0x2a4] ss:$8 sps:$4 sm:$0xff]   ;;  %vm3380_vm1 = vcmask 1045504  }
  0x4c   : > { %1308 = vmatpush1.bf16.msra.mxu0 %v7013_v15  ;;  %1211 = vmatprep.subr.bf16.mxu1 %v7014_v16  ;;  %v7054_v42 = vld [vmem:[%s8227_s6 + $0xa0] ss:$8 sps:$4 sm:$0xff]   ;;  %s8287_s30 = scalar_lea.vmem %s9119_s0, %s6786_s17  ;;  %v7056_v44 = vld [vmem:[%s8227_s6 + $0xb4] ss:$8 sps:$4 sm:$0xff]   ;;  %v7060_v46 = vld [vmem:[%s8227_s6 + $0xb0] ss:$8 sps:$4 sm:$0xff]  }
  0x4d   : > { %1309 = vmatprep.subr.bf16.mxu0 %v7016_v17  ;;  %v7055_v43 = vld [vmem:[%s8227_s6 + $0x2a0] ss:$8 sps:$4 sm:$0xff]   ;;  %v7058_v45 = vld [vmem:[%s8227_s6 + $0x2b4] ss:$8 sps:$4 sm:$0xff]   ;;  %v7061_v47 = vld [vmem:[%s8227_s6 + $0x2b0] ss:$8 sps:$4 sm:$0xff]  }
  0x4e   : > { %v339_v48 = vld [vmem:[%s8287_s30] sm:$0xff]  ;;  %v341_v53 = vld [vmem:[%s8287_s30 + $0x10] sm:$0xff]  ;;  %s6788_s14 = sadd.s32 64, %s6786_s17  ;;  %p333_p12 = scmp.lt.s32.totalorder %s8046_s20, 3  ;;  %vm4378_vm2 = vcmask 1044480   ;;  %vm5376_vm3 = vcmask 1043456  }
  0x4f   : > { %1212 = vmatpush1.bf16.msra.mxu1 %v7018_v18  ;;  %v343_v49 = vld [vmem:[%s8287_s30 + $0x20] sm:$0xff]  ;;  %v345_v54 = vld [vmem:[%s8287_s30 + $0x30] sm:$0xff]  ;;  %s8348_s28 = scalar_lea.vmem %s9120_s1, %s6788_s14  ;;  %s306_s17 = sand.u32 1, %s8026_s15  }
  0x50   : > { %1310 = vmatpush1.bf16.msra.mxu0 %v7019_v19  ;;  %1213 = vmatprep.subr.bf16.mxu1 %v7020_v20  ;;  %v7062_v50 = vld [vmem:[%s8227_s6 + $0xc4] ss:$8 sps:$4 sm:$0xff]   ;;  %v8297_v52 = vcombine.high %v339_v48, %v343_v49  ;;  %v8302_v55 = vcombine.high %v341_v53, %v345_v54  ;;  %v7066_v56 = vld [vmem:[%s8227_s6 + $0xc0] ss:$8 sps:$4 sm:$0xff]   ;;  %v7068_v58 = vld [vmem:[%s8227_s6 + $0xd4] ss:$8 sps:$4 sm:$0xff]   ;;  %v8323_v10 = vcombine.low %v339_v48, %v343_v49 }
  0x51   : > { %1311 = vmatprep.subr.bf16.mxu0 %v7022_v21  ;;  %v7064_v51 = vld [vmem:[%s8227_s6 + $0x2c4] ss:$8 sps:$4 sm:$0xff]   ;;  %v7067_v57 = vld [vmem:[%s8227_s6 + $0x2c0] ss:$8 sps:$4 sm:$0xff]   ;;  %v7070_v59 = vld [vmem:[%s8227_s6 + $0x2d4] ss:$8 sps:$4 sm:$0xff]   ;;  %v8325_v11 = vcombine.low %v341_v53, %v345_v54 }
  0x52   : > { %1235 = vmatprep.mubr.bf16.mxu1 %v8297_v52  ;;  %1333 = vmatprep.mubr.bf16.mxu0 %v8302_v55  ;;  %v7072_v60 = vld [vmem:[%s8227_s6 + $0xd0] ss:$8 sps:$4 sm:$0xff]   ;;  %v7074_v62 = vld [vmem:[%s8227_s6 + $0xe4] ss:$8 sps:$4 sm:$0xff]   ;;  %v7078_v0 = vld [vmem:[%s8227_s6 + $0xe0] ss:$8 sps:$4 sm:$0xff]  }
  0x53   : > { %1214 = vmatpush1.bf16.msra.mxu1 %v7024_v22  ;;  %v7073_v61 = vld [vmem:[%s8227_s6 + $0x2d0] ss:$8 sps:$4 sm:$0xff]   ;;  %v7076_v63 = vld [vmem:[%s8227_s6 + $0x2e4] ss:$8 sps:$4 sm:$0xff]   ;;  %v7079_v1 = vld [vmem:[%s8227_s6 + $0x2e0] ss:$8 sps:$4 sm:$0xff]  }
  0x54   : > { %1312 = vmatpush1.bf16.msra.mxu0 %v7025_v23  ;;  %1215 = vmatprep.subr.bf16.mxu1 %v7026_v24  ;;  %v7080_v2 = vld [vmem:[%s8227_s6 + $0xf4] ss:$8 sps:$4 sm:$0xff]   ;;  %v7084_v4 = vld [vmem:[%s8227_s6 + $0xf0] ss:$8 sps:$4 sm:$0xff]   ;;  %v7088_v6 = vld [vmem:[%s8227_s6 + $0x104] ss:$8 sps:$4 sm:$0xff]  }
  0x55   : > { %1313 = vmatprep.subr.bf16.mxu0 %v7028_v25  ;;  %v7082_v3 = vld [vmem:[%s8227_s6 + $0x2f4] ss:$8 sps:$4 sm:$0xff]   ;;  %v7085_v5 = vld [vmem:[%s8227_s6 + $0x2f0] ss:$8 sps:$4 sm:$0xff]   ;;  %v7091_v7 = vld [vmem:[%s8227_s6 + $0x304] ss:$8 sps:$4 sm:$0xff]  }
  0x56   : > { %v7086_v8 = vld [vmem:[%s8227_s6 + $0x100] ss:$8 sps:$4 sm:$0xff]   ;;  %v7094_v12 = vld [vmem:[%s8227_s6 + $0x114] ss:$8 sps:$4 sm:$0xff]   ;;  %v7092_v14 = vld [vmem:[%s8227_s6 + $0x110] ss:$8 sps:$4 sm:$0xff]  }
  0x57   : > { %1216 = vmatpush1.bf16.msra.mxu1 %v7030_v26  ;;  %v7089_v9 = vld [vmem:[%s8227_s6 + $0x300] ss:$8 sps:$4 sm:$0xff]   ;;  %v7097_v13 = vld [vmem:[%s8227_s6 + $0x314] ss:$8 sps:$4 sm:$0xff]   ;;  %v7095_v15 = vld [vmem:[%s8227_s6 + $0x310] ss:$8 sps:$4 sm:$0xff]  }
  0x58   : > { %1314 = vmatpush1.bf16.msra.mxu0 %v7031_v27  ;;  %1217 = vmatprep.subr.bf16.mxu1 %v7032_v28  ;;  %v7100_v16 = vld [vmem:[%s8227_s6 + $0x124] ss:$8 sps:$4 sm:$0xff]   ;;  %v7098_v18 = vld [vmem:[%s8227_s6 + $0x120] ss:$8 sps:$4 sm:$0xff]   ;;  %v7106_v20 = vld [vmem:[%s8227_s6 + $0x134] ss:$8 sps:$4 sm:$0xff]  }
  0x59   : > { %1315 = vmatprep.subr.bf16.mxu0 %v7034_v29  ;;  %v7103_v17 = vld [vmem:[%s8227_s6 + $0x324] ss:$8 sps:$4 sm:$0xff]   ;;  %v7101_v19 = vld [vmem:[%s8227_s6 + $0x320] ss:$8 sps:$4 sm:$0xff]   ;;  %v7109_v21 = vld [vmem:[%s8227_s6 + $0x334] ss:$8 sps:$4 sm:$0xff]  }
  0x5a   : > { %v7104_v22 = vld [vmem:[%s8227_s6 + $0x130] ss:$8 sps:$4 sm:$0xff]   ;;  %v7112_v24 = vld [vmem:[%s8227_s6 + $0x144] ss:$8 sps:$4 sm:$0xff]   ;;  %v7110_v26 = vld [vmem:[%s8227_s6 + $0x140] ss:$8 sps:$4 sm:$0xff]  }
  0x5b   : > { %1218 = vmatpush1.bf16.msra.mxu1 %v7036_v30  ;;  %v7107_v23 = vld [vmem:[%s8227_s6 + $0x330] ss:$8 sps:$4 sm:$0xff]   ;;  %v7115_v25 = vld [vmem:[%s8227_s6 + $0x344] ss:$8 sps:$4 sm:$0xff]   ;;  %v7113_v27 = vld [vmem:[%s8227_s6 + $0x340] ss:$8 sps:$4 sm:$0xff]  }
  0x5c   : > { %1316 = vmatpush1.bf16.msra.mxu0 %v7037_v31  ;;  %1219 = vmatprep.subr.bf16.mxu1 %v7038_v32  ;;  %v7118_v28 = vld [vmem:[%s8227_s6 + $0x154] ss:$8 sps:$4 sm:$0xff]   ;;  %v347_v30 = vld [vmem:[%s8348_s28] sm:$0xff]  ;;  %v7128_v53 = vld [vmem:[%s8227_s6 + $0x170] ss:$8 sps:$4 sm:$0xff]   ;;  %s334_s29 = scalar_select %p333_p12, %s8046_s20, 3 }
  0x5d   : > { %1317 = vmatprep.subr.bf16.mxu0 %v7040_v33  ;;  %v7121_v29 = vld [vmem:[%s8227_s6 + $0x354] ss:$8 sps:$4 sm:$0xff]   ;;  %v351_v31 = vld [vmem:[%s8348_s28 + $0x20] sm:$0xff]  ;;  %v7131_v54 = vld [vmem:[%s8227_s6 + $0x370] ss:$8 sps:$4 sm:$0xff]   ;;  %s5606_s25 = sshll.u32 %s306_s17, 5 }
  0x5e   : > { %v8356_v32 = vcombine.high %v347_v30, %v351_v31  ;;  %v349_v33 = vld [vmem:[%s8348_s28 + $0x10] sm:$0xff]  ;;  %v8385_v48 = vld [vmem:[%s8287_s30 + $0x18] sm:$0xff]  ;;  %s5611_s13 = sshll.u32 %s334_s29, 1  ;;  %s308_s15 = scalar_lea.vmem [#allocation4], %s5606_s25 }
  0x5f   : > { %1220 = vmatpush1.bf16.msra.mxu1 %v7042_v34  ;;  %v353_v34 = vld [vmem:[%s8348_s28 + $0x30] sm:$0xff]  ;;  %s336_s9 = scalar_lea.vmem %s9122_s3, %s5611_s13  ;;  %p9131_p0 = scmp.ne.s32.totalorder %s9128_s11, 0 }
  0x60   : > { %1318 = vmatpush1.bf16.msra.mxu0 %v7043_v35  ;;  %1221 = vmatprep.subr.bf16.mxu1 %v7044_v36  ;;  %v7116_v35 = vld [vmem:[%s8227_s6 + $0x150] ss:$8 sps:$4 sm:$0xff]   ;;  %s6781_s7 = sshll.u32 (%p9131_p0), %s8046_s20, 1 }
  0x61   : > { %1319 = vmatprep.subr.bf16.mxu0 %v7046_v37  ;;  %v7119_v36 = vld [vmem:[%s8227_s6 + $0x350] ss:$8 sps:$4 sm:$0xff]   ;;  %v8362_v37 = vcombine.low %v347_v30, %v351_v31  ;;  %v348_v30 = vld [vmem:[%s8348_s28 + $0x8] sm:$0xff] }
  0x63   : > { %1222 = vmatpush1.bf16.msra.mxu1 %v7048_v38  ;;  %v8364_v38 = vcombine.high %v349_v33, %v353_v34 }
  0x64   : > { %1320 = vmatpush1.bf16.msra.mxu0 %v7049_v39  ;;  %1223 = vmatprep.subr.bf16.mxu1 %v7050_v40  ;;  %v8366_v39 = vcombine.low %v349_v33, %v353_v34  ;;  %v7124_v40 = vld [vmem:[%s8227_s6 + $0x164] ss:$8 sps:$4 sm:$0xff]  }
  0x65   : > { %1321 = vmatprep.subr.bf16.mxu0 %v7052_v41  ;;  %v7127_v41 = vld [vmem:[%s8227_s6 + $0x364] ss:$8 sps:$4 sm:$0xff]  }
  0x66   : > { %v352_v34 = vld [vmem:[%s8348_s28 + $0x28] sm:$0xff] }
  0x67   : > { %1224 = vmatpush1.bf16.msra.mxu1 %v7054_v42  ;;  %v7122_v42 = vld [vmem:[%s8227_s6 + $0x160] ss:$8 sps:$4 sm:$0xff]  }
  0x68   : > { %1322 = vmatpush1.bf16.msra.mxu0 %v7055_v43  ;;  %1225 = vmatprep.subr.bf16.mxu1 %v7056_v44  ;;  %v7125_v43 = vld [vmem:[%s8227_s6 + $0x360] ss:$8 sps:$4 sm:$0xff]   ;;  %v7130_v44 = vld [vmem:[%s8227_s6 + $0x174] ss:$8 sps:$4 sm:$0xff]  }
  0x69   : > { %1323 = vmatprep.subr.bf16.mxu0 %v7058_v45  ;;  %v7133_v45 = vld [vmem:[%s8227_s6 + $0x374] ss:$8 sps:$4 sm:$0xff]  }
  0x6b   : > { %1226 = vmatpush1.bf16.msra.mxu1 %v7060_v46  ;;  %v8379_v46 = vld [vmem:[%s8287_s30 + $0x8] sm:$0xff] }
  0x6c   : > { %1324 = vmatpush1.bf16.msra.mxu0 %v7061_v47  ;;  %1227 = vmatprep.subr.bf16.mxu1 %v7062_v50  ;;  %v8382_v47 = vld [vmem:[%s8287_s30 + $0x28] sm:$0xff]  ;;  %v8392_v50 = vld [vmem:[%s8287_s30 + $0x38] sm:$0xff]  ;;  %s6782_s30 = sshll.u32 (%p9131_p0), %s8050_s21, 4 }
  0x6d   : > { %1325 = vmatprep.subr.bf16.mxu0 %v7064_v51  ;;  %v8389_v49 = vcombine.high %v8379_v46, %v8382_v47  ;;  %v8396_v51 = vcombine.high %v8385_v48, %v8392_v50  ;;  %v8441_v31 = vcombine.low %v8379_v46, %v8382_v47  ;;  %v8445_v33 = vcombine.low %v8385_v48, %v8392_v50  ;;  %v7196_v46 = vld [vmem:[%s8227_s6 + $0x424] ss:$8 sps:$4 sm:$0xff]   ;;  %v7194_v48 = vld [vmem:[%s8227_s6 + $0x420] ss:$8 sps:$4 sm:$0xff]   ;;  %s5439_s14 = sadd.s32 (%p9131_p0), %s6782_s30, %s6781_s7 }
  0x6e   : > { %v7199_v47 = vld [vmem:[%s8227_s6 + $0x824] ss:$8 sps:$4 sm:$0xff]   ;;  %v7197_v50 = vld [vmem:[%s8227_s6 + $0x820] ss:$8 sps:$4 sm:$0xff]   ;;  %s6783_s27 = sshll.u32 (%p9131_p0), %s5439_s14, 3 }
  0x6f   : > { %1228 = vmatpush1.bf16.msra.mxu1 %v7066_v56  ;;  %v7136_v56 = vld [vmem:[%s8227_s6 + $0x184] ss:$8 sps:$4 sm:$0xff]   ;;  %s5441_s29 = scalar_lea.vmem (%p9131_p0), %s9123_s4, %s6783_s27 }
  0x70   : > { %1326 = vmatpush1.bf16.msra.mxu0 %v7067_v57  ;;  %1229 = vmatprep.subr.bf16.mxu1 %v7068_v58  ;;  %v7139_v57 = vld [vmem:[%s8227_s6 + $0x384] ss:$8 sps:$4 sm:$0xff]   ;;  %v7134_v58 = vld [vmem:[%s8227_s6 + $0x180] ss:$8 sps:$4 sm:$0xff]  }
  0x71   : > { %1327 = vmatprep.subr.bf16.mxu0 %v7070_v59  ;;  %v7137_v59 = vld [vmem:[%s8227_s6 + $0x380] ss:$8 sps:$4 sm:$0xff]  }
  0x73   : > { %1230 = vmatpush1.bf16.msra.mxu1 %v7072_v60  ;;  %v7142_v60 = vld [vmem:[%s8227_s6 + $0x194] ss:$8 sps:$4 sm:$0xff]  }
  0x74   : > { %1328 = vmatpush1.bf16.msra.mxu0 %v7073_v61  ;;  %1231 = vmatprep.subr.bf16.mxu1 %v7074_v62  ;;  %v7145_v61 = vld [vmem:[%s8227_s6 + $0x394] ss:$8 sps:$4 sm:$0xff]   ;;  %v7140_v62 = vld [vmem:[%s8227_s6 + $0x190] ss:$8 sps:$4 sm:$0xff]  }
  0x75   : > { %1329 = vmatprep.subr.bf16.mxu0 %v7076_v63  ;;  %v7143_v63 = vld [vmem:[%s8227_s6 + $0x390] ss:$8 sps:$4 sm:$0xff]  }
  0x77   : > { %1232 = vmatpush1.bf16.msra.mxu1 %v7078_v0  ;;  %v7148_v0 = vld [vmem:[%s8227_s6 + $0x1a4] ss:$8 sps:$4 sm:$0xff]  }
  0x78   : > { %1330 = vmatpush1.bf16.msra.mxu0 %v7079_v1  ;;  %1233 = vmatprep.subr.bf16.mxu1 %v7080_v2  ;;  %v7151_v1 = vld [vmem:[%s8227_s6 + $0x3a4] ss:$8 sps:$4 sm:$0xff]   ;;  %v7146_v2 = vld [vmem:[%s8227_s6 + $0x1a0] ss:$8 sps:$4 sm:$0xff]  }
  0x79   : > { %1331 = vmatprep.subr.bf16.mxu0 %v7082_v3  ;;  %v7149_v3 = vld [vmem:[%s8227_s6 + $0x3a0] ss:$8 sps:$4 sm:$0xff]  }
  0x7b   : > { %1234 = vmatpush1.bf16.msra.mxu1 %v7084_v4  ;;  %v7154_v4 = vld [vmem:[%s8227_s6 + $0x1b4] ss:$8 sps:$4 sm:$0xff]  }
  0x7c   : > { %1332 = vmatpush1.bf16.msra.mxu0 %v7085_v5  ;;  %1252 = vmatprep.subr.bf16.mxu1 %v7088_v6  ;;  %v7157_v5 = vld [vmem:[%s8227_s6 + $0x3b4] ss:$8 sps:$4 sm:$0xff]   ;;  %v7152_v6 = vld [vmem:[%s8227_s6 + $0x1b0] ss:$8 sps:$4 sm:$0xff]  }
  0x7d   : > { %1350 = vmatprep.subr.bf16.mxu0 %v7091_v7  ;;  %v7155_v7 = vld [vmem:[%s8227_s6 + $0x3b0] ss:$8 sps:$4 sm:$0xff]  }
  0x7e   : > { %1236 = vmatmul.mubr.bf16.vlgmr.msra.gmra.mrb[0].mxu1 %v8323_v10 }
  0x7f   : > { %1334 = vmatmul.mubr.bf16.vlgmr.msra.gmra.mrb[0].mxu0 %v8325_v11  ;;  %1253 = vmatpush1.bf16.msra.mxu1 %v7086_v8  ;;  %v7160_v8 = vld [vmem:[%s8227_s6 + $0x1c4] ss:$8 sps:$4 sm:$0xff]  }
  0x80   : > { %1351 = vmatpush1.bf16.msra.mxu0 %v7089_v9  ;;  %1254 = vmatprep.subr.bf16.mxu1 %v7094_v12  ;;  %v7163_v9 = vld [vmem:[%s8227_s6 + $0x3c4] ss:$8 sps:$4 sm:$0xff]   ;;  %v7158_v12 = vld [vmem:[%s8227_s6 + $0x1c0] ss:$8 sps:$4 sm:$0xff]  }
  0x81   : > { %1352 = vmatprep.subr.bf16.mxu0 %v7097_v13  ;;  %1245 = vmatprep.mubr.bf16.mxu1 %v8356_v32  ;;  %v7161_v13 = vld [vmem:[%s8227_s6 + $0x3c0] ss:$8 sps:$4 sm:$0xff]  }
  0x82   : > { %1343 = vmatprep.mubr.bf16.mxu0 %v8364_v38 }
  0x83   : > { %1255 = vmatpush1.bf16.msra.mxu1 %v7092_v14  ;;  %v7166_v14 = vld [vmem:[%s8227_s6 + $0x1d4] ss:$8 sps:$4 sm:$0xff]  }
  0x84   : > { %1353 = vmatpush1.bf16.msra.mxu0 %v7095_v15  ;;  %1256 = vmatprep.subr.bf16.mxu1 %v7100_v16  ;;  %v7169_v15 = vld [vmem:[%s8227_s6 + $0x3d4] ss:$8 sps:$4 sm:$0xff]   ;;  %v7164_v16 = vld [vmem:[%s8227_s6 + $0x1d0] ss:$8 sps:$4 sm:$0xff]  }
  0x85   : > { %1354 = vmatprep.subr.bf16.mxu0 %v7103_v17  ;;  %v7167_v17 = vld [vmem:[%s8227_s6 + $0x3d0] ss:$8 sps:$4 sm:$0xff]  }
  0x86   : > { %1246 = vmatmul.mubr.bf16.gmra.mrb[4].mxu1 %v8362_v37 }
  0x87   : > { %1257 = vmatpush1.bf16.msra.mxu1 %v7098_v18  ;;  %1344 = vmatmul.mubr.bf16.gmra.mrb[4].mxu0 %v8366_v39  ;;  %v7172_v18 = vld [vmem:[%s8227_s6 + $0x1e4] ss:$8 sps:$4 sm:$0xff]  }
  0x88   : > { %1355 = vmatpush1.bf16.msra.mxu0 %v7101_v19  ;;  %1258 = vmatprep.subr.bf16.mxu1 %v7106_v20  ;;  %v7175_v19 = vld [vmem:[%s8227_s6 + $0x3e4] ss:$8 sps:$4 sm:$0xff]   ;;  %v7170_v20 = vld [vmem:[%s8227_s6 + $0x1e0] ss:$8 sps:$4 sm:$0xff]  }
  0x89   : > { %1356 = vmatprep.subr.bf16.mxu0 %v7109_v21  ;;  %1284 = vmatprep.mubr.bf16.mxu1 %v8389_v49  ;;  %v7173_v21 = vld [vmem:[%s8227_s6 + $0x3e0] ss:$8 sps:$4 sm:$0xff]  }
  0x8a   : > { %1382 = vmatprep.mubr.bf16.mxu0 %v8396_v51 }
  0x8b   : > { %1259 = vmatpush1.bf16.msra.mxu1 %v7104_v22  ;;  %v7178_v22 = vld [vmem:[%s8227_s6 + $0x1f4] ss:$8 sps:$4 sm:$0xff]  }
  0x8c   : > { %1357 = vmatpush1.bf16.msra.mxu0 %v7107_v23  ;;  %1260 = vmatprep.subr.bf16.mxu1 %v7112_v24  ;;  %v7181_v23 = vld [vmem:[%s8227_s6 + $0x3f4] ss:$8 sps:$4 sm:$0xff]   ;;  %v7176_v24 = vld [vmem:[%s8227_s6 + $0x1f0] ss:$8 sps:$4 sm:$0xff]  }
  0x8d   : > { %1358 = vmatprep.subr.bf16.mxu0 %v7115_v25  ;;  %v7179_v25 = vld [vmem:[%s8227_s6 + $0x3f0] ss:$8 sps:$4 sm:$0xff]  }
  0x8f   : > { %1261 = vmatpush1.bf16.msra.mxu1 %v7110_v26  ;;  %v7184_v26 = vld [vmem:[%s8227_s6 + $0x404] ss:$8 sps:$4 sm:$0xff]  }
  0x90   : > { %1359 = vmatpush1.bf16.msra.mxu0 %v7113_v27  ;;  %1262 = vmatprep.subr.bf16.mxu1 %v7118_v28  ;;  %v7187_v27 = vld [vmem:[%s8227_s6 + $0x804] ss:$8 sps:$4 sm:$0xff]   ;;  %v7182_v28 = vld [vmem:[%s8227_s6 + $0x400] ss:$8 sps:$4 sm:$0xff]  }
  0x91   : > { %1360 = vmatprep.subr.bf16.mxu0 %v7121_v29  ;;  %v7185_v29 = vld [vmem:[%s8227_s6 + $0x800] ss:$8 sps:$4 sm:$0xff]  }
  0x93   : > { %1263 = vmatpush1.bf16.msra.mxu1 %v7116_v35  ;;  %v350_v35 = vld [vmem:[%s8348_s28 + $0x18] sm:$0xff] }
  0x94   : > { %1361 = vmatpush1.bf16.msra.mxu0 %v7119_v36  ;;  %1264 = vmatprep.subr.bf16.mxu1 %v7124_v40  ;;  %v354_v36 = vld [vmem:[%s8348_s28 + $0x38] sm:$0xff] }
  0x95   : > { %1362 = vmatprep.subr.bf16.mxu0 %v7127_v41  ;;  %v7190_v40 = vld [vmem:[%s8227_s6 + $0x414] ss:$8 sps:$4 sm:$0xff]  }
  0x96   : > { %v7193_v41 = vld [vmem:[%s8227_s6 + $0x814] ss:$8 sps:$4 sm:$0xff]  }
  0x97   : > { %1265 = vmatpush1.bf16.msra.mxu1 %v7122_v42  ;;  %v8452_v42 = vcombine.high %v348_v30, %v352_v34 }
  0x98   : > { %1363 = vmatpush1.bf16.msra.mxu0 %v7125_v43  ;;  %1266 = vmatprep.subr.bf16.mxu1 %v7130_v44  ;;  %v8454_v43 = vcombine.high %v350_v35, %v354_v36  ;;  %v7188_v44 = vld [vmem:[%s8227_s6 + $0x410] ss:$8 sps:$4 sm:$0xff]  }
  0x99   : > { %1364 = vmatprep.subr.bf16.mxu0 %v7133_v45  ;;  %v7191_v45 = vld [vmem:[%s8227_s6 + $0x810] ss:$8 sps:$4 sm:$0xff]  }
  0x9b   : > { %1267 = vmatpush1.bf16.msra.mxu1 %v7128_v53  ;;  %v8466_v53 = vcombine.low %v348_v30, %v352_v34  ;;  %v7256_v30 = vld [vmem:[%s8227_s6 + $0x4c4] ss:$8 sps:$4 sm:$0xff]  }
  0x9c   : > { %1365 = vmatpush1.bf16.msra.mxu0 %v7131_v54  ;;  %1268 = vmatprep.subr.bf16.mxu1 %v7136_v56  ;;  %v8468_v54 = vcombine.low %v350_v35, %v354_v36  ;;  %v7202_v56 = vld [vmem:[%s8227_s6 + $0x434] ss:$8 sps:$4 sm:$0xff]   ;;  %v7259_v34 = vld [vmem:[%s8227_s6 + $0x8c4] ss:$8 sps:$4 sm:$0xff]   ;;  %v7254_v35 = vld [vmem:[%s8227_s6 + $0x4c0] ss:$8 sps:$4 sm:$0xff]  }
  0x9d   : > { %1366 = vmatprep.subr.bf16.mxu0 %v7139_v57  ;;  %v7205_v57 = vld [vmem:[%s8227_s6 + $0x834] ss:$8 sps:$4 sm:$0xff]   ;;  %v7257_v36 = vld [vmem:[%s8227_s6 + $0x8c0] ss:$8 sps:$4 sm:$0xff]  }
  0x9f   : > { %1269 = vmatpush1.bf16.msra.mxu1 %v7134_v58  ;;  %v7200_v58 = vld [vmem:[%s8227_s6 + $0x430] ss:$8 sps:$4 sm:$0xff]  }
  0xa0   : > { %1367 = vmatpush1.bf16.msra.mxu0 %v7137_v59  ;;  %1270 = vmatprep.subr.bf16.mxu1 %v7142_v60  ;;  %v7203_v59 = vld [vmem:[%s8227_s6 + $0x830] ss:$8 sps:$4 sm:$0xff]   ;;  %v7208_v60 = vld [vmem:[%s8227_s6 + $0x444] ss:$8 sps:$4 sm:$0xff]  }
  0xa1   : > { %1368 = vmatprep.subr.bf16.mxu0 %v7145_v61  ;;  %v7211_v61 = vld [vmem:[%s8227_s6 + $0x844] ss:$8 sps:$4 sm:$0xff]  }
  0xa3   : > { %1271 = vmatpush1.bf16.msra.mxu1 %v7140_v62  ;;  %v7206_v62 = vld [vmem:[%s8227_s6 + $0x440] ss:$8 sps:$4 sm:$0xff]  }
  0xa4   : > { %1369 = vmatpush1.bf16.msra.mxu0 %v7143_v63  ;;  %1272 = vmatprep.subr.bf16.mxu1 %v7148_v0  ;;  %v7209_v63 = vld [vmem:[%s8227_s6 + $0x840] ss:$8 sps:$4 sm:$0xff]   ;;  %v7214_v0 = vld [vmem:[%s8227_s6 + $0x454] ss:$8 sps:$4 sm:$0xff]  }
  0xa5   : > { %1370 = vmatprep.subr.bf16.mxu0 %v7151_v1  ;;  %v7217_v1 = vld [vmem:[%s8227_s6 + $0x854] ss:$8 sps:$4 sm:$0xff]  }
  0xa7   : > { %1273 = vmatpush1.bf16.msra.mxu1 %v7146_v2  ;;  %v7212_v2 = vld [vmem:[%s8227_s6 + $0x450] ss:$8 sps:$4 sm:$0xff]  }
  0xa8   : > { %1371 = vmatpush1.bf16.msra.mxu0 %v7149_v3  ;;  %1274 = vmatprep.subr.bf16.mxu1 %v7154_v4  ;;  %v7215_v3 = vld [vmem:[%s8227_s6 + $0x850] ss:$8 sps:$4 sm:$0xff]   ;;  %v7220_v4 = vld [vmem:[%s8227_s6 + $0x464] ss:$8 sps:$4 sm:$0xff]  }
  0xa9   : > { %1372 = vmatprep.subr.bf16.mxu0 %v7157_v5  ;;  %v7223_v5 = vld [vmem:[%s8227_s6 + $0x864] ss:$8 sps:$4 sm:$0xff]  }
  0xab   : > { %1275 = vmatpush1.bf16.msra.mxu1 %v7152_v6  ;;  %v7218_v6 = vld [vmem:[%s8227_s6 + $0x460] ss:$8 sps:$4 sm:$0xff]  }
  0xac   : > { %1373 = vmatpush1.bf16.msra.mxu0 %v7155_v7  ;;  %1276 = vmatprep.subr.bf16.mxu1 %v7160_v8  ;;  %v7221_v7 = vld [vmem:[%s8227_s6 + $0x860] ss:$8 sps:$4 sm:$0xff]   ;;  %v7226_v8 = vld [vmem:[%s8227_s6 + $0x474] ss:$8 sps:$4 sm:$0xff]  }
  0xad   : > { %1374 = vmatprep.subr.bf16.mxu0 %v7163_v9  ;;  %v7229_v9 = vld [vmem:[%s8227_s6 + $0x874] ss:$8 sps:$4 sm:$0xff]  }
  0xaf   : > { %1277 = vmatpush1.bf16.msra.mxu1 %v7158_v12  ;;  %v7224_v12 = vld [vmem:[%s8227_s6 + $0x470] ss:$8 sps:$4 sm:$0xff]  }
  0xb0   : > { %1375 = vmatpush1.bf16.msra.mxu0 %v7161_v13  ;;  %1278 = vmatprep.subr.bf16.mxu1 %v7166_v14  ;;  %v7227_v13 = vld [vmem:[%s8227_s6 + $0x870] ss:$8 sps:$4 sm:$0xff]   ;;  %v7232_v14 = vld [vmem:[%s8227_s6 + $0x484] ss:$8 sps:$4 sm:$0xff]  }
  0xb1   : > { %1376 = vmatprep.subr.bf16.mxu0 %v7169_v15  ;;  %v7235_v15 = vld [vmem:[%s8227_s6 + $0x884] ss:$8 sps:$4 sm:$0xff]  }
  0xb3   : > { %1279 = vmatpush1.bf16.msra.mxu1 %v7164_v16  ;;  %v7230_v16 = vld [vmem:[%s8227_s6 + $0x480] ss:$8 sps:$4 sm:$0xff]  }
  0xb4   : > { %1377 = vmatpush1.bf16.msra.mxu0 %v7167_v17  ;;  %1280 = vmatprep.subr.bf16.mxu1 %v7172_v18  ;;  %v7233_v17 = vld [vmem:[%s8227_s6 + $0x880] ss:$8 sps:$4 sm:$0xff]   ;;  %v7238_v18 = vld [vmem:[%s8227_s6 + $0x494] ss:$8 sps:$4 sm:$0xff]  }
  0xb5   : > { %1378 = vmatprep.subr.bf16.mxu0 %v7175_v19  ;;  %v7241_v19 = vld [vmem:[%s8227_s6 + $0x894] ss:$8 sps:$4 sm:$0xff]  }
  0xb7   : > { %1281 = vmatpush1.bf16.msra.mxu1 %v7170_v20  ;;  %v7236_v20 = vld [vmem:[%s8227_s6 + $0x490] ss:$8 sps:$4 sm:$0xff]  }
  0xb8   : > { %1379 = vmatpush1.bf16.msra.mxu0 %v7173_v21  ;;  %1282 = vmatprep.subr.bf16.mxu1 %v7178_v22  ;;  %v7239_v21 = vld [vmem:[%s8227_s6 + $0x890] ss:$8 sps:$4 sm:$0xff]   ;;  %v7244_v22 = vld [vmem:[%s8227_s6 + $0x4a4] ss:$8 sps:$4 sm:$0xff]  }
  0xb9   : > { %1380 = vmatprep.subr.bf16.mxu0 %v7181_v23  ;;  %v7247_v23 = vld [vmem:[%s8227_s6 + $0x8a4] ss:$8 sps:$4 sm:$0xff]  }
  0xbb   : > { %1283 = vmatpush1.bf16.msra.mxu1 %v7176_v24  ;;  %v7242_v24 = vld [vmem:[%s8227_s6 + $0x4a0] ss:$8 sps:$4 sm:$0xff]  }
  0xbc   : > { %1381 = vmatpush1.bf16.msra.mxu0 %v7179_v25  ;;  %2172 = vmatprep.subr.bf16.mxu1 %v7184_v26  ;;  %v7245_v25 = vld [vmem:[%s8227_s6 + $0x8a0] ss:$8 sps:$4 sm:$0xff]   ;;  %v7250_v26 = vld [vmem:[%s8227_s6 + $0x4b4] ss:$8 sps:$4 sm:$0xff]  }
  0xbd   : > { %3170 = vmatprep.subr.bf16.mxu0 %v7187_v27  ;;  %v7253_v27 = vld [vmem:[%s8227_s6 + $0x8b4] ss:$8 sps:$4 sm:$0xff]  }
  0xbe   : > { %1285 = vmatmul.mubr.bf16.vlgmr.msra.gmra.mrb[0].mxu1 %v8441_v31 }
  0xbf   : > { %1383 = vmatmul.mubr.bf16.vlgmr.msra.gmra.mrb[0].mxu0 %v8445_v33  ;;  %2173 = vmatpush1.bf16.msra.mxu1 %v7182_v28  ;;  %v7248_v28 = vld [vmem:[%s8227_s6 + $0x4b0] ss:$8 sps:$4 sm:$0xff]  }
  0xc0   : > { %3171 = vmatpush1.bf16.msra.mxu0 %v7185_v29  ;;  %2174 = vmatprep.subr.bf16.mxu1 %v7190_v40  ;;  %v7251_v29 = vld [vmem:[%s8227_s6 + $0x8b0] ss:$8 sps:$4 sm:$0xff]   ;;  %v7262_v40 = vld [vmem:[%s8227_s6 + $0x4d4] ss:$8 sps:$4 sm:$0xff]  }
  0xc1   : > { %3172 = vmatprep.subr.bf16.mxu0 %v7193_v41  ;;  %1294 = vmatprep.mubr.bf16.mxu1 %v8452_v42  ;;  %v7265_v41 = vld [vmem:[%s8227_s6 + $0x8d4] ss:$8 sps:$4 sm:$0xff]  }
  0xc2   : > { %1392 = vmatprep.mubr.bf16.mxu0 %v8454_v43 }
  0xc3   : > { %2175 = vmatpush1.bf16.msra.mxu1 %v7188_v44  ;;  %v7260_v44 = vld [vmem:[%s8227_s6 + $0x4d0] ss:$8 sps:$4 sm:$0xff]  }
  0xc4   : > { %3173 = vmatpush1.bf16.msra.mxu0 %v7191_v45  ;;  %2176 = vmatprep.subr.bf16.mxu1 %v7196_v46  ;;  %v7263_v45 = vld [vmem:[%s8227_s6 + $0x8d0] ss:$8 sps:$4 sm:$0xff]   ;;  %v7268_v46 = vld [vmem:[%s8227_s6 + $0x4e4] ss:$8 sps:$4 sm:$0xff]  }
  0xc5   : > { %3174 = vmatprep.subr.bf16.mxu0 %v7199_v47  ;;  %v7271_v47 = vld [vmem:[%s8227_s6 + $0x8e4] ss:$8 sps:$4 sm:$0xff]  }
  0xc6   : > { %1295 = vmatmul.mubr.bf16.gmra.mrb[8].mxu1 %v8466_v53 }
  0xc7   : > { %1393 = vmatmul.mubr.bf16.gmra.mrb[8].mxu0 %v8468_v54  ;;  %2177 = vmatpush1.bf16.msra.mxu1 %v7194_v48  ;;  %v7266_v48 = vld [vmem:[%s8227_s6 + $0x4e0] ss:$8 sps:$4 sm:$0xff]  }
  0xc8   : > { %3175 = vmatpush1.bf16.msra.mxu0 %v7197_v50  ;;  %2178 = vmatprep.subr.bf16.mxu1 %v7202_v56  ;;  %v7269_v50 = vld [vmem:[%s8227_s6 + $0x8e0] ss:$8 sps:$4 sm:$0xff]   ;;  %v7274_v56 = vld [vmem:[%s8227_s6 + $0x4f4] ss:$8 sps:$4 sm:$0xff]  }
  0xc9   : > { %3176 = vmatprep.subr.bf16.mxu0 %v7205_v57  ;;  %2204 = vmatprep.mubr.bf16.mxu1 %v8297_v52  ;;  %v7277_v57 = vld [vmem:[%s8227_s6 + $0x8f4] ss:$8 sps:$4 sm:$0xff]  }
  0xca   : > { %3202 = vmatprep.mubr.bf16.mxu0 %v8297_v52 }
  0xcb   : > { %2179 = vmatpush1.bf16.msra.mxu1 %v7200_v58  ;;  %v7272_v58 = vld [vmem:[%s8227_s6 + $0x4f0] ss:$8 sps:$4 sm:$0xff]  }
  0xcc   : > { %3177 = vmatpush1.bf16.msra.mxu0 %v7203_v59  ;;  %2180 = vmatprep.subr.bf16.mxu1 %v7208_v60  ;;  %v7275_v59 = vld [vmem:[%s8227_s6 + $0x8f0] ss:$8 sps:$4 sm:$0xff]   ;;  %v7280_v60 = vld [vmem:[%s8227_s6 + $0x504] ss:$8 sps:$4 sm:$0xff]  }
  0xcd   : > { %3178 = vmatprep.subr.bf16.mxu0 %v7211_v61  ;;  %v7283_v61 = vld [vmem:[%s8227_s6 + $0x904] ss:$8 sps:$4 sm:$0xff]  }
  0xcf   : > { %2181 = vmatpush1.bf16.msra.mxu1 %v7206_v62  ;;  %v7278_v62 = vld [vmem:[%s8227_s6 + $0x500] ss:$8 sps:$4 sm:$0xff]  }
  0xd0   : > { %3179 = vmatpush1.bf16.msra.mxu0 %v7209_v63  ;;  %2182 = vmatprep.subr.bf16.mxu1 %v7214_v0  ;;  %v7281_v63 = vld [vmem:[%s8227_s6 + $0x900] ss:$8 sps:$4 sm:$0xff]   ;;  %v7286_v0 = vld [vmem:[%s8227_s6 + $0x514] ss:$8 sps:$4 sm:$0xff]  }
  0xd1   : > { %3180 = vmatprep.subr.bf16.mxu0 %v7217_v1  ;;  %v7289_v1 = vld [vmem:[%s8227_s6 + $0x914] ss:$8 sps:$4 sm:$0xff]  }
  0xd3   : > { %2183 = vmatpush1.bf16.msra.mxu1 %v7212_v2  ;;  %v7284_v2 = vld [vmem:[%s8227_s6 + $0x510] ss:$8 sps:$4 sm:$0xff]  }
  0xd4   : > { %3181 = vmatpush1.bf16.msra.mxu0 %v7215_v3  ;;  %2184 = vmatprep.subr.bf16.mxu1 %v7220_v4  ;;  %v7287_v3 = vld [vmem:[%s8227_s6 + $0x910] ss:$8 sps:$4 sm:$0xff]   ;;  %v7292_v4 = vld [vmem:[%s8227_s6 + $0x524] ss:$8 sps:$4 sm:$0xff]  }
  0xd5   : > { %3182 = vmatprep.subr.bf16.mxu0 %v7223_v5  ;;  %v7295_v5 = vld [vmem:[%s8227_s6 + $0x924] ss:$8 sps:$4 sm:$0xff]  }
  0xd7   : > { %2185 = vmatpush1.bf16.msra.mxu1 %v7218_v6  ;;  %v7290_v6 = vld [vmem:[%s8227_s6 + $0x520] ss:$8 sps:$4 sm:$0xff]  }
  0xd8   : > { %3183 = vmatpush1.bf16.msra.mxu0 %v7221_v7  ;;  %2186 = vmatprep.subr.bf16.mxu1 %v7226_v8  ;;  %v7293_v7 = vld [vmem:[%s8227_s6 + $0x920] ss:$8 sps:$4 sm:$0xff]   ;;  %v7298_v8 = vld [vmem:[%s8227_s6 + $0x534] ss:$8 sps:$4 sm:$0xff]  }
  0xd9   : > { %3184 = vmatprep.subr.bf16.mxu0 %v7229_v9  ;;  %v7301_v9 = vld [vmem:[%s8227_s6 + $0x934] ss:$8 sps:$4 sm:$0xff]  }
  0xdb   : > { %2187 = vmatpush1.bf16.msra.mxu1 %v7224_v12  ;;  %v7296_v12 = vld [vmem:[%s8227_s6 + $0x530] ss:$8 sps:$4 sm:$0xff]  }
  0xdc   : > { %3185 = vmatpush1.bf16.msra.mxu0 %v7227_v13  ;;  %2188 = vmatprep.subr.bf16.mxu1 %v7232_v14  ;;  %v7299_v13 = vld [vmem:[%s8227_s6 + $0x930] ss:$8 sps:$4 sm:$0xff]   ;;  %v7304_v14 = vld [vmem:[%s8227_s6 + $0x544] ss:$8 sps:$4 sm:$0xff]  }
  0xdd   : > { %3186 = vmatprep.subr.bf16.mxu0 %v7235_v15  ;;  %v7307_v15 = vld [vmem:[%s8227_s6 + $0x944] ss:$8 sps:$4 sm:$0xff]  }
  0xdf   : > { %2189 = vmatpush1.bf16.msra.mxu1 %v7230_v16  ;;  %v7302_v16 = vld [vmem:[%s8227_s6 + $0x540] ss:$8 sps:$4 sm:$0xff]  }
  0xe0   : > { %3187 = vmatpush1.bf16.msra.mxu0 %v7233_v17  ;;  %2190 = vmatprep.subr.bf16.mxu1 %v7238_v18  ;;  %v7305_v17 = vld [vmem:[%s8227_s6 + $0x940] ss:$8 sps:$4 sm:$0xff]   ;;  %v7310_v18 = vld [vmem:[%s8227_s6 + $0x554] ss:$8 sps:$4 sm:$0xff]  }
  0xe1   : > { %3188 = vmatprep.subr.bf16.mxu0 %v7241_v19  ;;  %v7313_v19 = vld [vmem:[%s8227_s6 + $0x954] ss:$8 sps:$4 sm:$0xff]  }
  0xe3   : > { %2191 = vmatpush1.bf16.msra.mxu1 %v7236_v20  ;;  %v7308_v20 = vld [vmem:[%s8227_s6 + $0x550] ss:$8 sps:$4 sm:$0xff]  }
  0xe4   : > { %3189 = vmatpush1.bf16.msra.mxu0 %v7239_v21  ;;  %2192 = vmatprep.subr.bf16.mxu1 %v7244_v22  ;;  %v7311_v21 = vld [vmem:[%s8227_s6 + $0x950] ss:$8 sps:$4 sm:$0xff]   ;;  %v7316_v22 = vld [vmem:[%s8227_s6 + $0x564] ss:$8 sps:$4 sm:$0xff]  }
  0xe5   : > { %3190 = vmatprep.subr.bf16.mxu0 %v7247_v23  ;;  %v7319_v23 = vld [vmem:[%s8227_s6 + $0x964] ss:$8 sps:$4 sm:$0xff]  }
  0xe7   : > { %2193 = vmatpush1.bf16.msra.mxu1 %v7242_v24  ;;  %v7314_v24 = vld [vmem:[%s8227_s6 + $0x560] ss:$8 sps:$4 sm:$0xff]  }
  0xe8   : > { %3191 = vmatpush1.bf16.msra.mxu0 %v7245_v25  ;;  %2194 = vmatprep.subr.bf16.mxu1 %v7250_v26  ;;  %v7317_v25 = vld [vmem:[%s8227_s6 + $0x960] ss:$8 sps:$4 sm:$0xff]   ;;  %v7322_v26 = vld [vmem:[%s8227_s6 + $0x574] ss:$8 sps:$4 sm:$0xff]  }
  0xe9   : > { %3192 = vmatprep.subr.bf16.mxu0 %v7253_v27  ;;  %v7325_v27 = vld [vmem:[%s8227_s6 + $0x974] ss:$8 sps:$4 sm:$0xff]  }
  0xeb   : > { %2195 = vmatpush1.bf16.msra.mxu1 %v7248_v28  ;;  %v7320_v28 = vld [vmem:[%s8227_s6 + $0x570] ss:$8 sps:$4 sm:$0xff]  }
  0xec   : > { %3193 = vmatpush1.bf16.msra.mxu0 %v7251_v29  ;;  %2196 = vmatprep.subr.bf16.mxu1 %v7256_v30  ;;  %v7323_v29 = vld [vmem:[%s8227_s6 + $0x970] ss:$8 sps:$4 sm:$0xff]   ;;  %v7328_v30 = vld [vmem:[%s8227_s6 + $0x584] ss:$8 sps:$4 sm:$0xff]  }
  0xed   : > { %3194 = vmatprep.subr.bf16.mxu0 %v7259_v34  ;;  %v7331_v34 = vld [vmem:[%s8227_s6 + $0x984] ss:$8 sps:$4 sm:$0xff]  }
  0xef   : > { %2197 = vmatpush1.bf16.msra.mxu1 %v7254_v35  ;;  %v7326_v35 = vld [vmem:[%s8227_s6 + $0x580] ss:$8 sps:$4 sm:$0xff]  }
  0xf0   : > { %3195 = vmatpush1.bf16.msra.mxu0 %v7257_v36  ;;  %2198 = vmatprep.subr.bf16.mxu1 %v7262_v40  ;;  %v7329_v36 = vld [vmem:[%s8227_s6 + $0x980] ss:$8 sps:$4 sm:$0xff]   ;;  %v7334_v40 = vld [vmem:[%s8227_s6 + $0x594] ss:$8 sps:$4 sm:$0xff]  }
  0xf1   : > { %3196 = vmatprep.subr.bf16.mxu0 %v7265_v41  ;;  %v7337_v41 = vld [vmem:[%s8227_s6 + $0x994] ss:$8 sps:$4 sm:$0xff]  }
  0xf3   : > { %2199 = vmatpush1.bf16.msra.mxu1 %v7260_v44  ;;  %v7332_v44 = vld [vmem:[%s8227_s6 + $0x590] ss:$8 sps:$4 sm:$0xff]  }
  0xf4   : > { %3197 = vmatpush1.bf16.msra.mxu0 %v7263_v45  ;;  %2200 = vmatprep.subr.bf16.mxu1 %v7268_v46  ;;  %v7335_v45 = vld [vmem:[%s8227_s6 + $0x990] ss:$8 sps:$4 sm:$0xff]   ;;  %v7340_v46 = vld [vmem:[%s8227_s6 + $0x5a4] ss:$8 sps:$4 sm:$0xff]  }
  0xf5   : > { %3198 = vmatprep.subr.bf16.mxu0 %v7271_v47  ;;  %v7343_v47 = vld [vmem:[%s8227_s6 + $0x9a4] ss:$8 sps:$4 sm:$0xff]  }
  0xf7   : > { %2201 = vmatpush1.bf16.msra.mxu1 %v7266_v48  ;;  %v7338_v48 = vld [vmem:[%s8227_s6 + $0x5a0] ss:$8 sps:$4 sm:$0xff]  }
  0xf8   : > { %3199 = vmatpush1.bf16.msra.mxu0 %v7269_v50  ;;  %2202 = vmatprep.subr.bf16.mxu1 %v7274_v56  ;;  %v7341_v50 = vld [vmem:[%s8227_s6 + $0x9a0] ss:$8 sps:$4 sm:$0xff]   ;;  %v7346_v56 = vld [vmem:[%s8227_s6 + $0x5b4] ss:$8 sps:$4 sm:$0xff]  }
  0xf9   : > { %3200 = vmatprep.subr.bf16.mxu0 %v7277_v57  ;;  %v7349_v57 = vld [vmem:[%s8227_s6 + $0x9b4] ss:$8 sps:$4 sm:$0xff]  }
  0xfb   : > { %2203 = vmatpush1.bf16.msra.mxu1 %v7272_v58  ;;  %v7344_v58 = vld [vmem:[%s8227_s6 + $0x5b0] ss:$8 sps:$4 sm:$0xff]  }
  0xfc   : > { %3201 = vmatpush1.bf16.msra.mxu0 %v7275_v59  ;;  %2223 = vmatprep.subr.bf16.mxu1 %v7280_v60  ;;  %v7347_v59 = vld [vmem:[%s8227_s6 + $0x9b0] ss:$8 sps:$4 sm:$0xff]   ;;  %v7352_v60 = vld [vmem:[%s8227_s6 + $0x5c4] ss:$8 sps:$4 sm:$0xff]  }
  0xfd   : > { %3221 = vmatprep.subr.bf16.mxu0 %v7283_v61  ;;  %v7355_v61 = vld [vmem:[%s8227_s6 + $0x9c4] ss:$8 sps:$4 sm:$0xff]  }
  0xfe   : > { %2205 = vmatmul.mubr.bf16.vlgmr.msra.gmra.mrb[12].mxu1 %v8323_v10 }
  0xff   : > { %3203 = vmatmul.mubr.bf16.vlgmr.msra.gmra.mrb[12].mxu0 %v8323_v10  ;;  %2224 = vmatpush1.bf16.msra.mxu1 %v7278_v62  ;;  %v7350_v62 = vld [vmem:[%s8227_s6 + $0x5c0] ss:$8 sps:$4 sm:$0xff]  }
 0x100   : > { %3222 = vmatpush1.bf16.msra.mxu0 %v7281_v63  ;;  %2225 = vmatprep.subr.bf16.mxu1 %v7286_v0  ;;  %v7353_v63 = vld [vmem:[%s8227_s6 + $0x9c0] ss:$8 sps:$4 sm:$0xff]   ;;  %v7358_v0 = vld [vmem:[%s8227_s6 + $0x5d4] ss:$8 sps:$4 sm:$0xff]  }
 0x101   : > { %3223 = vmatprep.subr.bf16.mxu0 %v7289_v1  ;;  %2214 = vmatprep.mubr.bf16.mxu1 %v8356_v32  ;;  %v7361_v1 = vld [vmem:[%s8227_s6 + $0x9d4] ss:$8 sps:$4 sm:$0xff]  }
 0x102   : > { %3212 = vmatprep.mubr.bf16.mxu0 %v8356_v32 }
 0x103   : > { %2226 = vmatpush1.bf16.msra.mxu1 %v7284_v2  ;;  %v7356_v2 = vld [vmem:[%s8227_s6 + $0x5d0] ss:$8 sps:$4 sm:$0xff]  }
 0x104   : > { %3224 = vmatpush1.bf16.msra.mxu0 %v7287_v3  ;;  %2227 = vmatprep.subr.bf16.mxu1 %v7292_v4  ;;  %v7359_v3 = vld [vmem:[%s8227_s6 + $0x9d0] ss:$8 sps:$4 sm:$0xff]   ;;  %v7364_v4 = vld [vmem:[%s8227_s6 + $0x5e4] ss:$8 sps:$4 sm:$0xff]  }
 0x105   : > { %3225 = vmatprep.subr.bf16.mxu0 %v7295_v5  ;;  %v7367_v5 = vld [vmem:[%s8227_s6 + $0x9e4] ss:$8 sps:$4 sm:$0xff]  }
 0x106   : > { %2215 = vmatmul.mubr.bf16.gmra.mrb[16].mxu1 %v8362_v37 }
 0x107   : > { %3213 = vmatmul.mubr.bf16.gmra.mrb[16].mxu0 %v8362_v37  ;;  %2228 = vmatpush1.bf16.msra.mxu1 %v7290_v6  ;;  %v7362_v6 = vld [vmem:[%s8227_s6 + $0x5e0] ss:$8 sps:$4 sm:$0xff]  }
 0x108   : > { %3226 = vmatpush1.bf16.msra.mxu0 %v7293_v7  ;;  %2229 = vmatprep.subr.bf16.mxu1 %v7298_v8  ;;  %v7365_v7 = vld [vmem:[%s8227_s6 + $0x9e0] ss:$8 sps:$4 sm:$0xff]   ;;  %v7370_v8 = vld [vmem:[%s8227_s6 + $0x5f4] ss:$8 sps:$4 sm:$0xff]  }
 0x109   : > { %3227 = vmatprep.subr.bf16.mxu0 %v7301_v9  ;;  %2255 = vmatprep.mubr.bf16.mxu1 %v8389_v49  ;;  %v7373_v9 = vld [vmem:[%s8227_s6 + $0x9f4] ss:$8 sps:$4 sm:$0xff]  }
 0x10a   : > { %3253 = vmatprep.mubr.bf16.mxu0 %v8389_v49 }
 0x10b   : > { %2230 = vmatpush1.bf16.msra.mxu1 %v7296_v12  ;;  %v7368_v12 = vld [vmem:[%s8227_s6 + $0x5f0] ss:$8 sps:$4 sm:$0xff]  }
 0x10c   : > { %3228 = vmatpush1.bf16.msra.mxu0 %v7299_v13  ;;  %2231 = vmatprep.subr.bf16.mxu1 %v7304_v14  ;;  %v7371_v13 = vld [vmem:[%s8227_s6 + $0x9f0] ss:$8 sps:$4 sm:$0xff]   ;;  %v7376_v14 = vld [vmem:[%s8227_s6 + $0x604] ss:$8 sps:$4 sm:$0xff]  }
 0x10d   : > { %3229 = vmatprep.subr.bf16.mxu0 %v7307_v15  ;;  %v7379_v15 = vld [vmem:[%s8227_s6 + $0xa04] ss:$8 sps:$4 sm:$0xff]  }
 0x10f   : > { %2232 = vmatpush1.bf16.msra.mxu1 %v7302_v16  ;;  %v7374_v16 = vld [vmem:[%s8227_s6 + $0x600] ss:$8 sps:$4 sm:$0xff]  }
 0x110   : > { %3230 = vmatpush1.bf16.msra.mxu0 %v7305_v17  ;;  %2233 = vmatprep.subr.bf16.mxu1 %v7310_v18  ;;  %v7377_v17 = vld [vmem:[%s8227_s6 + $0xa00] ss:$8 sps:$4 sm:$0xff]   ;;  %v7382_v18 = vld [vmem:[%s8227_s6 + $0x614] ss:$8 sps:$4 sm:$0xff]  }
 0x111   : > { %3231 = vmatprep.subr.bf16.mxu0 %v7313_v19  ;;  %v7385_v19 = vld [vmem:[%s8227_s6 + $0xa14] ss:$8 sps:$4 sm:$0xff]  }
 0x113   : > { %2234 = vmatpush1.bf16.msra.mxu1 %v7308_v20  ;;  %v7380_v20 = vld [vmem:[%s8227_s6 + $0x610] ss:$8 sps:$4 sm:$0xff]  }
 0x114   : > { %3232 = vmatpush1.bf16.msra.mxu0 %v7311_v21  ;;  %2235 = vmatprep.subr.bf16.mxu1 %v7316_v22  ;;  %v7383_v21 = vld [vmem:[%s8227_s6 + $0xa10] ss:$8 sps:$4 sm:$0xff]   ;;  %v7388_v22 = vld [vmem:[%s8227_s6 + $0x624] ss:$8 sps:$4 sm:$0xff]  }
 0x115   : > { %3233 = vmatprep.subr.bf16.mxu0 %v7319_v23  ;;  %v7391_v23 = vld [vmem:[%s8227_s6 + $0xa24] ss:$8 sps:$4 sm:$0xff]  }
 0x117   : > { %2236 = vmatpush1.bf16.msra.mxu1 %v7314_v24  ;;  %v7386_v24 = vld [vmem:[%s8227_s6 + $0x620] ss:$8 sps:$4 sm:$0xff]  }
 0x118   : > { %3234 = vmatpush1.bf16.msra.mxu0 %v7317_v25  ;;  %2237 = vmatprep.subr.bf16.mxu1 %v7322_v26  ;;  %v7389_v25 = vld [vmem:[%s8227_s6 + $0xa20] ss:$8 sps:$4 sm:$0xff]   ;;  %v7394_v26 = vld [vmem:[%s8227_s6 + $0x634] ss:$8 sps:$4 sm:$0xff]  }
 0x119   : > { %3235 = vmatprep.subr.bf16.mxu0 %v7325_v27  ;;  %v7397_v27 = vld [vmem:[%s8227_s6 + $0xa34] ss:$8 sps:$4 sm:$0xff]  }
 0x11b   : > { %2238 = vmatpush1.bf16.msra.mxu1 %v7320_v28  ;;  %v7392_v28 = vld [vmem:[%s8227_s6 + $0x630] ss:$8 sps:$4 sm:$0xff]  }
 0x11c   : > { %3236 = vmatpush1.bf16.msra.mxu0 %v7323_v29  ;;  %2239 = vmatprep.subr.bf16.mxu1 %v7328_v30  ;;  %v7395_v29 = vld [vmem:[%s8227_s6 + $0xa30] ss:$8 sps:$4 sm:$0xff]   ;;  %v7400_v30 = vld [vmem:[%s8227_s6 + $0x644] ss:$8 sps:$4 sm:$0xff]  }
 0x11d   : > { %3237 = vmatprep.subr.bf16.mxu0 %v7331_v34  ;;  %v7403_v34 = vld [vmem:[%s8227_s6 + $0xa44] ss:$8 sps:$4 sm:$0xff]  }
 0x11f   : > { %2240 = vmatpush1.bf16.msra.mxu1 %v7326_v35  ;;  %v7398_v35 = vld [vmem:[%s8227_s6 + $0x640] ss:$8 sps:$4 sm:$0xff]  }
 0x120   : > { %3238 = vmatpush1.bf16.msra.mxu0 %v7329_v36  ;;  %2241 = vmatprep.subr.bf16.mxu1 %v7334_v40  ;;  %v7401_v36 = vld [vmem:[%s8227_s6 + $0xa40] ss:$8 sps:$4 sm:$0xff]   ;;  %v7406_v40 = vld [vmem:[%s8227_s6 + $0x654] ss:$8 sps:$4 sm:$0xff]  }
 0x121   : > { %3239 = vmatprep.subr.bf16.mxu0 %v7337_v41  ;;  %v7409_v41 = vld [vmem:[%s8227_s6 + $0xa54] ss:$8 sps:$4 sm:$0xff]  }
 0x123   : > { %2242 = vmatpush1.bf16.msra.mxu1 %v7332_v44  ;;  %v7404_v44 = vld [vmem:[%s8227_s6 + $0x650] ss:$8 sps:$4 sm:$0xff]  }
 0x124   : > { %3240 = vmatpush1.bf16.msra.mxu0 %v7335_v45  ;;  %2243 = vmatprep.subr.bf16.mxu1 %v7340_v46  ;;  %v7407_v45 = vld [vmem:[%s8227_s6 + $0xa50] ss:$8 sps:$4 sm:$0xff]   ;;  %v7412_v46 = vld [vmem:[%s8227_s6 + $0x664] ss:$8 sps:$4 sm:$0xff]  }
 0x125   : > { %3241 = vmatprep.subr.bf16.mxu0 %v7343_v47  ;;  %v7415_v47 = vld [vmem:[%s8227_s6 + $0xa64] ss:$8 sps:$4 sm:$0xff]  }
 0x127   : > { %2244 = vmatpush1.bf16.msra.mxu1 %v7338_v48  ;;  %v7410_v48 = vld [vmem:[%s8227_s6 + $0x660] ss:$8 sps:$4 sm:$0xff]  }
 0x128   : > { %3242 = vmatpush1.bf16.msra.mxu0 %v7341_v50  ;;  %2245 = vmatprep.subr.bf16.mxu1 %v7346_v56  ;;  %v7413_v50 = vld [vmem:[%s8227_s6 + $0xa60] ss:$8 sps:$4 sm:$0xff]   ;;  %v7418_v56 = vld [vmem:[%s8227_s6 + $0x674] ss:$8 sps:$4 sm:$0xff]  }
 0x129   : > { %3243 = vmatprep.subr.bf16.mxu0 %v7349_v57  ;;  %v7421_v57 = vld [vmem:[%s8227_s6 + $0xa74] ss:$8 sps:$4 sm:$0xff]  }
 0x12b   : > { %2246 = vmatpush1.bf16.msra.mxu1 %v7344_v58  ;;  %v7416_v58 = vld [vmem:[%s8227_s6 + $0x670] ss:$8 sps:$4 sm:$0xff]  }
 0x12c   : > { %3244 = vmatpush1.bf16.msra.mxu0 %v7347_v59  ;;  %2247 = vmatprep.subr.bf16.mxu1 %v7352_v60  ;;  %v7419_v59 = vld [vmem:[%s8227_s6 + $0xa70] ss:$8 sps:$4 sm:$0xff]   ;;  %v7424_v60 = vld [vmem:[%s8227_s6 + $0x684] ss:$8 sps:$4 sm:$0xff]  }
 0x12d   : > { %3245 = vmatprep.subr.bf16.mxu0 %v7355_v61  ;;  %v7427_v61 = vld [vmem:[%s8227_s6 + $0xa84] ss:$8 sps:$4 sm:$0xff]  }
 0x12f   : > { %2248 = vmatpush1.bf16.msra.mxu1 %v7350_v62  ;;  %v7422_v62 = vld [vmem:[%s8227_s6 + $0x680] ss:$8 sps:$4 sm:$0xff]  }
 0x130   : > { %3246 = vmatpush1.bf16.msra.mxu0 %v7353_v63  ;;  %2249 = vmatprep.subr.bf16.mxu1 %v7358_v0  ;;  %v7425_v63 = vld [vmem:[%s8227_s6 + $0xa80] ss:$8 sps:$4 sm:$0xff]   ;;  %v7430_v0 = vld [vmem:[%s8227_s6 + $0x694] ss:$8 sps:$4 sm:$0xff]  }
 0x131   : > { %3247 = vmatprep.subr.bf16.mxu0 %v7361_v1  ;;  %v7433_v1 = vld [vmem:[%s8227_s6 + $0xa94] ss:$8 sps:$4 sm:$0xff]  }
 0x133   : > { %2250 = vmatpush1.bf16.msra.mxu1 %v7356_v2  ;;  %v7428_v2 = vld [vmem:[%s8227_s6 + $0x690] ss:$8 sps:$4 sm:$0xff]  }
 0x134   : > { %3248 = vmatpush1.bf16.msra.mxu0 %v7359_v3  ;;  %2251 = vmatprep.subr.bf16.mxu1 %v7364_v4  ;;  %v7431_v3 = vld [vmem:[%s8227_s6 + $0xa90] ss:$8 sps:$4 sm:$0xff]   ;;  %v7436_v4 = vld [vmem:[%s8227_s6 + $0x6a4] ss:$8 sps:$4 sm:$0xff]  }
 0x135   : > { %3249 = vmatprep.subr.bf16.mxu0 %v7367_v5  ;;  %v7439_v5 = vld [vmem:[%s8227_s6 + $0xaa4] ss:$8 sps:$4 sm:$0xff]  }
 0x137   : > { %2252 = vmatpush1.bf16.msra.mxu1 %v7362_v6  ;;  %v7434_v6 = vld [vmem:[%s8227_s6 + $0x6a0] ss:$8 sps:$4 sm:$0xff]  }
 0x138   : > { %3250 = vmatpush1.bf16.msra.mxu0 %v7365_v7  ;;  %2253 = vmatprep.subr.bf16.mxu1 %v7370_v8  ;;  %v7437_v7 = vld [vmem:[%s8227_s6 + $0xaa0] ss:$8 sps:$4 sm:$0xff]   ;;  %v7442_v8 = vld [vmem:[%s8227_s6 + $0x6b4] ss:$8 sps:$4 sm:$0xff]  }
 0x139   : > { %3251 = vmatprep.subr.bf16.mxu0 %v7373_v9  ;;  %v7445_v9 = vld [vmem:[%s8227_s6 + $0xab4] ss:$8 sps:$4 sm:$0xff]  }
 0x13b   : > { %2254 = vmatpush1.bf16.msra.mxu1 %v7368_v12 }
 0x13c   : > { %3252 = vmatpush1.bf16.msra.mxu0 %v7371_v13  ;;  %2274 = vmatprep.subr.bf16.mxu1 %v7376_v14 }
 0x13d   : > { %3272 = vmatprep.subr.bf16.mxu0 %v7379_v15 }
 0x13e   : > { %2256 = vmatmul.mubr.bf16.vlgmr.msra.gmra.mrb[12].mxu1 %v8441_v31 }
 0x13f   : > { %3254 = vmatmul.mubr.bf16.vlgmr.msra.gmra.mrb[12].mxu0 %v8441_v31  ;;  %2275 = vmatpush1.bf16.msra.mxu1 %v7374_v16  ;;  %v7440_v16 = vld [vmem:[%s8227_s6 + $0x6b0] ss:$8 sps:$4 sm:$0xff]  }
 0x140   : > { %3273 = vmatpush1.bf16.msra.mxu0 %v7377_v17  ;;  %2276 = vmatprep.subr.bf16.mxu1 %v7382_v18  ;;  %v7443_v17 = vld [vmem:[%s8227_s6 + $0xab0] ss:$8 sps:$4 sm:$0xff]  }
 0x141   : > { %3274 = vmatprep.subr.bf16.mxu0 %v7385_v19  ;;  %2265 = vmatprep.mubr.bf16.mxu1 %v8452_v42 }
 0x142   : > { %3263 = vmatprep.mubr.bf16.mxu0 %v8452_v42 }
 0x143   : > { %2277 = vmatpush1.bf16.msra.mxu1 %v7380_v20  ;;  %v7448_v20 = vld [vmem:[%s8227_s6 + $0x6c4] ss:$8 sps:$4 sm:$0xff]  }
 0x144   : > { %3275 = vmatpush1.bf16.msra.mxu0 %v7383_v21  ;;  %2278 = vmatprep.subr.bf16.mxu1 %v7388_v22  ;;  %v7451_v21 = vld [vmem:[%s8227_s6 + $0xac4] ss:$8 sps:$4 sm:$0xff]  }
 0x145   : > { %3276 = vmatprep.subr.bf16.mxu0 %v7391_v23 }
 0x146   : > { %2266 = vmatmul.mubr.bf16.gmra.mrb[16].mxu1 %v8466_v53 }
 0x147   : > { %3264 = vmatmul.mubr.bf16.gmra.mrb[16].mxu0 %v8466_v53  ;;  %2279 = vmatpush1.bf16.msra.mxu1 %v7386_v24  ;;  %v7446_v24 = vld [vmem:[%s8227_s6 + $0x6c0] ss:$8 sps:$4 sm:$0xff]  }
 0x148   : > { %3277 = vmatpush1.bf16.msra.mxu0 %v7389_v25  ;;  %2280 = vmatprep.subr.bf16.mxu1 %v7394_v26  ;;  %v7449_v25 = vld [vmem:[%s8227_s6 + $0xac0] ss:$8 sps:$4 sm:$0xff]   ;;  %v7454_v26 = vld [vmem:[%s8227_s6 + $0x6d4] ss:$8 sps:$4 sm:$0xff]  }
 0x149   : > { %3278 = vmatprep.subr.bf16.mxu0 %v7397_v27  ;;  %2306 = vmatprep.mubr.bf16.mxu1 %v8302_v55  ;;  %v7457_v27 = vld [vmem:[%s8227_s6 + $0xad4] ss:$8 sps:$4 sm:$0xff]  }
 0x14a   : > { %3304 = vmatprep.mubr.bf16.mxu0 %v8302_v55 }
 0x14b   : > { %2281 = vmatpush1.bf16.msra.mxu1 %v7392_v28  ;;  %v7452_v28 = vld [vmem:[%s8227_s6 + $0x6d0] ss:$8 sps:$4 sm:$0xff]  }
 0x14c   : > { %3279 = vmatpush1.bf16.msra.mxu0 %v7395_v29  ;;  %2282 = vmatprep.subr.bf16.mxu1 %v7400_v30  ;;  %v7455_v29 = vld [vmem:[%s8227_s6 + $0xad0] ss:$8 sps:$4 sm:$0xff]   ;;  %v7460_v30 = vld [vmem:[%s8227_s6 + $0x6e4] ss:$8 sps:$4 sm:$0xff]  }
 0x14d   : > { %3280 = vmatprep.subr.bf16.mxu0 %v7403_v34  ;;  %v7463_v34 = vld [vmem:[%s8227_s6 + $0xae4] ss:$8 sps:$4 sm:$0xff]  }
 0x14f   : > { %2283 = vmatpush1.bf16.msra.mxu1 %v7398_v35  ;;  %v7458_v35 = vld [vmem:[%s8227_s6 + $0x6e0] ss:$8 sps:$4 sm:$0xff]  }
 0x150   : > { %3281 = vmatpush1.bf16.msra.mxu0 %v7401_v36  ;;  %2284 = vmatprep.subr.bf16.mxu1 %v7406_v40  ;;  %v7461_v36 = vld [vmem:[%s8227_s6 + $0xae0] ss:$8 sps:$4 sm:$0xff]   ;;  %v7466_v40 = vld [vmem:[%s8227_s6 + $0x6f4] ss:$8 sps:$4 sm:$0xff]  }
 0x151   : > { %3282 = vmatprep.subr.bf16.mxu0 %v7409_v41  ;;  %v7469_v41 = vld [vmem:[%s8227_s6 + $0xaf4] ss:$8 sps:$4 sm:$0xff]  }
 0x153   : > { %2285 = vmatpush1.bf16.msra.mxu1 %v7404_v44  ;;  %v7464_v44 = vld [vmem:[%s8227_s6 + $0x6f0] ss:$8 sps:$4 sm:$0xff]  }
 0x154   : > { %3283 = vmatpush1.bf16.msra.mxu0 %v7407_v45  ;;  %2286 = vmatprep.subr.bf16.mxu1 %v7412_v46  ;;  %v7467_v45 = vld [vmem:[%s8227_s6 + $0xaf0] ss:$8 sps:$4 sm:$0xff]   ;;  %v7472_v46 = vld [vmem:[%s8227_s6 + $0x704] ss:$8 sps:$4 sm:$0xff]  }
 0x155   : > { %3284 = vmatprep.subr.bf16.mxu0 %v7415_v47  ;;  %v7475_v47 = vld [vmem:[%s8227_s6 + $0xb04] ss:$8 sps:$4 sm:$0xff]  }
 0x157   : > { %2287 = vmatpush1.bf16.msra.mxu1 %v7410_v48  ;;  %v7470_v48 = vld [vmem:[%s8227_s6 + $0x700] ss:$8 sps:$4 sm:$0xff]  }
 0x158   : > { %3285 = vmatpush1.bf16.msra.mxu0 %v7413_v50  ;;  %2288 = vmatprep.subr.bf16.mxu1 %v7418_v56  ;;  %v7473_v50 = vld [vmem:[%s8227_s6 + $0xb00] ss:$8 sps:$4 sm:$0xff]   ;;  %v7478_v56 = vld [vmem:[%s8227_s6 + $0x714] ss:$8 sps:$4 sm:$0xff]  }
 0x159   : > { %3286 = vmatprep.subr.bf16.mxu0 %v7421_v57  ;;  %v1247_v12 = vpop.f32.mrb[4].mxu1  ;;  %v7481_v57 = vld [vmem:[%s8227_s6 + $0xb14] ss:$8 sps:$4 sm:$0xff]  }
 0x15a   : > { %v1345_v13 = vpop.f32.mrb[4].mxu0  ;;  %v1248_v14 = vpop.f32.mrb[5].mxu1  ;;  %v7500_v12 = vld [vmem:[%s8227_s6 + $0x750] ss:$8 sps:$4 sm:$0xff]  }
 0x15b   : > { %2289 = vmatpush1.bf16.msra.mxu1 %v7416_v58  ;;  %v1346_v15 = vpop.f32.mrb[5].mxu0  ;;  %v1249_v18 = vpop.f32.mrb[6].mxu1  ;;  %v7476_v58 = vld [vmem:[%s8227_s6 + $0x710] ss:$8 sps:$4 sm:$0xff]   ;;  %v7508_v14 = vld [vmem:[%s8227_s6 + $0x764] ss:$8 sps:$4 sm:$0xff]  }
 0x15c   : > { %3287 = vmatpush1.bf16.msra.mxu0 %v7419_v59  ;;  %2290 = vmatprep.subr.bf16.mxu1 %v7424_v60  ;;  %v1347_v19 = vpop.f32.mrb[6].mxu0  ;;  %v1250_v22 = vpop.f32.mrb[7].mxu1  ;;  %v7479_v59 = vld [vmem:[%s8227_s6 + $0xb10] ss:$8 sps:$4 sm:$0xff]   ;;  %v7484_v60 = vld [vmem:[%s8227_s6 + $0x724] ss:$8 sps:$4 sm:$0xff]  }
 0x15d   : > { %3288 = vmatprep.subr.bf16.mxu0 %v7427_v61  ;;  %v1348_v23 = vpop.f32.mrb[7].mxu0  ;;  %v7487_v61 = vld [vmem:[%s8227_s6 + $0xb24] ss:$8 sps:$4 sm:$0xff]   ;;  %v7503_v13 = vld [vmem:[%s8227_s6 + $0xb50] ss:$8 sps:$4 sm:$0xff]  }
 0x15e   : > { %v7511_v15 = vld [vmem:[%s8227_s6 + $0xb64] ss:$8 sps:$4 sm:$0xff]  }
 0x15f   : > { %2291 = vmatpush1.bf16.msra.mxu1 %v7422_v62  ;;  %v7482_v62 = vld [vmem:[%s8227_s6 + $0x720] ss:$8 sps:$4 sm:$0xff]  }
 0x160   : > { %3289 = vmatpush1.bf16.msra.mxu0 %v7425_v63  ;;  %2292 = vmatprep.subr.bf16.mxu1 %v7430_v0  ;;  %v7485_v63 = vld [vmem:[%s8227_s6 + $0xb20] ss:$8 sps:$4 sm:$0xff]   ;;  %v7490_v0 = vld [vmem:[%s8227_s6 + $0x734] ss:$8 sps:$4 sm:$0xff]  }
 0x161   : > { %3290 = vmatprep.subr.bf16.mxu0 %v7433_v1  ;;  %v7493_v1 = vld [vmem:[%s8227_s6 + $0xb34] ss:$8 sps:$4 sm:$0xff]  }
 0x163   : > { %2293 = vmatpush1.bf16.msra.mxu1 %v7428_v2  ;;  %v7488_v2 = vld [vmem:[%s8227_s6 + $0x730] ss:$8 sps:$4 sm:$0xff]  }
 0x164   : > { %3291 = vmatpush1.bf16.msra.mxu0 %v7431_v3  ;;  %2294 = vmatprep.subr.bf16.mxu1 %v7436_v4  ;;  %v7491_v3 = vld [vmem:[%s8227_s6 + $0xb30] ss:$8 sps:$4 sm:$0xff]   ;;  %v7496_v4 = vld [vmem:[%s8227_s6 + $0x744] ss:$8 sps:$4 sm:$0xff]  }
 0x165   : > { %3292 = vmatprep.subr.bf16.mxu0 %v7439_v5  ;;  %v7499_v5 = vld [vmem:[%s8227_s6 + $0xb44] ss:$8 sps:$4 sm:$0xff]  }
 0x167   : > { %2295 = vmatpush1.bf16.msra.mxu1 %v7434_v6  ;;  %v7494_v6 = vld [vmem:[%s8227_s6 + $0x740] ss:$8 sps:$4 sm:$0xff]  }
 0x168   : > { %3293 = vmatpush1.bf16.msra.mxu0 %v7437_v7  ;;  %2296 = vmatprep.subr.bf16.mxu1 %v7442_v8  ;;  %v7497_v7 = vld [vmem:[%s8227_s6 + $0xb40] ss:$8 sps:$4 sm:$0xff]   ;;  %v7502_v8 = vld [vmem:[%s8227_s6 + $0x754] ss:$8 sps:$4 sm:$0xff]  }
 0x169   : > { %3294 = vmatprep.subr.bf16.mxu0 %v7445_v9  ;;  %v7505_v9 = vld [vmem:[%s8227_s6 + $0xb54] ss:$8 sps:$4 sm:$0xff]  }
 0x16b   : > { %2297 = vmatpush1.bf16.msra.mxu1 %v7440_v16 }
 0x16c   : > { %3295 = vmatpush1.bf16.msra.mxu0 %v7443_v17  ;;  %2298 = vmatprep.subr.bf16.mxu1 %v7448_v20 }
 0x16d   : > { %3296 = vmatprep.subr.bf16.mxu0 %v7451_v21 }
 0x16f   : > { %2299 = vmatpush1.bf16.msra.mxu1 %v7446_v24  ;;  %v7506_v24 = vld [vmem:[%s8227_s6 + $0x760] ss:$8 sps:$4 sm:$0xff]  }
 0x170   : > { %3297 = vmatpush1.bf16.msra.mxu0 %v7449_v25  ;;  %2300 = vmatprep.subr.bf16.mxu1 %v7454_v26  ;;  %v7509_v25 = vld [vmem:[%s8227_s6 + $0xb60] ss:$8 sps:$4 sm:$0xff]  }
 0x171   : > { %3298 = vmatprep.subr.bf16.mxu0 %v7457_v27 }
 0x173   : > { %2301 = vmatpush1.bf16.msra.mxu1 %v7452_v28 }
 0x174   : > { %3299 = vmatpush1.bf16.msra.mxu0 %v7455_v29  ;;  %2302 = vmatprep.subr.bf16.mxu1 %v7460_v30  ;;  %v7514_v29 = vld [vmem:[%s8227_s6 + $0x774] ss:$8 sps:$4 sm:$0xff]  }
 0x175   : > { %3300 = vmatprep.subr.bf16.mxu0 %v7463_v34  ;;  %v7517_v30 = vld [vmem:[%s8227_s6 + $0xb74] ss:$8 sps:$4 sm:$0xff]  }
 0x177   : > { %2303 = vmatpush1.bf16.msra.mxu1 %v7458_v35  ;;  %v7512_v35 = vld [vmem:[%s8227_s6 + $0x770] ss:$8 sps:$4 sm:$0xff]  }
 0x178   : > { %3301 = vmatpush1.bf16.msra.mxu0 %v7461_v36  ;;  %2304 = vmatprep.subr.bf16.mxu1 %v7466_v40  ;;  %v7515_v36 = vld [vmem:[%s8227_s6 + $0xb70] ss:$8 sps:$4 sm:$0xff]   ;;  %v7520_v40 = vld [vmem:[%s8227_s6 + $0x784] ss:$8 sps:$4 sm:$0xff]  }
 0x179   : > { %3302 = vmatprep.subr.bf16.mxu0 %v7469_v41  ;;  %v7523_v41 = vld [vmem:[%s8227_s6 + $0xb84] ss:$8 sps:$4 sm:$0xff]  }
 0x17b   : > { %2305 = vmatpush1.bf16.msra.mxu1 %v7464_v44 }
 0x17c   : > { %3303 = vmatpush1.bf16.msra.mxu0 %v7467_v45  ;;  %2325 = vmatprep.subr.bf16.mxu1 %v7472_v46 }
 0x17d   : > { %3323 = vmatprep.subr.bf16.mxu0 %v7475_v47 }
 0x17e   : > { %2307 = vmatmul.mubr.bf16.vlgmr.msra.gmra.mrb[12].mxu1 %v8325_v11 }
 0x17f   : > { %3305 = vmatmul.mubr.bf16.vlgmr.msra.gmra.mrb[12].mxu0 %v8325_v11  ;;  %2326 = vmatpush1.bf16.msra.mxu1 %v7470_v48  ;;  %v7518_v48 = vld [vmem:[%s8227_s6 + $0x780] ss:$8 sps:$4 sm:$0xff]  }
 0x180   : > { %3324 = vmatpush1.bf16.msra.mxu0 %v7473_v50  ;;  %2327 = vmatprep.subr.bf16.mxu1 %v7478_v56  ;;  %v7521_v50 = vld [vmem:[%s8227_s6 + $0xb80] ss:$8 sps:$4 sm:$0xff]  }
 0x181   : > { %3325 = vmatprep.subr.bf16.mxu0 %v7481_v57  ;;  %2316 = vmatprep.mubr.bf16.mxu1 %v8364_v38 }
 0x182   : > { %3314 = vmatprep.mubr.bf16.mxu0 %v8364_v38 }
 0x183   : > { %2328 = vmatpush1.bf16.msra.mxu1 %v7476_v58  ;;  %v7526_v58 = vld [vmem:[%s8227_s6 + $0x794] ss:$8 sps:$4 sm:$0xff]  }
 0x184   : > { %3326 = vmatpush1.bf16.msra.mxu0 %v7479_v59  ;;  %2329 = vmatprep.subr.bf16.mxu1 %v7484_v60  ;;  %v7529_v59 = vld [vmem:[%s8227_s6 + $0xb94] ss:$8 sps:$4 sm:$0xff]  }
 0x185   : > { %3327 = vmatprep.subr.bf16.mxu0 %v7487_v61 }
 0x186   : > { %2317 = vmatmul.mubr.bf16.gmra.mrb[16].mxu1 %v8366_v39 }
 0x187   : > { %3315 = vmatmul.mubr.bf16.gmra.mrb[16].mxu0 %v8366_v39  ;;  %2330 = vmatpush1.bf16.msra.mxu1 %v7482_v62  ;;  %v7524_v62 = vld [vmem:[%s8227_s6 + $0x790] ss:$8 sps:$4 sm:$0xff]  }
 0x188   : > { %3328 = vmatpush1.bf16.msra.mxu0 %v7485_v63  ;;  %2331 = vmatprep.subr.bf16.mxu1 %v7490_v0  ;;  %v7527_v63 = vld [vmem:[%s8227_s6 + $0xb90] ss:$8 sps:$4 sm:$0xff]   ;;  %v7532_v0 = vld [vmem:[%s8227_s6 + $0x7a4] ss:$8 sps:$4 sm:$0xff]  }
 0x189   : > { %3329 = vmatprep.subr.bf16.mxu0 %v7493_v1  ;;  %2357 = vmatprep.mubr.bf16.mxu1 %v8396_v51  ;;  %v7535_v1 = vld [vmem:[%s8227_s6 + $0xba4] ss:$8 sps:$4 sm:$0xff]  }
 0x18a   : > { %3355 = vmatprep.mubr.bf16.mxu0 %v8396_v51 }
 0x18b   : > { %2332 = vmatpush1.bf16.msra.mxu1 %v7488_v2  ;;  %v7530_v2 = vld [vmem:[%s8227_s6 + $0x7a0] ss:$8 sps:$4 sm:$0xff]  }
 0x18c   : > { %3330 = vmatpush1.bf16.msra.mxu0 %v7491_v3  ;;  %2333 = vmatprep.subr.bf16.mxu1 %v7496_v4  ;;  %v7533_v3 = vld [vmem:[%s8227_s6 + $0xba0] ss:$8 sps:$4 sm:$0xff]   ;;  %v7538_v4 = vld [vmem:[%s8227_s6 + $0x7b4] ss:$8 sps:$4 sm:$0xff]  }
 0x18d   : > { %3331 = vmatprep.subr.bf16.mxu0 %v7499_v5  ;;  %v7541_v5 = vld [vmem:[%s8227_s6 + $0xbb4] ss:$8 sps:$4 sm:$0xff]  }
 0x18f   : > { %2334 = vmatpush1.bf16.msra.mxu1 %v7494_v6  ;;  %v7536_v6 = vld [vmem:[%s8227_s6 + $0x7b0] ss:$8 sps:$4 sm:$0xff]  }
 0x190   : > { %3332 = vmatpush1.bf16.msra.mxu0 %v7497_v7  ;;  %2335 = vmatprep.subr.bf16.mxu1 %v7502_v8  ;;  %v7539_v7 = vld [vmem:[%s8227_s6 + $0xbb0] ss:$8 sps:$4 sm:$0xff]   ;;  %v7544_v8 = vld [vmem:[%s8227_s6 + $0x7c4] ss:$8 sps:$4 sm:$0xff]  }
 0x191   : > { %3333 = vmatprep.subr.bf16.mxu0 %v7505_v9  ;;  %v1286_v16 = vpop.f32.mrb[0].mxu1  ;;  %v7547_v9 = vld [vmem:[%s8227_s6 + $0xbc4] ss:$8 sps:$4 sm:$0xff]  }
 0x192   : > { %v1384_v17 = vpop.f32.mrb[0].mxu0  ;;  %v1288_v19 = vpop.f32.mrb[1].mxu1 }
 0x193   : > { %v8704_v18 = vadd.f32 %v1384_v17, %v1286_v16  ;;  %v1386_v20 = vpop.f32.mrb[1].mxu0  ;;  %v1290_v22 = vpop.f32.mrb[2].mxu1  ;;  %2336 = vmatpush1.bf16.msra.mxu1 %v7500_v12  ;;  %v7542_v12 = vld [vmem:[%s8227_s6 + $0x7c0] ss:$8 sps:$4 sm:$0xff]   ;;  %v7548_v16 = vld [vmem:[%s8227_s6 + $0x7d0] ss:$8 sps:$4 sm:$0xff]  }
 0x194   : > { %v8706_v21 = vadd.f32 %v1386_v20, %v1288_v19  ;;  %v1388_v23 = vpop.f32.mrb[2].mxu0  ;;  %3334 = vmatpush1.bf16.msra.mxu0 %v7503_v13  ;;  %v1292_v27 = vpop.f32.mrb[3].mxu1  ;;  %2337 = vmatprep.subr.bf16.mxu1 %v7508_v14  ;;  %v7545_v13 = vld [vmem:[%s8227_s6 + $0xbc0] ss:$8 sps:$4 sm:$0xff]   ;;  %v7550_v14 = vld [vmem:[%s8227_s6 + $0x7d4] ss:$8 sps:$4 sm:$0xff]  }
 0x195   : > { %v8710_v26 = vadd.f32 %v1388_v23, %v1290_v22  ;;  %v1390_v28 = vpop.f32.mrb[3].mxu0  ;;  %3335 = vmatprep.subr.bf16.mxu0 %v7511_v15  ;;  %v7553_v15 = vld [vmem:[%s8227_s6 + $0xbd4] ss:$8 sps:$4 sm:$0xff]   ;;  %v7551_v17 = vld [vmem:[%s8227_s6 + $0xbd0] ss:$8 sps:$4 sm:$0xff]  }
 0x196   : > { %v8714_v34 = vadd.f32 %v1390_v28, %v1292_v27  ;;  %v7556_v19 = vld [vmem:[%s8227_s6 + $0x7e4] ss:$8 sps:$4 sm:$0xff]   ;;  %v7554_v22 = vld [vmem:[%s8227_s6 + $0x7e0] ss:$8 sps:$4 sm:$0xff]   ;;  %v7560_v27 = vld [vmem:[%s8227_s6 + $0x7f0] ss:$8 sps:$4 sm:$0xff]  }
 0x197   : > { %2338 = vmatpush1.bf16.msra.mxu1 %v7506_v24  ;;  %v7559_v20 = vld [vmem:[%s8227_s6 + $0xbe4] ss:$8 sps:$4 sm:$0xff]   ;;  %v7557_v23 = vld [vmem:[%s8227_s6 + $0xbe0] ss:$8 sps:$4 sm:$0xff]   ;;  %v7562_v24 = vld [vmem:[%s8227_s6 + $0x7f4] ss:$8 sps:$4 sm:$0xff]  }
 0x198   : > { %3336 = vmatpush1.bf16.msra.mxu0 %v7509_v25  ;;  %2339 = vmatprep.subr.bf16.mxu1 %v7514_v29  ;;  %v7565_v25 = vld [vmem:[%s8227_s6 + $0xbf4] ss:$8 sps:$4 sm:$0xff]   ;;  %v7563_v28 = vld [vmem:[%s8227_s6 + $0xbf0] ss:$8 sps:$4 sm:$0xff]   ;;  %v7568_v29 = vld [vmem:[%s8227_s6 + $0xc04] ss:$8 sps:$4 sm:$0xff]  }
 0x199   : > { %3337 = vmatprep.subr.bf16.mxu0 %v7517_v30  ;;  %v1296_v44 = vpop.f32.mrb[8].mxu1  ;;  %v7571_v30 = vld [vmem:[%s8227_s6 + $0x1004] ss:$8 sps:$4 sm:$0xff]  }
 0x19a   : > { %v1394_v45 = vpop.f32.mrb[8].mxu0  ;;  %v1297_v46 = vpop.f32.mrb[9].mxu1  ;;  %v7572_v44 = vld [vmem:[%s8227_s6 + $0xc10] ss:$8 sps:$4 sm:$0xff]  }
 0x19b   : > { %v1395_v47 = vpop.f32.mrb[9].mxu0  ;;  %2340 = vmatpush1.bf16.msra.mxu1 %v7512_v35  ;;  %v1298_v56 = vpop.f32.mrb[10].mxu1  ;;  %v7566_v35 = vld [vmem:[%s8227_s6 + $0xc00] ss:$8 sps:$4 sm:$0xff]   ;;  %v7575_v45 = vld [vmem:[%s8227_s6 + $0x1010] ss:$8 sps:$4 sm:$0xff]  }
 0x19c   : > { %3338 = vmatpush1.bf16.msra.mxu0 %v7515_v36  ;;  %v1396_v57 = vpop.f32.mrb[10].mxu0  ;;  %2341 = vmatprep.subr.bf16.mxu1 %v7520_v40  ;;  %v1299_v60 = vpop.f32.mrb[11].mxu1  ;;  %v7569_v36 = vld [vmem:[%s8227_s6 + $0x1000] ss:$8 sps:$4 sm:$0xff]   ;;  %v7574_v40 = vld [vmem:[%s8227_s6 + $0xc14] ss:$8 sps:$4 sm:$0xff]  }
 0x19d   : > { %3339 = vmatprep.subr.bf16.mxu0 %v7523_v41  ;;  %v1397_v61 = vpop.f32.mrb[11].mxu0  ;;  %v7577_v41 = vld [vmem:[%s8227_s6 + $0x1014] ss:$8 sps:$4 sm:$0xff]   ;;  %v7580_v46 = vld [vmem:[%s8227_s6 + $0xc24] ss:$8 sps:$4 sm:$0xff]  }
 0x19e   : > { %v7583_v47 = vld [vmem:[%s8227_s6 + $0x1024] ss:$8 sps:$4 sm:$0xff]   ;;  %v7586_v56 = vld [vmem:[%s8227_s6 + $0xc34] ss:$8 sps:$4 sm:$0xff]  }
 0x19f   : > { %2342 = vmatpush1.bf16.msra.mxu1 %v7518_v48  ;;  %v7578_v48 = vld [vmem:[%s8227_s6 + $0xc20] ss:$8 sps:$4 sm:$0xff]   ;;  %v7589_v57 = vld [vmem:[%s8227_s6 + $0x1034] ss:$8 sps:$4 sm:$0xff]   ;;  %v7592_v60 = vld [vmem:[%s8227_s6 + $0xc44] ss:$8 sps:$4 sm:$0xff]  }
 0x1a0   : > { %3340 = vmatpush1.bf16.msra.mxu0 %v7521_v50  ;;  %2343 = vmatprep.subr.bf16.mxu1 %v7526_v58  ;;  %v7581_v50 = vld [vmem:[%s8227_s6 + $0x1020] ss:$8 sps:$4 sm:$0xff]   ;;  %v7584_v58 = vld [vmem:[%s8227_s6 + $0xc30] ss:$8 sps:$4 sm:$0xff]   ;;  %v7595_v61 = vld [vmem:[%s8227_s6 + $0x1044] ss:$8 sps:$4 sm:$0xff]  }
 0x1a1   : > { %3341 = vmatprep.subr.bf16.mxu0 %v7529_v59  ;;  %v7587_v59 = vld [vmem:[%s8227_s6 + $0x1030] ss:$8 sps:$4 sm:$0xff]  }
 0x1a3   : > { %2344 = vmatpush1.bf16.msra.mxu1 %v7524_v62  ;;  %v7590_v62 = vld [vmem:[%s8227_s6 + $0xc40] ss:$8 sps:$4 sm:$0xff]  }
 0x1a4   : > { %3342 = vmatpush1.bf16.msra.mxu0 %v7527_v63  ;;  %2345 = vmatprep.subr.bf16.mxu1 %v7532_v0  ;;  %v7593_v63 = vld [vmem:[%s8227_s6 + $0x1040] ss:$8 sps:$4 sm:$0xff]   ;;  %v7598_v0 = vld [vmem:[%s8227_s6 + $0xc54] ss:$8 sps:$4 sm:$0xff]  }
 0x1a5   : > { %3343 = vmatprep.subr.bf16.mxu0 %v7535_v1  ;;  %v7601_v1 = vld [vmem:[%s8227_s6 + $0x1054] ss:$8 sps:$4 sm:$0xff]  }
 0x1a7   : > { %2346 = vmatpush1.bf16.msra.mxu1 %v7530_v2  ;;  %v7596_v2 = vld [vmem:[%s8227_s6 + $0xc50] ss:$8 sps:$4 sm:$0xff]  }
 0x1a8   : > { %3344 = vmatpush1.bf16.msra.mxu0 %v7533_v3  ;;  %2347 = vmatprep.subr.bf16.mxu1 %v7538_v4  ;;  %v7599_v3 = vld [vmem:[%s8227_s6 + $0x1050] ss:$8 sps:$4 sm:$0xff]   ;;  %v7607_v4 = vld [vmem:[%s8227_s6 + $0x1064] ss:$8 sps:$4 sm:$0xff]  }
 0x1a9   : > { %3345 = vmatprep.subr.bf16.mxu0 %v7541_v5  ;;  %v7602_v5 = vld [vmem:[%s8227_s6 + $0xc60] ss:$8 sps:$4 sm:$0xff]  }
 0x1ab   : > { %2348 = vmatpush1.bf16.msra.mxu1 %v7536_v6  ;;  %v7605_v6 = vld [vmem:[%s8227_s6 + $0x1060] ss:$8 sps:$4 sm:$0xff]  }
 0x1ac   : > { %3346 = vmatpush1.bf16.msra.mxu0 %v7539_v7  ;;  %2349 = vmatprep.subr.bf16.mxu1 %v7544_v8  ;;  %v7610_v7 = vld [vmem:[%s8227_s6 + $0xc74] ss:$8 sps:$4 sm:$0xff]  }
 0x1ad   : > { %3347 = vmatprep.subr.bf16.mxu0 %v7547_v9  ;;  %v7613_v8 = vld [vmem:[%s8227_s6 + $0x1074] ss:$8 sps:$4 sm:$0xff]   ;;  %v7608_v9 = vld [vmem:[%s8227_s6 + $0xc70] ss:$8 sps:$4 sm:$0xff]  }
 0x1af   : > { %2350 = vmatpush1.bf16.msra.mxu1 %v7542_v12  ;;  %v7611_v12 = vld [vmem:[%s8227_s6 + $0x1070] ss:$8 sps:$4 sm:$0xff]  }
 0x1b0   : > { %3348 = vmatpush1.bf16.msra.mxu0 %v7545_v13  ;;  %2351 = vmatprep.subr.bf16.mxu1 %v7550_v14  ;;  %v7616_v13 = vld [vmem:[%s8227_s6 + $0xc84] ss:$8 sps:$4 sm:$0xff]  }
 0x1b1   : > { %3349 = vmatprep.subr.bf16.mxu0 %v7553_v15  ;;  %v7619_v14 = vld [vmem:[%s8227_s6 + $0x1084] ss:$8 sps:$4 sm:$0xff]   ;;  %v7614_v15 = vld [vmem:[%s8227_s6 + $0xc80] ss:$8 sps:$4 sm:$0xff]  }
 0x1b3   : > { %2352 = vmatpush1.bf16.msra.mxu1 %v7548_v16  ;;  %v7617_v16 = vld [vmem:[%s8227_s6 + $0x1080] ss:$8 sps:$4 sm:$0xff]  }
 0x1b4   : > { %3350 = vmatpush1.bf16.msra.mxu0 %v7551_v17  ;;  %2353 = vmatprep.subr.bf16.mxu1 %v7556_v19  ;;  %v7622_v17 = vld [vmem:[%s8227_s6 + $0xc94] ss:$8 sps:$4 sm:$0xff]  }
 0x1b5   : > { %3351 = vmatprep.subr.bf16.mxu0 %v7559_v20  ;;  %v7625_v19 = vld [vmem:[%s8227_s6 + $0x1094] ss:$8 sps:$4 sm:$0xff]   ;;  %v7620_v20 = vld [vmem:[%s8227_s6 + $0xc90] ss:$8 sps:$4 sm:$0xff]  }
 0x1b7   : > { %2354 = vmatpush1.bf16.msra.mxu1 %v7554_v22  ;;  %v7623_v22 = vld [vmem:[%s8227_s6 + $0x1090] ss:$8 sps:$4 sm:$0xff]  }
 0x1b8   : > { %3352 = vmatpush1.bf16.msra.mxu0 %v7557_v23  ;;  %2355 = vmatprep.subr.bf16.mxu1 %v7562_v24  ;;  %v7628_v23 = vld [vmem:[%s8227_s6 + $0xca4] ss:$8 sps:$4 sm:$0xff]  }
 0x1b9   : > { %3353 = vmatprep.subr.bf16.mxu0 %v7565_v25  ;;  %v7631_v24 = vld [vmem:[%s8227_s6 + $0x10a4] ss:$8 sps:$4 sm:$0xff]   ;;  %v7626_v25 = vld [vmem:[%s8227_s6 + $0xca0] ss:$8 sps:$4 sm:$0xff]  }
 0x1bb   : > { %2356 = vmatpush1.bf16.msra.mxu1 %v7560_v27  ;;  %v7629_v27 = vld [vmem:[%s8227_s6 + $0x10a0] ss:$8 sps:$4 sm:$0xff]  }
 0x1bc   : > { %3354 = vmatpush1.bf16.msra.mxu0 %v7563_v28  ;;  %4168 = vmatprep.subr.bf16.mxu1 %v7568_v29  ;;  %v7634_v28 = vld [vmem:[%s8227_s6 + $0xcb4] ss:$8 sps:$4 sm:$0xff]  }
 0x1bd   : > { %5166 = vmatprep.subr.bf16.mxu0 %v7571_v30  ;;  %v7637_v29 = vld [vmem:[%s8227_s6 + $0x10b4] ss:$8 sps:$4 sm:$0xff]   ;;  %v7632_v30 = vld [vmem:[%s8227_s6 + $0xcb0] ss:$8 sps:$4 sm:$0xff]  }
 0x1be   : > { %2358 = vmatmul.mubr.bf16.vlgmr.msra.gmra.mrb[12].mxu1 %v8445_v33 }
 0x1bf   : > { %3356 = vmatmul.mubr.bf16.vlgmr.msra.gmra.mrb[12].mxu0 %v8445_v33  ;;  %4169 = vmatpush1.bf16.msra.mxu1 %v7566_v35  ;;  %v7635_v35 = vld [vmem:[%s8227_s6 + $0x10b0] ss:$8 sps:$4 sm:$0xff]  }
 0x1c0   : > { %5167 = vmatpush1.bf16.msra.mxu0 %v7569_v36  ;;  %4170 = vmatprep.subr.bf16.mxu1 %v7574_v40  ;;  %v7640_v36 = vld [vmem:[%s8227_s6 + $0xcc4] ss:$8 sps:$4 sm:$0xff]  }
 0x1c1   : > { %5168 = vmatprep.subr.bf16.mxu0 %v7577_v41  ;;  %2367 = vmatprep.mubr.bf16.mxu1 %v8454_v43  ;;  %v7643_v40 = vld [vmem:[%s8227_s6 + $0x10c4] ss:$8 sps:$4 sm:$0xff]   ;;  %v7638_v41 = vld [vmem:[%s8227_s6 + $0xcc0] ss:$8 sps:$4 sm:$0xff]  }
 0x1c2   : > { %3365 = vmatprep.mubr.bf16.mxu0 %v8454_v43 }
 0x1c3   : > { %4171 = vmatpush1.bf16.msra.mxu1 %v7572_v44  ;;  %v7641_v44 = vld [vmem:[%s8227_s6 + $0x10c0] ss:$8 sps:$4 sm:$0xff]  }
 0x1c4   : > { %5169 = vmatpush1.bf16.msra.mxu0 %v7575_v45  ;;  %4172 = vmatprep.subr.bf16.mxu1 %v7580_v46  ;;  %v7646_v45 = vld [vmem:[%s8227_s6 + $0xcd4] ss:$8 sps:$4 sm:$0xff]  }
 0x1c5   : > { %5170 = vmatprep.subr.bf16.mxu0 %v7583_v47  ;;  %v7649_v46 = vld [vmem:[%s8227_s6 + $0x10d4] ss:$8 sps:$4 sm:$0xff]   ;;  %v7644_v47 = vld [vmem:[%s8227_s6 + $0xcd0] ss:$8 sps:$4 sm:$0xff]  }
 0x1c6   : > { %2368 = vmatmul.mubr.bf16.gmra.mrb[16].mxu1 %v8468_v54 }
 0x1c7   : > { %3366 = vmatmul.mubr.bf16.gmra.mrb[16].mxu0 %v8468_v54  ;;  %4173 = vmatpush1.bf16.msra.mxu1 %v7578_v48  ;;  %v7647_v48 = vld [vmem:[%s8227_s6 + $0x10d0] ss:$8 sps:$4 sm:$0xff]  }
 0x1c8   : > { %5171 = vmatpush1.bf16.msra.mxu0 %v7581_v50  ;;  %4174 = vmatprep.subr.bf16.mxu1 %v7586_v56  ;;  %v7652_v50 = vld [vmem:[%s8227_s6 + $0xce4] ss:$8 sps:$4 sm:$0xff]  }
 0x1c9   : > { %5172 = vmatprep.subr.bf16.mxu0 %v7589_v57  ;;  %4200 = vmatprep.mubr.bf16.mxu1 %v8297_v52  ;;  %v7655_v56 = vld [vmem:[%s8227_s6 + $0x10e4] ss:$8 sps:$4 sm:$0xff]   ;;  %v7650_v57 = vld [vmem:[%s8227_s6 + $0xce0] ss:$8 sps:$4 sm:$0xff]  }
 0x1ca   : > { %5198 = vmatprep.mubr.bf16.mxu0 %v8297_v52  ;;  %v7604_v52 = vld [vmem:[%s8227_s6 + $0xc64] ss:$8 sps:$4 sm:$0xff]  }
 0x1cb   : > { %4175 = vmatpush1.bf16.msra.mxu1 %v7584_v58  ;;  %v7653_v58 = vld [vmem:[%s8227_s6 + $0x10e0] ss:$8 sps:$4 sm:$0xff]  }
 0x1cc   : > { %5173 = vmatpush1.bf16.msra.mxu0 %v7587_v59  ;;  %4176 = vmatprep.subr.bf16.mxu1 %v7592_v60  ;;  %v7658_v59 = vld [vmem:[%s8227_s6 + $0xcf4] ss:$8 sps:$4 sm:$0xff]  }
 0x1cd   : > { %5174 = vmatprep.subr.bf16.mxu0 %v7595_v61  ;;  %v7661_v60 = vld [vmem:[%s8227_s6 + $0x10f4] ss:$8 sps:$4 sm:$0xff]   ;;  %v7656_v61 = vld [vmem:[%s8227_s6 + $0xcf0] ss:$8 sps:$4 sm:$0xff]  }
 0x1cf   : > { %4177 = vmatpush1.bf16.msra.mxu1 %v7590_v62  ;;  %v7659_v62 = vld [vmem:[%s8227_s6 + $0x10f0] ss:$8 sps:$4 sm:$0xff]  }
 0x1d0   : > { %5175 = vmatpush1.bf16.msra.mxu0 %v7593_v63  ;;  %4178 = vmatprep.subr.bf16.mxu1 %v7598_v0  ;;  %v7664_v63 = vld [vmem:[%s8227_s6 + $0xd04] ss:$8 sps:$4 sm:$0xff]  }
 0x1d1   : > { %5176 = vmatprep.subr.bf16.mxu0 %v7601_v1  ;;  %v7667_v0 = vld [vmem:[%s8227_s6 + $0x1104] ss:$8 sps:$4 sm:$0xff]   ;;  %v7662_v1 = vld [vmem:[%s8227_s6 + $0xd00] ss:$8 sps:$4 sm:$0xff]  }
 0x1d3   : > { %4179 = vmatpush1.bf16.msra.mxu1 %v7596_v2  ;;  %v7665_v2 = vld [vmem:[%s8227_s6 + $0x1100] ss:$8 sps:$4 sm:$0xff]  }
 0x1d4   : > { %5177 = vmatpush1.bf16.msra.mxu0 %v7599_v3  ;;  %4180 = vmatprep.subr.bf16.mxu1 %v7604_v52  ;;  %v7670_v3 = vld [vmem:[%s8227_s6 + $0xd14] ss:$8 sps:$4 sm:$0xff]  }
 0x1d5   : > { %5178 = vmatprep.subr.bf16.mxu0 %v7607_v4  ;;  %v7673_v52 = vld [vmem:[%s8227_s6 + $0x1114] ss:$8 sps:$4 sm:$0xff]   ;;  %v7668_v4 = vld [vmem:[%s8227_s6 + $0xd10] ss:$8 sps:$4 sm:$0xff]  }
 0x1d7   : > { %4181 = vmatpush1.bf16.msra.mxu1 %v7602_v5  ;;  %v7671_v5 = vld [vmem:[%s8227_s6 + $0x1110] ss:$8 sps:$4 sm:$0xff]  }
 0x1d8   : > { %5179 = vmatpush1.bf16.msra.mxu0 %v7605_v6  ;;  %4182 = vmatprep.subr.bf16.mxu1 %v7610_v7  ;;  %v7676_v6 = vld [vmem:[%s8227_s6 + $0xd24] ss:$8 sps:$4 sm:$0xff]  }
 0x1d9   : > { %5180 = vmatprep.subr.bf16.mxu0 %v7613_v8  ;;  %v7679_v7 = vld [vmem:[%s8227_s6 + $0x1124] ss:$8 sps:$4 sm:$0xff]   ;;  %v7677_v8 = vld [vmem:[%s8227_s6 + $0x1120] ss:$8 sps:$4 sm:$0xff]  }
 0x1db   : > { %4183 = vmatpush1.bf16.msra.mxu1 %v7608_v9  ;;  %v7682_v9 = vld [vmem:[%s8227_s6 + $0xd34] ss:$8 sps:$4 sm:$0xff]  }
 0x1dc   : > { %5181 = vmatpush1.bf16.msra.mxu0 %v7611_v12  ;;  %4184 = vmatprep.subr.bf16.mxu1 %v7616_v13  ;;  %v7685_v12 = vld [vmem:[%s8227_s6 + $0x1134] ss:$8 sps:$4 sm:$0xff]   ;;  %v7683_v13 = vld [vmem:[%s8227_s6 + $0x1130] ss:$8 sps:$4 sm:$0xff]  }
 0x1dd   : > { %5182 = vmatprep.subr.bf16.mxu0 %v7619_v14  ;;  %v7688_v14 = vld [vmem:[%s8227_s6 + $0xd44] ss:$8 sps:$4 sm:$0xff]  }
 0x1df   : > { %4185 = vmatpush1.bf16.msra.mxu1 %v7614_v15  ;;  %v7691_v15 = vld [vmem:[%s8227_s6 + $0x1144] ss:$8 sps:$4 sm:$0xff]  }
 0x1e0   : > { %5183 = vmatpush1.bf16.msra.mxu0 %v7617_v16  ;;  %4186 = vmatprep.subr.bf16.mxu1 %v7622_v17  ;;  %v7689_v16 = vld [vmem:[%s8227_s6 + $0x1140] ss:$8 sps:$4 sm:$0xff]   ;;  %v7694_v17 = vld [vmem:[%s8227_s6 + $0xd54] ss:$8 sps:$4 sm:$0xff]  }
 0x1e1   : > { %5184 = vmatprep.subr.bf16.mxu0 %v7625_v19  ;;  %v7697_v19 = vld [vmem:[%s8227_s6 + $0x1154] ss:$8 sps:$4 sm:$0xff]  }
 0x1e3   : > { %4187 = vmatpush1.bf16.msra.mxu1 %v7620_v20  ;;  %v7692_v20 = vld [vmem:[%s8227_s6 + $0xd50] ss:$8 sps:$4 sm:$0xff]  }
 0x1e4   : > { %5185 = vmatpush1.bf16.msra.mxu0 %v7623_v22  ;;  %4188 = vmatprep.subr.bf16.mxu1 %v7628_v23  ;;  %v7695_v22 = vld [vmem:[%s8227_s6 + $0x1150] ss:$8 sps:$4 sm:$0xff]   ;;  %v7703_v23 = vld [vmem:[%s8227_s6 + $0x1164] ss:$8 sps:$4 sm:$0xff]  }
 0x1e5   : > { %5186 = vmatprep.subr.bf16.mxu0 %v7631_v24  ;;  %v7698_v24 = vld [vmem:[%s8227_s6 + $0xd60] ss:$8 sps:$4 sm:$0xff]  }
 0x1e7   : > { %4189 = vmatpush1.bf16.msra.mxu1 %v7626_v25  ;;  %v7701_v25 = vld [vmem:[%s8227_s6 + $0x1160] ss:$8 sps:$4 sm:$0xff]  }
 0x1e8   : > { %5187 = vmatpush1.bf16.msra.mxu0 %v7629_v27  ;;  %4190 = vmatprep.subr.bf16.mxu1 %v7634_v28  ;;  %v7706_v27 = vld [vmem:[%s8227_s6 + $0xd74] ss:$8 sps:$4 sm:$0xff]  }
 0x1e9   : > { %5188 = vmatprep.subr.bf16.mxu0 %v7637_v29  ;;  %v7709_v28 = vld [vmem:[%s8227_s6 + $0x1174] ss:$8 sps:$4 sm:$0xff]   ;;  %v7704_v29 = vld [vmem:[%s8227_s6 + $0xd70] ss:$8 sps:$4 sm:$0xff]  }
 0x1eb   : > { %4191 = vmatpush1.bf16.msra.mxu1 %v7632_v30  ;;  %v7707_v30 = vld [vmem:[%s8227_s6 + $0x1170] ss:$8 sps:$4 sm:$0xff]  }
 0x1ec   : > { %5189 = vmatpush1.bf16.msra.mxu0 %v7635_v35  ;;  %4192 = vmatprep.subr.bf16.mxu1 %v7640_v36  ;;  %v7712_v35 = vld [vmem:[%s8227_s6 + $0xd84] ss:$8 sps:$4 sm:$0xff]  }
 0x1ed   : > { %5190 = vmatprep.subr.bf16.mxu0 %v7643_v40  ;;  %v7715_v36 = vld [vmem:[%s8227_s6 + $0x1184] ss:$8 sps:$4 sm:$0xff]   ;;  %v7710_v40 = vld [vmem:[%s8227_s6 + $0xd80] ss:$8 sps:$4 sm:$0xff]  }
 0x1ef   : > { %4193 = vmatpush1.bf16.msra.mxu1 %v7638_v41  ;;  %v7713_v41 = vld [vmem:[%s8227_s6 + $0x1180] ss:$8 sps:$4 sm:$0xff]  }
 0x1f0   : > { %5191 = vmatpush1.bf16.msra.mxu0 %v7641_v44  ;;  %4194 = vmatprep.subr.bf16.mxu1 %v7646_v45  ;;  %v7718_v44 = vld [vmem:[%s8227_s6 + $0xd94] ss:$8 sps:$4 sm:$0xff]  }
 0x1f1   : > { %5192 = vmatprep.subr.bf16.mxu0 %v7649_v46  ;;  %v7721_v45 = vld [vmem:[%s8227_s6 + $0x1194] ss:$8 sps:$4 sm:$0xff]   ;;  %v7716_v46 = vld [vmem:[%s8227_s6 + $0xd90] ss:$8 sps:$4 sm:$0xff]  }
 0x1f3   : > { %4195 = vmatpush1.bf16.msra.mxu1 %v7644_v47  ;;  %v7719_v47 = vld [vmem:[%s8227_s6 + $0x1190] ss:$8 sps:$4 sm:$0xff]  }
 0x1f4   : > { %5193 = vmatpush1.bf16.msra.mxu0 %v7647_v48  ;;  %4196 = vmatprep.subr.bf16.mxu1 %v7652_v50  ;;  %v7724_v48 = vld [vmem:[%s8227_s6 + $0xda4] ss:$8 sps:$4 sm:$0xff]  }
 0x1f5   : > { %5194 = vmatprep.subr.bf16.mxu0 %v7655_v56  ;;  %v7727_v50 = vld [vmem:[%s8227_s6 + $0x11a4] ss:$8 sps:$4 sm:$0xff]   ;;  %v7722_v56 = vld [vmem:[%s8227_s6 + $0xda0] ss:$8 sps:$4 sm:$0xff]  }
 0x1f7   : > { %4197 = vmatpush1.bf16.msra.mxu1 %v7650_v57  ;;  %v7725_v57 = vld [vmem:[%s8227_s6 + $0x11a0] ss:$8 sps:$4 sm:$0xff]  }
 0x1f8   : > { %5195 = vmatpush1.bf16.msra.mxu0 %v7653_v58  ;;  %4198 = vmatprep.subr.bf16.mxu1 %v7658_v59  ;;  %v7730_v58 = vld [vmem:[%s8227_s6 + $0xdb4] ss:$8 sps:$4 sm:$0xff]  }
 0x1f9   : > { %5196 = vmatprep.subr.bf16.mxu0 %v7661_v60  ;;  %v7733_v59 = vld [vmem:[%s8227_s6 + $0x11b4] ss:$8 sps:$4 sm:$0xff]   ;;  %v7728_v60 = vld [vmem:[%s8227_s6 + $0xdb0] ss:$8 sps:$4 sm:$0xff]  }
 0x1fb   : > { %4199 = vmatpush1.bf16.msra.mxu1 %v7656_v61  ;;  %v7731_v61 = vld [vmem:[%s8227_s6 + $0x11b0] ss:$8 sps:$4 sm:$0xff]  }
 0x1fc   : > { %5197 = vmatpush1.bf16.msra.mxu0 %v7659_v62  ;;  %4219 = vmatprep.subr.bf16.mxu1 %v7664_v63  ;;  %v7736_v62 = vld [vmem:[%s8227_s6 + $0xdc4] ss:$8 sps:$4 sm:$0xff]  }
 0x1fd   : > { %5217 = vmatprep.subr.bf16.mxu0 %v7667_v0  ;;  %v7739_v63 = vld [vmem:[%s8227_s6 + $0x11c4] ss:$8 sps:$4 sm:$0xff]   ;;  %v7734_v0 = vld [vmem:[%s8227_s6 + $0xdc0] ss:$8 sps:$4 sm:$0xff]  }
 0x1fe   : > { %4201 = vmatmul.mubr.bf16.vlgmr.msra.gmra.mrb[20].mxu1 %v8323_v10 }
 0x1ff   : > { %5199 = vmatmul.mubr.bf16.vlgmr.msra.gmra.mrb[20].mxu0 %v8323_v10  ;;  %4220 = vmatpush1.bf16.msra.mxu1 %v7662_v1  ;;  %v7674_v10 = vld [vmem:[%s8227_s6 + $0xd20] ss:$8 sps:$4 sm:$0xff]  }
 0x200   : > { %5218 = vmatpush1.bf16.msra.mxu0 %v7665_v2  ;;  %4221 = vmatprep.subr.bf16.mxu1 %v7670_v3  ;;  %v7737_v1 = vld [vmem:[%s8227_s6 + $0x11c0] ss:$8 sps:$4 sm:$0xff]   ;;  %v7742_v2 = vld [vmem:[%s8227_s6 + $0xdd4] ss:$8 sps:$4 sm:$0xff]  }
 0x201   : > { %5219 = vmatprep.subr.bf16.mxu0 %v7673_v52  ;;  %4210 = vmatprep.mubr.bf16.mxu1 %v8356_v32  ;;  %v7745_v3 = vld [vmem:[%s8227_s6 + $0x11d4] ss:$8 sps:$4 sm:$0xff]   ;;  %v7740_v52 = vld [vmem:[%s8227_s6 + $0xdd0] ss:$8 sps:$4 sm:$0xff]  }
 0x202   : > { %5208 = vmatprep.mubr.bf16.mxu0 %v8356_v32  ;;  %v7680_v32 = vld [vmem:[%s8227_s6 + $0xd30] ss:$8 sps:$4 sm:$0xff]  }
 0x203   : > { %4222 = vmatpush1.bf16.msra.mxu1 %v7668_v4  ;;  %v7743_v4 = vld [vmem:[%s8227_s6 + $0x11d0] ss:$8 sps:$4 sm:$0xff]  }
 0x204   : > { %5220 = vmatpush1.bf16.msra.mxu0 %v7671_v5  ;;  %4223 = vmatprep.subr.bf16.mxu1 %v7676_v6  ;;  %v7748_v5 = vld [vmem:[%s8227_s6 + $0xde4] ss:$8 sps:$4 sm:$0xff]  }
 0x205   : > { %5221 = vmatprep.subr.bf16.mxu0 %v7679_v7  ;;  %v7751_v6 = vld [vmem:[%s8227_s6 + $0x11e4] ss:$8 sps:$4 sm:$0xff]   ;;  %v7746_v7 = vld [vmem:[%s8227_s6 + $0xde0] ss:$8 sps:$4 sm:$0xff]  }
 0x206   : > { %4211 = vmatmul.mubr.bf16.gmra.mrb[24].mxu1 %v8362_v37 }
 0x207   : > { %5209 = vmatmul.mubr.bf16.gmra.mrb[24].mxu0 %v8362_v37  ;;  %4224 = vmatpush1.bf16.msra.mxu1 %v7674_v10  ;;  %v7686_v37 = vld [vmem:[%s8227_s6 + $0xd40] ss:$8 sps:$4 sm:$0xff]  }
 0x208   : > { %5222 = vmatpush1.bf16.msra.mxu0 %v7677_v8  ;;  %4225 = vmatprep.subr.bf16.mxu1 %v7682_v9  ;;  %v7749_v10 = vld [vmem:[%s8227_s6 + $0x11e0] ss:$8 sps:$4 sm:$0xff]   ;;  %v7754_v8 = vld [vmem:[%s8227_s6 + $0xdf4] ss:$8 sps:$4 sm:$0xff]  }
 0x209   : > { %5223 = vmatprep.subr.bf16.mxu0 %v7685_v12  ;;  %4251 = vmatprep.mubr.bf16.mxu1 %v8389_v49  ;;  %v7757_v9 = vld [vmem:[%s8227_s6 + $0x11f4] ss:$8 sps:$4 sm:$0xff]   ;;  %v7752_v12 = vld [vmem:[%s8227_s6 + $0xdf0] ss:$8 sps:$4 sm:$0xff]  }
 0x20a   : > { %5249 = vmatprep.mubr.bf16.mxu0 %v8389_v49  ;;  %v7700_v49 = vld [vmem:[%s8227_s6 + $0xd64] ss:$8 sps:$4 sm:$0xff]  }
 0x20b   : > { %4226 = vmatpush1.bf16.msra.mxu1 %v7680_v32  ;;  %v7755_v32 = vld [vmem:[%s8227_s6 + $0x11f0] ss:$8 sps:$4 sm:$0xff]  }
 0x20c   : > { %5224 = vmatpush1.bf16.msra.mxu0 %v7683_v13  ;;  %4227 = vmatprep.subr.bf16.mxu1 %v7688_v14  ;;  %v7760_v13 = vld [vmem:[%s8227_s6 + $0xe04] ss:$8 sps:$4 sm:$0xff]  }
 0x20d   : > { %5225 = vmatprep.subr.bf16.mxu0 %v7691_v15  ;;  %v7763_v14 = vld [vmem:[%s8227_s6 + $0x1204] ss:$8 sps:$4 sm:$0xff]   ;;  %v7758_v15 = vld [vmem:[%s8227_s6 + $0xe00] ss:$8 sps:$4 sm:$0xff]  }
 0x20f   : > { %4228 = vmatpush1.bf16.msra.mxu1 %v7686_v37  ;;  %v7761_v37 = vld [vmem:[%s8227_s6 + $0x1200] ss:$8 sps:$4 sm:$0xff]  }
 0x210   : > { %5226 = vmatpush1.bf16.msra.mxu0 %v7689_v16  ;;  %4229 = vmatprep.subr.bf16.mxu1 %v7694_v17  ;;  %v7766_v16 = vld [vmem:[%s8227_s6 + $0xe14] ss:$8 sps:$4 sm:$0xff]  }
 0x211   : > { %5227 = vmatprep.subr.bf16.mxu0 %v7697_v19  ;;  %v7769_v17 = vld [vmem:[%s8227_s6 + $0x1214] ss:$8 sps:$4 sm:$0xff]   ;;  %v7764_v19 = vld [vmem:[%s8227_s6 + $0xe10] ss:$8 sps:$4 sm:$0xff]  }
 0x213   : > { %4230 = vmatpush1.bf16.msra.mxu1 %v7692_v20  ;;  %v7767_v20 = vld [vmem:[%s8227_s6 + $0x1210] ss:$8 sps:$4 sm:$0xff]  }
 0x214   : > { %5228 = vmatpush1.bf16.msra.mxu0 %v7695_v22  ;;  %4231 = vmatprep.subr.bf16.mxu1 %v7700_v49  ;;  %v7772_v22 = vld [vmem:[%s8227_s6 + $0xe24] ss:$8 sps:$4 sm:$0xff]  }
 0x215   : > { %5229 = vmatprep.subr.bf16.mxu0 %v7703_v23  ;;  %v7775_v49 = vld [vmem:[%s8227_s6 + $0x1224] ss:$8 sps:$4 sm:$0xff]   ;;  %v7773_v23 = vld [vmem:[%s8227_s6 + $0x1220] ss:$8 sps:$4 sm:$0xff]  }
 0x217   : > { %4232 = vmatpush1.bf16.msra.mxu1 %v7698_v24  ;;  %v7778_v24 = vld [vmem:[%s8227_s6 + $0xe34] ss:$8 sps:$4 sm:$0xff]  }
 0x218   : > { %5230 = vmatpush1.bf16.msra.mxu0 %v7701_v25  ;;  %4233 = vmatprep.subr.bf16.mxu1 %v7706_v27  ;;  %v7781_v25 = vld [vmem:[%s8227_s6 + $0x1234] ss:$8 sps:$4 sm:$0xff]   ;;  %v7779_v27 = vld [vmem:[%s8227_s6 + $0x1230] ss:$8 sps:$4 sm:$0xff]  }
 0x219   : > { %5231 = vmatprep.subr.bf16.mxu0 %v7709_v28  ;;  %v7784_v28 = vld [vmem:[%s8227_s6 + $0xe44] ss:$8 sps:$4 sm:$0xff]  }
 0x21b   : > { %4234 = vmatpush1.bf16.msra.mxu1 %v7704_v29  ;;  %v7787_v29 = vld [vmem:[%s8227_s6 + $0x1244] ss:$8 sps:$4 sm:$0xff]  }
 0x21c   : > { %5232 = vmatpush1.bf16.msra.mxu0 %v7707_v30  ;;  %4235 = vmatprep.subr.bf16.mxu1 %v7712_v35  ;;  %v7785_v30 = vld [vmem:[%s8227_s6 + $0x1240] ss:$8 sps:$4 sm:$0xff]   ;;  %v7790_v35 = vld [vmem:[%s8227_s6 + $0xe54] ss:$8 sps:$4 sm:$0xff]  }
 0x21d   : > { %5233 = vmatprep.subr.bf16.mxu0 %v7715_v36  ;;  %v7793_v36 = vld [vmem:[%s8227_s6 + $0x1254] ss:$8 sps:$4 sm:$0xff]  }
 0x21f   : > { %4236 = vmatpush1.bf16.msra.mxu1 %v7710_v40  ;;  %v7788_v40 = vld [vmem:[%s8227_s6 + $0xe50] ss:$8 sps:$4 sm:$0xff]  }
 0x220   : > { %5234 = vmatpush1.bf16.msra.mxu0 %v7713_v41  ;;  %4237 = vmatprep.subr.bf16.mxu1 %v7718_v44  ;;  %v7791_v41 = vld [vmem:[%s8227_s6 + $0x1250] ss:$8 sps:$4 sm:$0xff]   ;;  %v7799_v44 = vld [vmem:[%s8227_s6 + $0x1264] ss:$8 sps:$4 sm:$0xff]  }
 0x221   : > { %5235 = vmatprep.subr.bf16.mxu0 %v7721_v45  ;;  %v7794_v45 = vld [vmem:[%s8227_s6 + $0xe60] ss:$8 sps:$4 sm:$0xff]  }
 0x223   : > { %4238 = vmatpush1.bf16.msra.mxu1 %v7716_v46  ;;  %v7797_v46 = vld [vmem:[%s8227_s6 + $0x1260] ss:$8 sps:$4 sm:$0xff]  }
 0x224   : > { %5236 = vmatpush1.bf16.msra.mxu0 %v7719_v47  ;;  %4239 = vmatprep.subr.bf16.mxu1 %v7724_v48  ;;  %v7802_v47 = vld [vmem:[%s8227_s6 + $0xe74] ss:$8 sps:$4 sm:$0xff]  }
 0x225   : > { %5237 = vmatprep.subr.bf16.mxu0 %v7727_v50  ;;  %v7805_v48 = vld [vmem:[%s8227_s6 + $0x1274] ss:$8 sps:$4 sm:$0xff]   ;;  %v7800_v50 = vld [vmem:[%s8227_s6 + $0xe70] ss:$8 sps:$4 sm:$0xff]  }
 0x227   : > { %4240 = vmatpush1.bf16.msra.mxu1 %v7722_v56  ;;  %v7803_v56 = vld [vmem:[%s8227_s6 + $0x1270] ss:$8 sps:$4 sm:$0xff]  }
 0x228   : > { %5238 = vmatpush1.bf16.msra.mxu0 %v7725_v57  ;;  %4241 = vmatprep.subr.bf16.mxu1 %v7730_v58  ;;  %v7808_v57 = vld [vmem:[%s8227_s6 + $0xe84] ss:$8 sps:$4 sm:$0xff]  }
 0x229   : > { %5239 = vmatprep.subr.bf16.mxu0 %v7733_v59  ;;  %v7811_v58 = vld [vmem:[%s8227_s6 + $0x1284] ss:$8 sps:$4 sm:$0xff]   ;;  %v7806_v59 = vld [vmem:[%s8227_s6 + $0xe80] ss:$8 sps:$4 sm:$0xff]  }
 0x22b   : > { %4242 = vmatpush1.bf16.msra.mxu1 %v7728_v60  ;;  %v7809_v60 = vld [vmem:[%s8227_s6 + $0x1280] ss:$8 sps:$4 sm:$0xff]  }
 0x22c   : > { %5240 = vmatpush1.bf16.msra.mxu0 %v7731_v61  ;;  %4243 = vmatprep.subr.bf16.mxu1 %v7736_v62  ;;  %v7814_v61 = vld [vmem:[%s8227_s6 + $0xe94] ss:$8 sps:$4 sm:$0xff]  }
 0x22d   : > { %5241 = vmatprep.subr.bf16.mxu0 %v7739_v63  ;;  %v7817_v62 = vld [vmem:[%s8227_s6 + $0x1294] ss:$8 sps:$4 sm:$0xff]   ;;  %v7812_v63 = vld [vmem:[%s8227_s6 + $0xe90] ss:$8 sps:$4 sm:$0xff]  }
 0x22f   : > { %4244 = vmatpush1.bf16.msra.mxu1 %v7734_v0  ;;  %v7815_v0 = vld [vmem:[%s8227_s6 + $0x1290] ss:$8 sps:$4 sm:$0xff]  }
 0x230   : > { %5242 = vmatpush1.bf16.msra.mxu0 %v7737_v1  ;;  %4245 = vmatprep.subr.bf16.mxu1 %v7742_v2  ;;  %v7820_v1 = vld [vmem:[%s8227_s6 + $0xea4] ss:$8 sps:$4 sm:$0xff]  }
 0x231   : > { %5243 = vmatprep.subr.bf16.mxu0 %v7745_v3  ;;  %v7823_v2 = vld [vmem:[%s8227_s6 + $0x12a4] ss:$8 sps:$4 sm:$0xff]   ;;  %v7818_v3 = vld [vmem:[%s8227_s6 + $0xea0] ss:$8 sps:$4 sm:$0xff]  }
 0x233   : > { %4246 = vmatpush1.bf16.msra.mxu1 %v7740_v52  ;;  %v7821_v52 = vld [vmem:[%s8227_s6 + $0x12a0] ss:$8 sps:$4 sm:$0xff]  }
 0x234   : > { %5244 = vmatpush1.bf16.msra.mxu0 %v7743_v4  ;;  %4247 = vmatprep.subr.bf16.mxu1 %v7748_v5  ;;  %v7826_v4 = vld [vmem:[%s8227_s6 + $0xeb4] ss:$8 sps:$4 sm:$0xff]  }
 0x235   : > { %5245 = vmatprep.subr.bf16.mxu0 %v7751_v6  ;;  %v7829_v5 = vld [vmem:[%s8227_s6 + $0x12b4] ss:$8 sps:$4 sm:$0xff]   ;;  %v7824_v6 = vld [vmem:[%s8227_s6 + $0xeb0] ss:$8 sps:$4 sm:$0xff]  }
 0x237   : > { %4248 = vmatpush1.bf16.msra.mxu1 %v7746_v7  ;;  %v7827_v7 = vld [vmem:[%s8227_s6 + $0x12b0] ss:$8 sps:$4 sm:$0xff]  }
 0x238   : > { %5246 = vmatpush1.bf16.msra.mxu0 %v7749_v10  ;;  %4249 = vmatprep.subr.bf16.mxu1 %v7754_v8  ;;  %v7832_v10 = vld [vmem:[%s8227_s6 + $0xec4] ss:$8 sps:$4 sm:$0xff]  }
 0x239   : > { %5247 = vmatprep.subr.bf16.mxu0 %v7757_v9  ;;  %v7835_v8 = vld [vmem:[%s8227_s6 + $0x12c4] ss:$8 sps:$4 sm:$0xff]   ;;  %v7830_v9 = vld [vmem:[%s8227_s6 + $0xec0] ss:$8 sps:$4 sm:$0xff]  }
 0x23b   : > { %4250 = vmatpush1.bf16.msra.mxu1 %v7752_v12  ;;  %v7833_v12 = vld [vmem:[%s8227_s6 + $0x12c0] ss:$8 sps:$4 sm:$0xff]  }
 0x23c   : > { %5248 = vmatpush1.bf16.msra.mxu0 %v7755_v32  ;;  %4270 = vmatprep.subr.bf16.mxu1 %v7760_v13  ;;  %v7838_v32 = vld [vmem:[%s8227_s6 + $0xed4] ss:$8 sps:$4 sm:$0xff]  }
 0x23d   : > { %5268 = vmatprep.subr.bf16.mxu0 %v7763_v14  ;;  %v7841_v13 = vld [vmem:[%s8227_s6 + $0x12d4] ss:$8 sps:$4 sm:$0xff]   ;;  %v7836_v14 = vld [vmem:[%s8227_s6 + $0xed0] ss:$8 sps:$4 sm:$0xff]  }
 0x23e   : > { %4252 = vmatmul.mubr.bf16.vlgmr.msra.gmra.mrb[20].mxu1 %v8441_v31 }
 0x23f   : > { %5250 = vmatmul.mubr.bf16.vlgmr.msra.gmra.mrb[20].mxu0 %v8441_v31  ;;  %4271 = vmatpush1.bf16.msra.mxu1 %v7758_v15  ;;  %v7770_v31 = vld [vmem:[%s8227_s6 + $0xe20] ss:$8 sps:$4 sm:$0xff]   ;;  %v7839_v15 = vld [vmem:[%s8227_s6 + $0x12d0] ss:$8 sps:$4 sm:$0xff]  }
 0x240   : > { %5269 = vmatpush1.bf16.msra.mxu0 %v7761_v37  ;;  %4272 = vmatprep.subr.bf16.mxu1 %v7766_v16  ;;  %v7844_v37 = vld [vmem:[%s8227_s6 + $0xee4] ss:$8 sps:$4 sm:$0xff]  }
 0x241   : > { %5270 = vmatprep.subr.bf16.mxu0 %v7769_v17  ;;  %4261 = vmatprep.mubr.bf16.mxu1 %v8452_v42  ;;  %v7847_v16 = vld [vmem:[%s8227_s6 + $0x12e4] ss:$8 sps:$4 sm:$0xff]   ;;  %v7842_v17 = vld [vmem:[%s8227_s6 + $0xee0] ss:$8 sps:$4 sm:$0xff]  }
 0x242   : > { %5259 = vmatprep.mubr.bf16.mxu0 %v8452_v42  ;;  %v7776_v42 = vld [vmem:[%s8227_s6 + $0xe30] ss:$8 sps:$4 sm:$0xff]  }
 0x243   : > { %4273 = vmatpush1.bf16.msra.mxu1 %v7764_v19  ;;  %v7845_v19 = vld [vmem:[%s8227_s6 + $0x12e0] ss:$8 sps:$4 sm:$0xff]  }
 0x244   : > { %5271 = vmatpush1.bf16.msra.mxu0 %v7767_v20  ;;  %4274 = vmatprep.subr.bf16.mxu1 %v7772_v22  ;;  %v7850_v20 = vld [vmem:[%s8227_s6 + $0xef4] ss:$8 sps:$4 sm:$0xff]  }
 0x245   : > { %5272 = vmatprep.subr.bf16.mxu0 %v7775_v49  ;;  %v7853_v22 = vld [vmem:[%s8227_s6 + $0x12f4] ss:$8 sps:$4 sm:$0xff]   ;;  %v7848_v49 = vld [vmem:[%s8227_s6 + $0xef0] ss:$8 sps:$4 sm:$0xff]  }
 0x246   : > { %4262 = vmatmul.mubr.bf16.gmra.mrb[24].mxu1 %v8466_v53 }
 0x247   : > { %5260 = vmatmul.mubr.bf16.gmra.mrb[24].mxu0 %v8466_v53  ;;  %4275 = vmatpush1.bf16.msra.mxu1 %v7770_v31  ;;  %v7782_v53 = vld [vmem:[%s8227_s6 + $0xe40] ss:$8 sps:$4 sm:$0xff]   ;;  %v7851_v31 = vld [vmem:[%s8227_s6 + $0x12f0] ss:$8 sps:$4 sm:$0xff]  }
 0x248   : > { %5273 = vmatpush1.bf16.msra.mxu0 %v7773_v23  ;;  %4276 = vmatprep.subr.bf16.mxu1 %v7778_v24  ;;  %v7856_v23 = vld [vmem:[%s8227_s6 + $0xf04] ss:$8 sps:$4 sm:$0xff]  }
 0x249   : > { %5274 = vmatprep.subr.bf16.mxu0 %v7781_v25  ;;  %4302 = vmatprep.mubr.bf16.mxu1 %v8302_v55  ;;  %v7859_v24 = vld [vmem:[%s8227_s6 + $0x1304] ss:$8 sps:$4 sm:$0xff]   ;;  %v7854_v25 = vld [vmem:[%s8227_s6 + $0xf00] ss:$8 sps:$4 sm:$0xff]  }
 0x24a   : > { %5300 = vmatprep.mubr.bf16.mxu0 %v8302_v55  ;;  %v7796_v55 = vld [vmem:[%s8227_s6 + $0xe64] ss:$8 sps:$4 sm:$0xff]  }
 0x24b   : > { %4277 = vmatpush1.bf16.msra.mxu1 %v7776_v42  ;;  %v7857_v42 = vld [vmem:[%s8227_s6 + $0x1300] ss:$8 sps:$4 sm:$0xff]  }
 0x24c   : > { %5275 = vmatpush1.bf16.msra.mxu0 %v7779_v27  ;;  %4278 = vmatprep.subr.bf16.mxu1 %v7784_v28  ;;  %v7862_v27 = vld [vmem:[%s8227_s6 + $0xf14] ss:$8 sps:$4 sm:$0xff]  }
 0x24d   : > { %5276 = vmatprep.subr.bf16.mxu0 %v7787_v29  ;;  %v7865_v28 = vld [vmem:[%s8227_s6 + $0x1314] ss:$8 sps:$4 sm:$0xff]   ;;  %v7860_v29 = vld [vmem:[%s8227_s6 + $0xf10] ss:$8 sps:$4 sm:$0xff]  }
 0x24f   : > { %4279 = vmatpush1.bf16.msra.mxu1 %v7782_v53  ;;  %v7863_v53 = vld [vmem:[%s8227_s6 + $0x1310] ss:$8 sps:$4 sm:$0xff]  }
 0x250   : > { %5277 = vmatpush1.bf16.msra.mxu0 %v7785_v30  ;;  %4280 = vmatprep.subr.bf16.mxu1 %v7790_v35  ;;  %v7868_v30 = vld [vmem:[%s8227_s6 + $0xf24] ss:$8 sps:$4 sm:$0xff]  }
 0x251   : > { %5278 = vmatprep.subr.bf16.mxu0 %v7793_v36  ;;  %v7871_v35 = vld [vmem:[%s8227_s6 + $0x1324] ss:$8 sps:$4 sm:$0xff]   ;;  %v7869_v36 = vld [vmem:[%s8227_s6 + $0x1320] ss:$8 sps:$4 sm:$0xff]  }
 0x253   : > { %4281 = vmatpush1.bf16.msra.mxu1 %v7788_v40  ;;  %v7874_v40 = vld [vmem:[%s8227_s6 + $0xf34] ss:$8 sps:$4 sm:$0xff]  }
 0x254   : > { %5279 = vmatpush1.bf16.msra.mxu0 %v7791_v41  ;;  %4282 = vmatprep.subr.bf16.mxu1 %v7796_v55  ;;  %v7877_v41 = vld [vmem:[%s8227_s6 + $0x1334] ss:$8 sps:$4 sm:$0xff]   ;;  %v7875_v55 = vld [vmem:[%s8227_s6 + $0x1330] ss:$8 sps:$4 sm:$0xff]  }
 0x255   : > { %5280 = vmatprep.subr.bf16.mxu0 %v7799_v44  ;;  %v7880_v44 = vld [vmem:[%s8227_s6 + $0xf44] ss:$8 sps:$4 sm:$0xff]  }
 0x257   : > { %4283 = vmatpush1.bf16.msra.mxu1 %v7794_v45  ;;  %v7883_v45 = vld [vmem:[%s8227_s6 + $0x1344] ss:$8 sps:$4 sm:$0xff]  }
 0x258   : > { %5281 = vmatpush1.bf16.msra.mxu0 %v7797_v46  ;;  %4284 = vmatprep.subr.bf16.mxu1 %v7802_v47  ;;  %v7881_v46 = vld [vmem:[%s8227_s6 + $0x1340] ss:$8 sps:$4 sm:$0xff]   ;;  %v7886_v47 = vld [vmem:[%s8227_s6 + $0xf54] ss:$8 sps:$4 sm:$0xff]  }
 0x259   : > { %5282 = vmatprep.subr.bf16.mxu0 %v7805_v48  ;;  %v7889_v48 = vld [vmem:[%s8227_s6 + $0x1354] ss:$8 sps:$4 sm:$0xff]  }
 0x25b   : > { %4285 = vmatpush1.bf16.msra.mxu1 %v7800_v50  ;;  %v7884_v50 = vld [vmem:[%s8227_s6 + $0xf50] ss:$8 sps:$4 sm:$0xff]  }
 0x25c   : > { %5283 = vmatpush1.bf16.msra.mxu0 %v7803_v56  ;;  %4286 = vmatprep.subr.bf16.mxu1 %v7808_v57  ;;  %v7887_v56 = vld [vmem:[%s8227_s6 + $0x1350] ss:$8 sps:$4 sm:$0xff]   ;;  %v7895_v57 = vld [vmem:[%s8227_s6 + $0x1364] ss:$8 sps:$4 sm:$0xff]  }
 0x25d   : > { %5284 = vmatprep.subr.bf16.mxu0 %v7811_v58 }
 0x25f   : > { %4287 = vmatpush1.bf16.msra.mxu1 %v7806_v59 }
 0x260   : > { %5285 = vmatpush1.bf16.msra.mxu0 %v7809_v60  ;;  %4288 = vmatprep.subr.bf16.mxu1 %v7814_v61 }
 0x261   : > { %5286 = vmatprep.subr.bf16.mxu0 %v7817_v62  ;;  %v7890_v62 = vld [vmem:[%s8227_s6 + $0xf60] ss:$8 sps:$4 sm:$0xff]  }
 0x263   : > { %4289 = vmatpush1.bf16.msra.mxu1 %v7812_v63  ;;  %v7893_v63 = vld [vmem:[%s8227_s6 + $0x1360] ss:$8 sps:$4 sm:$0xff]  }
 0x264   : > { %5287 = vmatpush1.bf16.msra.mxu0 %v7815_v0  ;;  %4290 = vmatprep.subr.bf16.mxu1 %v7820_v1 }
 0x265   : > { %5288 = vmatprep.subr.bf16.mxu0 %v7823_v2  ;;  %v7898_v2 = vld [vmem:[%s8227_s6 + $0xf74] ss:$8 sps:$4 sm:$0xff]  }
 0x267   : > { %4291 = vmatpush1.bf16.msra.mxu1 %v7818_v3  ;;  %v7901_v3 = vld [vmem:[%s8227_s6 + $0x1374] ss:$8 sps:$4 sm:$0xff]  }
 0x268   : > { %5289 = vmatpush1.bf16.msra.mxu0 %v7821_v52  ;;  %4292 = vmatprep.subr.bf16.mxu1 %v7826_v4 }
 0x269   : > { %5290 = vmatprep.subr.bf16.mxu0 %v7829_v5 }
 0x26b   : > { %4293 = vmatpush1.bf16.msra.mxu1 %v7824_v6 }
 0x26c   : > { %5291 = vmatpush1.bf16.msra.mxu0 %v7827_v7  ;;  %4294 = vmatprep.subr.bf16.mxu1 %v7832_v10 }
 0x26d   : > { %5292 = vmatprep.subr.bf16.mxu0 %v7835_v8 }
 0x26f   : > { %4295 = vmatpush1.bf16.msra.mxu1 %v7830_v9 }
 0x270   : > { %5293 = vmatpush1.bf16.msra.mxu0 %v7833_v12  ;;  %4296 = vmatprep.subr.bf16.mxu1 %v7838_v32 }
 0x271   : > { %5294 = vmatprep.subr.bf16.mxu0 %v7841_v13 }
 0x273   : > { %4297 = vmatpush1.bf16.msra.mxu1 %v7836_v14 }
 0x274   : > { %5295 = vmatpush1.bf16.msra.mxu0 %v7839_v15  ;;  %4298 = vmatprep.subr.bf16.mxu1 %v7844_v37 }
 0x275   : > { %5296 = vmatprep.subr.bf16.mxu0 %v7847_v16 }
 0x277   : > { %4299 = vmatpush1.bf16.msra.mxu1 %v7842_v17  ;;  %v7896_v17 = vld [vmem:[%s8227_s6 + $0xf70] ss:$8 sps:$4 sm:$0xff]  }
 0x278   : > { %5297 = vmatpush1.bf16.msra.mxu0 %v7845_v19  ;;  %4300 = vmatprep.subr.bf16.mxu1 %v7850_v20  ;;  %v7899_v19 = vld [vmem:[%s8227_s6 + $0x1370] ss:$8 sps:$4 sm:$0xff]  }
 0x279   : > { %5298 = vmatprep.subr.bf16.mxu0 %v7853_v22  ;;  %v7904_v22 = vld [vmem:[%s8227_s6 + $0xf84] ss:$8 sps:$4 sm:$0xff]  }
 0x27b   : > { %4301 = vmatpush1.bf16.msra.mxu1 %v7848_v49  ;;  %v7907_v49 = vld [vmem:[%s8227_s6 + $0x1384] ss:$8 sps:$4 sm:$0xff]  }
 0x27c   : > { %5299 = vmatpush1.bf16.msra.mxu0 %v7851_v31  ;;  %4321 = vmatprep.subr.bf16.mxu1 %v7856_v23 }
 0x27d   : > { %5319 = vmatprep.subr.bf16.mxu0 %v7859_v24 }
 0x27e   : > { %4303 = vmatmul.mubr.bf16.vlgmr.msra.gmra.mrb[20].mxu1 %v8325_v11 }
 0x27f   : > { %5301 = vmatmul.mubr.bf16.vlgmr.msra.gmra.mrb[20].mxu0 %v8325_v11  ;;  %4322 = vmatpush1.bf16.msra.mxu1 %v7854_v25  ;;  %v7866_v11 = vld [vmem:[%s8227_s6 + $0xf20] ss:$8 sps:$4 sm:$0xff]  }
 0x280   : > { %5320 = vmatpush1.bf16.msra.mxu0 %v7857_v42  ;;  %4323 = vmatprep.subr.bf16.mxu1 %v7862_v27 }
 0x281   : > { %5321 = vmatprep.subr.bf16.mxu0 %v7865_v28  ;;  %4312 = vmatprep.mubr.bf16.mxu1 %v8364_v38 }
 0x282   : > { %5310 = vmatprep.mubr.bf16.mxu0 %v8364_v38  ;;  %v7872_v38 = vld [vmem:[%s8227_s6 + $0xf30] ss:$8 sps:$4 sm:$0xff]  }
 0x283   : > { %4324 = vmatpush1.bf16.msra.mxu1 %v7860_v29  ;;  %v7902_v29 = vld [vmem:[%s8227_s6 + $0xf80] ss:$8 sps:$4 sm:$0xff]  }
 0x284   : > { %5322 = vmatpush1.bf16.msra.mxu0 %v7863_v53  ;;  %4325 = vmatprep.subr.bf16.mxu1 %v7868_v30 }
 0x285   : > { %5323 = vmatprep.subr.bf16.mxu0 %v7871_v35 }
 0x286   : > { %4313 = vmatmul.mubr.bf16.gmra.mrb[24].mxu1 %v8366_v39 }
 0x287   : > { %5311 = vmatmul.mubr.bf16.gmra.mrb[24].mxu0 %v8366_v39  ;;  %4326 = vmatpush1.bf16.msra.mxu1 %v7866_v11  ;;  %v7878_v39 = vld [vmem:[%s8227_s6 + $0xf40] ss:$8 sps:$4 sm:$0xff]  }
 0x288   : > { %5324 = vmatpush1.bf16.msra.mxu0 %v7869_v36  ;;  %4327 = vmatprep.subr.bf16.mxu1 %v7874_v40  ;;  %v7905_v11 = vld [vmem:[%s8227_s6 + $0x1380] ss:$8 sps:$4 sm:$0xff]  }
 0x289   : > { %5325 = vmatprep.subr.bf16.mxu0 %v7877_v41  ;;  %4353 = vmatprep.mubr.bf16.mxu1 %v8396_v51 }
 0x28a   : > { %5351 = vmatprep.mubr.bf16.mxu0 %v8396_v51  ;;  %v7892_v51 = vld [vmem:[%s8227_s6 + $0xf64] ss:$8 sps:$4 sm:$0xff]  }
 0x28b   : > { %4328 = vmatpush1.bf16.msra.mxu1 %v7872_v38 }
 0x28c   : > { %5326 = vmatpush1.bf16.msra.mxu0 %v7875_v55  ;;  %4329 = vmatprep.subr.bf16.mxu1 %v7880_v44  ;;  %v7910_v55 = vld [vmem:[%s8227_s6 + $0xf94] ss:$8 sps:$4 sm:$0xff]  }
 0x28d   : > { %5327 = vmatprep.subr.bf16.mxu0 %v7883_v45  ;;  %v7913_v44 = vld [vmem:[%s8227_s6 + $0x1394] ss:$8 sps:$4 sm:$0xff]  }
 0x28f   : > { %4330 = vmatpush1.bf16.msra.mxu1 %v7878_v39 }
 0x290   : > { %5328 = vmatpush1.bf16.msra.mxu0 %v7881_v46  ;;  %4331 = vmatprep.subr.bf16.mxu1 %v7886_v47 }
 0x291   : > { %5329 = vmatprep.subr.bf16.mxu0 %v7889_v48  ;;  %v2359_v58 = vpop.f32.mrb[12].mxu1 }
 0x292   : > { %v3357_v59 = vpop.f32.mrb[12].mxu0  ;;  %v2361_v60 = vpop.f32.mrb[13].mxu1  ;;  %v2383_v52 = vrot.slane %v2359_v58, 1  ;;  %v7917_v58 = vld [vmem:[%s8227_s6 + $0x13a0] ss:$8 sps:$4 sm:$0xff]  }
 0x293   : > { %v3359_v61 = vpop.f32.mrb[13].mxu0  ;;  %v2363_v0 = vpop.f32.mrb[14].mxu1  ;;  %4332 = vmatpush1.bf16.msra.mxu1 %v7884_v50  ;;  %v3381_v4 = vrot.slane %v3357_v59, 2  ;;  %v2386_v8 = vrot.slane %v2361_v60, 1  ;;  %v7908_v50 = vld [vmem:[%s8227_s6 + $0xf90] ss:$8 sps:$4 sm:$0xff]  }
 0x294   : > { %v3361_v1 = vpop.f32.mrb[14].mxu0  ;;  %5330 = vmatpush1.bf16.msra.mxu0 %v7887_v56  ;;  %v2384_v5 = vrot.slane %v2363_v0, 1  ;;  %v2365_v7 = vpop.f32.mrb[15].mxu1  ;;  %4333 = vmatprep.subr.bf16.mxu1 %v7892_v51  ;;  %v3384_v9 = vrot.slane %v3359_v61, 2  ;;  %v7911_v56 = vld [vmem:[%s8227_s6 + $0x1390] ss:$8 sps:$4 sm:$0xff]  }
 0x295   : > { %v3382_v6 = vrot.slane %v3361_v1, 2  ;;  %v3363_v10 = vpop.f32.mrb[15].mxu0  ;;  %5331 = vmatprep.subr.bf16.mxu0 %v7895_v57  ;;  %v2387_v12 = vrot.slane %v2365_v7, 1  ;;  %v7919_v57 = vld [vmem:[%s8227_s6 + $0x13a4] ss:$8 sps:$4 sm:$0xff]  }
 0x296   : > { %v3385_v32 = vrot.slane %v3363_v10, 2  ;;  %v2385_v13 = vsel %vm2382_vm0, %v2383_v52, %v2384_v5  ;;  %v7922_v59 = vld [vmem:[%s8227_s6 + $0xfb4] ss:$8 sps:$4 sm:$0xff]   ;;  %v7920_v61 = vld [vmem:[%s8227_s6 + $0xfb0] ss:$8 sps:$4 sm:$0xff]  }
 0x297   : > { %v3383_v14 = vsel %vm3380_vm1, %v3381_v4, %v3382_v6  ;;  %v2397_v15 = vadd.f32 %v8704_v18, %v2385_v13  ;;  %v2388_v37 = vsel %vm2382_vm0, %v2386_v8, %v2387_v12  ;;  %4334 = vmatpush1.bf16.msra.mxu1 %v7890_v62  ;;  %v7925_v60 = vld [vmem:[%s8227_s6 + $0x13b4] ss:$8 sps:$4 sm:$0xff]   ;;  %v7923_v62 = vld [vmem:[%s8227_s6 + $0x13b0] ss:$8 sps:$4 sm:$0xff]   ;;  %v7931_v0 = vld [vmem:[%s8227_s6 + $0x13c4] ss:$8 sps:$4 sm:$0xff]  }
 0x298   : > { %v3386_v16 = vsel %vm3380_vm1, %v3384_v9, %v3385_v32  ;;  %5332 = vmatpush1.bf16.msra.mxu0 %v7893_v63  ;;  %v2398_v20 = vadd.f32 %v8706_v21, %v2388_v37  ;;  %4335 = vmatprep.subr.bf16.mxu1 %v7898_v2  ;;  %v7928_v63 = vld [vmem:[%s8227_s6 + $0xfc4] ss:$8 sps:$4 sm:$0xff]   ;;  %v7926_v1 = vld [vmem:[%s8227_s6 + $0xfc0] ss:$8 sps:$4 sm:$0xff]   ;;  %v7937_v52 = vld [vmem:[%s8227_s6 + $0x13d4] ss:$8 sps:$4 sm:$0xff]  }
 0x299   : > { %5333 = vmatprep.subr.bf16.mxu0 %v7901_v3  ;;  %v9014_v31 = vadd.f32 %v3383_v14, %v2397_v15  ;;  %v2369_v23 = vpop.f32.mrb[16].mxu1  ;;  %v7929_v2 = vld [vmem:[%s8227_s6 + $0x13c0] ss:$8 sps:$4 sm:$0xff]   ;;  %v7934_v3 = vld [vmem:[%s8227_s6 + $0xfd4] ss:$8 sps:$4 sm:$0xff]   ;;  %v5397_v14 = vlaneseq }
 0x29a   : > { %v3367_v18 = vpop.f32.mrb[16].mxu0  ;;  %v9016_v24 = vadd.f32 %v3386_v16, %v2398_v20  ;;  %v2389_v25 = vrot.slane %v2369_v23, 1  ;;  %v2371_v27 = vpop.f32.mrb[17].mxu1  ;;  %v7932_v4 = vld [vmem:[%s8227_s6 + $0xfd0] ss:$8 sps:$4 sm:$0xff]  }
 0x29b   : > { %v3387_v42 = vrot.slane %v3367_v18, 2  ;;  %v3369_v28 = vpop.f32.mrb[17].mxu0  ;;  %v2391_v53 = vrot.slane %v2371_v27, 1  ;;  %v2373_v30 = vpop.f32.mrb[18].mxu1  ;;  %4336 = vmatpush1.bf16.msra.mxu1 %v7896_v17  ;;  %v7943_v7 = vld [vmem:[%s8227_s6 + $0x13e4] ss:$8 sps:$4 sm:$0xff]  }
 0x29c   : > { %v3389_v21 = vrot.slane %v3369_v28, 2  ;;  %v3371_v35 = vpop.f32.mrb[18].mxu0  ;;  %5334 = vmatpush1.bf16.msra.mxu0 %v7899_v19  ;;  %v2390_v36 = vsel %vm2382_vm0, %v2384_v5, %v2389_v25  ;;  %v2374_v41 = vpop.f32.mrb[19].mxu1  ;;  %4337 = vmatprep.subr.bf16.mxu1 %v7904_v22  ;;  %v7935_v5 = vld [vmem:[%s8227_s6 + $0x13d0] ss:$8 sps:$4 sm:$0xff]   ;;  %v5398_v15 = vshrl.u32 %v5397_v14, 7 }
 0x29d   : > { %v3388_v40 = vsel %vm3380_vm1, %v3382_v6, %v3387_v42  ;;  %v3372_v38 = vpop.f32.mrb[19].mxu0  ;;  %5335 = vmatprep.subr.bf16.mxu0 %v7907_v49  ;;  %v2399_v45 = vadd.f32 %v8710_v26, %v2390_v36  ;;  %v2392_v39 = vsel %vm2382_vm0, %v2387_v12, %v2391_v53  ;;  %v7916_v26 = vld [vmem:[%s8227_s6 + $0xfa4] ss:$8 sps:$4 sm:$0xff]   ;;  %v7938_v10 = vld [vmem:[%s8227_s6 + $0xfe0] ss:$8 sps:$4 sm:$0xff]  }
 0x29e   : > { %v3390_v46 = vsel %vm3380_vm1, %v3385_v32, %v3389_v21  ;;  %v2400_v47 = vadd.f32 %v8714_v34, %v2392_v39  ;;  %v7914_v34 = vld [vmem:[%s8227_s6 + $0xfa0] ss:$8 sps:$4 sm:$0xff]   ;;  %v7940_v6 = vld [vmem:[%s8227_s6 + $0xfe4] ss:$8 sps:$4 sm:$0xff]   ;;  %v7946_v9 = vld [vmem:[%s8227_s6 + $0xff4] ss:$8 sps:$4 sm:$0xff]  }
 0x29f   : > { %v9028_v48 = vadd.f32 %v3388_v40, %v2399_v45  ;;  %4338 = vmatpush1.bf16.msra.mxu1 %v7902_v29  ;;  %v7941_v8 = vld [vmem:[%s8227_s6 + $0x13e0] ss:$8 sps:$4 sm:$0xff]   ;;  %v7949_v12 = vld [vmem:[%s8227_s6 + $0x13f4] ss:$8 sps:$4 sm:$0xff]   ;;  %v7944_v32 = vld [vmem:[%s8227_s6 + $0xff0] ss:$8 sps:$4 sm:$0xff]  }
 0x2a0   : > { %5336 = vmatpush1.bf16.msra.mxu0 %v7905_v11  ;;  %v9032_v51 = vadd.f32 %v3390_v46, %v2400_v47  ;;  %4339 = vmatprep.subr.bf16.mxu1 %v7910_v55  ;;  %v7947_v13 = vld [vmem:[%s8227_s6 + $0x13f0] ss:$8 sps:$4 sm:$0xff]   ;;  %v5395_v20 = vld [vmem:[%s336_s9] sm:$0x3]  ;;  %v5403_v22 = vsub.s32 1, %v5398_v15 }
 0x2a1   : > { %5337 = vmatprep.subr.bf16.mxu0 %v7913_v44 }
 0x2a2   : > { %v5404_v55 = vrot.slane %v5395_v20, %v5403_v22 }
 0x2a3   : > { %4340 = vmatpush1.bf16.msra.mxu1 %v7908_v50 }
 0x2a4   : > { %5338 = vmatpush1.bf16.msra.mxu0 %v7911_v56  ;;  %4341 = vmatprep.subr.bf16.mxu1 %v7916_v26 }
 0x2a5   : > { %5339 = vmatprep.subr.bf16.mxu0 %v7919_v57 }
 0x2a7   : > { %4342 = vmatpush1.bf16.msra.mxu1 %v7914_v34 }
 0x2a8   : > { %5340 = vmatpush1.bf16.msra.mxu0 %v7917_v58  ;;  %4343 = vmatprep.subr.bf16.mxu1 %v7922_v59 }
 0x2a9   : > { %5341 = vmatprep.subr.bf16.mxu0 %v7925_v60 }
 0x2ab   : > { %4344 = vmatpush1.bf16.msra.mxu1 %v7920_v61 }
 0x2ac   : > { %5342 = vmatpush1.bf16.msra.mxu0 %v7923_v62  ;;  %4345 = vmatprep.subr.bf16.mxu1 %v7928_v63 }
 0x2ad   : > { %5343 = vmatprep.subr.bf16.mxu0 %v7931_v0 }
 0x2af   : > { %4346 = vmatpush1.bf16.msra.mxu1 %v7926_v1 }
 0x2b0   : > { %5344 = vmatpush1.bf16.msra.mxu0 %v7929_v2  ;;  %4347 = vmatprep.subr.bf16.mxu1 %v7934_v3 }
 0x2b1   : > { %5345 = vmatprep.subr.bf16.mxu0 %v7937_v52 }
 0x2b3   : > { %4348 = vmatpush1.bf16.msra.mxu1 %v7932_v4 }
 0x2b4   : > { %5346 = vmatpush1.bf16.msra.mxu0 %v7935_v5  ;;  %4349 = vmatprep.subr.bf16.mxu1 %v7940_v6 }
 0x2b5   : > { %5347 = vmatprep.subr.bf16.mxu0 %v7943_v7 }
 0x2b7   : > { %4350 = vmatpush1.bf16.msra.mxu1 %v7938_v10 }
 0x2b8   : > { %5348 = vmatpush1.bf16.msra.mxu0 %v7941_v8  ;;  %4351 = vmatprep.subr.bf16.mxu1 %v7946_v9 }
 0x2b9   : > { %5349 = vmatprep.subr.bf16.mxu0 %v7949_v12 }
 0x2bb   : > { %4352 = vmatpush1.bf16.msra.mxu1 %v7944_v32 }
 0x2bc   : > { %5350 = vmatpush1.bf16.msra.mxu0 %v7947_v13 }
 0x2be   : > { %4354 = vmatmul.mubr.bf16.vlgmr.msra.gmra.mrb[20].mxu1 %v8445_v33 }
 0x2bf   : > { %5352 = vmatmul.mubr.bf16.vlgmr.msra.gmra.mrb[20].mxu0 %v8445_v33  ;;  %4363 = vmatprep.mubr.bf16.mxu1 %v8454_v43 }
 0x2c0   : > { %5361 = vmatprep.mubr.bf16.mxu0 %v8454_v43 }
 0x2c6   : > { %4364 = vmatmul.mubr.bf16.gmra.mrb[24].mxu1 %v8468_v54 }
 0x2c7   : > { %5362 = vmatmul.mubr.bf16.gmra.mrb[24].mxu0 %v8468_v54  ;;  %v5399_v54 = vsub.s32 0, %v5398_v15 }
 0x2c9   : > { %v5400_v36 = vrot.slane %v5395_v20, %v5399_v54 }
 0x391   : > { %v4355_v37 = vpop.f32.mrb[20].mxu1 }
 0x392   : > { %v5353_v16 = vpop.f32.mrb[20].mxu0  ;;  %v4357_v33 = vpop.f32.mrb[21].mxu1  ;;  %v4379_v49 = vrot.slane %v4355_v37, 3 }
 0x393   : > { %v5355_v17 = vpop.f32.mrb[21].mxu0  ;;  %v4359_v43 = vpop.f32.mrb[22].mxu1  ;;  %v5377_v23 = vrot.slane %v5353_v16, 4  ;;  %v4382_v28 = vrot.slane %v4357_v33, 3 }
 0x394   : > { %v5357_v19 = vpop.f32.mrb[22].mxu0  ;;  %v4380_v18 = vrot.slane %v4359_v43, 3  ;;  %v4361_v42 = vpop.f32.mrb[23].mxu1  ;;  %v5380_v29 = vrot.slane %v5355_v17, 4 }
 0x395   : > { %v5378_v25 = vrot.slane %v5357_v19, 4  ;;  %v5359_v27 = vpop.f32.mrb[23].mxu0  ;;  %v4383_v53 = vrot.slane %v4361_v42, 3 }
 0x396   : > { %v5381_v21 = vrot.slane %v5359_v27, 4  ;;  %v4381_v30 = vsel %vm4378_vm2, %v4379_v49, %v4380_v18 }
 0x397   : > { %v5379_v35 = vsel %vm5376_vm3, %v5377_v23, %v5378_v25  ;;  %v4393_v11 = vadd.f32 %v4381_v30, %v9014_v31  ;;  %v4384_v40 = vsel %vm4378_vm2, %v4382_v28, %v4383_v53 }
 0x398   : > { %v5382_v41 = vsel %vm5376_vm3, %v5380_v29, %v5381_v21  ;;  %v4394_v38 = vadd.f32 %v4384_v40, %v9016_v24 }
 0x399   : > { %v5391_v44 = vadd.f32 %v5379_v35, %v4393_v11  ;;  %v4365_v45 = vpop.f32.mrb[24].mxu1 }
 0x39a   : > { %v5363_v39 = vpop.f32.mrb[24].mxu0  ;;  %v5392_v46 = vadd.f32 %v5382_v41, %v4394_v38  ;;  %v4385_v47 = vrot.slane %v4365_v45, 3  ;;  %v4367_v56 = vpop.f32.mrb[25].mxu1 }
 0x39b   : > { %v5383_v50 = vrot.slane %v5363_v39, 4  ;;  %v5365_v26 = vpop.f32.mrb[25].mxu0  ;;  %v5407_v57 = vadd.f32 %v5400_v36, %v5391_v44  ;;  %v4387_v31 = vrot.slane %v4367_v56, 3  ;;  %v4369_v58 = vpop.f32.mrb[26].mxu1 }
 0x39c   : > { %v5385_v34 = vrot.slane %v5365_v26, 4  ;;  %v5367_v59 = vpop.f32.mrb[26].mxu0  ;;  %v5408_v60 = vadd.f32 %v5404_v55, %v5392_v46  ;;  %v4386_v61 = vsel %vm4378_vm2, %v4380_v18, %v4385_v47  ;;  %v4370_v62 = vpop.f32.mrb[27].mxu1 }
 0x39d   : > { %v5384_v24 = vsel %vm5376_vm3, %v5378_v25, %v5383_v50  ;;  %v5368_v63 = vpop.f32.mrb[27].mxu0  ;;  %vm5411_vm4 = vcmp.ge.f32.partialorder %v5407_v57, 0.0  ;;  %v5415_v0 = vmul.f32 0.1, %v5407_v57  ;;  %v4395_v1 = vadd.f32 %v4386_v61, %v9028_v48 }
 0x39e   : > { %v4388_v2 = vsel %vm4378_vm2, %v4383_v53, %v4387_v31  ;;  %vm5412_vm5 = vcmp.ge.f32.partialorder %v5408_v60, 0.0  ;;  %v5416_v3 = vmul.f32 0.1, %v5408_v60  ;;  %v5386_v4 = vsel %vm5376_vm3, %v5381_v21, %v5385_v34 }
 0x39f   : > { %v4396_v52 = vadd.f32 %v4388_v2, %v9032_v51  ;;  %v5419_v5 = vsel %vm5411_vm4, %v5407_v57, %v5415_v0  ;;  %v5393_v6 = vadd.f32 %v5384_v24, %v4395_v1 }
 0x3a0   : > { %5423 = vst [vmem:[%s308_s15] sm:$0xff] %v5419_v5  ;;  %v5420_v7 = vsel %vm5412_vm5, %v5408_v60, %v5416_v3 }
 0x3a1   : > { %v5394_v10 = vadd.f32 %v5386_v4, %v4396_v52  ;;  %5424 = vst [vmem:[%s308_s15 + $0x8] sm:$0xff] %v5420_v7  ;;  %v5409_v8 = vadd.f32 %v5400_v36, %v5393_v6 }
 0x3a2   : > { %5433 = sbr.rel (!%p9131_p0) target bundleno = 945 (0x3b1), region = 44 }
 0x3a3   : > { %v5410_v9 = vadd.f32 %v5404_v55, %v5394_v10  ;;  %vm5413_vm6 = vcmp.ge.f32.partialorder %v5409_v8, 0.0  ;;  %v5417_v12 = vmul.f32 0.1, %v5409_v8 }
 0x3a5   : > { %vm5414_vm7 = vcmp.ge.f32.partialorder %v5410_v9, 0.0  ;;  %v5418_v48 = vmul.f32 0.1, %v5410_v9  ;;  %v5421_v32 = vsel %vm5413_vm6, %v5409_v8, %v5417_v12 }
 0x3a6   : > { %5425 = vst [vmem:[%s308_s15 + $0x10] sm:$0xff] %v5421_v32 }
 0x3a7   : > { %v5422_v13 = vsel %vm5414_vm7, %v5410_v9, %v5418_v48  ;;  %v5454_v51 = vld [vmem:[%s308_s15] sm:$0xff] (%p9131_p0) }
 0x3a8   : > { %5426 = vst [vmem:[%s308_s15 + $0x18] sm:$0xff] %v5422_v13  ;;  %v5456_v14 = vld [vmem:[%s308_s15 + $0x8] sm:$0xff] (%p9131_p0)  ;;  %5455 = vst [vmem:[%s5441_s29] sm:$0xff] (%p9131_p0), %v5454_v51 }
 0x3a9   : > { %5457 = vst [vmem:[%s5441_s29 + $0x8] sm:$0xff] %v5456_v14 }
 0x3ad   : > { %v5458_v15 = vld [vmem:[%s308_s15 + $0x10] sm:$0xff] }
 0x3ae   : > { %5459 = vst [vmem:[%s5441_s29 + $0x40] sm:$0xff] %v5458_v15 }
 0x3af   : > { %v5460_v37 = vld [vmem:[%s308_s15 + $0x18] sm:$0xff] }
 0x3b0   : > { %5461 = vst [vmem:[%s5441_s29 + $0x48] sm:$0xff] %v5460_v37 }
 0x3b1 PF: > { %s17_s24 = sadd.s32 1, %s8062_s24   ;;  %s9132_s11 = sld [smem:[#allocation6_spill]] }
 0x3b2   : > { %p14_p1 = scmp.ge.s32.totalorder %s17_s24, 10   ;;  %s9133_s15 = smov %s8030_s16 }
 0x3b3   : > { %s9134_s16 = smov %s8172_s10  ;;  %s9135_s17 = smov %s8038_s18 }
 0x3b4   : > { %s9136_s18 = smov %s8042_s19  ;;  %s9137_s19 = smov %s8160_s5 }
 0x3b5   : > { %s9138_s20 = smov %s8054_s22  ;;  %s9139_s21 = smov %s8058_s23 }
 0x3b6   : > { %s9140_s22 = smov %s9143_s26  ;;  %16 = sbr.rel (!%p14_p1) target bundleno = 6 (0x6), region = 112 }
 0x3b7   : > { %s9141_s23 = smov %s9132_s11 }
 0x3bd   :  { %5477 = vsyncpa [#allocation3], 1 }
 0x3be   :  { %5479 = vsyncpa [#allocation3 + $0x1], 1 }

</bundles_post_ra>
